<compile_context>
chip_gen: v6e
topology: v6e:2x2x1
jax: 0.10.0
libtpu: 0.0.40
codegen_flags: <defaults>
</compile_context>

<pallas_src>
import functools

import jax
import jax.numpy as jnp
from jax.experimental import pallas as pl
from jax.experimental.pallas import tpu as pltpu

# Keep matmul precision identical between the Pallas kernels and the pure-JAX
# reference used for the correctness check.
jax.config.update("jax_default_matmul_precision", "highest")

NEG_SLOPE = 0.01   # F.leaky_relu default
BN_EPS = 1e-5      # nn.BatchNorm1d default
DIAG_INF = 1e8


# ---------------------------------------------------------------------------
# Kernel 1: per batch element — build windows, graph construction, masked
#           adjacency, BN1 affine, MPNN(k=1) projection, BN2 partial sums.
# ---------------------------------------------------------------------------
def _graph_mpnn_kernel(xp_ref, mask_ref, eye_ref, wm_ref, bm_ref, wt_ref, bt_ref,
                       sc1_ref, sh1_ref, y_ref, sum_ref, sq_ref,
                       *, tw, stride, nw, ns):
    # xp_ref : (1, Tp, S, D)   zero-padded time slab of one batch element
    # mask   : (N, N)          decay mask (Mask_Matrix),  eye: (N, N) identity
    # wm/bm  : mapping weight (D, D, pre-transposed) / bias (1, D)
    # wt/bt  : theta[0] weight (D, Dout, pre-transposed) / bias (1, Dout)
    # sc1/sh1: (1, D)  BN1 (training-mode) fused scale / shift
    # y_ref  : (1, nw, N, Dout) pre-BN2 MPNN output
    # sum/sq : (1, 1, Dout)     partial sums of y and y^2 for BN2 statistics
    xp = xp_ref[0]                                      # (Tp, S, D)
    n = tw * ns
    d_in = xp.shape[-1]

    # Gather the nw overlapping windows in VMEM; node ordering is time-major
    # (node = t*ns + s), matching the PyTorch unfold + reshape.
    if stride == 1:
        x = jnp.concatenate([xp[t:t + nw] for t in range(tw)], axis=1)   # (nw, N, D)
    else:
        x = jnp.concatenate(
            [xp[w * stride:w * stride + tw].reshape(1, n, d_in) for w in range(nw)],
            axis=0)

    xf = x.reshape(nw * n, d_in)                        # flatten for projections

    # Dot_Graph_Construction_weights: mapping, then H @ H^T (batched, no .T)
    h = jnp.dot(xf, wm_ref[...], preferred_element_type=jnp.float32) + bm_ref[...]
    hb = h.reshape(nw, n, d_in)
    s = jnp.einsum("wnd,wmd->wnm", hb, hb, preferred_element_type=jnp.float32)

    s = s - eye_ref[...] * DIAG_INF                     # mask self-similarity
    s = jnp.where(s >= 0, s, NEG_SLOPE * s)             # leaky_relu
    s = s - jnp.max(s, axis=-1, keepdims=True)          # stable softmax
    e = jnp.exp(s)
    p = e * pl.reciprocal(jnp.sum(e, axis=-1, keepdims=True), approx=True)
    a = (p + eye_ref[...]) * mask_ref[...]              # (softmax + I) * pre_relation

    # BN1 (batch statistics folded into scale/shift), then theta0(A @ X)
    xbn = (xf * sc1_ref[...] + sh1_ref[...]).reshape(nw, n, d_in)
    z = jnp.einsum("wnm,wmd->wnd", a, xbn, preferred_element_type=jnp.float32)
    y = jnp.dot(z.reshape(nw * n, d_in), wt_ref[...],
                preferred_element_type=jnp.float32) + bt_ref[...]       # (nw*N, Dout)

    d_out = y.shape[-1]
    y_ref[0] = y.reshape(nw, n, d_out)
    # Per-block partial sums so BN2 stats never re-read y_pre from HBM.
    sum_ref[0] = jnp.sum(y, axis=0, keepdims=True)
    sq_ref[0] = jnp.sum(y * y, axis=0, keepdims=True)


# ---------------------------------------------------------------------------
# Kernel 2: per batch element — BN2 affine + leaky_relu + time-window pooling
# ---------------------------------------------------------------------------
def _bn_relu_pool_kernel(y_ref, sc2_ref, sh2_ref, o_ref, *, tw, ns, nw, pool):
    # y_ref : (1, nw, N, Dout), N = tw * ns (time-major nodes)
    # o_ref : (1, nw, ns, Dout)
    y = y_ref[0] * sc2_ref[...] + sh2_ref[...]          # BN2 affine
    y = jnp.where(y >= 0, y, NEG_SLOPE * y)             # leaky_relu
    y = y.reshape(nw, tw, ns, y.shape[-1])              # split the time-window axis
    if pool == "mean":
        o_ref[0] = jnp.mean(y, axis=1)
    else:
        o_ref[0] = jnp.max(y, axis=1)


# ---------------------------------------------------------------------------
# Plain-JAX glue
# ---------------------------------------------------------------------------
def mask_matrix(num_node, time_length, decay):
    """Equivalent of Mask_Matrix: block (i, j) = decay ** |i - j|."""
    ti = jnp.arange(time_length)
    block = jnp.asarray(decay, jnp.float32) ** jnp.abs(
        ti[:, None] - ti[None, :]).astype(jnp.float32)
    return jnp.kron(block, jnp.ones((num_node, num_node), jnp.float32))


def conv_graph_st(x, time_window_size, stride):
    """Equivalent of Conv_GraphST (F.unfold) — used only by the JAX reference."""
    bs, t_len, num_sensors, feat = x.shape
    if (time_window_size - 1) % 2 != 0:
        raise ValueError("time_window_size should be odd")
    pd = (time_window_size - 1) // 2
    xp = jnp.pad(x, ((0, 0), (pd, pd), (0, 0), (0, 0)))
    num_windows = (t_len + 2 * pd - time_window_size) // stride + 1
    idx = jnp.arange(num_windows)[:, None] * stride + jnp.arange(time_window_size)[None, :]
    y = xp[:, idx]                                    # (bs, L, tw, S, D)
    return y, num_windows


def graph_convpool_mpnn_block_v6(x, params, *, time_window_size, stride,
                                 decay, pool_choice):
    bs, t_len, num_sensors, in_dim = x.shape
    out_dim = params["wt"].shape[0]
    tw = time_window_size
    if (tw - 1) % 2 != 0:
        raise ValueError("time_window_size should be odd")
    pd = (tw - 1) // 2
    t_pad = t_len + 2 * pd
    nw = (t_pad - tw) // stride + 1
    n_nodes = tw * num_sensors
    n_graphs = bs * nw

    xp = jnp.pad(x.astype(jnp.float32), ((0, 0), (pd, pd), (0, 0), (0, 0)))

    # BN1 (training-mode) statistics of the *unfolded* node tensor, computed
    # without materializing the unfold: padded time index p appears in count[p]
    # windows, so a weighted reduction over the padded slab is exact.
    t_rel = jnp.arange(t_pad)[None, :] - jnp.arange(nw)[:, None] * stride
    count = jnp.sum((t_rel >= 0) & (t_rel < tw), axis=0).astype(jnp.float32)
    n1 = float(n_graphs * n_nodes)
    wgt = count[None, :, None, None]
    mu1 = jnp.sum(xp * wgt, axis=(0, 1, 2)) / n1
    var1 = jnp.sum(((xp - mu1) ** 2) * wgt, axis=(0, 1, 2)) / n1
    scale1 = params["gamma1"] / jnp.sqrt(var1 + BN_EPS)
    shift1 = params["beta1"] - mu1 * scale1
    sc1 = scale1.reshape(1, in_dim).astype(jnp.float32)
    sh1 = shift1.reshape(1, in_dim).astype(jnp.float32)

    mask = mask_matrix(num_sensors, tw, decay)            # (N, N) decay mask
    eye = jnp.eye(n_nodes, dtype=jnp.float32)             # hoisted out of kernel

    wm_t = params["wm"].T.astype(jnp.float32)
    bm = params["bm"].reshape(1, in_dim).astype(jnp.float32)
    wt_t = params["wt"].T.astype(jnp.float32)
    bt = params["bt"].reshape(1, out_dim).astype(jnp.float32)

    def resident(shape):
        return pl.BlockSpec(shape, lambda b: (0, 0))

    kernel1 = functools.partial(_graph_mpnn_kernel, tw=tw, stride=stride,
                                nw=nw, ns=num_sensors)
    y_pre, sum_y, sq_y = pl.pallas_call(
        kernel1,
        out_shape=(
            jax.ShapeDtypeStruct((bs, nw, n_nodes, out_dim), jnp.float32),
            jax.ShapeDtypeStruct((bs, 1, out_dim), jnp.float32),
            jax.ShapeDtypeStruct((bs, 1, out_dim), jnp.float32),
        ),
        grid=(bs,),
        in_specs=[
            pl.BlockSpec((1, t_pad, num_sensors, in_dim), lambda b: (b, 0, 0, 0)),
            resident((n_nodes, n_nodes)),      # decay mask
            resident((n_nodes, n_nodes)),      # identity
            resident((in_dim, in_dim)),        # Wm^T
            resident((1, in_dim)),             # bm
            resident((in_dim, out_dim)),       # Wt^T
            resident((1, out_dim)),            # bt
            resident((1, in_dim)),             # BN1 scale
            resident((1, in_dim)),             # BN1 shift
        ],
        out_specs=(
            pl.BlockSpec((1, nw, n_nodes, out_dim), lambda b: (b, 0, 0, 0)),
            pl.BlockSpec((1, 1, out_dim), lambda b: (b, 0, 0)),
            pl.BlockSpec((1, 1, out_dim), lambda b: (b, 0, 0)),
        ),
        compiler_params=pltpu.CompilerParams(dimension_semantics=("parallel",)),
    )(xp, mask, eye, wm_t, bm, wt_t, bt, sc1, sh1)

    # BN2 (training-mode) statistics from the in-kernel partial sums — no extra
    # HBM pass over y_pre.
    n2 = float(n_graphs * n_nodes)
    mu2 = jnp.sum(sum_y, axis=(0, 1)) / n2
    var2 = jnp.maximum(jnp.sum(sq_y, axis=(0, 1)) / n2 - mu2 * mu2, 0.0)
    scale2 = params["gamma2"] / jnp.sqrt(var2 + BN_EPS)
    shift2 = params["beta2"] - mu2 * scale2
    sc2 = scale2.reshape(1, out_dim).astype(jnp.float32)
    sh2 = shift2.reshape(1, out_dim).astype(jnp.float32)

    kernel2 = functools.partial(_bn_relu_pool_kernel, tw=tw, ns=num_sensors,
                                nw=nw, pool=pool_choice)
    pooled = pl.pallas_call(
        kernel2,
        out_shape=jax.ShapeDtypeStruct((bs, nw, num_sensors, out_dim), jnp.float32),
        grid=(bs,),
        in_specs=[
            pl.BlockSpec((1, nw, n_nodes, out_dim), lambda b: (b, 0, 0, 0)),
            resident((1, out_dim)),
            resident((1, out_dim)),
        ],
        out_specs=pl.BlockSpec((1, nw, num_sensors, out_dim), lambda b: (b, 0, 0, 0)),
        compiler_params=pltpu.CompilerParams(dimension_semantics=("parallel",)),
    )(y_pre, sc2, sh2)

    return pooled


# ---------------------------------------------------------------------------
# Pure-JAX reference (mirrors the PyTorch forward) for correctness checking
# ---------------------------------------------------------------------------
def reference_forward(x, params, *, time_window_size, stride, decay, pool_choice):
    bs, _, num_sensors, in_dim = x.shape
    tw = time_window_size
    y_win, num_windows = conv_graph_st(x, tw, stride)
    n_graphs = bs * num_windows
    n_nodes = tw * num_sensors
    xn = y_win.reshape(n_graphs, n_nodes, in_dim).astype(jnp.float32)

    mask = mask_matrix(num_sensors, tw, decay)

    h = xn @ params["wm"].T + params["bm"]
    adj = jnp.einsum("bnd,bmd->bnm", h, h)
    eye = jnp.eye(n_nodes, dtype=jnp.float32)
    adj = adj - eye * DIAG_INF
    adj = jnp.where(adj >= 0, adj, NEG_SLOPE * adj)
    adj = jax.nn.softmax(adj, axis=-1) + eye
    a = adj * mask

    mu1 = xn.mean(axis=(0, 1))
    var1 = xn.var(axis=(0, 1))
    xbn = (xn - mu1) / jnp.sqrt(var1 + BN_EPS) * params["gamma1"] + params["beta1"]

    z = jnp.einsum("bnm,bmd->bnd", a, xbn)
    y = z @ params["wt"].T + params["bt"]

    mu2 = y.mean(axis=(0, 1))
    var2 = y.var(axis=(0, 1))
    ybn = (y - mu2) / jnp.sqrt(var2 + BN_EPS) * params["gamma2"] + params["beta2"]
    ylr = jnp.where(ybn >= 0, ybn, NEG_SLOPE * ybn)

    yr = ylr.reshape(bs, num_windows, tw, num_sensors, -1)
    if pool_choice == "mean":
        return yr.mean(axis=2)
    return yr.max(axis=2)


# ---------------------------------------------------------------------------
if __name__ == "__main__":
    key = jax.random.PRNGKey(0)
    bs, time_length, num_sensors, input_dim = 2, 8, 8, 16
    output_dim = 32
    time_window_size, stride, decay, pool_choice = 3, 1, 0.7, "mean"

    k = jax.random.split(key, 5)
    x = jax.random.normal(k[0], (bs, time_length, num_sensors, input_dim), jnp.float32)
    params = {
        "wm": jax.random.normal(k[1], (input_dim, input_dim), jnp.float32) / jnp.sqrt(input_dim),
        "bm": jax.random.normal(k[2], (input_dim,), jnp.float32) * 0.1,
        "wt": jax.random.normal(k[3], (output_dim, input_dim), jnp.float32) / jnp.sqrt(input_dim),
        "bt": jax.random.normal(k[4], (output_dim,), jnp.float32) * 0.1,
        "gamma1": jnp.ones((input_dim,), jnp.float32),    # BatchNorm1d default init
        "beta1": jnp.zeros((input_dim,), jnp.float32),
        "gamma2": jnp.ones((output_dim,), jnp.float32),
        "beta2": jnp.zeros((output_dim,), jnp.float32),
    }

    fwd = jax.jit(functools.partial(
        graph_convpool_mpnn_block_v6, time_window_size=time_window_size,
        stride=stride, decay=decay, pool_choice=pool_choice))
    out = jax.block_until_ready(fwd(x, params))

    pd = (time_window_size - 1) // 2
    num_windows = (time_length + 2 * pd - time_window_size) // stride + 1
    assert out.shape == (bs, num_windows, num_sensors, output_dim), out.shape

    ref = reference_forward(
        x, params, time_window_size=time_window_size, stride=stride,
        decay=decay, pool_choice=pool_choice)
    ref = jax.block_until_ready(ref)

    if not jnp.allclose(out, ref, rtol=2e-3, atol=2e-3):
        max_err = jnp.max(jnp.abs(out - ref))
        raise AssertionError(f"Pallas output mismatch, max abs err = {max_err}")

    print("KERNEL_OK")
</pallas_src>

<mosaic_0001>
module attributes {stable_mosaic.version = 11 : i64} {
  func.func @_graph_mpnn_kernel(%arg0: i32, %arg1: memref<1x10x8x16xf32, #tpu.memory_space<vmem>>, %arg2: memref<24x24xf32, #tpu.memory_space<vmem>>, %arg3: memref<24x24xf32, #tpu.memory_space<vmem>>, %arg4: memref<16x16xf32, #tpu.memory_space<vmem>>, %arg5: memref<1x16xf32, #tpu.memory_space<vmem>>, %arg6: memref<16x32xf32, #tpu.memory_space<vmem>>, %arg7: memref<1x32xf32, #tpu.memory_space<vmem>>, %arg8: memref<1x16xf32, #tpu.memory_space<vmem>>, %arg9: memref<1x16xf32, #tpu.memory_space<vmem>>, %arg10: memref<1x8x24x32xf32, #tpu.memory_space<vmem>>, %arg11: memref<1x1x32xf32, #tpu.memory_space<vmem>>, %arg12: memref<1x1x32xf32, #tpu.memory_space<vmem>>) attributes {dimension_semantics = [#tpu.dimension_semantics<parallel>], iteration_bounds = array<i64: 2>, scalar_prefetch = 0 : i64, scratch_operands = 0 : i64, tpu.core_type = #tpu.core_type<tc>, window_params = [{transform_indices = @transform_0, window_bounds = array<i64: 1, 10, 8, 16>}, {pipeline_mode = #tpu.pipeline_mode<synchronous>, transform_indices = @transform_1, window_bounds = array<i64: 24, 24>}, {pipeline_mode = #tpu.pipeline_mode<synchronous>, transform_indices = @transform_2, window_bounds = array<i64: 24, 24>}, {pipeline_mode = #tpu.pipeline_mode<synchronous>, transform_indices = @transform_3, window_bounds = array<i64: 16, 16>}, {pipeline_mode = #tpu.pipeline_mode<synchronous>, transform_indices = @transform_4, window_bounds = array<i64: 1, 16>}, {pipeline_mode = #tpu.pipeline_mode<synchronous>, transform_indices = @transform_5, window_bounds = array<i64: 16, 32>}, {pipeline_mode = #tpu.pipeline_mode<synchronous>, transform_indices = @transform_6, window_bounds = array<i64: 1, 32>}, {pipeline_mode = #tpu.pipeline_mode<synchronous>, transform_indices = @transform_7, window_bounds = array<i64: 1, 16>}, {pipeline_mode = #tpu.pipeline_mode<synchronous>, transform_indices = @transform_8, window_bounds = array<i64: 1, 16>}, {transform_indices = @transform_9, window_bounds = array<i64: 1, 8, 24, 32>}, {transform_indices = @transform_10, window_bounds = array<i64: 1, 1, 32>}, {transform_indices = @transform_11, window_bounds = array<i64: 1, 1, 32>}]} {
    %c0 = arith.constant 0 : index
    %c0_0 = arith.constant 0 : index
    %c0_1 = arith.constant 0 : index
    %c0_2 = arith.constant 0 : index
    %0 = vector.load %arg1[%c0, %c0_0, %c0_1, %c0_2] : memref<1x10x8x16xf32, #tpu.memory_space<vmem>>, vector<1x10x8x16xf32>
    %1 = vector.shape_cast %0 : vector<1x10x8x16xf32> to vector<10x8x16xf32>
    %2 = vector.extract_strided_slice %1 {offsets = [0, 0, 0], sizes = [8, 8, 16], strides = [1, 1, 1]} : vector<10x8x16xf32> to vector<8x8x16xf32>
    %3 = vector.extract_strided_slice %1 {offsets = [1, 0, 0], sizes = [8, 8, 16], strides = [1, 1, 1]} : vector<10x8x16xf32> to vector<8x8x16xf32>
    %4 = vector.extract_strided_slice %1 {offsets = [2, 0, 0], sizes = [8, 8, 16], strides = [1, 1, 1]} : vector<10x8x16xf32> to vector<8x8x16xf32>
    %5 = tpu.concatenate %2, %3, %4 in 1 : vector<8x8x16xf32>, vector<8x8x16xf32>, vector<8x8x16xf32> -> vector<8x24x16xf32>
    %6 = vector.shape_cast %5 : vector<8x24x16xf32> to vector<192x16xf32>
    %c0_3 = arith.constant 0 : index
    %c0_4 = arith.constant 0 : index
    %7 = vector.load %arg4[%c0_3, %c0_4] : memref<16x16xf32, #tpu.memory_space<vmem>>, vector<16x16xf32>
    %cst = arith.constant dense<0.000000e+00> : vector<192x16xf32>
    %8 = tpu.matmul %6, %7, %cst {dimension_numbers = #tpu.dot_dimension_numbers<[1], [0], [0], [1], [0, 0, 1, 1], [], []>, precision = #tpu.contract_precision<fp32>} : vector<192x16xf32>, vector<16x16xf32>, vector<192x16xf32> -> vector<192x16xf32>
    %c0_5 = arith.constant 0 : index
    %c0_6 = arith.constant 0 : index
    %9 = vector.load %arg5[%c0_5, %c0_6] : memref<1x16xf32, #tpu.memory_space<vmem>>, vector<1x16xf32>
    %10 = vector.broadcast %9 : vector<1x16xf32> to vector<192x16xf32>
    %11 = arith.addf %8, %10 : vector<192x16xf32>
    %12 = vector.shape_cast %11 : vector<192x16xf32> to vector<8x24x16xf32>
    "tpu.trace_start"() <{level = 10 : i32, message = "wnd,wmd->wnm"}> : () -> ()
    %cst_7 = arith.constant dense<0.000000e+00> : vector<8x24x24xf32>
    %13 = tpu.matmul %12, %12, %cst_7 {dimension_numbers = #tpu.dot_dimension_numbers<[2], [2], [1], [1], [0, 0, 0, 1, 1, 1], [0], [0]>, precision = #tpu.contract_precision<fp32>} : vector<8x24x16xf32>, vector<8x24x16xf32>, vector<8x24x24xf32> -> vector<8x24x24xf32>
    "tpu.trace_stop"() : () -> ()
    %c0_8 = arith.constant 0 : index
    %c0_9 = arith.constant 0 : index
    %14 = vector.load %arg3[%c0_8, %c0_9] : memref<24x24xf32, #tpu.memory_space<vmem>>, vector<24x24xf32>
    %cst_10 = arith.constant 1.000000e+08 : f32
    %15 = vector.broadcast %cst_10 : f32 to vector<24x24xf32>
    %16 = arith.mulf %14, %15 : vector<24x24xf32>
    %17 = vector.shape_cast %16 : vector<24x24xf32> to vector<1x24x24xf32>
    %18 = vector.broadcast %17 : vector<1x24x24xf32> to vector<8x24x24xf32>
    %19 = arith.subf %13, %18 : vector<8x24x24xf32>
    %cst_11 = arith.constant 0.000000e+00 : f32
    %20 = vector.broadcast %cst_11 : f32 to vector<8x24x24xf32>
    %21 = arith.cmpf oge, %19, %20 : vector<8x24x24xf32>
    %cst_12 = arith.constant 0.00999999977 : f32
    %22 = vector.broadcast %cst_12 : f32 to vector<8x24x24xf32>
    %23 = arith.mulf %22, %19 : vector<8x24x24xf32>
    %24 = arith.select %21, %19, %23 : vector<8x24x24xi1>, vector<8x24x24xf32>
    %cst_13 = arith.constant dense<0xFF800000> : vector<8x24xf32>
    %25 = vector.multi_reduction <maximumf>, %24, %cst_13 [2] : vector<8x24x24xf32> to vector<8x24xf32>
    %26 = vector.shape_cast %25 : vector<8x24xf32> to vector<8x24x1xf32>
    %27 = vector.broadcast %26 : vector<8x24x1xf32> to vector<8x24x24xf32>
    %28 = arith.subf %24, %27 : vector<8x24x24xf32>
    %29 = math.exp %28 : vector<8x24x24xf32>
    %cst_14 = arith.constant dense<0.000000e+00> : vector<8x24xf32>
    %30 = vector.multi_reduction <add>, %29, %cst_14 [2] : vector<8x24x24xf32> to vector<8x24xf32>
    %31 = vector.shape_cast %30 : vector<8x24xf32> to vector<8x24x1xf32>
    %32 = tpu.reciprocal %31 {approx = true} : vector<8x24x1xf32> -> vector<8x24x1xf32>
    %33 = vector.broadcast %32 : vector<8x24x1xf32> to vector<8x24x24xf32>
    %34 = arith.mulf %29, %33 : vector<8x24x24xf32>
    %c0_15 = arith.constant 0 : index
    %c0_16 = arith.constant 0 : index
    %35 = vector.load %arg3[%c0_15, %c0_16] : memref<24x24xf32, #tpu.memory_space<vmem>>, vector<24x24xf32>
    %36 = vector.shape_cast %35 : vector<24x24xf32> to vector<1x24x24xf32>
    %37 = vector.broadcast %36 : vector<1x24x24xf32> to vector<8x24x24xf32>
    %38 = arith.addf %34, %37 : vector<8x24x24xf32>
    %c0_17 = arith.constant 0 : index
    %c0_18 = arith.constant 0 : index
    %39 = vector.load %arg2[%c0_17, %c0_18] : memref<24x24xf32, #tpu.memory_space<vmem>>, vector<24x24xf32>
    %40 = vector.shape_cast %39 : vector<24x24xf32> to vector<1x24x24xf32>
    %41 = vector.broadcast %40 : vector<1x24x24xf32> to vector<8x24x24xf32>
    %42 = arith.mulf %38, %41 : vector<8x24x24xf32>
    %c0_19 = arith.constant 0 : index
    %c0_20 = arith.constant 0 : index
    %43 = vector.load %arg8[%c0_19, %c0_20] : memref<1x16xf32, #tpu.memory_space<vmem>>, vector<1x16xf32>
    %44 = vector.broadcast %43 : vector<1x16xf32> to vector<192x16xf32>
    %45 = arith.mulf %6, %44 : vector<192x16xf32>
    %c0_21 = arith.constant 0 : index
    %c0_22 = arith.constant 0 : index
    %46 = vector.load %arg9[%c0_21, %c0_22] : memref<1x16xf32, #tpu.memory_space<vmem>>, vector<1x16xf32>
    %47 = vector.broadcast %46 : vector<1x16xf32> to vector<192x16xf32>
    %48 = arith.addf %45, %47 : vector<192x16xf32>
    %49 = vector.shape_cast %48 : vector<192x16xf32> to vector<8x24x16xf32>
    "tpu.trace_start"() <{level = 10 : i32, message = "wnm,wmd->wnd"}> : () -> ()
    %cst_23 = arith.constant dense<0.000000e+00> : vector<8x24x16xf32>
    %50 = tpu.matmul %42, %49, %cst_23 {dimension_numbers = #tpu.dot_dimension_numbers<[2], [1], [1], [2], [0, 0, 0, 1, 1, 2], [0], [0]>, precision = #tpu.contract_precision<fp32>} : vector<8x24x24xf32>, vector<8x24x16xf32>, vector<8x24x16xf32> -> vector<8x24x16xf32>
    "tpu.trace_stop"() : () -> ()
    %51 = vector.shape_cast %50 : vector<8x24x16xf32> to vector<192x16xf32>
    %c0_24 = arith.constant 0 : index
    %c0_25 = arith.constant 0 : index
    %52 = vector.load %arg6[%c0_24, %c0_25] : memref<16x32xf32, #tpu.memory_space<vmem>>, vector<16x32xf32>
    %cst_26 = arith.constant dense<0.000000e+00> : vector<192x32xf32>
    %53 = tpu.matmul %51, %52, %cst_26 {dimension_numbers = #tpu.dot_dimension_numbers<[1], [0], [0], [1], [0, 0, 1, 1], [], []>, precision = #tpu.contract_precision<fp32>} : vector<192x16xf32>, vector<16x32xf32>, vector<192x32xf32> -> vector<192x32xf32>
    %c0_27 = arith.constant 0 : index
    %c0_28 = arith.constant 0 : index
    %54 = vector.load %arg7[%c0_27, %c0_28] : memref<1x32xf32, #tpu.memory_space<vmem>>, vector<1x32xf32>
    %55 = vector.broadcast %54 : vector<1x32xf32> to vector<192x32xf32>
    %56 = arith.addf %53, %55 : vector<192x32xf32>
    %57 = vector.shape_cast %56 : vector<192x32xf32> to vector<8x24x32xf32>
    %c0_29 = arith.constant 0 : index
    %c0_30 = arith.constant 0 : index
    %c0_31 = arith.constant 0 : index
    %c0_32 = arith.constant 0 : index
    %58 = vector.load %arg10[%c0_29, %c0_30, %c0_31, %c0_32] : memref<1x8x24x32xf32, #tpu.memory_space<vmem>>, vector<1x8x24x32xf32>
    %59 = vector.shape_cast %58 : vector<1x8x24x32xf32> to vector<8x24x32xf32>
    %60 = vector.shape_cast %57 : vector<8x24x32xf32> to vector<1x8x24x32xf32>
    tpu.vector_store %arg10[%c0_29, %c0_30, %c0_31, %c0_32], %60 {strides = array<i32>} : memref<1x8x24x32xf32, #tpu.memory_space<vmem>>, vector<1x8x24x32xf32>,
    %cst_33 = arith.constant dense<0.000000e+00> : vector<32xf32>
    %61 = vector.multi_reduction <add>, %56, %cst_33 [0] : vector<192x32xf32> to vector<32xf32>
    %62 = vector.shape_cast %61 : vector<32xf32> to vector<1x32xf32>
    %c0_34 = arith.constant 0 : index
    %c0_35 = arith.constant 0 : index
    %c0_36 = arith.constant 0 : index
    %63 = vector.load %arg11[%c0_34, %c0_35, %c0_36] : memref<1x1x32xf32, #tpu.memory_space<vmem>>, vector<1x1x32xf32>
    %64 = vector.shape_cast %63 : vector<1x1x32xf32> to vector<1x32xf32>
    %65 = vector.shape_cast %62 : vector<1x32xf32> to vector<1x1x32xf32>
    tpu.vector_store %arg11[%c0_34, %c0_35, %c0_36], %65 {strides = array<i32>} : memref<1x1x32xf32, #tpu.memory_space<vmem>>, vector<1x1x32xf32>,
    %66 = arith.mulf %56, %56 : vector<192x32xf32>
    %cst_37 = arith.constant dense<0.000000e+00> : vector<32xf32>
    %67 = vector.multi_reduction <add>, %66, %cst_37 [0] : vector<192x32xf32> to vector<32xf32>
    %68 = vector.shape_cast %67 : vector<32xf32> to vector<1x32xf32>
    %c0_38 = arith.constant 0 : index
    %c0_39 = arith.constant 0 : index
    %c0_40 = arith.constant 0 : index
    %69 = vector.load %arg12[%c0_38, %c0_39, %c0_40] : memref<1x1x32xf32, #tpu.memory_space<vmem>>, vector<1x1x32xf32>
    %70 = vector.shape_cast %69 : vector<1x1x32xf32> to vector<1x32xf32>
    %71 = vector.shape_cast %68 : vector<1x32xf32> to vector<1x1x32xf32>
    tpu.vector_store %arg12[%c0_38, %c0_39, %c0_40], %71 {strides = array<i32>} : memref<1x1x32xf32, #tpu.memory_space<vmem>>, vector<1x1x32xf32>,
    return
  }
  func.func @transform_0(%arg0: i32) -> (i32, i32, i32, i32) {
    %c0_i32 = arith.constant 0 : i32
    %c0_i32_0 = arith.constant 0 : i32
    %c0_i32_1 = arith.constant 0 : i32
    %c0_i32_2 = arith.constant 0 : i32
    return %arg0, %c0_i32, %c0_i32_0, %c0_i32_1 : i32, i32, i32, i32
  }
  func.func @transform_1(%arg0: i32) -> (i32, i32) {
    %c0_i32 = arith.constant 0 : i32
    %c0_i32_0 = arith.constant 0 : i32
    %c0_i32_1 = arith.constant 0 : i32
    return %c0_i32, %c0_i32_0 : i32, i32
  }
  func.func @transform_2(%arg0: i32) -> (i32, i32) {
    %c0_i32 = arith.constant 0 : i32
    %c0_i32_0 = arith.constant 0 : i32
    %c0_i32_1 = arith.constant 0 : i32
    return %c0_i32, %c0_i32_0 : i32, i32
  }
  func.func @transform_3(%arg0: i32) -> (i32, i32) {
    %c0_i32 = arith.constant 0 : i32
    %c0_i32_0 = arith.constant 0 : i32
    %c0_i32_1 = arith.constant 0 : i32
    return %c0_i32, %c0_i32_0 : i32, i32
  }
  func.func @transform_4(%arg0: i32) -> (i32, i32) {
    %c0_i32 = arith.constant 0 : i32
    %c0_i32_0 = arith.constant 0 : i32
    %c0_i32_1 = arith.constant 0 : i32
    return %c0_i32, %c0_i32_0 : i32, i32
  }
  func.func @transform_5(%arg0: i32) -> (i32, i32) {
    %c0_i32 = arith.constant 0 : i32
    %c0_i32_0 = arith.constant 0 : i32
    %c0_i32_1 = arith.constant 0 : i32
    return %c0_i32, %c0_i32_0 : i32, i32
  }
  func.func @transform_6(%arg0: i32) -> (i32, i32) {
    %c0_i32 = arith.constant 0 : i32
    %c0_i32_0 = arith.constant 0 : i32
    %c0_i32_1 = arith.constant 0 : i32
    return %c0_i32, %c0_i32_0 : i32, i32
  }
  func.func @transform_7(%arg0: i32) -> (i32, i32) {
    %c0_i32 = arith.constant 0 : i32
    %c0_i32_0 = arith.constant 0 : i32
    %c0_i32_1 = arith.constant 0 : i32
    return %c0_i32, %c0_i32_0 : i32, i32
  }
  func.func @transform_8(%arg0: i32) -> (i32, i32) {
    %c0_i32 = arith.constant 0 : i32
    %c0_i32_0 = arith.constant 0 : i32
    %c0_i32_1 = arith.constant 0 : i32
    return %c0_i32, %c0_i32_0 : i32, i32
  }
  func.func @transform_9(%arg0: i32) -> (i32, i32, i32, i32) {
    %c0_i32 = arith.constant 0 : i32
    %c0_i32_0 = arith.constant 0 : i32
    %c0_i32_1 = arith.constant 0 : i32
    %c0_i32_2 = arith.constant 0 : i32
    return %arg0, %c0_i32, %c0_i32_0, %c0_i32_1 : i32, i32, i32, i32
  }
  func.func @transform_10(%arg0: i32) -> (i32, i32, i32) {
    %c0_i32 = arith.constant 0 : i32
    %c0_i32_0 = arith.constant 0 : i32
    %c0_i32_1 = arith.constant 0 : i32
    return %arg0, %c0_i32, %c0_i32_0 : i32, i32, i32
  }
  func.func @transform_11(%arg0: i32) -> (i32, i32, i32) {
    %c0_i32 = arith.constant 0 : i32
    %c0_i32_0 = arith.constant 0 : i32
    %c0_i32_1 = arith.constant 0 : i32
    return %arg0, %c0_i32, %c0_i32_0 : i32, i32, i32
  }
}

module attributes {stable_mosaic.version = 11 : i64} {
  func.func @_bn_relu_pool_kernel(%arg0: i32, %arg1: memref<1x8x24x32xf32, #tpu.memory_space<vmem>>, %arg2: memref<1x32xf32, #tpu.memory_space<vmem>>, %arg3: memref<1x32xf32, #tpu.memory_space<vmem>>, %arg4: memref<1x8x8x32xf32, #tpu.memory_space<vmem>>) attributes {dimension_semantics = [#tpu.dimension_semantics<parallel>], iteration_bounds = array<i64: 2>, scalar_prefetch = 0 : i64, scratch_operands = 0 : i64, tpu.core_type = #tpu.core_type<tc>, window_params = [{transform_indices = @transform_0, window_bounds = array<i64: 1, 8, 24, 32>}, {pipeline_mode = #tpu.pipeline_mode<synchronous>, transform_indices = @transform_1, window_bounds = array<i64: 1, 32>}, {pipeline_mode = #tpu.pipeline_mode<synchronous>, transform_indices = @transform_2, window_bounds = array<i64: 1, 32>}, {transform_indices = @transform_3, window_bounds = array<i64: 1, 8, 8, 32>}]} {
    %c0 = arith.constant 0 : index
    %c0_0 = arith.constant 0 : index
    %c0_1 = arith.constant 0 : index
    %c0_2 = arith.constant 0 : index
    %0 = vector.load %arg1[%c0, %c0_0, %c0_1, %c0_2] : memref<1x8x24x32xf32, #tpu.memory_space<vmem>>, vector<1x8x24x32xf32>
    %1 = vector.shape_cast %0 : vector<1x8x24x32xf32> to vector<8x24x32xf32>
    %c0_3 = arith.constant 0 : index
    %c0_4 = arith.constant 0 : index
    %2 = vector.load %arg2[%c0_3, %c0_4] : memref<1x32xf32, #tpu.memory_space<vmem>>, vector<1x32xf32>
    %3 = vector.shape_cast %2 : vector<1x32xf32> to vector<1x1x32xf32>
    %4 = vector.broadcast %3 : vector<1x1x32xf32> to vector<8x24x32xf32>
    %5 = arith.mulf %1, %4 : vector<8x24x32xf32>
    %c0_5 = arith.constant 0 : index
    %c0_6 = arith.constant 0 : index
    %6 = vector.load %arg3[%c0_5, %c0_6] : memref<1x32xf32, #tpu.memory_space<vmem>>, vector<1x32xf32>
    %7 = vector.shape_cast %6 : vector<1x32xf32> to vector<1x1x32xf32>
    %8 = vector.broadcast %7 : vector<1x1x32xf32> to vector<8x24x32xf32>
    %9 = arith.addf %5, %8 : vector<8x24x32xf32>
    %cst = arith.constant 0.000000e+00 : f32
    %10 = vector.broadcast %cst : f32 to vector<8x24x32xf32>
    %11 = arith.cmpf oge, %9, %10 : vector<8x24x32xf32>
    %cst_7 = arith.constant 0.00999999977 : f32
    %12 = vector.broadcast %cst_7 : f32 to vector<8x24x32xf32>
    %13 = arith.mulf %12, %9 : vector<8x24x32xf32>
    %14 = arith.select %11, %9, %13 : vector<8x24x32xi1>, vector<8x24x32xf32>
    %15 = vector.shape_cast %14 : vector<8x24x32xf32> to vector<8x3x8x32xf32>
    %cst_8 = arith.constant dense<0.000000e+00> : vector<8x8x32xf32>
    %16 = vector.multi_reduction <add>, %15, %cst_8 [1] : vector<8x3x8x32xf32> to vector<8x8x32xf32>
    %cst_9 = arith.constant 3.000000e+00 : f32
    %17 = vector.broadcast %cst_9 : f32 to vector<8x8x32xf32>
    %18 = arith.divf %16, %17 : vector<8x8x32xf32>
    %c0_10 = arith.constant 0 : index
    %c0_11 = arith.constant 0 : index
    %c0_12 = arith.constant 0 : index
    %c0_13 = arith.constant 0 : index
    %19 = vector.load %arg4[%c0_10, %c0_11, %c0_12, %c0_13] : memref<1x8x8x32xf32, #tpu.memory_space<vmem>>, vector<1x8x8x32xf32>
    %20 = vector.shape_cast %19 : vector<1x8x8x32xf32> to vector<8x8x32xf32>
    %21 = vector.shape_cast %18 : vector<8x8x32xf32> to vector<1x8x8x32xf32>
    tpu.vector_store %arg4[%c0_10, %c0_11, %c0_12, %c0_13], %21 {strides = array<i32>} : memref<1x8x8x32xf32, #tpu.memory_space<vmem>>, vector<1x8x8x32xf32>,
    return
  }
  func.func @transform_0(%arg0: i32) -> (i32, i32, i32, i32) {
    %c0_i32 = arith.constant 0 : i32
    %c0_i32_0 = arith.constant 0 : i32
    %c0_i32_1 = arith.constant 0 : i32
    %c0_i32_2 = arith.constant 0 : i32
    return %arg0, %c0_i32, %c0_i32_0, %c0_i32_1 : i32, i32, i32, i32
  }
  func.func @transform_1(%arg0: i32) -> (i32, i32) {
    %c0_i32 = arith.constant 0 : i32
    %c0_i32_0 = arith.constant 0 : i32
    %c0_i32_1 = arith.constant 0 : i32
    return %c0_i32, %c0_i32_0 : i32, i32
  }
  func.func @transform_2(%arg0: i32) -> (i32, i32) {
    %c0_i32 = arith.constant 0 : i32
    %c0_i32_0 = arith.constant 0 : i32
    %c0_i32_1 = arith.constant 0 : i32
    return %c0_i32, %c0_i32_0 : i32, i32
  }
  func.func @transform_3(%arg0: i32) -> (i32, i32, i32, i32) {
    %c0_i32 = arith.constant 0 : i32
    %c0_i32_0 = arith.constant 0 : i32
    %c0_i32_1 = arith.constant 0 : i32
    %c0_i32_2 = arith.constant 0 : i32
    return %arg0, %c0_i32, %c0_i32_0, %c0_i32_1 : i32, i32, i32, i32
  }
}

</mosaic_0001>

<bundles_post_ra>
// kernel: graph_convpool_mpnn_block_v6.3
= control target key start
LH: loop header
LB: loop body
LE: loop exit
PB: predicated region body
PF: predicated region fallthrough
CT: control target
= control target key end

     0   :  { %8 = vsyncpa [#allocation3], 0  ;;  %s836_s0 = inlined_call_operand.vmem [shape: f32[2,8,24,32], index: 0, kind: input, shape index: {}]   ;;  %s837_s1 = inlined_call_operand.vmem [shape: f32[1,32], index: 1, kind: input, shape index: {}]   ;;  %s838_s2 = inlined_call_operand.vmem [shape: f32[1,32], index: 2, kind: input, shape index: {}]   ;;  %s839_s3 = inlined_call_operand.hbm [shape: f32[2,8,8,32], index: 3, kind: output, shape index: {}]  }
   0x1   :  { %10 = vsyncpa [#allocation3 + $0x1], 0  ;;  %s602_s12 = smov 0   ;;  %s604_s13 = smov 0  }
   0x2   :  { %s606_s14 = smov 0   ;;  %s608_s15 = smov 0  }
   0x3 LB: > { %s623_s16 = sadd.s32 4294967295, %s577_s15   ;;  %s461_s17 = sadd.s32 4294967294, %s577_s15   ;;  %s577_s15 = sphi %s608_s15, %s845_s15   ;;  %s573_s14 = sphi %s606_s14, %s844_s14   ;;  %s569_s13 = sphi %s604_s13, %s843_s13   ;;  %s565_s12 = sphi %s602_s12, %s842_s12  }
   0x4   : > { %s627_s18 = sadd.s32 1, %s577_s15   ;;  %s91_s19 = sadd.s32 1, %s573_s14 }
   0x5   : > { %s88_s20 = ssub.s32 %s577_s15, %s627_s18  ;;  %p101_p0 = scmp.ne.s32.totalorder %s573_s14, %s569_s13 }
   0x6   : > { %p89_p1 = scmp.eq.s32.totalorder %s88_s20, 0  ;;  %p102_p2 = scmp.eq.s32.totalorder %s623_s16, 1 }
   0x7   : > { %p107_p3 = scmp.ne.s32.totalorder %s569_s13, %s565_s12  ;;  %p108_p4 = scmp.eq.s32.totalorder %s461_s17, 1 }
   0x8   : > { %s638_s21 = scalar_select %p89_p1, %s573_s14, %s91_s19  }
   0x9   : > { %p640_p5 = por %p102_p2, %p101_p0  ;;  %p644_p6 = por %p108_p4, %p107_p3 }
   0xa   : > { %p464_p7 = scmp.ge.s32.totalorder %s577_s15, 1  ;;  %p140_p8 = scmp.lt.s32.totalorder %s577_s15, 3 }
   0xc   : > { %p141_p9 = pnand %p464_p7, %p140_p8 }
   0xd   : > { %p164_p10 = scmp.lt.s32.totalorder (!%p141_p9), %s623_s16, 1  ;;  %s161_s6 = sand.u32 (!%p141_p9), 1, %s569_s13  }
   0xe   : > { %144 = sbr.rel (%p141_p9) target bundleno = 88 (0x58), region = 32  ;;  %s465_s7 = sshll.u32 (!%p141_p9), %s161_s6, 6 }
   0xf   : > { %s711_s8 = scalar_lea.vmem (!%p141_p9), [#allocation2], %s465_s7  ;;  %s474_s10 = sshll.u32 (!%p141_p9), %s623_s16, 10 }
  0x10   : > { %s399_s9 = sshll.u32 (!%p141_p9), %s711_s8, 4  ;;  %s790_s19 = scalar_lea.hbm (!%p141_p9), %s839_s3, %s474_s10  ;;  %s785_s9 = int_to_ptr.vmem [resolvable:$true] %s399_s9 }
  0x11   : > { %s796_s20 = scalar_lea.sflag (!%p141_p9), [#allocation3], %s161_s6 }
  0x13   : > { %s165_s24 = scalar_select %p164_p10, %s623_s16, 1  ;;  %v655_v0 = vld [vmem:[%s837_s1] ss:$0 sm:$0xff]  ;;  %vm327_vm0 = vcmask 261120  }
  0x14   : > { %v665_v1 = vld [vmem:[%s838_s2] ss:$0 sm:$0xff]  ;;  %s517_s16 = scalar_lea.vmem %s785_s9, 1024 }
  0x15   : > { %s475_s25 = smul.u32 192, %s165_s24  ;;  %p518_p11 = scmp.ne.s32.totalorder %s785_s9, %s517_s16 }
  0x16   : > { %s579_s24 = smov [#allocation2]  }
  0x17   : > { %s660_s30 = scalar_lea.vmem %s836_s0, %s475_s25  ;;  %p519_p12 = pnand %p518_p11, %p640_p5 }
  0x18   : > { %v169_v2 = vld [vmem:[%s660_s30] sm:$0xff]  ;;  %v170_v3 = vld [vmem:[%s660_s30 + $0x8] sm:$0xff]  ;;  %v171_v4 = vld [vmem:[%s660_s30 + $0x10] sm:$0xff]  ;;  %s521_s25 = sshll.u32 %s579_s24, 4  ;;  %s522_s25 = int_to_ptr.vmem [resolvable:$false] %s521_s25 }
  0x19   : > { %v200_v5 = vmul.f32 %v655_v0, %v169_v2  ;;  %v201_v6 = vmul.f32 %v655_v0, %v170_v3  ;;  %v202_v7 = vmul.f32 %v655_v0, %v171_v4  ;;  %v172_v8 = vld [vmem:[%s660_s30 + $0x18] sm:$0xff]  ;;  %v173_v9 = vld [vmem:[%s660_s30 + $0x20] sm:$0xff]  ;;  %v174_v10 = vld [vmem:[%s660_s30 + $0x28] sm:$0xff]  ;;  %p520_p13 = pneg %p519_p12  ;;  %s523_s26 = scalar_lea.vmem %s522_s25, 2048 }
  0x1a   : > { %v203_v11 = vmul.f32 %v655_v0, %v172_v8  ;;  %v204_v12 = vmul.f32 %v655_v0, %v173_v9  ;;  %v205_v13 = vmul.f32 %v655_v0, %v174_v10  ;;  %v175_v14 = vld [vmem:[%s660_s30 + $0x30] sm:$0xff]  ;;  %v176_v15 = vld [vmem:[%s660_s30 + $0x38] sm:$0xff]  ;;  %v177_v34 = vld [vmem:[%s660_s30 + $0x40] sm:$0xff]  ;;  %p524_p0 = scmp.lt.s32.totalorder %s785_s9, %s522_s25  ;;  %p525_p1 = scmp.lt.s32.totalorder %s523_s26, %s517_s16 }
  0x1b   : > { %v231_v16 = vadd.f32 %v665_v1, %v200_v5  ;;  %v232_v17 = vadd.f32 %v665_v1, %v201_v6  ;;  %v233_v18 = vadd.f32 %v665_v1, %v202_v7  ;;  %v206_v19 = vmul.f32 %v655_v0, %v175_v14  ;;  %v178_v39 = vld [vmem:[%s660_s30 + $0x48] sm:$0xff]  ;;  %v179_v40 = vld [vmem:[%s660_s30 + $0x50] sm:$0xff]  ;;  %v180_v49 = vld [vmem:[%s660_s30 + $0x58] sm:$0xff] }
  0x1c   : > { %v234_v20 = vadd.f32 %v665_v1, %v203_v11  ;;  %v235_v21 = vadd.f32 %v665_v1, %v204_v12  ;;  %v236_v22 = vadd.f32 %v665_v1, %v205_v13  ;;  %v207_v23 = vmul.f32 %v655_v0, %v176_v15  ;;  %v181_v60 = vld [vmem:[%s660_s30 + $0x60] sm:$0xff]  ;;  %v182_v6 = vld [vmem:[%s660_s30 + $0x68] sm:$0xff]  ;;  %v183_v10 = vld [vmem:[%s660_s30 + $0x70] sm:$0xff]  ;;  %p526_p2 = por %p525_p1, %p524_p0 }
  0x1d   : > { %vm255_vm1 = vcmp.ge.f32.partialorder %v231_v16, 0.0  ;;  %vm256_vm2 = vcmp.ge.f32.partialorder %v232_v17, 0.0  ;;  %vm257_vm3 = vcmp.ge.f32.partialorder %v233_v18, 0.0  ;;  %v279_v24 = vmul.f32 0.01, %v231_v16  ;;  %v184_v14 = vld [vmem:[%s660_s30 + $0x78] sm:$0xff] }
  0x1e   : > { %v280_v25 = vmul.f32 0.01, %v232_v17  ;;  %v281_v26 = vmul.f32 0.01, %v233_v18  ;;  %vm258_vm4 = vcmp.ge.f32.partialorder %v234_v20, 0.0  ;;  %vm259_vm5 = vcmp.ge.f32.partialorder %v235_v21, 0.0  ;;  %p527_p3 = pnand %p526_p2, %p520_p13 }
  0x1f   : > { %v303_v27 = vsel %vm255_vm1, %v231_v16, %v279_v24  ;;  %vm260_vm6 = vcmp.ge.f32.partialorder %v236_v22, 0.0  ;;  %v282_v28 = vmul.f32 0.01, %v234_v20  ;;  %v283_v29 = vmul.f32 0.01, %v235_v21 }
  0x20   : > { %v304_v30 = vsel %vm256_vm2, %v232_v17, %v280_v25  ;;  %v305_v31 = vsel %vm257_vm3, %v233_v18, %v281_v26  ;;  %v328_v32 = vsel %vm327_vm0, %v303_v27, 0.0  ;;  %v284_v33 = vmul.f32 0.01, %v236_v22  ;;  %v185_v25 = vld [vmem:[%s660_s30 + $0x80] sm:$0xff] }
  0x21   : > { %v329_v35 = vsel %vm327_vm0, %v304_v30, 0.0  ;;  %v331_v36 = vsel %vm327_vm0, %v305_v31, 0.0  ;;  %v306_v37 = vsel %vm258_vm4, %v234_v20, %v282_v28  ;;  %v307_v38 = vsel %vm259_vm5, %v235_v21, %v283_v29  ;;  %v186_v31 = vld [vmem:[%s660_s30 + $0x88] sm:$0xff] }
  0x22   : > { %v330_v41 = vadd.f32 %v329_v35, %v328_v32  ;;  %v308_v42 = vsel %vm260_vm6, %v236_v22, %v284_v33  ;;  %v333_v43 = vsel %vm327_vm0, %v306_v37, 0.0  ;;  %v334_v44 = vsel %vm327_vm0, %v307_v38, 0.0 }
  0x23   : > { %v335_v45 = vadd.f32 %v334_v44, %v333_v43  ;;  %v336_v46 = vsel %vm327_vm0, %v308_v42, 0.0  ;;  %v208_v47 = vmul.f32 %v655_v0, %v177_v34  ;;  %v237_v48 = vadd.f32 %v665_v1, %v206_v19 }
  0x24   : > { %v332_v50 = vadd.f32 %v331_v36, %v330_v41  ;;  %v238_v51 = vadd.f32 %v665_v1, %v207_v23  ;;  %v209_v52 = vmul.f32 %v655_v0, %v178_v39  ;;  %v210_v53 = vmul.f32 %v655_v0, %v179_v40 }
  0x25   : > { %v337_v54 = vadd.f32 %v336_v46, %v335_v45  ;;  %v239_v55 = vadd.f32 %v665_v1, %v208_v47  ;;  %vm261_vm7 = vcmp.ge.f32.partialorder %v237_v48, 0.0  ;;  %v285_v56 = vmul.f32 0.01, %v237_v48  ;;  %v187_v45 = vld [vmem:[%s660_s30 + $0x90] sm:$0xff] }
  0x26   : > { %v369_v57 = vmul.f32 0.33333334, %v332_v50  ;;  %vm262_vm8 = vcmp.ge.f32.partialorder %v238_v51, 0.0  ;;  %v286_v58 = vmul.f32 0.01, %v238_v51  ;;  %v211_v59 = vmul.f32 %v655_v0, %v180_v49  ;;  %v188_v50 = vld [vmem:[%s660_s30 + $0x98] sm:$0xff] }
  0x27   : > { %v370_v61 = vmul.f32 0.33333334, %v337_v54  ;;  %vm263_vm9 = vcmp.ge.f32.partialorder %v239_v55, 0.0  ;;  %v287_v62 = vmul.f32 0.01, %v239_v55  ;;  %v309_v63 = vsel %vm261_vm7, %v237_v48, %v285_v56  ;;  %v189_v54 = vld [vmem:[%s660_s30 + $0xa0] sm:$0xff] }
  0x28   : > { %377 = vst.msk [vmem:[%s711_s8] sm:$0xff] %vm327_vm0, %v369_v57  ;;  %v310_v2 = vsel %vm262_vm8, %v238_v51, %v286_v58  ;;  %v338_v3 = vsel %vm327_vm0, %v309_v63, 0.0  ;;  %v240_v4 = vadd.f32 %v665_v1, %v209_v52  ;;  %v241_v5 = vadd.f32 %v665_v1, %v210_v53 }
  0x29   : > { %378 = vst.msk [vmem:[%s711_s8 + $0x8] sm:$0xff] %vm327_vm0, %v370_v61  ;;  %v311_v7 = vsel %vm263_vm9, %v239_v55, %v287_v62  ;;  %v339_v8 = vsel %vm327_vm0, %v310_v2, 0.0  ;;  %v242_v9 = vadd.f32 %v665_v1, %v211_v59  ;;  %v212_v11 = vmul.f32 %v655_v0, %v181_v60 }
  0x2a   : > { %v340_v12 = vadd.f32 %v339_v8, %v338_v3  ;;  %v341_v13 = vsel %vm327_vm0, %v311_v7, 0.0  ;;  %vm264_vm10 = vcmp.ge.f32.partialorder %v240_v4, 0.0  ;;  %vm265_vm11 = vcmp.ge.f32.partialorder %v241_v5, 0.0  ;;  %v190_v3 = vld [vmem:[%s660_s30 + $0xa8] sm:$0xff] }
  0x2b   : > { %vm266_vm12 = vcmp.ge.f32.partialorder %v242_v9, 0.0  ;;  %v288_v15 = vmul.f32 0.01, %v240_v4  ;;  %v289_v16 = vmul.f32 0.01, %v241_v5  ;;  %v213_v17 = vmul.f32 %v655_v0, %v182_v6 }
  0x2c   : > { %v342_v18 = vadd.f32 %v341_v13, %v340_v12  ;;  %v290_v19 = vmul.f32 0.01, %v242_v9  ;;  %v214_v20 = vmul.f32 %v655_v0, %v183_v10  ;;  %v243_v21 = vadd.f32 %v665_v1, %v212_v11  ;;  %v192_v13 = vld [vmem:[%s660_s30 + $0xb8] sm:$0xff] }
  0x2d   : > { %v312_v22 = vsel %vm264_vm10, %v240_v4, %v288_v15  ;;  %v313_v23 = vsel %vm265_vm11, %v241_v5, %v289_v16  ;;  %v244_v24 = vadd.f32 %v665_v1, %v213_v17  ;;  %v215_v26 = vmul.f32 %v655_v0, %v184_v14  ;;  %v191_v4 = vld [vmem:[%s660_s30 + $0xb0] sm:$0xff] }
  0x2e   : > { %v371_v27 = vmul.f32 0.33333334, %v342_v18  ;;  %v314_v28 = vsel %vm266_vm12, %v242_v9, %v290_v19  ;;  %v343_v29 = vsel %vm327_vm0, %v312_v22, 0.0  ;;  %v344_v30 = vsel %vm327_vm0, %v313_v23, 0.0 }
  0x2f   : > { %v345_v32 = vadd.f32 %v344_v30, %v343_v29  ;;  %v346_v33 = vsel %vm327_vm0, %v314_v28, 0.0  ;;  %v245_v34 = vadd.f32 %v665_v1, %v214_v20  ;;  %vm267_vm13 = vcmp.ge.f32.partialorder %v243_v21, 0.0 }
  0x30   : > { %379 = vst.msk [vmem:[%s711_s8 + $0x10] sm:$0xff] %vm327_vm0, %v371_v27  ;;  %vm268_vm14 = vcmp.ge.f32.partialorder %v244_v24, 0.0  ;;  %v291_v35 = vmul.f32 0.01, %v243_v21  ;;  %v292_v36 = vmul.f32 0.01, %v244_v24  ;;  %v216_v37 = vmul.f32 %v655_v0, %v185_v25 }
  0x31   : > { %v347_v38 = vadd.f32 %v346_v33, %v345_v32  ;;  %vm269_vm15 = vcmp.ge.f32.partialorder %v245_v34, 0.0  ;;  %v293_v39 = vmul.f32 0.01, %v245_v34  ;;  %v217_v40 = vmul.f32 %v655_v0, %v186_v31 }
  0x32   : > { %v315_v41 = vsel %vm267_vm13, %v243_v21, %v291_v35  ;;  %v316_v42 = vsel %vm268_vm14, %v244_v24, %v292_v36  ;;  %v246_v43 = vadd.f32 %v665_v1, %v215_v26  ;;  %v247_v44 = vadd.f32 %v665_v1, %v216_v37 }
  0x33   : > { %v372_v46 = vmul.f32 0.33333334, %v347_v38  ;;  %v317_v47 = vsel %vm269_vm15, %v245_v34, %v293_v39  ;;  %v348_v48 = vsel %vm327_vm0, %v315_v41, 0.0  ;;  %v349_v49 = vsel %vm327_vm0, %v316_v42, 0.0 }
  0x34   : > { %v350_v51 = vadd.f32 %v349_v49, %v348_v48  ;;  %v351_v52 = vsel %vm327_vm0, %v317_v47, 0.0  ;;  %v248_v53 = vadd.f32 %v665_v1, %v217_v40  ;;  %vm270_vm1 = vcmp.ge.f32.partialorder %v246_v43, 0.0 }
  0x35   : > { %380 = vst.msk [vmem:[%s711_s8 + $0x18] sm:$0xff] %vm327_vm0, %v372_v46  ;;  %vm271_vm2 = vcmp.ge.f32.partialorder %v247_v44, 0.0  ;;  %v294_v55 = vmul.f32 0.01, %v246_v43  ;;  %v295_v56 = vmul.f32 0.01, %v247_v44  ;;  %v218_v57 = vmul.f32 %v655_v0, %v187_v45 }
  0x36   : > { %v352_v58 = vadd.f32 %v351_v52, %v350_v51  ;;  %vm272_vm3 = vcmp.ge.f32.partialorder %v248_v53, 0.0  ;;  %v296_v59 = vmul.f32 0.01, %v248_v53  ;;  %v219_v60 = vmul.f32 %v655_v0, %v188_v50 }
  0x37   : > { %v318_v61 = vsel %vm270_vm1, %v246_v43, %v294_v55  ;;  %v319_v62 = vsel %vm271_vm2, %v247_v44, %v295_v56  ;;  %v220_v63 = vmul.f32 %v655_v0, %v189_v54  ;;  %v249_v2 = vadd.f32 %v665_v1, %v218_v57 }
  0x38   : > { %v373_v5 = vmul.f32 0.33333334, %v352_v58  ;;  %v320_v6 = vsel %vm272_vm3, %v248_v53, %v296_v59  ;;  %v353_v7 = vsel %vm327_vm0, %v318_v61, 0.0  ;;  %v354_v8 = vsel %vm327_vm0, %v319_v62, 0.0 }
  0x39   : > { %v355_v9 = vadd.f32 %v354_v8, %v353_v7  ;;  %v356_v10 = vsel %vm327_vm0, %v320_v6, 0.0  ;;  %v250_v11 = vadd.f32 %v665_v1, %v219_v60  ;;  %v251_v12 = vadd.f32 %v665_v1, %v220_v63 }
  0x3a   : > { %381 = vst.msk [vmem:[%s711_s8 + $0x20] sm:$0xff] %vm327_vm0, %v373_v5  ;;  %vm273_vm4 = vcmp.ge.f32.partialorder %v249_v2, 0.0  ;;  %v297_v14 = vmul.f32 0.01, %v249_v2  ;;  %v221_v15 = vmul.f32 %v655_v0, %v190_v3  ;;  %v222_v16 = vmul.f32 %v655_v0, %v191_v4 }
  0x3b   : > { %v357_v17 = vadd.f32 %v356_v10, %v355_v9  ;;  %vm274_vm5 = vcmp.ge.f32.partialorder %v250_v11, 0.0  ;;  %vm275_vm6 = vcmp.ge.f32.partialorder %v251_v12, 0.0  ;;  %v298_v18 = vmul.f32 0.01, %v250_v11 }
  0x3c   : > { %v299_v19 = vmul.f32 0.01, %v251_v12  ;;  %v321_v20 = vsel %vm273_vm4, %v249_v2, %v297_v14  ;;  %v223_v21 = vmul.f32 %v655_v0, %v192_v13  ;;  %v252_v22 = vadd.f32 %v665_v1, %v221_v15 }
  0x3d   : > { %v374_v23 = vmul.f32 0.33333334, %v357_v17  ;;  %v322_v24 = vsel %vm274_vm5, %v250_v11, %v298_v18  ;;  %v358_v25 = vsel %vm327_vm0, %v321_v20, 0.0  ;;  %v253_v26 = vadd.f32 %v665_v1, %v222_v16 }
  0x3e   : > { %v323_v27 = vsel %vm275_vm6, %v251_v12, %v299_v19  ;;  %v359_v28 = vsel %vm327_vm0, %v322_v24, 0.0  ;;  %v254_v29 = vadd.f32 %v665_v1, %v223_v21  ;;  %vm276_vm7 = vcmp.ge.f32.partialorder %v252_v22, 0.0 }
  0x3f   : > { %382 = vst.msk [vmem:[%s711_s8 + $0x28] sm:$0xff] %vm327_vm0, %v374_v23  ;;  %v360_v30 = vadd.f32 %v359_v28, %v358_v25  ;;  %v361_v0 = vsel %vm327_vm0, %v323_v27, 0.0  ;;  %vm277_vm8 = vcmp.ge.f32.partialorder %v253_v26, 0.0  ;;  %v300_v31 = vmul.f32 0.01, %v252_v22 }
  0x40   : > { %vm278_vm9 = vcmp.ge.f32.partialorder %v254_v29, 0.0  ;;  %v301_v32 = vmul.f32 0.01, %v253_v26  ;;  %v302_v33 = vmul.f32 0.01, %v254_v29 }
  0x41   : > { %v362_v34 = vadd.f32 %v361_v0, %v360_v30  ;;  %v324_v35 = vsel %vm276_vm7, %v252_v22, %v300_v31 }
  0x42   : > { %v325_v36 = vsel %vm277_vm8, %v253_v26, %v301_v32  ;;  %v326_v1 = vsel %vm278_vm9, %v254_v29, %v302_v33  ;;  %v363_v37 = vsel %vm327_vm0, %v324_v35, 0.0 }
  0x43   : > { %v375_v38 = vmul.f32 0.33333334, %v362_v34  ;;  %v364_v39 = vsel %vm327_vm0, %v325_v36, 0.0  ;;  %v366_v40 = vsel %vm327_vm0, %v326_v1, 0.0 }
  0x44   : > { %v365_v41 = vadd.f32 %v364_v39, %v363_v37 }
  0x45   : > { %383 = vst.msk [vmem:[%s711_s8 + $0x30] sm:$0xff] %vm327_vm0, %v375_v38 }
  0x46   : > { %v367_v42 = vadd.f32 %v366_v40, %v365_v41 }
  0x48   : > { %v376_v43 = vmul.f32 0.33333334, %v367_v42 }
  0x4a   : > { %384 = vst.msk [vmem:[%s711_s8 + $0x38] sm:$0xff] %vm327_vm0, %v376_v43 }
  0x4b   : > { %530 = shalt.err (!%p527_p3)
}
  0x4c   : > { %s531_s27 = scalar_lea.hbm %s790_s19, 1024  ;;  %s535_s30 = scalar_lea.hbm %s839_s3, 2048 }
  0x4d   : > { %p532_p4 = scmp.ne.s32.totalorder %s790_s19, %s531_s27  ;;  %p536_p9 = scmp.lt.s32.totalorder %s790_s19, %s839_s3 }
  0x4e   : > { %p537_p10 = scmp.lt.s32.totalorder %s535_s30, %s531_s27 }
  0x4f   : > { %p533_p7 = pnand %p532_p4, %p640_p5 }
  0x50   : > { %p538_p11 = por %p537_p10, %p536_p9 }
  0x51   : > { %p534_p8 = pneg %p533_p7 }
  0x53   : > { %p539_p12 = pnand %p538_p11, %p534_p8 }
  0x55   : > { %542 = shalt.err (!%p539_p12)
}
  0x56   : > { %s580_s6 = smov 128   ;;  %s581_s7 = smov 8  }
  0x57   : > { %476 = dma.vmem_to_hbm [thread:$0]  (%p640_p5), %s785_s9, 1024, %s790_s19, %s796_s20, %s580_s6, %s580_s6, %s581_s7  }
  0x58 PF: > { %p482_p13 = scmp.ge.s32.totalorder %s577_s15, 2  ;;  %s414_s8 = sand.u32 1, %s565_s12  }
  0x59   : > { %s415_s10 = scalar_lea.sflag [#allocation3], %s414_s8 }
  0x5a   : > { %p479_p0 = pnand %p482_p13, %p644_p6 }
  0x5c   : > { %p480_p1 = pneg %p479_p0 }
  0x5e   : > { %560 = dma.done.wait (%p480_p1), %s415_s10, 1024  }
  0x5f   : > { %562 = vsyncadd (%p480_p1), %s415_s10, 4294966272  ;;  %p13_p2 = scmp.ge.s32.totalorder %s627_s18, 4   ;;  %s842_s12 = smov %s569_s13 }
  0x60   : > { %s843_s13 = smov %s573_s14  ;;  %s844_s14 = smov %s638_s21 }
  0x61   : > { %s845_s15 = smov %s627_s18  ;;  %15 = sbr.rel (!%p13_p2) target bundleno = 3 (0x3), region = 67 }
  0x66   :  { %420 = vsyncpa [#allocation3], 1 }
  0x67   :  { %422 = vsyncpa [#allocation3 + $0x1], 1 }

// kernel: graph_convpool_mpnn_block_v6.2
= control target key start
LH: loop header
LB: loop body
LE: loop exit
PB: predicated region body
PF: predicated region fallthrough
CT: control target
= control target key end

     0   :  { %s16232_s17 = smov 0   ;;  %s20234_s0 = inlined_call_operand.vmem [shape: f32[2,10,8,16], index: 0, kind: input, shape index: {}]   ;;  %s20235_s1 = inlined_call_operand.vmem [shape: f32[24,24], index: 1, kind: input, shape index: {}]   ;;  %s20236_s2 = inlined_call_operand.vmem [shape: f32[24,24], index: 2, kind: input, shape index: {}]   ;;  %s20237_s3 = inlined_call_operand.vmem [shape: f32[16,16], index: 3, kind: input, shape index: {}]   ;;  %s20238_s4 = inlined_call_operand.vmem [shape: f32[1,16], index: 4, kind: input, shape index: {}]   ;;  %s20239_s5 = inlined_call_operand.vmem [shape: f32[16,32], index: 5, kind: input, shape index: {}]   ;;  %s20240_s6 = inlined_call_operand.vmem [shape: f32[1,32], index: 6, kind: input, shape index: {}]   ;;  %s20241_s7 = inlined_call_operand.vmem [shape: f32[1,16], index: 7, kind: input, shape index: {}]   ;;  %s20242_s8 = inlined_call_operand.vmem [shape: f32[1,16], index: 8, kind: input, shape index: {}]   ;;  %s20243_s9 = inlined_call_operand.vmem [shape: f32[2,8,24,32], index: 9, kind: output, shape index: {0}]   ;;  %s20244_s10 = inlined_call_operand.vmem [shape: f32[2,1,32], index: 10, kind: output, shape index: {1}]   ;;  %s20245_s11 = inlined_call_operand.vmem [shape: f32[2,1,32], index: 11, kind: output, shape index: {2}]  }
   0x1 LB: > { %s13218_s18 = sadd.s32 4294967295, %s16168_s17   ;;  %p13222_p0 = scmp.ge.s32.totalorder %s16168_s17, 1  ;;  %s16168_s17 = sphi %s16232_s17, %s22_s17  }
   0x2   : > { %p342_p1 = scmp.lt.s32.totalorder %s16168_s17, 3 }
   0x4   : > { %p343_p2 = pnand %p13222_p0, %p342_p1 }
   0x6   : > { %346 = sbr.rel (%p343_p2) target bundleno = 1826 (0x722), region = 56 }
   0xb   : > { %v415_v0 = vld [vmem:[%s20237_s3 + $0x8] sm:$0xff]  ;;  %v414_v1 = vld [vmem:[%s20237_s3] sm:$0xff]  ;;  %p388_p3 = scmp.lt.s32.totalorder %s13218_s18, 1  ;;  %vm423_vm0 = vcmask 130048   ;;  %vm16171_vm1 = vmmov 0   ;;  %vm6540_vm2 = vcmask 195584  }
   0xc   : > { %v16246_v2 = vand.u32 4294901760, %v415_v0  ;;  %v16248_v3 = vand.u32 4294901760, %v414_v1  ;;  %v16304_v26 = vld [vmem:[%s20241_s7] ss:$0 sm:$0xff] }
   0xd   : > { %s20439_s18 = smov (!%p388_p3, %s13218_s18), 1  ;;  %v16319_v32 = vld [vmem:[%s20242_s8] ss:$0 sm:$0xff] }
   0xe   : > { %14119 = vmatprep.subr.mxu0 %v16246_v2  ;;  %v16254_v4 = vsub.f32 %v415_v0, %v16246_v2  ;;  %v16257_v5 = vsub.f32 %v414_v1, %v16248_v3  ;;  %s16039_s23 = smul.u32 80, %s20439_s18  ;;  %s400_s30 = scalar_lea.vmem %s20244_s10, %s20439_s18 }
   0xf   : > { %14120 = vmatpush3.msra.mxu0 %v16246_v2  ;;  %s16040_s24 = smul.u32 192, %s20439_s18  ;;  %s403_s14 = scalar_lea.vmem %s20245_s11, %s20439_s18 }
  0x10   : > { %v16262_v6 = vand.u32 4294901760, %v16254_v4  ;;  %14121 = vmatprep.subr.mxu0 %v16248_v3  ;;  %v16266_v7 = vand.u32 4294901760, %v16257_v5  ;;  %s16272_s26 = scalar_lea.vmem %s20234_s0, %s16039_s23 }
  0x11   : > { %14122 = vmatpush3.msra.mxu0 %v16248_v3  ;;  %v404_v10 = vld [vmem:[%s16272_s26] sm:$0xff]  ;;  %v405_v11 = vld [vmem:[%s16272_s26 + $0x8] sm:$0xff]  ;;  %v406_v12 = vld [vmem:[%s16272_s26 + $0x10] sm:$0xff]  ;;  %s20020_s28 = scalar_lea.vmem %s20243_s9, %s16040_s24 }
  0x12   : > { %v793_v8 = vsub.f32 %v16254_v4, %v16262_v6  ;;  %v800_v9 = vsub.f32 %v16257_v5, %v16266_v7  ;;  %14199 = vmatprep.subr.mxu0 %v16254_v4  ;;  %v425_v13 = vsel %vm423_vm0, %v404_v10, 0  ;;  %v428_v14 = vsel %vm423_vm0, %v405_v11, 0  ;;  %v407_v15 = vld [vmem:[%s16272_s26 + $0x18] sm:$0xff]  ;;  %v408_v25 = vld [vmem:[%s16272_s26 + $0x20] sm:$0xff]  ;;  %v409_v35 = vld [vmem:[%s16272_s26 + $0x28] sm:$0xff] }
  0x13   : > { %v16285_v18 = vand.u32 4294901760, %v425_v13  ;;  %v16287_v19 = vand.u32 4294901760, %v428_v14  ;;  %v431_v20 = vsel %vm423_vm0, %v406_v12, 0  ;;  %v434_v24 = vsel %vm423_vm0, %v407_v15, 0  ;;  %v410_v49 = vld [vmem:[%s16272_s26 + $0x30] sm:$0xff]  ;;  %v411_v58 = vld [vmem:[%s16272_s26 + $0x38] sm:$0xff] }
  0x14   : > { %v794_v16 = vand.u32 4294901760, %v793_v8  ;;  %v801_v17 = vand.u32 4294901760, %v800_v9  ;;  %v16297_v23 = vand.u32 4294901760, %v431_v20  ;;  %v16306_v27 = vand.u32 4294901760, %v434_v24  ;;  %v412_v0 = vld [vmem:[%s16272_s26 + $0x40] sm:$0xff] }
  0x15   : > { %v16291_v21 = vsub.f32 %v425_v13, %v16285_v18  ;;  %14163 = vmatprep.mubr.f32.mxu1 %v16285_v18  ;;  %v16295_v22 = vsub.f32 %v428_v14, %v16287_v19  ;;  %v6866_v31 = vmul.f32 %v16304_v26, %v407_v15  ;;  %v437_v34 = vsel %vm423_vm0, %v408_v25, 0 }
  0x16   : > { %14159 = vmatprep.subr.mxu1 %v794_v16  ;;  %v16313_v30 = vsub.f32 %v431_v20, %v16297_v23  ;;  %v16322_v33 = vsub.f32 %v434_v24, %v16306_v27  ;;  %v16343_v41 = vand.u32 4294901760, %v437_v34  ;;  %v6867_v42 = vmul.f32 %v16304_v26, %v408_v25 }
  0x17   : > { %14160 = vmatpush3.msra.mxu1 %v794_v16  ;;  %v523_v28 = vand.u32 4294901760, %v16291_v21  ;;  %v16310_v29 = vand.u32 4294901760, %v16295_v22  ;;  %v16336_v39 = vadd.f32 %v16319_v32, %v6866_v31  ;;  %v440_v46 = vsel %vm423_vm0, %v409_v35, 0 }
  0x18   : > { %14161 = vmatprep.subr.mxu1 %v801_v17  ;;  %v16333_v38 = vand.u32 4294901760, %v16313_v30  ;;  %v16341_v40 = vand.u32 4294901760, %v16322_v33  ;;  %v16352_v47 = vsub.f32 %v437_v34, %v16343_v41  ;;  %v16355_v48 = vadd.f32 %v16319_v32, %v6867_v42 }
  0x19   : > { %14162 = vmatpush3.msra.mxu1 %v801_v17  ;;  %v524_v36 = vsub.f32 %v16291_v21, %v523_v28  ;;  %v534_v37 = vsub.f32 %v16295_v22, %v16310_v29  ;;  %20304 = vst [vmem:[#allocation2_spill] sm:$0xff] %v16336_v39  ;;  %v6868_v51 = vmul.f32 %v16304_v26, %v409_v35  ;;  %v16365_v54 = vand.u32 4294901760, %v440_v46 }
  0x1a   : > { %14164 = vmatmul.mubr.f32.vlgmr.msra.gmra.mxu1 %v16287_v19  ;;  %14239 = vmatprep.subr.mxu1 %v16246_v2  ;;  %v544_v45 = vsub.f32 %v16313_v30, %v16333_v38  ;;  %20305 = vst [vmem:[#allocation3_spill] sm:$0xff] %v16355_v48  ;;  %v6869_v52 = vmul.f32 %v16304_v26, %v410_v49  ;;  %v16368_v55 = vand.u32 4294901760, %v16352_v47  ;;  %v443_v59 = vsel %vm423_vm0, %v410_v49, 0 }
  0x1b   : > { %14166 = vmatprep.mubr.f32.mxu1 %v16297_v23  ;;  %14240 = vmatpush3.msra.mxu1 %v16246_v2  ;;  %v525_v43 = vand.u32 4294901760, %v524_v36  ;;  %v535_v44 = vand.u32 4294901760, %v534_v37  ;;  %v574_v53 = vsub.f32 %v16322_v33, %v16341_v40  ;;  %v16371_v56 = vadd.f32 %v16319_v32, %v6868_v51 }
  0x1c   : > { %14241 = vmatprep.subr.mxu1 %v16248_v3  ;;  %v545_v50 = vand.u32 4294901760, %v544_v45  ;;  %v16374_v57 = vadd.f32 %v16319_v32, %v6869_v52  ;;  %v6870_v60 = vmul.f32 %v16304_v26, %v411_v58  ;;  %v16386_v62 = vsub.f32 %v440_v46, %v16365_v54 }
  0x1d   : > { %14242 = vmatpush3.msra.mxu1 %v16248_v3  ;;  %14123 = vmatprep.mubr.f32.mxu0 %v525_v43  ;;  %20306 = vst [vmem:[#allocation4_spill] sm:$0xff] %v16371_v56  ;;  %v575_v61 = vand.u32 4294901760, %v574_v53  ;;  %v604_v1 = vsub.f32 %v16352_v47, %v16368_v55  ;;  %v6871_v8 = vmul.f32 %v16304_v26, %v412_v0  ;;  %v446_v14 = vsel %vm423_vm0, %v411_v58, 0 }
  0x1e   : > { %14167 = vmatmul.mubr.f32.gmra.mxu1 %v16287_v19  ;;  %14124 = vmatmul.mubr.f32.vlgmr.msra.gmra.mxu0 %v535_v44  ;;  %20307 = vst [vmem:[#allocation5_spill] sm:$0xff] %v16374_v57  ;;  %v16389_v63 = vadd.f32 %v16319_v32, %v6870_v60  ;;  %v16406_v11 = vand.u32 4294901760, %v16386_v62  ;;  %v16419_v17 = vand.u32 4294901760, %v446_v14  ;;  %v449_v24 = vsel %vm423_vm0, %v412_v0, 0 }
  0x1f   : > { %14169 = vmatprep.mubr.f32.mxu1 %v16297_v23  ;;  %14126 = vmatprep.mubr.f32.mxu0 %v545_v50  ;;  %v16401_v9 = vadd.f32 %v16319_v32, %v6871_v8  ;;  %v605_v12 = vand.u32 4294901760, %v604_v1 }
  0x20   : > { %14200 = vmatpush3.msra.mxu0 %v16254_v4  ;;  %14319 = vmatprep.subr.mxu1 %v16246_v2  ;;  %20308 = vst [vmem:[#allocation6_spill] sm:$0xff] %v16389_v63  ;;  %v16394_v4 = vand.u32 4294901760, %v443_v59  ;;  %v634_v16 = vsub.f32 %v16386_v62, %v16406_v11 }
  0x21   : > { %14201 = vmatprep.subr.mxu0 %v16257_v5  ;;  %20309 = vst [vmem:[#allocation7_spill] sm:$0xff] %v16401_v9 }
  0x22   : > { %14170 = vmatmul.mubr.f32.gmra.mxu1 %v16306_v27  ;;  %14202 = vmatpush3.msra.mxu0 %v16257_v5  ;;  %v413_v5 = vld [vmem:[%s16272_s26 + $0x48] sm:$0xff]  ;;  %v16409_v13 = vsub.f32 %v443_v59, %v16394_v4  ;;  %v635_v25 = vand.u32 4294901760, %v634_v16 }
  0x23   : > { %14127 = vmatmul.mubr.f32.gmra.mxu0 %v535_v44  ;;  %14172 = vmatprep.mubr.f32.mxu1 %v16297_v23  ;;  %v6872_v10 = vmul.f32 %v16304_v26, %v413_v5  ;;  %v16428_v26 = vsub.f32 %v446_v14, %v16419_v17  ;;  %v452_v37 = vsel %vm423_vm0, %v413_v5, 0 }
  0x24   : > { %14129 = vmatprep.mubr.f32.mxu0 %v545_v50  ;;  %14279 = vmatprep.subr.mxu0 %v16262_v6  ;;  %v16422_v20 = vand.u32 4294901760, %v16409_v13  ;;  %v16447_v43 = vand.u32 4294901760, %v452_v37 }
  0x25   : > { %v16413_v15 = vadd.f32 %v16319_v32, %v6872_v10  ;;  %v16432_v32 = vand.u32 4294901760, %v449_v24  ;;  %v16437_v34 = vand.u32 4294901760, %v16428_v26 }
  0x26   : > { %14173 = vmatmul.mubr.f32.gmra.mxu1 %v16306_v27  ;;  %v664_v31 = vsub.f32 %v16409_v13, %v16422_v20  ;;  %v16455_v46 = vsub.f32 %v452_v37, %v16447_v43 }
  0x27   : > { %14130 = vmatmul.mubr.f32.gmra.mxu0 %v575_v61  ;;  %14175 = vmatprep.mubr.f32.mxu1 %v16343_v41  ;;  %20310 = vst [vmem:[#allocation8_spill] sm:$0xff] %v16413_v15  ;;  %v16440_v36 = vsub.f32 %v449_v24, %v16432_v32  ;;  %v694_v42 = vsub.f32 %v16428_v26, %v16437_v34 }
  0x28   : > { %14132 = vmatprep.mubr.f32.mxu0 %v545_v50  ;;  %v665_v35 = vand.u32 4294901760, %v664_v31  ;;  %v753_v50 = vand.u32 4294901760, %v16455_v46 }
  0x29   : > { %v16450_v44 = vand.u32 4294901760, %v16440_v36  ;;  %v695_v45 = vand.u32 4294901760, %v694_v42 }
  0x2a   : > { %14176 = vmatmul.mubr.f32.gmra.mxu1 %v16306_v27  ;;  %v754_v52 = vsub.f32 %v16455_v46, %v753_v50 }
  0x2b   : > { %14133 = vmatmul.mubr.f32.gmra.mxu0 %v575_v61  ;;  %14178 = vmatprep.mubr.f32.mxu1 %v16343_v41  ;;  %v724_v49 = vsub.f32 %v16440_v36, %v16450_v44 }
  0x2c   : > { %14135 = vmatprep.mubr.f32.mxu0 %v605_v12  ;;  %v755_v53 = vand.u32 4294901760, %v754_v52 }
  0x2d   : > { %v725_v51 = vand.u32 4294901760, %v724_v49 }
  0x2e   : > { %14179 = vmatmul.mubr.f32.gmra.mxu1 %v16365_v54 }
  0x2f   : > { %14136 = vmatmul.mubr.f32.gmra.mxu0 %v575_v61  ;;  %14181 = vmatprep.mubr.f32.mxu1 %v16343_v41 }
  0x30   : > { %14138 = vmatprep.mubr.f32.mxu0 %v605_v12 }
  0x32   : > { %14182 = vmatmul.mubr.f32.gmra.mxu1 %v16365_v54 }
  0x33   : > { %14139 = vmatmul.mubr.f32.gmra.mxu0 %v635_v25  ;;  %14184 = vmatprep.mubr.f32.mxu1 %v16394_v4 }
  0x34   : > { %14141 = vmatprep.mubr.f32.mxu0 %v605_v12 }
  0x36   : > { %14185 = vmatmul.mubr.f32.gmra.mxu1 %v16365_v54 }
  0x37   : > { %14142 = vmatmul.mubr.f32.gmra.mxu0 %v635_v25  ;;  %14187 = vmatprep.mubr.f32.mxu1 %v16394_v4 }
  0x38   : > { %14144 = vmatprep.mubr.f32.mxu0 %v665_v35 }
  0x3a   : > { %14188 = vmatmul.mubr.f32.gmra.mxu1 %v16419_v17 }
  0x3b   : > { %14145 = vmatmul.mubr.f32.gmra.mxu0 %v635_v25  ;;  %14190 = vmatprep.mubr.f32.mxu1 %v16394_v4 }
  0x3c   : > { %14147 = vmatprep.mubr.f32.mxu0 %v665_v35 }
  0x3e   : > { %14191 = vmatmul.mubr.f32.gmra.mxu1 %v16419_v17 }
  0x3f   : > { %14148 = vmatmul.mubr.f32.gmra.mxu0 %v695_v45  ;;  %14193 = vmatprep.mubr.f32.mxu1 %v16432_v32 }
  0x40   : > { %14150 = vmatprep.mubr.f32.mxu0 %v665_v35 }
  0x42   : > { %14194 = vmatmul.mubr.f32.gmra.mxu1 %v16419_v17 }
  0x43   : > { %14151 = vmatmul.mubr.f32.gmra.mxu0 %v695_v45  ;;  %14196 = vmatprep.mubr.f32.mxu1 %v16432_v32 }
  0x44   : > { %14153 = vmatprep.mubr.f32.mxu0 %v725_v51 }
  0x46   : > { %14197 = vmatmul.mubr.f32.gmra.mxu1 %v16447_v43 }
  0x47   : > { %14154 = vmatmul.mubr.f32.gmra.mxu0 %v695_v45  ;;  %14243 = vmatprep.mubr.f32.mxu1 %v523_v28 }
  0x48   : > { %14156 = vmatprep.mubr.f32.mxu0 %v725_v51 }
  0x4a   : > { %14244 = vmatmul.mubr.f32.vlgmr.msra.gmra.mxu1 %v16310_v29 }
  0x4b   : > { %14157 = vmatmul.mubr.f32.gmra.mxu0 %v755_v53  ;;  %14246 = vmatprep.mubr.f32.mxu1 %v16333_v38 }
  0x4c   : > { %14203 = vmatprep.mubr.f32.mxu0 %v16291_v21  ;;  %14320 = vmatpush3.msra.mxu1 %v16246_v2  ;;  %v20246_v2 = vmov 0.0  }
  0x4d   : > { %14321 = vmatprep.subr.mxu1 %v16248_v3 }
  0x4e   : > { %14247 = vmatmul.mubr.f32.gmra.mxu1 %v16310_v29 }
  0x4f   : > { %14204 = vmatmul.mubr.f32.vlgmr.msra.gmra.mxu0 %v16295_v22  ;;  %14249 = vmatprep.mubr.f32.mxu1 %v16333_v38 }
  0x50   : > { %14206 = vmatprep.mubr.f32.mxu0 %v16313_v30  ;;  %14280 = vmatpush3.msra.mxu0 %v16262_v6 }
  0x51   : > { %14281 = vmatprep.subr.mxu0 %v16266_v7  ;;  %14322 = vmatpush3.msra.mxu1 %v16248_v3 }
  0x52   : > { %14250 = vmatmul.mubr.f32.gmra.mxu1 %v16341_v40  ;;  %14282 = vmatpush3.msra.mxu0 %v16266_v7  ;;  %v16579_v7 = vld [vmem:[%s20238_s4] ss:$0 sm:$0xff] }
  0x53   : > { %14207 = vmatmul.mubr.f32.gmra.mxu0 %v16295_v22  ;;  %14252 = vmatprep.mubr.f32.mxu1 %v16333_v38 }
  0x54   : > { %14209 = vmatprep.mubr.f32.mxu0 %v16313_v30  ;;  %14359 = vmatprep.subr.mxu0 %v20246_v2 }
  0x55   : > { %14374 = vmatprep.subr.mxu1 %v20246_v2 }
  0x56   : > { %14253 = vmatmul.mubr.f32.gmra.mxu1 %v16341_v40 }
  0x57   : > { %14210 = vmatmul.mubr.f32.gmra.mxu0 %v16322_v33  ;;  %14255 = vmatprep.mubr.f32.mxu1 %v16368_v55 }
  0x58   : > { %14212 = vmatprep.mubr.f32.mxu0 %v16313_v30 }
  0x5a   : > { %14256 = vmatmul.mubr.f32.gmra.mxu1 %v16341_v40 }
  0x5b   : > { %14213 = vmatmul.mubr.f32.gmra.mxu0 %v16322_v33  ;;  %14258 = vmatprep.mubr.f32.mxu1 %v16368_v55 }
  0x5c   : > { %14215 = vmatprep.mubr.f32.mxu0 %v16352_v47 }
  0x5e   : > { %14259 = vmatmul.mubr.f32.gmra.mxu1 %v16406_v11 }
  0x5f   : > { %14216 = vmatmul.mubr.f32.gmra.mxu0 %v16322_v33  ;;  %14261 = vmatprep.mubr.f32.mxu1 %v16368_v55 }
  0x60   : > { %14218 = vmatprep.mubr.f32.mxu0 %v16352_v47 }
  0x62   : > { %14262 = vmatmul.mubr.f32.gmra.mxu1 %v16406_v11 }
  0x63   : > { %14219 = vmatmul.mubr.f32.gmra.mxu0 %v16386_v62  ;;  %14264 = vmatprep.mubr.f32.mxu1 %v16422_v20 }
  0x64   : > { %14221 = vmatprep.mubr.f32.mxu0 %v16352_v47 }
  0x66   : > { %14265 = vmatmul.mubr.f32.gmra.mxu1 %v16406_v11 }
  0x67   : > { %14222 = vmatmul.mubr.f32.gmra.mxu0 %v16386_v62  ;;  %14267 = vmatprep.mubr.f32.mxu1 %v16422_v20 }
  0x68   : > { %14224 = vmatprep.mubr.f32.mxu0 %v16409_v13 }
  0x6a   : > { %14268 = vmatmul.mubr.f32.gmra.mxu1 %v16437_v34 }
  0x6b   : > { %14225 = vmatmul.mubr.f32.gmra.mxu0 %v16386_v62  ;;  %14270 = vmatprep.mubr.f32.mxu1 %v16422_v20 }
  0x6c   : > { %14227 = vmatprep.mubr.f32.mxu0 %v16409_v13 }
  0x6e   : > { %14271 = vmatmul.mubr.f32.gmra.mxu1 %v16437_v34 }
  0x6f   : > { %14228 = vmatmul.mubr.f32.gmra.mxu0 %v16428_v26  ;;  %14273 = vmatprep.mubr.f32.mxu1 %v16450_v44 }
  0x70   : > { %14230 = vmatprep.mubr.f32.mxu0 %v16409_v13 }
  0x72   : > { %14274 = vmatmul.mubr.f32.gmra.mxu1 %v16437_v34 }
  0x73   : > { %14231 = vmatmul.mubr.f32.gmra.mxu0 %v16428_v26  ;;  %14276 = vmatprep.mubr.f32.mxu1 %v16450_v44 }
  0x74   : > { %14233 = vmatprep.mubr.f32.mxu0 %v16440_v36 }
  0x76   : > { %14277 = vmatmul.mubr.f32.gmra.mxu1 %v753_v50 }
  0x77   : > { %14234 = vmatmul.mubr.f32.gmra.mxu0 %v16428_v26  ;;  %14323 = vmatprep.mubr.f32.mxu1 %v16285_v18 }
  0x78   : > { %14236 = vmatprep.mubr.f32.mxu0 %v16440_v36 }
  0x7a   : > { %14324 = vmatmul.mubr.f32.vlgmr.msra.gmra.mxu1 %v16287_v19 }
  0x7b   : > { %14237 = vmatmul.mubr.f32.gmra.mxu0 %v16455_v46  ;;  %14326 = vmatprep.mubr.f32.mxu1 %v16297_v23 }
  0x7c   : > { %14283 = vmatprep.mubr.f32.mxu0 %v16285_v18 }
  0x7e   : > { %14327 = vmatmul.mubr.f32.gmra.mxu1 %v16287_v19 }
  0x7f   : > { %14284 = vmatmul.mubr.f32.vlgmr.msra.gmra.mxu0 %v16287_v19  ;;  %14329 = vmatprep.mubr.f32.mxu1 %v16297_v23 }
  0x80   : > { %14286 = vmatprep.mubr.f32.mxu0 %v16297_v23 }
  0x82   : > { %14330 = vmatmul.mubr.f32.gmra.mxu1 %v16306_v27 }
  0x83   : > { %14287 = vmatmul.mubr.f32.gmra.mxu0 %v16287_v19  ;;  %14332 = vmatprep.mubr.f32.mxu1 %v16297_v23 }
  0x84   : > { %14289 = vmatprep.mubr.f32.mxu0 %v16297_v23 }
  0x86   : > { %14333 = vmatmul.mubr.f32.gmra.mxu1 %v16306_v27 }
  0x87   : > { %14290 = vmatmul.mubr.f32.gmra.mxu0 %v16306_v27  ;;  %14335 = vmatprep.mubr.f32.mxu1 %v16343_v41 }
  0x88   : > { %14292 = vmatprep.mubr.f32.mxu0 %v16297_v23 }
  0x8a   : > { %14336 = vmatmul.mubr.f32.gmra.mxu1 %v16306_v27 }
  0x8b   : > { %14293 = vmatmul.mubr.f32.gmra.mxu0 %v16306_v27  ;;  %14338 = vmatprep.mubr.f32.mxu1 %v16343_v41 }
  0x8c   : > { %14295 = vmatprep.mubr.f32.mxu0 %v16343_v41 }
  0x8e   : > { %14339 = vmatmul.mubr.f32.gmra.mxu1 %v16365_v54 }
  0x8f   : > { %14296 = vmatmul.mubr.f32.gmra.mxu0 %v16306_v27  ;;  %14341 = vmatprep.mubr.f32.mxu1 %v16343_v41 }
  0x90   : > { %14298 = vmatprep.mubr.f32.mxu0 %v16343_v41 }
  0x92   : > { %14342 = vmatmul.mubr.f32.gmra.mxu1 %v16365_v54 }
  0x93   : > { %14299 = vmatmul.mubr.f32.gmra.mxu0 %v16365_v54  ;;  %14344 = vmatprep.mubr.f32.mxu1 %v16394_v4 }
  0x94   : > { %14301 = vmatprep.mubr.f32.mxu0 %v16343_v41 }
  0x96   : > { %14345 = vmatmul.mubr.f32.gmra.mxu1 %v16365_v54 }
  0x97   : > { %14302 = vmatmul.mubr.f32.gmra.mxu0 %v16365_v54  ;;  %14347 = vmatprep.mubr.f32.mxu1 %v16394_v4 }
  0x98   : > { %14304 = vmatprep.mubr.f32.mxu0 %v16394_v4 }
  0x9a   : > { %14348 = vmatmul.mubr.f32.gmra.mxu1 %v16419_v17 }
  0x9b   : > { %14305 = vmatmul.mubr.f32.gmra.mxu0 %v16365_v54  ;;  %14350 = vmatprep.mubr.f32.mxu1 %v16394_v4 }
  0x9c   : > { %14307 = vmatprep.mubr.f32.mxu0 %v16394_v4 }
  0x9e   : > { %14351 = vmatmul.mubr.f32.gmra.mxu1 %v16419_v17 }
  0x9f   : > { %14308 = vmatmul.mubr.f32.gmra.mxu0 %v16419_v17  ;;  %14353 = vmatprep.mubr.f32.mxu1 %v16432_v32 }
  0xa0   : > { %14310 = vmatprep.mubr.f32.mxu0 %v16394_v4 }
  0xa2   : > { %14354 = vmatmul.mubr.f32.gmra.mxu1 %v16419_v17 }
  0xa3   : > { %14311 = vmatmul.mubr.f32.gmra.mxu0 %v16419_v17  ;;  %14356 = vmatprep.mubr.f32.mxu1 %v16432_v32 }
  0xa4   : > { %14313 = vmatprep.mubr.f32.mxu0 %v16432_v32 }
  0xa6   : > { %14357 = vmatmul.mubr.f32.gmra.mxu1 %v16447_v43 }
  0xa7   : > { %14314 = vmatmul.mubr.f32.gmra.mxu0 %v16419_v17  ;;  %14380 = vmatprep.mubr.msk.f32.mxu1 %vm16171_vm1, %v20246_v2 }
  0xa8   : > { %14316 = vmatprep.mubr.f32.mxu0 %v16432_v32 }
  0xab   : > { %14317 = vmatmul.mubr.f32.gmra.mxu0 %v16447_v43 }
  0xac   : > { %14365 = vmatprep.mubr.msk.f32.mxu0 %vm16171_vm1, %v20246_v2 }
  0xda   : > { %v14165_v3 = vpop.f32.mrf.mxu1 }
  0xdc   : > { %v16574_v6 = vpop.f32.mrf.mxu1 }
  0xde   : > { %v14168_v18 = vpop.f32.mrf.mxu1  ;;  %v14125_v19 = vpop.f32.mrf.mxu0 }
  0xdf   : > { %v538_v21 = vadd.f32 %v14125_v19, %v16579_v7 }
  0xe0   : > { %v16582_v22 = vpop.f32.mrf.mxu1  ;;  %v16584_v23 = vpop.f32.mrf.mxu0 }
  0xe1   : > { %v16586_v27 = vadd.f32 %v14165_v3, %v538_v21 }
  0xe2   : > { %v14171_v28 = vpop.f32.mrf.mxu1 }
  0xe3   : > { %v14128_v29 = vpop.f32.mrf.mxu0 }
  0xe4   : > { %v558_v30 = vadd.f32 %v14128_v29, %v16579_v7  ;;  %v16589_v33 = vpop.f32.mrf.mxu1 }
  0xe5   : > { %v16591_v38 = vpop.f32.mrf.mxu0 }
  0xe6   : > { %v16593_v40 = vadd.f32 %v14168_v18, %v558_v30  ;;  %v14174_v41 = vpop.f32.mrf.mxu1 }
  0xe7   : > { %v14131_v47 = vpop.f32.mrf.mxu0 }
  0xe8   : > { %v578_v54 = vadd.f32 %v14131_v47, %v16579_v7  ;;  %v16596_v55 = vpop.f32.mrf.mxu1 }
  0xe9   : > { %v16598_v58 = vpop.f32.mrf.mxu0 }
  0xea   : > { %v16600_v59 = vadd.f32 %v14171_v28, %v578_v54  ;;  %v14177_v60 = vpop.f32.mrf.mxu1 }
  0xeb   : > { %v14134_v61 = vpop.f32.mrf.mxu0 }
  0xec   : > { %v598_v62 = vadd.f32 %v14134_v61, %v16579_v7  ;;  %v16603_v0 = vpop.f32.mrf.mxu1 }
  0xed   : > { %v16605_v1 = vpop.f32.mrf.mxu0 }
  0xee   : > { %v16607_v4 = vadd.f32 %v14174_v41, %v598_v62  ;;  %v14180_v8 = vpop.f32.mrf.mxu1 }
  0xef   : > { %v14137_v5 = vpop.f32.mrf.mxu0 }
  0xf0   : > { %v618_v10 = vadd.f32 %v14137_v5, %v16579_v7  ;;  %v16610_v11 = vpop.f32.mrf.mxu1 }
  0xf1   : > { %v16612_v12 = vpop.f32.mrf.mxu0 }
  0xf2   : > { %v16614_v13 = vadd.f32 %v14177_v60, %v618_v10  ;;  %v14183_v14 = vpop.f32.mrf.mxu1 }
  0xf3   : > { %v14140_v16 = vpop.f32.mrf.mxu0 }
  0xf4   : > { %v638_v17 = vadd.f32 %v14140_v16, %v16579_v7  ;;  %v16617_v20 = vpop.f32.mrf.mxu1 }
  0xf5   : > { %v16619_v24 = vpop.f32.mrf.mxu0 }
  0xf6   : > { %v16621_v25 = vadd.f32 %v14180_v8, %v638_v17  ;;  %v14186_v26 = vpop.f32.mrf.mxu1 }
  0xf7   : > { %v14143_v31 = vpop.f32.mrf.mxu0 }
  0xf8   : > { %v658_v32 = vadd.f32 %v14143_v31, %v16579_v7  ;;  %v16624_v34 = vpop.f32.mrf.mxu1 }
  0xf9   : > { %v16626_v35 = vpop.f32.mrf.mxu0 }
  0xfa   : > { %v16628_v36 = vadd.f32 %v14183_v14, %v658_v32  ;;  %v14189_v37 = vpop.f32.mrf.mxu1 }
  0xfb   : > { %v14146_v42 = vpop.f32.mrf.mxu0 }
  0xfc   : > { %v678_v43 = vadd.f32 %v14146_v42, %v16579_v7  ;;  %v16631_v44 = vpop.f32.mrf.mxu1 }
  0xfd   : > { %v16633_v45 = vpop.f32.mrf.mxu0 }
  0xfe   : > { %v16635_v46 = vadd.f32 %v14186_v26, %v678_v43  ;;  %v14192_v49 = vpop.f32.mrf.mxu1 }
  0xff   : > { %v14149_v50 = vpop.f32.mrf.mxu0 }
 0x100   : > { %v698_v51 = vadd.f32 %v14149_v50, %v16579_v7  ;;  %v16638_v52 = vpop.f32.mrf.mxu1 }
 0x101   : > { %20311 = vst [vmem:[#allocation9_spill] sm:$0xff] %v16638_v52  ;;  %v16640_v53 = vpop.f32.mrf.mxu0 }
 0x102   : > { %v16642_v3 = vadd.f32 %v14189_v37, %v698_v51  ;;  %v14195_v18 = vpop.f32.mrf.mxu1 }
 0x103   : > { %v14152_v19 = vpop.f32.mrf.mxu0 }
 0x104   : > { %v718_v21 = vadd.f32 %v14152_v19, %v16579_v7  ;;  %v16645_v28 = vpop.f32.mrf.mxu1 }
 0x105   : > { %20312 = vst [vmem:[#allocation10_spill] sm:$0xff] %v16645_v28  ;;  %v16647_v29 = vpop.f32.mrf.mxu0 }
 0x106   : > { %20313 = vst [vmem:[#allocation11_spill] sm:$0xff] %v16647_v29  ;;  %v16649_v30 = vadd.f32 %v14192_v49, %v718_v21  ;;  %v14198_v41 = vpop.f32.mrf.mxu1 }
 0x107   : > { %v14155_v47 = vpop.f32.mrf.mxu0 }
 0x108   : > { %v738_v54 = vadd.f32 %v14155_v47, %v16579_v7  ;;  %v16652_v60 = vpop.f32.mrf.mxu1 }
 0x109   : > { %20314 = vst [vmem:[#allocation12_spill] sm:$0xff] %v16652_v60  ;;  %v16654_v61 = vpop.f32.mrf.mxu0 }
 0x10a   : > { %20315 = vst [vmem:[#allocation13_spill] sm:$0xff] %v16654_v61  ;;  %v16656_v62 = vadd.f32 %v14195_v18, %v738_v54  ;;  %v16658_v8 = vpop.f32.mrf.mxu1 }
 0x10b   : > { %v14158_v5 = vpop.f32.mrf.mxu0 }
 0x10c   : > { %v758_v10 = vadd.f32 %v14158_v5, %v16579_v7  ;;  %v16661_v14 = vpop.f32.mrf.mxu1 }
 0x10d   : > { %v16663_v16 = vpop.f32.mrf.mxu0 }
 0x10e   : > { %20316 = vst [vmem:[#allocation14_spill] sm:$0xff] %v16663_v16  ;;  %v16665_v17 = vadd.f32 %v14198_v41, %v758_v10  ;;  %v14248_v26 = vpop.f32.mrf.mxu1 }
 0x10f   : > { %v16667_v31 = vpop.f32.mrf.mxu0 }
 0x110   : > { %v16669_v32 = vpop.f32.mrf.mxu1 }
 0x111   : > { %v16671_v37 = vpop.f32.mrf.mxu0 }
 0x112   : > { %v14251_v42 = vpop.f32.mrf.mxu1 }
 0x113   : > { %v14208_v43 = vpop.f32.mrf.mxu0 }
 0x114   : > { %v1074_v49 = vadd.f32 %v14208_v43, %v16593_v40  ;;  %v16674_v50 = vpop.f32.mrf.mxu1 }
 0x115   : > { %v16676_v51 = vpop.f32.mrf.mxu0 }
 0x116   : > { %v16678_v18 = vadd.f32 %v14248_v26, %v1074_v49  ;;  %v14254_v19 = vpop.f32.mrf.mxu1 }
 0x117   : > { %v14211_v21 = vpop.f32.mrf.mxu0 }
 0x118   : > { %v1088_v41 = vadd.f32 %v14211_v21, %v16600_v59  ;;  %v16681_v47 = vpop.f32.mrf.mxu1 }
 0x119   : > { %v16683_v54 = vpop.f32.mrf.mxu0 }
 0x11a   : > { %v16685_v5 = vadd.f32 %v14251_v42, %v1088_v41  ;;  %v14257_v10 = vpop.f32.mrf.mxu1 }
 0x11b   : > { %v14214_v2 = vpop.f32.mrf.mxu0 }
 0x11c   : > { %v1102_v40 = vadd.f32 %v14214_v2, %v16607_v4  ;;  %v16688_v43 = vpop.f32.mrf.mxu1 }
 0x11d   : > { %v16690_v15 = vpop.f32.mrf.mxu0 }
 0x11e   : > { %v16692_v26 = vadd.f32 %v14254_v19, %v1102_v40  ;;  %v14260_v49 = vpop.f32.mrf.mxu1 }
 0x11f   : > { %v14217_v9 = vpop.f32.mrf.mxu0 }
 0x120   : > { %v1116_v59 = vadd.f32 %v14217_v9, %v16614_v13  ;;  %v16695_v21 = vpop.f32.mrf.mxu1 }
 0x121   : > { %v16697_v63 = vpop.f32.mrf.mxu0 }
 0x122   : > { %v16699_v42 = vadd.f32 %v14257_v10, %v1116_v59  ;;  %v14263_v41 = vpop.f32.mrf.mxu1 }
 0x123   : > { %v14220_v57 = vpop.f32.mrf.mxu0 }
 0x124   : > { %v1130_v2 = vadd.f32 %v14220_v57, %v16621_v25  ;;  %v16702_v4 = vpop.f32.mrf.mxu1 }
 0x125   : > { %v16704_v56 = vpop.f32.mrf.mxu0 }
 0x126   : > { %v16706_v19 = vadd.f32 %v14260_v49, %v1130_v2  ;;  %v14266_v40 = vpop.f32.mrf.mxu1 }
 0x127   : > { %v14223_v48 = vpop.f32.mrf.mxu0 }
 0x128   : > { %v1144_v9 = vadd.f32 %v14223_v48, %v16628_v36  ;;  %v16709_v13 = vpop.f32.mrf.mxu1 }
 0x129   : > { %v16711_v39 = vpop.f32.mrf.mxu0 }
 0x12a   : > { %v16713_v10 = vadd.f32 %v14263_v41, %v1144_v9  ;;  %v14269_v59 = vpop.f32.mrf.mxu1 }
 0x12b   : > { %v14226_v60 = vpop.f32.mrf.mxu0 }
 0x12c   : > { %v1158_v57 = vadd.f32 %v14226_v60, %v16635_v46  ;;  %v16716_v25 = vpop.f32.mrf.mxu1 }
 0x12d   : > { %v16718_v16 = vpop.f32.mrf.mxu0 }
 0x12e   : > { %v16720_v49 = vadd.f32 %v14266_v40, %v1158_v57  ;;  %v14272_v2 = vpop.f32.mrf.mxu1  ;;  %v528_v40 = vadd.f32 %v16579_v7, %v16584_v23 }
 0x12f   : > { %v14229_v52 = vpop.f32.mrf.mxu0 }
 0x130   : > { %20317 = vst [vmem:[#allocation15_spill] sm:$0xff] %v16720_v49  ;;  %v1172_v48 = vadd.f32 %v14229_v52, %v16642_v3  ;;  %v16723_v36 = vpop.f32.mrf.mxu1 }
 0x131   : > { %20318 = vst [vmem:[#allocation16_spill] sm:$0xff] %v16723_v36  ;;  %v16725_v28 = vpop.f32.mrf.mxu0 }
 0x132   : > { %v16727_v41 = vadd.f32 %v14269_v59, %v1172_v48  ;;  %v14275_v9 = vpop.f32.mrf.mxu1  ;;  %v839_v48 = vadd.f32 %v16574_v6, %v528_v40 }
 0x133   : > { %v14232_v29 = vpop.f32.mrf.mxu0 }
 0x134   : > { %v1186_v46 = vadd.f32 %v14232_v29, %v16649_v30  ;;  %v16730_v60 = vpop.f32.mrf.mxu1  ;;  %v548_v29 = vadd.f32 %v16579_v7, %v16591_v38  ;;  %v1060_v30 = vadd.f32 %v16667_v31, %v16586_v27 }
 0x135   : > { %20319 = vst [vmem:[#allocation17_spill] sm:$0xff] %v16730_v60  ;;  %v16732_v61 = vpop.f32.mrf.mxu0 }
 0x136   : > { %v16736_v57 = vadd.f32 %v14272_v2, %v1186_v46  ;;  %v14278_v52 = vpop.f32.mrf.mxu1  ;;  %v1053_v46 = vadd.f32 %v16671_v37, %v839_v48  ;;  %v1297_v6 = vadd.f32 %v16658_v8, %v1060_v30 }
 0x137   : > { %v14235_v3 = vpop.f32.mrf.mxu0 }
 0x138   : > { %20320 = vst [vmem:[#allocation18_spill] sm:$0xff] %v16736_v57  ;;  %v1200_v36 = vadd.f32 %v14235_v3, %v16656_v62  ;;  %v16739_v49 = vpop.f32.mrf.mxu1  ;;  %v1289_v27 = vadd.f32 %v16661_v14, %v1053_v46 }
 0x139   : > { %20321 = vst [vmem:[#allocation19_spill] sm:$0xff] %v16739_v49  ;;  %v16741_v59 = vpop.f32.mrf.mxu0  ;;  %v851_v49 = vadd.f32 %v16582_v22, %v548_v29 }
 0x13a   : > { %v16748_v60 = vadd.f32 %v14275_v9, %v1200_v36  ;;  %v14325_v2 = vpop.f32.mrf.mxu1 }
 0x13b   : > { %v14238_v23 = vpop.f32.mrf.mxu0  ;;  %v1067_v31 = vadd.f32 %v16676_v51, %v851_v49 }
 0x13c   : > { %20322 = vst [vmem:[#allocation20_spill] sm:$0xff] %v16748_v60  ;;  %v1214_v62 = vadd.f32 %v14238_v23, %v16665_v17  ;;  %v1760_v57 = vpop.f32.mrf.mxu1 }
 0x13d   : > { %v16752_v3 = vpop.f32.mrf.mxu0  ;;  %v1305_v23 = vadd.f32 %v16669_v32, %v1067_v31 }
 0x13e   : > { %v16756_v40 = vadd.f32 %v14278_v52, %v1214_v62  ;;  %v16760_v17 = vpop.f32.mrf.mxu1 }
 0x13f   : > { %v14285_v38 = vpop.f32.mrf.mxu0 }
 0x140   : > { %v1556_v36 = vadd.f32 %v14285_v38, %v1297_v6  ;;  %v1772_v51 = vpop.f32.mrf.mxu1  ;;  %v20323_v38 = vmov 0.0  }
 0x141   : > { %v1549_v9 = vpop.f32.mrf.mxu0 }
 0x142   : > { %v1767_v60 = vadd.f32 %v14325_v2, %v1556_v36  ;;  %v1550_v37 = vadd.f32 %v1549_v9, %v1289_v27 }
 0x143   : > { %v14288_v48 = vpop.f32.mrf.mxu0 }
 0x144   : > { %v1906_v22 = vsel %vm423_vm0, %v1767_v60, 0  ;;  %v1761_v8 = vadd.f32 %v1760_v57, %v1550_v37 }
 0x145   : > { %v1561_v52 = vpop.f32.mrf.mxu0  ;;  %v16765_v62 = vand.u32 4294901760, %v1906_v22 }
 0x146   : > { %v1903_v29 = vsel %vm423_vm0, %v1761_v8, 0  ;;  %v1562_v30 = vadd.f32 %v1561_v52, %v1305_v23 }
 0x147   : > { %v16767_v14 = vand.u32 4294901760, %v1903_v29  ;;  %v16772_v6 = vsub.f32 %v1906_v22, %v16765_v62  ;;  %v568_v22 = vadd.f32 %v16579_v7, %v16598_v58 }
 0x148   : > { %v1773_v49 = vadd.f32 %v1772_v51, %v1562_v30  ;;  %v14291_v30 = vpop.f32.mrf.mxu0 }
 0x149   : > { %v1980_v2 = vsub.f32 %v1903_v29, %v16767_v14  ;;  %v16784_v27 = vand.u32 4294901760, %v16772_v6  ;;  %v863_v29 = vadd.f32 %v16589_v33, %v568_v22  ;;  %v1580_v58 = vadd.f32 %v14291_v30, %v16685_v5 }
 0x14a   : > { %v1909_v46 = vsel %vm423_vm0, %v1773_v49, 0  ;;  %v1573_v49 = vpop.f32.mrf.mxu0 }
 0x14b   : > { %v16774_v32 = vand.u32 4294901760, %v1909_v46  ;;  %v16780_v57 = vand.u32 4294901760, %v1980_v2  ;;  %v1992_v23 = vsub.f32 %v16772_v6, %v16784_v27  ;;  %v1081_v51 = vadd.f32 %v16683_v54, %v863_v29 }
 0x14c   : > { %v1568_v54 = vadd.f32 %v14288_v48, %v16678_v18 }
 0x14d   : > { %v16777_v60 = vsub.f32 %v1909_v46, %v16774_v32  ;;  %14360 = vmatpush3.xpose.msra.mxu0 %v16774_v32  ;;  %v1982_v9 = vsub.f32 %v1980_v2, %v16780_v57  ;;  %v1993_v52 = vand.u32 4294901760, %v1992_v23  ;;  %v14331_v46 = vpop.f32.mrf.mxu1  ;;  %v1321_v33 = vadd.f32 %v16674_v50, %v1081_v51 }
 0x14e   : > { %14361 = vmatprep.subr.mxu0 %v20323_v38  ;;  %v1779_v50 = vadd.f32 %v16760_v17, %v1568_v54  ;;  %v608_v51 = vadd.f32 %v16579_v7, %v16612_v12  ;;  %v588_v12 = vadd.f32 %v16579_v7, %v16605_v1 }
 0x14f   : > { %v16787_v31 = vand.u32 4294901760, %v16777_v60  ;;  %v1983_v8 = vand.u32 4294901760, %v1982_v9  ;;  %v1791_v9 = vadd.f32 %v14331_v46, %v1580_v58  ;;  %v1784_v5 = vpop.f32.mrf.mxu1 }
 0x150   : > { %v2470_v17 = vsel %vm423_vm0, %v1779_v50, 0  ;;  %v887_v54 = vadd.f32 %v16603_v0, %v608_v51  ;;  %v875_v0 = vadd.f32 %v16596_v55, %v588_v12 }
 0x151   : > { %14362 = vmatpush3.xpose.msra.mxu0 %v16765_v62  ;;  %v2002_v36 = vsub.f32 %v16777_v60, %v16787_v31  ;;  %v2476_v18 = vsel %vm423_vm0, %v1791_v9, 0  ;;  %v16843_v23 = vand.u32 4294901760, %v2470_v17 }
 0x152   : > { %14363 = vmatprep.subr.mxu0 %v20323_v38  ;;  %v1109_v1 = vadd.f32 %v16697_v63, %v887_v54  ;;  %v1095_v50 = vadd.f32 %v16690_v15, %v875_v0  ;;  %v628_v54 = vadd.f32 %v16579_v7, %v16619_v24 }
 0x153   : > { %v2003_v37 = vand.u32 4294901760, %v2002_v36  ;;  %v1574_v36 = vadd.f32 %v1573_v49, %v1321_v33  ;;  %v14334_v49 = vpop.f32.mrf.mxu1 }
 0x154   : > { %v1337_v15 = vadd.f32 %v16681_v47, %v1095_v50  ;;  %v899_v24 = vadd.f32 %v16610_v11, %v628_v54 }
 0x155   : > { %14364 = vmatpush3.xpose.msra.mxu0 %v16767_v14  ;;  %14375 = vmatpush3.xpose.msra.mxu1 %v2003_v37  ;;  %v1785_v48 = vadd.f32 %v1784_v5, %v1574_v36  ;;  %v1796_v9 = vpop.f32.mrf.mxu1 }
 0x156   : > { %14376 = vmatprep.subr.mxu1 %v20323_v38  ;;  %14389 = vmatprep.subr.mxu0 %v20323_v38 }
 0x158   : > { %14366 = vmatmul.mubr.f32.vlgmr.msra.gmra.mxu0 %v1983_v8 }
 0x159   : > { %14377 = vmatpush3.xpose.msra.mxu1 %v1993_v52  ;;  %14390 = vmatpush3.xpose.msra.mxu0 %v16777_v60 }
 0x15a   : > { %14368 = vmatprep.mubr.msk.f32.mxu0 %vm16171_vm1, %v20323_v38  ;;  %14378 = vmatprep.subr.mxu1 %v20323_v38 }
 0x15b   : > { %14391 = vmatprep.subr.mxu0 %v20323_v38 }
 0x15c   : > { %14369 = vmatmul.mubr.f32.gmra.mxu0 %v1993_v52 }
 0x15d   : > { %14379 = vmatpush3.xpose.msra.mxu1 %v1983_v8  ;;  %14392 = vmatpush3.xpose.msra.mxu0 %v16772_v6 }
 0x15e   : > { %14371 = vmatprep.mubr.msk.f32.mxu0 %vm16171_vm1, %v20323_v38  ;;  %14393 = vmatprep.subr.mxu0 %v20323_v38 }
 0x15f   : > { %14404 = vmatprep.subr.mxu1 %v20323_v38 }
 0x160   : > { %14372 = vmatmul.mubr.f32.gmra.mxu0 %v2003_v37  ;;  %14381 = vmatmul.mubr.f32.vlgmr.msra.gmra.mxu1 %v16767_v14  ;;  %v16834_v37 = vand.u32 4294901760, %v2476_v18 }
 0x161   : > { %14394 = vmatpush3.xpose.msra.mxu0 %v1980_v2  ;;  %14405 = vmatpush3.xpose.msra.mxu1 %v16774_v32 }
 0x162   : > { %14383 = vmatprep.mubr.msk.f32.mxu1 %vm16171_vm1, %v20323_v38  ;;  %14395 = vmatprep.mubr.msk.f32.mxu0 %vm16171_vm1, %v20323_v38  ;;  %v16850_v22 = vsub.f32 %v2476_v18, %v16834_v37  ;;  %v16929_v18 = vpop.f32.mrf.mxu1 }
 0x163   : > { %14406 = vmatprep.subr.mxu1 %v20323_v38  ;;  %14419 = vmatprep.subr.mxu0 %v20323_v38 }
 0x164   : > { %14384 = vmatmul.mubr.f32.gmra.mxu1 %v16765_v62  ;;  %14396 = vmatmul.mubr.f32.vlgmr.msra.gmra.mxu0 %v1980_v2  ;;  %v2473_v2 = vsel %vm423_vm0, %v1785_v48, 0  ;;  %v16868_v52 = vand.u32 4294901760, %v16850_v22  ;;  %v1353_v48 = vadd.f32 %v16688_v43, %v1109_v1 }
 0x165   : > { %14407 = vmatpush3.xpose.msra.mxu1 %v16765_v62  ;;  %14420 = vmatpush3.xpose.msra.mxu0 %v16787_v31  ;;  %v16852_v8 = vand.u32 4294901760, %v2473_v2 }
 0x166   : > { %14386 = vmatprep.mubr.msk.f32.mxu1 %vm16171_vm1, %v20323_v38  ;;  %14398 = vmatprep.mubr.msk.f32.mxu0 %vm16171_vm1, %v20323_v38 }
 0x167   : > { %14408 = vmatprep.subr.mxu1 %v20323_v38  ;;  %14421 = vmatprep.subr.mxu0 %v20323_v38 }
 0x168   : > { %14387 = vmatmul.mubr.f32.gmra.mxu1 %v16774_v32  ;;  %14399 = vmatmul.mubr.f32.gmra.mxu0 %v16772_v6  ;;  %v16861_v6 = vsub.f32 %v2470_v17, %v16843_v23 }
 0x169   : > { %14409 = vmatpush3.xpose.msra.mxu1 %v16767_v14  ;;  %14422 = vmatpush3.xpose.msra.mxu0 %v16784_v27 }
 0x16a   : > { %14401 = vmatprep.mubr.msk.f32.mxu0 %vm16171_vm1, %v20323_v38  ;;  %14410 = vmatprep.mubr.msk.f32.mxu1 %vm16171_vm1, %v20323_v38  ;;  %v16882_v29 = vand.u32 4294901760, %v16861_v6 }
 0x16b   : > { %14423 = vmatprep.subr.mxu0 %v20323_v38  ;;  %14434 = vmatprep.subr.mxu1 %v20323_v38 }
 0x16c   : > { %14402 = vmatmul.mubr.f32.gmra.mxu0 %v16777_v60  ;;  %14411 = vmatmul.mubr.f32.vlgmr.msra.gmra.mxu1 %v16780_v57  ;;  %v16871_v60 = vsub.f32 %v2473_v2, %v16852_v8  ;;  %v2549_v46 = vsub.f32 %v16861_v6, %v16882_v29 }
 0x16d   : > { %14424 = vmatpush3.xpose.msra.mxu0 %v16780_v57  ;;  %14435 = vmatpush3.xpose.msra.mxu1 %v16774_v32  ;;  %v16877_v57 = vpop.f32.mrf.mxu0 }
 0x16e   : > { %14413 = vmatprep.mubr.msk.f32.mxu1 %vm16171_vm1, %v20323_v38  ;;  %14425 = vmatprep.mubr.msk.f32.mxu0 %vm16171_vm1, %v20323_v38  ;;  %v16893_v30 = vand.u32 4294901760, %v16871_v60  ;;  %v2550_v5 = vand.u32 4294901760, %v2549_v46 }
 0x16f   : > { %14436 = vmatprep.subr.mxu1 %v20323_v38  ;;  %14449 = vmatprep.subr.mxu0 %v20323_v38  ;;  %v1585_v58 = vpop.f32.mrf.mxu0 }
 0x170   : > { %14414 = vmatmul.mubr.f32.gmra.mxu1 %v16784_v27  ;;  %14426 = vmatmul.mubr.f32.vlgmr.msra.gmra.mxu0 %v16767_v14  ;;  %v2569_v27 = vsub.f32 %v16850_v22, %v16868_v52  ;;  %v2559_v33 = vsub.f32 %v16871_v60, %v16893_v30  ;;  %v1586_v43 = vadd.f32 %v1585_v58, %v1337_v15 }
 0x171   : > { %14437 = vmatpush3.xpose.msra.mxu1 %v16765_v62  ;;  %14450 = vmatpush3.xpose.msra.mxu0 %v16834_v37  ;;  %v16916_v36 = vpop.f32.mrf.mxu0 }
 0x172   : > { %14416 = vmatprep.mubr.msk.f32.mxu1 %vm16171_vm1, %v20323_v38  ;;  %14428 = vmatprep.mubr.msk.f32.mxu0 %vm16171_vm1, %v20323_v38  ;;  %v1797_v47 = vadd.f32 %v1796_v9, %v1586_v43 }
 0x173   : > { %14438 = vmatprep.subr.mxu1 %v20323_v38  ;;  %14451 = vmatprep.subr.mxu0 %v20323_v38  ;;  %v1597_v63 = vpop.f32.mrf.mxu0 }
 0x174   : > { %14417 = vmatmul.mubr.f32.gmra.mxu1 %v16787_v31  ;;  %14429 = vmatmul.mubr.f32.gmra.mxu0 %v16765_v62  ;;  %v2570_v31 = vand.u32 4294901760, %v2569_v27  ;;  %v1598_v55 = vadd.f32 %v1597_v63, %v1353_v48 }
 0x175   : > { %14439 = vmatpush3.xpose.msra.mxu1 %v16767_v14  ;;  %14452 = vmatpush3.xpose.msra.mxu0 %v16852_v8 }
 0x176   : > { %14431 = vmatprep.mubr.msk.f32.mxu0 %vm16171_vm1, %v20323_v38  ;;  %14440 = vmatprep.mubr.msk.f32.mxu1 %vm16171_vm1, %v20323_v38 }
 0x177   : > { %14453 = vmatprep.subr.mxu0 %v20323_v38  ;;  %14464 = vmatprep.subr.mxu1 %v20323_v38 }
 0x178   : > { %14432 = vmatmul.mubr.f32.gmra.mxu0 %v16774_v32  ;;  %14441 = vmatmul.mubr.f32.vlgmr.msra.gmra.mxu1 %v16767_v14  ;;  %v2560_v14 = vand.u32 4294901760, %v2559_v33 }
 0x179   : > { %14454 = vmatpush3.xpose.msra.mxu0 %v16843_v23  ;;  %14465 = vmatpush3.xpose.msra.mxu1 %v2570_v31 }
 0x17a   : > { %14443 = vmatprep.mubr.msk.f32.mxu1 %vm16171_vm1, %v20323_v38  ;;  %14455 = vmatprep.mubr.msk.f32.mxu0 %vm16171_vm1, %v20323_v38 }
 0x17b   : > { %14466 = vmatprep.subr.mxu1 %v20323_v38  ;;  %14479 = vmatprep.subr.mxu0 %v20323_v38 }
 0x17c   : > { %14444 = vmatmul.mubr.f32.gmra.mxu1 %v16765_v62  ;;  %14456 = vmatmul.mubr.f32.vlgmr.msra.gmra.mxu0 %v2550_v5  ;;  %v1808_v62 = vpop.f32.mrf.mxu1 }
 0x17d   : > { %14467 = vmatpush3.xpose.msra.mxu1 %v2560_v14  ;;  %14480 = vmatpush3.xpose.msra.mxu0 %v16850_v22  ;;  %v1809_v17 = vadd.f32 %v1808_v62, %v1598_v55 }
 0x17e   : > { %14446 = vmatprep.mubr.msk.f32.mxu1 %vm16171_vm1, %v20323_v38  ;;  %14458 = vmatprep.mubr.msk.f32.mxu0 %vm16171_vm1, %v20323_v38  ;;  %v14340_v0 = vpop.f32.mrf.mxu1 }
 0x17f   : > { %14468 = vmatprep.subr.mxu1 %v20323_v38  ;;  %14481 = vmatprep.subr.mxu0 %v20323_v38  ;;  %v3043_v2 = vsel %vm423_vm0, %v1809_v17, 0 }
 0x180   : > { %14447 = vmatmul.mubr.f32.gmra.mxu1 %v16774_v32  ;;  %14459 = vmatmul.mubr.f32.gmra.mxu0 %v2560_v14  ;;  %v1592_v32 = vadd.f32 %v16877_v57, %v16692_v26  ;;  %v3037_v57 = vsel %vm423_vm0, %v1797_v47, 0  ;;  %v16969_v27 = vand.u32 4294901760, %v3043_v2  ;;  %v1604_v14 = vadd.f32 %v16916_v36, %v16699_v42  ;;  %v1820_v50 = vpop.f32.mrf.mxu1 }
 0x181   : > { %14469 = vmatpush3.xpose.msra.mxu1 %v2550_v5  ;;  %14482 = vmatpush3.xpose.msra.mxu0 %v16871_v60  ;;  %v16978_v51 = vand.u32 4294901760, %v3037_v57  ;;  %v1123_v5 = vadd.f32 %v16704_v56, %v899_v24 }
 0x182   : > { %14461 = vmatprep.mubr.msk.f32.mxu0 %vm16171_vm1, %v20323_v38  ;;  %14470 = vmatprep.mubr.msk.f32.mxu1 %vm16171_vm1, %v20323_v38  ;;  %v1803_v26 = vadd.f32 %v14334_v49, %v1592_v32  ;;  %v16987_v49 = vsub.f32 %v3043_v2, %v16969_v27 }
 0x183   : > { %14483 = vmatprep.subr.mxu0 %v20323_v38  ;;  %14494 = vmatprep.subr.mxu1 %v20323_v38  ;;  %v1369_v56 = vadd.f32 %v16695_v21, %v1123_v5  ;;  %v1815_v21 = vadd.f32 %v16929_v18, %v1604_v14 }
 0x184   : > { %14462 = vmatmul.mubr.f32.gmra.mxu0 %v2570_v31  ;;  %14471 = vmatmul.mubr.f32.vlgmr.msra.gmra.mxu1 %v16843_v23 }
 0x185   : > { %14484 = vmatpush3.xpose.msra.mxu0 %v16861_v6  ;;  %14495 = vmatpush3.xpose.msra.mxu1 %v16834_v37  ;;  %v3604_v63 = vsel %vm423_vm0, %v1815_v21, 0 }
 0x186   : > { %14473 = vmatprep.mubr.msk.f32.mxu1 %vm16171_vm1, %v20323_v38  ;;  %14485 = vmatprep.mubr.msk.f32.mxu0 %vm16171_vm1, %v20323_v38  ;;  %v17104_v55 = vand.u32 4294901760, %v3604_v63 }
 0x187   : > { %14496 = vmatprep.subr.mxu1 %v20323_v38  ;;  %14509 = vmatprep.subr.mxu0 %v20323_v38 }
 0x188   : > { %14474 = vmatmul.mubr.f32.gmra.mxu1 %v16852_v8  ;;  %14486 = vmatmul.mubr.f32.vlgmr.msra.gmra.mxu0 %v16861_v6  ;;  %v3040_v6 = vsel %vm423_vm0, %v1803_v26, 0  ;;  %v17122_v43 = vsub.f32 %v3604_v63, %v17104_v55 }
 0x189   : > { %14497 = vmatpush3.xpose.msra.mxu1 %v16852_v8  ;;  %14510 = vmatpush3.xpose.msra.mxu0 %v16868_v52  ;;  %v16984_v58 = vand.u32 4294901760, %v3040_v6 }
 0x18a   : > { %14476 = vmatprep.mubr.msk.f32.mxu1 %vm16171_vm1, %v20323_v38  ;;  %14488 = vmatprep.mubr.msk.f32.mxu0 %vm16171_vm1, %v20323_v38  ;;  %v17143_v26 = vand.u32 4294901760, %v17122_v43 }
 0x18b   : > { %14498 = vmatprep.subr.mxu1 %v20323_v38  ;;  %14511 = vmatprep.subr.mxu0 %v20323_v38  ;;  %v17003_v46 = vsub.f32 %v3040_v6, %v16984_v58  ;;  %v668_v6 = vadd.f32 %v16579_v7, %v16633_v45  ;;  %v648_v45 = vadd.f32 %v16579_v7, %v16626_v35 }
 0x18c   : > { %14477 = vmatmul.mubr.f32.gmra.mxu1 %v16834_v37  ;;  %14489 = vmatmul.mubr.f32.gmra.mxu0 %v16871_v60  ;;  %v16996_v60 = vsub.f32 %v3037_v57, %v16978_v51 }
 0x18d   : > { %14499 = vmatpush3.xpose.msra.mxu1 %v16843_v23  ;;  %14512 = vmatpush3.xpose.msra.mxu0 %v16893_v30  ;;  %v17022_v12 = vand.u32 4294901760, %v17003_v46 }
 0x18e   : > { %14491 = vmatprep.mubr.msk.f32.mxu0 %vm16171_vm1, %v20323_v38  ;;  %14500 = vmatprep.mubr.msk.f32.mxu1 %vm16171_vm1, %v20323_v38 }
 0x18f   : > { %14513 = vmatprep.subr.mxu0 %v20323_v38  ;;  %14524 = vmatprep.subr.mxu1 %v20323_v38  ;;  %v3126_v33 = vsub.f32 %v17003_v46, %v17022_v12 }
 0x190   : > { %14492 = vmatmul.mubr.f32.gmra.mxu0 %v16850_v22  ;;  %14501 = vmatmul.mubr.f32.vlgmr.msra.gmra.mxu1 %v16882_v29  ;;  %v17008_v22 = vand.u32 4294901760, %v16987_v49 }
 0x191   : > { %14514 = vmatpush3.xpose.msra.mxu0 %v16882_v29  ;;  %14525 = vmatpush3.xpose.msra.mxu1 %v16834_v37  ;;  %v17015_v29 = vand.u32 4294901760, %v16996_v60  ;;  %v3127_v1 = vand.u32 4294901760, %v3126_v33 }
 0x192   : > { %14503 = vmatprep.mubr.msk.f32.mxu1 %vm16171_vm1, %v20323_v38  ;;  %14515 = vmatprep.mubr.msk.f32.mxu0 %vm16171_vm1, %v20323_v38 }
 0x193   : > { %14526 = vmatprep.subr.mxu1 %v20323_v38  ;;  %14539 = vmatprep.subr.mxu0 %v20323_v38  ;;  %v3116_v31 = vsub.f32 %v16996_v60, %v17015_v29 }
 0x194   : > { %14504 = vmatmul.mubr.f32.gmra.mxu1 %v16893_v30  ;;  %14516 = vmatmul.mubr.f32.vlgmr.msra.gmra.mxu0 %v16843_v23  ;;  %v3136_v30 = vsub.f32 %v16987_v49, %v17008_v22 }
 0x195   : > { %14527 = vmatpush3.xpose.msra.mxu1 %v16852_v8  ;;  %14540 = vmatpush3.xpose.msra.mxu0 %v16969_v27  ;;  %v3117_v9 = vand.u32 4294901760, %v3116_v31 }
 0x196   : > { %14506 = vmatprep.mubr.msk.f32.mxu1 %vm16171_vm1, %v20323_v38  ;;  %14518 = vmatprep.mubr.msk.f32.mxu0 %vm16171_vm1, %v20323_v38 }
 0x197   : > { %14528 = vmatprep.subr.mxu1 %v20323_v38  ;;  %14541 = vmatprep.subr.mxu0 %v20323_v38 }
 0x198   : > { %14507 = vmatmul.mubr.f32.gmra.mxu1 %v16868_v52  ;;  %14519 = vmatmul.mubr.f32.gmra.mxu0 %v16852_v8  ;;  %v3137_v52 = vand.u32 4294901760, %v3136_v30 }
 0x199   : > { %14529 = vmatpush3.xpose.msra.mxu1 %v16843_v23  ;;  %14542 = vmatpush3.xpose.msra.mxu0 %v16984_v58 }
 0x19a   : > { %14521 = vmatprep.mubr.msk.f32.mxu0 %vm16171_vm1, %v20323_v38  ;;  %14530 = vmatprep.mubr.msk.f32.mxu1 %vm16171_vm1, %v20323_v38 }
 0x19b   : > { %14543 = vmatprep.subr.mxu0 %v20323_v38  ;;  %14554 = vmatprep.subr.mxu1 %v20323_v38 }
 0x19c   : > { %14522 = vmatmul.mubr.f32.gmra.mxu0 %v16834_v37  ;;  %14531 = vmatmul.mubr.f32.vlgmr.msra.gmra.mxu1 %v16843_v23  ;;  %v14300_v23 = vpop.f32.mrf.mxu0 }
 0x19d   : > { %14544 = vmatpush3.xpose.msra.mxu0 %v16978_v51  ;;  %14555 = vmatpush3.xpose.msra.mxu1 %v3137_v52  ;;  %v1616_v11 = vadd.f32 %v14300_v23, %v16706_v19 }
 0x19e   : > { %14533 = vmatprep.mubr.msk.f32.mxu1 %vm16171_vm1, %v20323_v38  ;;  %14545 = vmatprep.mubr.msk.f32.mxu0 %vm16171_vm1, %v20323_v38 }
 0x19f   : > { %14556 = vmatprep.subr.mxu1 %v20323_v38  ;;  %14569 = vmatprep.subr.mxu0 %v20323_v38 }
 0x1a0   : > { %14534 = vmatmul.mubr.f32.gmra.mxu1 %v16852_v8  ;;  %14546 = vmatmul.mubr.f32.vlgmr.msra.gmra.mxu0 %v3117_v9  ;;  %v1609_v8 = vpop.f32.mrf.mxu0 }
 0x1a1   : > { %14557 = vmatpush3.xpose.msra.mxu1 %v3127_v1  ;;  %14570 = vmatpush3.xpose.msra.mxu0 %v16987_v49  ;;  %v1610_v19 = vadd.f32 %v1609_v8, %v1369_v56 }
 0x1a2   : > { %14536 = vmatprep.mubr.msk.f32.mxu1 %vm16171_vm1, %v20323_v38  ;;  %14548 = vmatprep.mubr.msk.f32.mxu0 %vm16171_vm1, %v20323_v38  ;;  %v17138_v47 = vpop.f32.mrf.mxu0 }
 0x1a3   : > { %14558 = vmatprep.subr.mxu1 %v20323_v38  ;;  %14571 = vmatprep.subr.mxu0 %v20323_v38  ;;  %v1821_v36 = vadd.f32 %v1820_v50, %v1610_v19 }
 0x1a4   : > { %14537 = vmatmul.mubr.f32.gmra.mxu1 %v16834_v37  ;;  %14549 = vmatmul.mubr.f32.gmra.mxu0 %v3127_v1  ;;  %v1827_v37 = vadd.f32 %v14340_v0, %v1616_v11 }
 0x1a5   : > { %14559 = vmatpush3.xpose.msra.mxu1 %v3117_v9  ;;  %14572 = vmatpush3.xpose.msra.mxu0 %v17003_v46  ;;  %v3607_v48 = vsel %vm423_vm0, %v1821_v36, 0 }
 0x1a6   : > { %14551 = vmatprep.mubr.msk.f32.mxu0 %vm16171_vm1, %v20323_v38  ;;  %14560 = vmatprep.mubr.msk.f32.mxu1 %vm16171_vm1, %v20323_v38  ;;  %v3610_v42 = vsel %vm423_vm0, %v1827_v37, 0  ;;  %v17113_v62 = vand.u32 4294901760, %v3607_v48 }
 0x1a7   : > { %14573 = vmatprep.subr.mxu0 %v20323_v38  ;;  %14584 = vmatprep.subr.mxu1 %v20323_v38  ;;  %v17095_v18 = vand.u32 4294901760, %v3610_v42 }
 0x1a8   : > { %14552 = vmatmul.mubr.f32.gmra.mxu0 %v3137_v52  ;;  %14561 = vmatmul.mubr.f32.vlgmr.msra.gmra.mxu1 %v16978_v51  ;;  %v17132_v17 = vsub.f32 %v3607_v48, %v17113_v62  ;;  %v17306_v48 = vld [vmem:[%s20238_s4] ss:$0 sm:$0xff] }
 0x1a9   : > { %14574 = vmatpush3.xpose.msra.mxu0 %v16996_v60  ;;  %14585 = vmatpush3.xpose.msra.mxu1 %v16969_v27  ;;  %v17111_v15 = vsub.f32 %v3610_v42, %v17095_v18 }
 0x1aa   : > { %14563 = vmatprep.mubr.msk.f32.mxu1 %vm16171_vm1, %v20323_v38  ;;  %14575 = vmatprep.mubr.msk.f32.mxu0 %vm16171_vm1, %v20323_v38  ;;  %v17154_v57 = vand.u32 4294901760, %v17132_v17 }
 0x1ab   : > { %14586 = vmatprep.subr.mxu1 %v20323_v38  ;;  %14599 = vmatprep.subr.mxu0 %v20323_v38  ;;  %v17129_v32 = vand.u32 4294901760, %v17111_v15 }
 0x1ac   : > { %14564 = vmatmul.mubr.f32.gmra.mxu1 %v16984_v58  ;;  %14576 = vmatmul.mubr.f32.vlgmr.msra.gmra.mxu0 %v16996_v60  ;;  %v14343_v60 = vpop.f32.mrf.mxu1 }
 0x1ad   : > { %14587 = vmatpush3.xpose.msra.mxu1 %v16984_v58  ;;  %14600 = vmatpush3.xpose.msra.mxu0 %v17008_v22  ;;  %v3703_v2 = vsub.f32 %v17111_v15, %v17129_v32 }
 0x1ae   : > { %14566 = vmatprep.mubr.msk.f32.mxu1 %vm16171_vm1, %v20323_v38  ;;  %14578 = vmatprep.mubr.msk.f32.mxu0 %vm16171_vm1, %v20323_v38  ;;  %v1832_v31 = vpop.f32.mrf.mxu1 }
 0x1af   : > { %14588 = vmatprep.subr.mxu1 %v20323_v38  ;;  %14601 = vmatprep.subr.mxu0 %v20323_v38 }
 0x1b0   : > { %14567 = vmatmul.mubr.f32.gmra.mxu1 %v16969_v27  ;;  %14579 = vmatmul.mubr.f32.gmra.mxu0 %v17003_v46  ;;  %v3683_v46 = vsub.f32 %v17122_v43, %v17143_v26  ;;  %v17190_v33 = vpop.f32.mrf.mxu1 }
 0x1b1   : > { %14589 = vmatpush3.xpose.msra.mxu1 %v16978_v51  ;;  %14602 = vmatpush3.xpose.msra.mxu0 %v17022_v12 }
 0x1b2   : > { %14581 = vmatprep.mubr.msk.f32.mxu0 %vm16171_vm1, %v20323_v38  ;;  %14590 = vmatprep.mubr.msk.f32.mxu1 %vm16171_vm1, %v20323_v38  ;;  %v3684_v35 = vand.u32 4294901760, %v3683_v46 }
 0x1b3   : > { %14603 = vmatprep.subr.mxu0 %v20323_v38  ;;  %14614 = vmatprep.subr.mxu1 %v20323_v38 }
 0x1b4   : > { %14582 = vmatmul.mubr.f32.gmra.mxu0 %v16987_v49  ;;  %14591 = vmatmul.mubr.f32.vlgmr.msra.gmra.mxu1 %v17015_v29  ;;  %v1621_v49 = vpop.f32.mrf.mxu0 }
 0x1b5   : > { %14604 = vmatpush3.xpose.msra.mxu0 %v17015_v29  ;;  %14615 = vmatpush3.xpose.msra.mxu1 %v16969_v27  ;;  %v3693_v29 = vsub.f32 %v17132_v17, %v17154_v57 }
 0x1b6   : > { %14593 = vmatprep.mubr.msk.f32.mxu1 %vm16171_vm1, %v20323_v38  ;;  %14605 = vmatprep.mubr.msk.f32.mxu0 %vm16171_vm1, %v20323_v38  ;;  %v17177_v30 = vpop.f32.mrf.mxu0 }
 0x1b7   : > { %14616 = vmatprep.subr.mxu1 %v20323_v38  ;;  %14629 = vmatprep.subr.mxu0 %v20323_v38 }
 0x1b8   : > { %14594 = vmatmul.mubr.f32.gmra.mxu1 %v17022_v12  ;;  %14606 = vmatmul.mubr.f32.vlgmr.msra.gmra.mxu0 %v16978_v51  ;;  %v923_v12 = vadd.f32 %v16624_v34, %v668_v6  ;;  %v911_v34 = vadd.f32 %v16617_v20, %v648_v45 }
 0x1b9   : > { %14617 = vmatpush3.xpose.msra.mxu1 %v16984_v58  ;;  %14630 = vmatpush3.xpose.msra.mxu0 %v17095_v18 }
 0x1ba   : > { %14596 = vmatprep.mubr.msk.f32.mxu1 %vm16171_vm1, %v20323_v38  ;;  %14608 = vmatprep.mubr.msk.f32.mxu0 %vm16171_vm1, %v20323_v38  ;;  %v1151_v7 = vadd.f32 %v16718_v16, %v923_v12  ;;  %v1137_v52 = vadd.f32 %v16711_v39, %v911_v34  ;;  %v1633_v16 = vpop.f32.mrf.mxu0 }
 0x1bb   : > { %14618 = vmatprep.subr.mxu1 %v20323_v38  ;;  %14631 = vmatprep.subr.mxu0 %v20323_v38 }
 0x1bc   : > { %14597 = vmatmul.mubr.f32.gmra.mxu1 %v17008_v22  ;;  %14609 = vmatmul.mubr.f32.gmra.mxu0 %v16984_v58  ;;  %v3704_v22 = vand.u32 4294901760, %v3703_v2  ;;  %v1401_v54 = vadd.f32 %v16709_v13, %v1151_v7  ;;  %v1385_v39 = vadd.f32 %v16702_v4, %v1137_v52 }
 0x1bd   : > { %14619 = vmatpush3.xpose.msra.mxu1 %v16978_v51  ;;  %14632 = vmatpush3.xpose.msra.mxu0 %v17113_v62 }
 0x1be   : > { %14611 = vmatprep.mubr.msk.f32.mxu0 %vm16171_vm1, %v20323_v38  ;;  %14620 = vmatprep.mubr.msk.f32.mxu1 %vm16171_vm1, %v20323_v38  ;;  %v1634_v20 = vadd.f32 %v1633_v16, %v1401_v54  ;;  %v1622_v13 = vadd.f32 %v1621_v49, %v1385_v39  ;;  %v20325_v16 = vld [vmem:[#allocation13_spill] sm:$0xff] }
 0x1bf   : > { %14633 = vmatprep.subr.mxu0 %v20323_v38  ;;  %14644 = vmatprep.subr.mxu1 %v20323_v38 }
 0x1c0   : > { %14612 = vmatmul.mubr.f32.gmra.mxu0 %v16969_v27  ;;  %14621 = vmatmul.mubr.f32.vlgmr.msra.gmra.mxu1 %v16978_v51  ;;  %v3694_v51 = vand.u32 4294901760, %v3693_v29  ;;  %v1833_v4 = vadd.f32 %v1832_v31, %v1622_v13 }
 0x1c1   : > { %14634 = vmatpush3.xpose.msra.mxu0 %v17104_v55  ;;  %14645 = vmatpush3.xpose.msra.mxu1 %v3704_v22 }
 0x1c2   : > { %14623 = vmatprep.mubr.msk.f32.mxu1 %vm16171_vm1, %v20323_v38  ;;  %14635 = vmatprep.mubr.msk.f32.mxu0 %vm16171_vm1, %v20323_v38  ;;  %v4171_v24 = vsel %vm423_vm0, %v1833_v4, 0  ;;  %v20327_v4 = vld [vmem:[#allocation10_spill] sm:$0xff] }
 0x1c3   : > { %14646 = vmatprep.subr.mxu1 %v20323_v38  ;;  %14659 = vmatprep.subr.mxu0 %v20323_v38  ;;  %v17239_v11 = vand.u32 4294901760, %v4171_v24 }
 0x1c4   : > { %14624 = vmatmul.mubr.f32.gmra.mxu1 %v16984_v58  ;;  %14636 = vmatmul.mubr.f32.vlgmr.msra.gmra.mxu0 %v3684_v35  ;;  %v1844_v58 = vpop.f32.mrf.mxu1 }
 0x1c5   : > { %14647 = vmatpush3.xpose.msra.mxu1 %v3694_v51  ;;  %14660 = vmatpush3.xpose.msra.mxu0 %v17111_v15  ;;  %v1845_v9 = vadd.f32 %v1844_v58, %v1634_v20  ;;  %v17257_v56 = vsub.f32 %v4171_v24, %v17239_v11  ;;  %v20326_v58 = vld [vmem:[#allocation11_spill] sm:$0xff] }
 0x1c6   : > { %14626 = vmatprep.mubr.msk.f32.mxu1 %vm16171_vm1, %v20323_v38  ;;  %14638 = vmatprep.mubr.msk.f32.mxu0 %vm16171_vm1, %v20323_v38  ;;  %v708_v13 = vadd.f32 %v17306_v48, %v20326_v58 }
 0x1c7   : > { %14648 = vmatprep.subr.mxu1 %v20323_v38  ;;  %14661 = vmatprep.subr.mxu0 %v20323_v38  ;;  %v4177_v1 = vsel %vm423_vm0, %v1845_v9, 0  ;;  %v17276_v37 = vand.u32 4294901760, %v17257_v56 }
 0x1c8   : > { %14627 = vmatmul.mubr.f32.gmra.mxu1 %v16969_v27  ;;  %14639 = vmatmul.mubr.f32.gmra.mxu0 %v3694_v51  ;;  %v1628_v27 = vadd.f32 %v17138_v47, %v16713_v10  ;;  %v17230_v23 = vand.u32 4294901760, %v4177_v1  ;;  %v14349_v47 = vpop.f32.mrf.mxu1 }
 0x1c9   : > { %14649 = vmatpush3.xpose.msra.mxu1 %v3684_v35  ;;  %14662 = vmatpush3.xpose.msra.mxu0 %v17132_v17  ;;  %v4250_v42 = vsub.f32 %v17257_v56, %v17276_v37 }
 0x1ca   : > { %14641 = vmatprep.mubr.msk.f32.mxu0 %vm16171_vm1, %v20323_v38  ;;  %14650 = vmatprep.mubr.msk.f32.mxu1 %vm16171_vm1, %v20323_v38  ;;  %v1839_v10 = vadd.f32 %v14343_v60, %v1628_v27  ;;  %v17248_v0 = vsub.f32 %v4177_v1, %v17230_v23 }
 0x1cb   : > { %14663 = vmatprep.subr.mxu0 %v20323_v38  ;;  %14674 = vmatprep.subr.mxu1 %v20323_v38 }
 0x1cc   : > { %14642 = vmatmul.mubr.f32.gmra.mxu0 %v3704_v22  ;;  %14651 = vmatmul.mubr.f32.vlgmr.msra.gmra.mxu1 %v17104_v55  ;;  %v4174_v5 = vsel %vm423_vm0, %v1839_v10, 0  ;;  %v17269_v19 = vand.u32 4294901760, %v17248_v0 }
 0x1cd   : > { %14664 = vmatpush3.xpose.msra.mxu0 %v17122_v43  ;;  %14675 = vmatpush3.xpose.msra.mxu1 %v17095_v18  ;;  %v17245_v8 = vand.u32 4294901760, %v4174_v5 }
 0x1ce   : > { %14653 = vmatprep.mubr.msk.f32.mxu1 %vm16171_vm1, %v20323_v38  ;;  %14665 = vmatprep.mubr.msk.f32.mxu0 %vm16171_vm1, %v20323_v38  ;;  %v4270_v21 = vsub.f32 %v17248_v0, %v17269_v19 }
 0x1cf   : > { %14676 = vmatprep.subr.mxu1 %v20323_v38  ;;  %14689 = vmatprep.subr.mxu0 %v20323_v38  ;;  %v17264_v14 = vsub.f32 %v4174_v5, %v17245_v8 }
 0x1d0   : > { %14654 = vmatmul.mubr.f32.gmra.mxu1 %v17113_v62  ;;  %14666 = vmatmul.mubr.f32.vlgmr.msra.gmra.mxu0 %v17122_v43  ;;  %v4271_v36 = vand.u32 4294901760, %v4270_v21  ;;  %v4251_v43 = vand.u32 4294901760, %v4250_v42 }
 0x1d1   : > { %14677 = vmatpush3.xpose.msra.mxu1 %v17113_v62  ;;  %14690 = vmatpush3.xpose.msra.mxu0 %v17129_v32  ;;  %v17283_v50 = vand.u32 4294901760, %v17264_v14 }
 0x1d2   : > { %14656 = vmatprep.mubr.msk.f32.mxu1 %vm16171_vm1, %v20323_v38  ;;  %14668 = vmatprep.mubr.msk.f32.mxu0 %vm16171_vm1, %v20323_v38 }
 0x1d3   : > { %14678 = vmatprep.subr.mxu1 %v20323_v38  ;;  %14691 = vmatprep.subr.mxu0 %v20323_v38  ;;  %v4260_v63 = vsub.f32 %v17264_v14, %v17283_v50 }
 0x1d4   : > { %14657 = vmatmul.mubr.f32.gmra.mxu1 %v17095_v18  ;;  %14669 = vmatmul.mubr.f32.gmra.mxu0 %v17132_v17 }
 0x1d5   : > { %14679 = vmatpush3.xpose.msra.mxu1 %v17104_v55  ;;  %14692 = vmatpush3.xpose.msra.mxu0 %v17154_v57 }
 0x1d6   : > { %14671 = vmatprep.mubr.msk.f32.mxu0 %vm16171_vm1, %v20323_v38  ;;  %14680 = vmatprep.mubr.msk.f32.mxu1 %vm16171_vm1, %v20323_v38 }
 0x1d7   : > { %14693 = vmatprep.subr.mxu0 %v20323_v38  ;;  %14704 = vmatprep.subr.mxu1 %v20323_v38 }
 0x1d8   : > { %14672 = vmatmul.mubr.f32.gmra.mxu0 %v17111_v15  ;;  %14681 = vmatmul.mubr.f32.vlgmr.msra.gmra.mxu1 %v17143_v26  ;;  %v688_v15 = vadd.f32 %v17306_v48, %v16640_v53 }
 0x1d9   : > { %14694 = vmatpush3.xpose.msra.mxu0 %v17143_v26  ;;  %14705 = vmatpush3.xpose.msra.mxu1 %v17095_v18  ;;  %v20324_v26 = vld [vmem:[#allocation15_spill] sm:$0xff] }
 0x1da   : > { %14683 = vmatprep.mubr.msk.f32.mxu1 %vm16171_vm1, %v20323_v38  ;;  %14695 = vmatprep.mubr.msk.f32.mxu0 %vm16171_vm1, %v20323_v38  ;;  %v935_v53 = vadd.f32 %v16631_v44, %v688_v15  ;;  %v1640_v2 = vadd.f32 %v17177_v30, %v20324_v26 }
 0x1db   : > { %14706 = vmatprep.subr.mxu1 %v20323_v38  ;;  %14719 = vmatprep.subr.mxu0 %v20323_v38 }
 0x1dc   : > { %14684 = vmatmul.mubr.f32.gmra.mxu1 %v17154_v57  ;;  %14696 = vmatmul.mubr.f32.vlgmr.msra.gmra.mxu0 %v17104_v55  ;;  %v1165_v17 = vadd.f32 %v16725_v28, %v935_v53  ;;  %v1856_v57 = vpop.f32.mrf.mxu1 }
 0x1dd   : > { %14707 = vmatpush3.xpose.msra.mxu1 %v17113_v62  ;;  %14720 = vmatpush3.xpose.msra.mxu0 %v17230_v23 }
 0x1de   : > { %14686 = vmatprep.mubr.msk.f32.mxu1 %vm16171_vm1, %v20323_v38  ;;  %14698 = vmatprep.mubr.msk.f32.mxu0 %vm16171_vm1, %v20323_v38  ;;  %v1417_v28 = vadd.f32 %v16716_v25, %v1165_v17  ;;  %v1851_v25 = vadd.f32 %v17190_v33, %v1640_v2  ;;  %v728_v33 = vadd.f32 %v17306_v48, %v20325_v16  ;;  %v17426_v20 = vpop.f32.mrf.mxu1 }
 0x1df   : > { %14708 = vmatprep.subr.mxu1 %v20323_v38  ;;  %14721 = vmatprep.subr.mxu0 %v20323_v38 }
 0x1e0   : > { %14687 = vmatmul.mubr.f32.gmra.mxu1 %v17129_v32  ;;  %14699 = vmatmul.mubr.f32.gmra.mxu0 %v17113_v62  ;;  %v4261_v32 = vand.u32 4294901760, %v4260_v63  ;;  %v4738_v60 = vsel %vm423_vm0, %v1851_v25, 0  ;;  %v959_v10 = vadd.f32 %v20327_v4, %v728_v33  ;;  %v1868_v24 = vpop.f32.mrf.mxu1 }
 0x1e1   : > { %14709 = vmatpush3.xpose.msra.mxu1 %v17104_v55  ;;  %14722 = vmatpush3.xpose.msra.mxu0 %v17245_v8  ;;  %v17370_v22 = vand.u32 4294901760, %v4738_v60 }
 0x1e2   : > { %14701 = vmatprep.mubr.msk.f32.mxu0 %vm16171_vm1, %v20323_v38  ;;  %14710 = vmatprep.mubr.msk.f32.mxu1 %vm16171_vm1, %v20323_v38  ;;  %v1193_v5 = vadd.f32 %v16741_v59, %v959_v10 }
 0x1e3   : > { %14723 = vmatprep.subr.mxu0 %v20323_v38  ;;  %14734 = vmatprep.subr.mxu1 %v20323_v38  ;;  %v17388_v30 = vsub.f32 %v4738_v60, %v17370_v22 }
 0x1e4   : > { %14702 = vmatmul.mubr.f32.gmra.mxu0 %v17095_v18  ;;  %14711 = vmatmul.mubr.f32.vlgmr.msra.gmra.mxu1 %v17104_v55  ;;  %v14309_v55 = vpop.f32.mrf.mxu0 }
 0x1e5   : > { %14724 = vmatpush3.xpose.msra.mxu0 %v17239_v11  ;;  %14735 = vmatpush3.xpose.msra.mxu1 %v4271_v36  ;;  %v1652_v44 = vadd.f32 %v14309_v55, %v16727_v41  ;;  %v17409_v34 = vand.u32 4294901760, %v17388_v30 }
 0x1e6   : > { %14713 = vmatprep.mubr.msk.f32.mxu1 %vm16171_vm1, %v20323_v38  ;;  %14725 = vmatprep.mubr.msk.f32.mxu0 %vm16171_vm1, %v20323_v38 }
 0x1e7   : > { %14736 = vmatprep.subr.mxu1 %v20323_v38  ;;  %14749 = vmatprep.subr.mxu0 %v20323_v38  ;;  %v4817_v39 = vsub.f32 %v17388_v30, %v17409_v34 }
 0x1e8   : > { %14714 = vmatmul.mubr.f32.gmra.mxu1 %v17113_v62  ;;  %14726 = vmatmul.mubr.f32.vlgmr.msra.gmra.mxu0 %v4251_v43  ;;  %v1645_v62 = vpop.f32.mrf.mxu0 }
 0x1e9   : > { %14737 = vmatpush3.xpose.msra.mxu1 %v4261_v32  ;;  %14750 = vmatpush3.xpose.msra.mxu0 %v17248_v0  ;;  %v1646_v41 = vadd.f32 %v1645_v62, %v1417_v28 }
 0x1ea   : > { %14716 = vmatprep.mubr.msk.f32.mxu1 %vm16171_vm1, %v20323_v38  ;;  %14728 = vmatprep.mubr.msk.f32.mxu0 %vm16171_vm1, %v20323_v38  ;;  %v17404_v35 = vpop.f32.mrf.mxu0 }
 0x1eb   : > { %14738 = vmatprep.subr.mxu1 %v20323_v38  ;;  %14751 = vmatprep.subr.mxu0 %v20323_v38  ;;  %v1857_v49 = vadd.f32 %v1856_v57, %v1646_v41 }
 0x1ec   : > { %14717 = vmatmul.mubr.f32.gmra.mxu1 %v17095_v18  ;;  %14729 = vmatmul.mubr.f32.gmra.mxu0 %v4261_v32  ;;  %v1863_v18 = vadd.f32 %v14349_v47, %v1652_v44  ;;  %v1657_v54 = vpop.f32.mrf.mxu0 }
 0x1ed   : > { %14739 = vmatpush3.xpose.msra.mxu1 %v4251_v43  ;;  %14752 = vmatpush3.xpose.msra.mxu0 %v17264_v14  ;;  %v4741_v45 = vsel %vm423_vm0, %v1857_v49, 0 }
 0x1ee   : > { %14731 = vmatprep.mubr.msk.f32.mxu0 %vm16171_vm1, %v20323_v38  ;;  %14740 = vmatprep.mubr.msk.f32.mxu1 %vm16171_vm1, %v20323_v38  ;;  %v4744_v6 = vsel %vm423_vm0, %v1863_v18, 0  ;;  %v17379_v12 = vand.u32 4294901760, %v4741_v45  ;;  %v17445_v1 = vpop.f32.mrf.mxu0 }
 0x1ef   : > { %14753 = vmatprep.subr.mxu0 %v20323_v38  ;;  %14764 = vmatprep.subr.mxu1 %v20323_v38  ;;  %v17361_v46 = vand.u32 4294901760, %v4744_v6 }
 0x1f0   : > { %14732 = vmatmul.mubr.f32.gmra.mxu0 %v4271_v36  ;;  %14741 = vmatmul.mubr.f32.vlgmr.msra.gmra.mxu1 %v17239_v11  ;;  %v17398_v7 = vsub.f32 %v4741_v45, %v17379_v12  ;;  %v1669_v59 = vpop.f32.mrf.mxu0 }
 0x1f1   : > { %14754 = vmatpush3.xpose.msra.mxu0 %v17257_v56  ;;  %14765 = vmatpush3.xpose.msra.mxu1 %v17230_v23  ;;  %v17377_v29 = vsub.f32 %v4744_v6, %v17361_v46 }
 0x1f2   : > { %14743 = vmatprep.mubr.msk.f32.mxu1 %vm16171_vm1, %v20323_v38  ;;  %14755 = vmatprep.mubr.msk.f32.mxu0 %vm16171_vm1, %v20323_v38  ;;  %v17420_v52 = vand.u32 4294901760, %v17398_v7  ;;  %v17471_v63 = vpop.f32.mrf.mxu0 }
 0x1f3   : > { %14766 = vmatprep.subr.mxu1 %v20323_v38  ;;  %14779 = vmatprep.subr.mxu0 %v20323_v38  ;;  %v17395_v31 = vand.u32 4294901760, %v17377_v29 }
 0x1f4   : > { %14744 = vmatmul.mubr.f32.gmra.mxu1 %v17245_v8  ;;  %14756 = vmatmul.mubr.f32.vlgmr.msra.gmra.mxu0 %v17257_v56  ;;  %v4827_v9 = vsub.f32 %v17398_v7, %v17420_v52  ;;  %v20328_v56 = vld [vmem:[#allocation9_spill] sm:$0xff]  ;;  %v17484_v53 = vpop.f32.mrf.mxu0 }
 0x1f5   : > { %14767 = vmatpush3.xpose.msra.mxu1 %v17245_v8  ;;  %14780 = vmatpush3.xpose.msra.mxu0 %v17269_v19  ;;  %v4837_v51 = vsub.f32 %v17377_v29, %v17395_v31 }
 0x1f6   : > { %14746 = vmatprep.mubr.msk.f32.mxu1 %vm16171_vm1, %v20323_v38  ;;  %14758 = vmatprep.mubr.msk.f32.mxu0 %vm16171_vm1, %v20323_v38 }
 0x1f7   : > { %14768 = vmatprep.subr.mxu1 %v20323_v38  ;;  %14781 = vmatprep.subr.mxu0 %v20323_v38  ;;  %v4838_v27 = vand.u32 4294901760, %v4837_v51 }
 0x1f8   : > { %14747 = vmatmul.mubr.f32.gmra.mxu1 %v17230_v23  ;;  %14759 = vmatmul.mubr.f32.gmra.mxu0 %v17264_v14  ;;  %v947_v14 = vadd.f32 %v20328_v56, %v708_v13  ;;  %v20332_v56 = vld [vmem:[#allocation14_spill] sm:$0xff] }
 0x1f9   : > { %14769 = vmatpush3.xpose.msra.mxu1 %v17239_v11  ;;  %14782 = vmatpush3.xpose.msra.mxu0 %v17283_v50 }
 0x1fa   : > { %14761 = vmatprep.mubr.msk.f32.mxu0 %vm16171_vm1, %v20323_v38  ;;  %14770 = vmatprep.mubr.msk.f32.mxu1 %vm16171_vm1, %v20323_v38 }
 0x1fb   : > { %14783 = vmatprep.subr.mxu0 %v20323_v38  ;;  %14794 = vmatprep.subr.mxu1 %v20323_v38 }
 0x1fc   : > { %14762 = vmatmul.mubr.f32.gmra.mxu0 %v17248_v0  ;;  %14771 = vmatmul.mubr.f32.vlgmr.msra.gmra.mxu1 %v17276_v37  ;;  %v4818_v0 = vand.u32 4294901760, %v4817_v39 }
 0x1fd   : > { %14784 = vmatpush3.xpose.msra.mxu0 %v17276_v37  ;;  %14795 = vmatpush3.xpose.msra.mxu1 %v17230_v23  ;;  %v17458_v37 = vpop.f32.mrf.mxu1 }
 0x1fe   : > { %14773 = vmatprep.mubr.msk.f32.mxu1 %vm16171_vm1, %v20323_v38  ;;  %14785 = vmatprep.mubr.msk.f32.mxu0 %vm16171_vm1, %v20323_v38 }
 0x1ff   : > { %14796 = vmatprep.subr.mxu1 %v20323_v38  ;;  %14809 = vmatprep.subr.mxu0 %v20323_v38  ;;  %v1880_v36 = vpop.f32.mrf.mxu1 }
 0x200   : > { %14774 = vmatmul.mubr.f32.gmra.mxu1 %v17283_v50  ;;  %14786 = vmatmul.mubr.f32.vlgmr.msra.gmra.mxu0 %v17239_v11  ;;  %v20329_v50 = vld [vmem:[#allocation17_spill] sm:$0xff] }
 0x201   : > { %14797 = vmatpush3.xpose.msra.mxu1 %v17245_v8  ;;  %14810 = vmatpush3.xpose.msra.mxu0 %v17361_v46  ;;  %v1449_v21 = vadd.f32 %v20329_v50, %v1193_v5  ;;  %v17500_v47 = vpop.f32.mrf.mxu1 }
 0x202   : > { %14776 = vmatprep.mubr.msk.f32.mxu1 %vm16171_vm1, %v20323_v38  ;;  %14788 = vmatprep.mubr.msk.f32.mxu0 %vm16171_vm1, %v20323_v38 }
 0x203   : > { %14798 = vmatprep.subr.mxu1 %v20323_v38  ;;  %14811 = vmatprep.subr.mxu0 %v20323_v38  ;;  %v17520_v25 = vpop.f32.mrf.mxu1 }
 0x204   : > { %14777 = vmatmul.mubr.f32.gmra.mxu1 %v17269_v19  ;;  %14789 = vmatmul.mubr.f32.gmra.mxu0 %v17245_v8  ;;  %v1179_v19 = vadd.f32 %v16732_v61, %v947_v14  ;;  %v20330_v61 = vld [vmem:[#allocation16_spill] sm:$0xff]  ;;  %v748_v14 = vadd.f32 %v17306_v48, %v20332_v56 }
 0x205   : > { %14799 = vmatpush3.xpose.msra.mxu1 %v17239_v11  ;;  %14812 = vmatpush3.xpose.msra.mxu0 %v17379_v12 }
 0x206   : > { %14791 = vmatprep.mubr.msk.f32.mxu0 %vm16171_vm1, %v20323_v38  ;;  %14800 = vmatprep.mubr.msk.f32.mxu1 %vm16171_vm1, %v20323_v38  ;;  %v1433_v42 = vadd.f32 %v20330_v61, %v1179_v19 }
 0x207   : > { %14813 = vmatprep.subr.mxu0 %v20323_v38  ;;  %14824 = vmatprep.subr.mxu1 %v20323_v38 }
 0x208   : > { %14792 = vmatmul.mubr.f32.gmra.mxu0 %v17230_v23  ;;  %14801 = vmatmul.mubr.f32.vlgmr.msra.gmra.mxu1 %v17239_v11  ;;  %v4828_v11 = vand.u32 4294901760, %v4827_v9  ;;  %v1658_v15 = vadd.f32 %v1657_v54, %v1433_v42 }
 0x209   : > { %14814 = vmatpush3.xpose.msra.mxu0 %v17370_v22  ;;  %14825 = vmatpush3.xpose.msra.mxu1 %v4838_v27 }
 0x20a   : > { %14803 = vmatprep.mubr.msk.f32.mxu1 %vm16171_vm1, %v20323_v38  ;;  %14815 = vmatprep.mubr.msk.f32.mxu0 %vm16171_vm1, %v20323_v38  ;;  %v1869_v55 = vadd.f32 %v1868_v24, %v1658_v15 }
 0x20b   : > { %14826 = vmatprep.subr.mxu1 %v20323_v38  ;;  %14839 = vmatprep.subr.mxu0 %v20323_v38 }
 0x20c   : > { %14804 = vmatmul.mubr.f32.gmra.mxu1 %v17245_v8  ;;  %14816 = vmatmul.mubr.f32.vlgmr.msra.gmra.mxu0 %v4818_v0  ;;  %v1670_v8 = vadd.f32 %v1669_v59, %v1449_v21  ;;  %v5305_v26 = vsel %vm423_vm0, %v1869_v55, 0 }
 0x20d   : > { %14827 = vmatpush3.xpose.msra.mxu1 %v4828_v11  ;;  %14840 = vmatpush3.xpose.msra.mxu0 %v17377_v29  ;;  %v17518_v57 = vand.u32 4294901760, %v5305_v26 }
 0x20e   : > { %14806 = vmatprep.mubr.msk.f32.mxu1 %vm16171_vm1, %v20323_v38  ;;  %14818 = vmatprep.mubr.msk.f32.mxu0 %vm16171_vm1, %v20323_v38  ;;  %v1881_v32 = vadd.f32 %v1880_v36, %v1670_v8  ;;  %v20333_v8 = vld [vmem:[#allocation12_spill] sm:$0xff] }
 0x20f   : > { %14828 = vmatprep.subr.mxu1 %v20323_v38  ;;  %14841 = vmatprep.subr.mxu0 %v20323_v38  ;;  %v971_v61 = vadd.f32 %v20333_v8, %v748_v14 }
 0x210   : > { %14807 = vmatmul.mubr.f32.gmra.mxu1 %v17230_v23  ;;  %14819 = vmatmul.mubr.f32.gmra.mxu0 %v4828_v11  ;;  %v20331_v23 = vld [vmem:[#allocation18_spill] sm:$0xff]  ;;  %v5311_v44 = vsel %vm423_vm0, %v1881_v32, 0 }
 0x211   : > { %14829 = vmatpush3.xpose.msra.mxu1 %v4818_v0  ;;  %14842 = vmatpush3.xpose.msra.mxu0 %v17398_v7  ;;  %v1664_v43 = vadd.f32 %v17404_v35, %v20331_v23  ;;  %v17507_v2 = vand.u32 4294901760, %v5311_v44  ;;  %v6438_v32 = vld [vmem:[%s20236_s2] sm:$0xff] }
 0x212   : > { %14821 = vmatprep.mubr.msk.f32.mxu0 %vm16171_vm1, %v20323_v38  ;;  %14830 = vmatprep.mubr.msk.f32.mxu1 %vm16171_vm1, %v20323_v38 }
 0x213   : > { %14843 = vmatprep.subr.mxu0 %v20323_v38  ;;  %14854 = vmatprep.subr.mxu1 %v20323_v38  ;;  %v1875_v17 = vadd.f32 %v17426_v20, %v1664_v43  ;;  %v17529_v60 = vsub.f32 %v5311_v44, %v17507_v2  ;;  %v1688_v44 = vadd.f32 %v17471_v63, %v16756_v40 }
 0x214   : > { %14822 = vmatmul.mubr.f32.gmra.mxu0 %v4838_v27  ;;  %14831 = vmatmul.mubr.f32.vlgmr.msra.gmra.mxu1 %v17370_v22 }
 0x215   : > { %14844 = vmatpush3.xpose.msra.mxu0 %v17388_v30  ;;  %14855 = vmatpush3.xpose.msra.mxu1 %v17361_v46  ;;  %v5308_v41 = vsel %vm423_vm0, %v1875_v17, 0 }
 0x216   : > { %14833 = vmatprep.mubr.msk.f32.mxu1 %vm16171_vm1, %v20323_v38  ;;  %14845 = vmatprep.mubr.msk.f32.mxu0 %vm16171_vm1, %v20323_v38  ;;  %v17526_v49 = vand.u32 4294901760, %v5308_v41 }
 0x217   : > { %14856 = vmatprep.subr.mxu1 %v20323_v38  ;;  %14869 = vmatprep.subr.mxu0 %v20323_v38 }
 0x218   : > { %v17494_v62 = vpop.f32.mrf.mxu0  ;;  %14834 = vmatmul.mubr.f32.gmra.mxu1 %v17379_v12  ;;  %14846 = vmatmul.mubr.f32.vlgmr.msra.gmra.mxu0 %v17388_v30  ;;  %v17549_v16 = vsub.f32 %v5308_v41, %v17526_v49  ;;  %v20334_v41 = vld [vmem:[#allocation19_spill] sm:$0xff] }
 0x219   : > { %14857 = vmatpush3.xpose.msra.mxu1 %v17379_v12  ;;  %14870 = vmatpush3.xpose.msra.mxu0 %v17395_v31 }
 0x21a   : > { %v14367_v28 = vpop.f32.mrf.mxu0  ;;  %14836 = vmatprep.mubr.msk.f32.mxu1 %vm16171_vm1, %v20323_v38  ;;  %14848 = vmatprep.mubr.msk.f32.mxu0 %vm16171_vm1, %v20323_v38  ;;  %v17570_v58 = vand.u32 4294901760, %v17549_v16 }
 0x21b   : > { %14858 = vmatprep.subr.mxu1 %v20323_v38  ;;  %14871 = vmatprep.subr.mxu0 %v20323_v38 }
 0x21c   : > { %v17512_v18 = vpop.f32.mrf.mxu0  ;;  %14837 = vmatmul.mubr.f32.gmra.mxu1 %v17361_v46  ;;  %14849 = vmatmul.mubr.f32.gmra.mxu0 %v17398_v7  ;;  %v17542_v7 = vsub.f32 %v5305_v26, %v17518_v57  ;;  %v5394_v24 = vsub.f32 %v17549_v16, %v17570_v58  ;;  %v17630_v26 = vmul.f32 1e+08, %v6438_v32 }
 0x21d   : > { %14859 = vmatpush3.xpose.msra.mxu1 %v17370_v22  ;;  %14872 = vmatpush3.xpose.msra.mxu0 %v17420_v52 }
 0x21e   : > { %v14370_v6 = vpop.f32.mrf.mxu0  ;;  %14851 = vmatprep.mubr.msk.f32.mxu0 %vm16171_vm1, %v20323_v38  ;;  %14860 = vmatprep.mubr.msk.f32.mxu1 %vm16171_vm1, %v20323_v38  ;;  %v17563_v54 = vand.u32 4294901760, %v17542_v7 }
 0x21f   : > { %14873 = vmatprep.subr.mxu0 %v20323_v38  ;;  %14884 = vmatprep.subr.mxu1 %v20323_v38  ;;  %v20335_v6 = vld [vmem:[#allocation20_spill] sm:$0xff] }
 0x220   : > { %v17533_v45 = vpop.f32.mrf.mxu0  ;;  %v17535_v30 = vpop.f32.mrf.mxu1  ;;  %14852 = vmatmul.mubr.f32.gmra.mxu0 %v17377_v29  ;;  %14861 = vmatmul.mubr.f32.vlgmr.msra.gmra.mxu1 %v17409_v34  ;;  %v17554_v29 = vand.u32 4294901760, %v17529_v60  ;;  %v5384_v9 = vsub.f32 %v17542_v7, %v17563_v54  ;;  %v1676_v40 = vadd.f32 %v17445_v1, %v20335_v6 }
 0x221   : > { %14874 = vmatpush3.xpose.msra.mxu0 %v17409_v34  ;;  %14885 = vmatpush3.xpose.msra.mxu1 %v17361_v46  ;;  %v2092_v48 = vadd.f32 %v17535_v30, %v17494_v62 }
 0x222   : > { %v14373_v35 = vpop.f32.mrf.mxu0  ;;  %v14382_v51 = vpop.f32.mrf.mxu1  ;;  %14863 = vmatprep.mubr.msk.f32.mxu1 %vm16171_vm1, %v20323_v38  ;;  %14875 = vmatprep.mubr.msk.f32.mxu0 %vm16171_vm1, %v20323_v38  ;;  %v5385_v11 = vand.u32 4294901760, %v5384_v9 }
 0x223   : > { %14886 = vmatprep.subr.mxu1 %v20323_v38  ;;  %14899 = vmatprep.subr.mxu0 %v20323_v38  ;;  %v6439_v35 = vld [vmem:[%s20236_s2 + $0x8] sm:$0xff] }
 0x224   : > { %v17556_v34 = vpop.f32.mrf.mxu1  ;;  %v2181_v33 = vpop.f32.mrf.mxu0  ;;  %14864 = vmatmul.mubr.f32.gmra.mxu1 %v17420_v52  ;;  %14876 = vmatmul.mubr.f32.vlgmr.msra.gmra.mxu0 %v17370_v22  ;;  %v5404_v52 = vsub.f32 %v17529_v60, %v17554_v29  ;;  %v17653_v9 = vmul.f32 1e+08, %v6439_v35 }
 0x225   : > { %14887 = vmatpush3.xpose.msra.mxu1 %v17379_v12  ;;  %14900 = vmatpush3.xpose.msra.mxu0 %v17507_v2  ;;  %v2182_v15 = vadd.f32 %v2181_v33, %v2092_v48  ;;  %v2098_v55 = vadd.f32 %v17556_v34, %v17512_v18 }
 0x226   : > { %v14385_v20 = vpop.f32.mrf.mxu1  ;;  %v14397_v39 = vpop.f32.mrf.mxu0  ;;  %14866 = vmatprep.mubr.msk.f32.mxu1 %vm16171_vm1, %v20323_v38  ;;  %14878 = vmatprep.mubr.msk.f32.mxu0 %vm16171_vm1, %v20323_v38 }
 0x227   : > { %14888 = vmatprep.subr.mxu1 %v20323_v38  ;;  %14901 = vmatprep.subr.mxu0 %v20323_v38  ;;  %v1899_v20 = vadd.f32 %v17500_v47, %v1688_v44 }
 0x228   : > { %v17576_v13 = vpop.f32.mrf.mxu1  ;;  %v2188_v27 = vpop.f32.mrf.mxu0  ;;  %14867 = vmatmul.mubr.f32.gmra.mxu1 %v17395_v31  ;;  %14879 = vmatmul.mubr.f32.gmra.mxu0 %v17379_v12  ;;  %v5405_v31 = vand.u32 4294901760, %v5404_v52 }
 0x229   : > { %14889 = vmatpush3.xpose.msra.mxu1 %v17370_v22  ;;  %14902 = vmatpush3.xpose.msra.mxu0 %v17526_v49  ;;  %v2104_v51 = vadd.f32 %v17576_v13, %v17533_v45 }
 0x22a   : > { %v14388_v4 = vpop.f32.mrf.mxu1  ;;  %v14400_v10 = vpop.f32.mrf.mxu0  ;;  %14881 = vmatprep.mubr.msk.f32.mxu0 %vm16171_vm1, %v20323_v38  ;;  %14890 = vmatprep.mubr.msk.f32.mxu1 %vm16171_vm1, %v20323_v38 }
 0x22b   : > { %14903 = vmatprep.subr.mxu0 %v20323_v38  ;;  %14914 = vmatprep.subr.mxu1 %v20323_v38  ;;  %v6440_v10 = vld [vmem:[%s20236_s2 + $0x10] sm:$0xff] }
 0x22c   : > { %v17592_v5 = vpop.f32.mrf.mxu0  ;;  %v2271_v0 = vpop.f32.mrf.mxu1  ;;  %14882 = vmatmul.mubr.f32.gmra.mxu0 %v17361_v46  ;;  %14891 = vmatmul.mubr.f32.vlgmr.msra.gmra.mxu1 %v17370_v22  ;;  %v5395_v22 = vand.u32 4294901760, %v5394_v24 }
 0x22d   : > { %14904 = vmatpush3.xpose.msra.mxu0 %v17518_v57  ;;  %14915 = vmatpush3.xpose.msra.mxu1 %v5405_v31  ;;  %v2272_v17 = vadd.f32 %v2271_v0, %v2182_v15  ;;  %v2196_v45 = vadd.f32 %v17592_v5, %v2104_v51  ;;  %v5878_v5 = vsel %vm423_vm0, %v1899_v20, 0 }
 0x22e   : > { %v14403_v19 = vpop.f32.mrf.mxu0  ;;  %v14412_v59 = vpop.f32.mrf.mxu1  ;;  %14893 = vmatprep.mubr.msk.f32.mxu1 %vm16171_vm1, %v20323_v38  ;;  %14905 = vmatprep.mubr.msk.f32.mxu0 %vm16171_vm1, %v20323_v38  ;;  %v17687_v48 = vand.u32 4294901760, %v5878_v5 }
 0x22f   : > { %14916 = vmatprep.subr.mxu1 %v20323_v38  ;;  %14929 = vmatprep.subr.mxu0 %v20323_v38  ;;  %v17674_v19 = vmul.f32 1e+08, %v6440_v10 }
 0x230   : > { %v2279_v50 = vpop.f32.mrf.mxu1  ;;  %v2367_v21 = vpop.f32.mrf.mxu0  ;;  %14894 = vmatmul.mubr.f32.gmra.mxu1 %v17379_v12  ;;  %14906 = vmatmul.mubr.f32.vlgmr.msra.gmra.mxu0 %v5385_v11  ;;  %v1207_v12 = vadd.f32 %v16752_v3, %v971_v61 }
 0x231   : > { %14917 = vmatpush3.xpose.msra.mxu1 %v5395_v22  ;;  %14930 = vmatpush3.xpose.msra.mxu0 %v17529_v60  ;;  %v2368_v28 = vadd.f32 %v2367_v21, %v2272_v17  ;;  %v17711_v17 = vsub.f32 %v5878_v5, %v17687_v48 }
 0x232   : > { %v14415_v42 = vpop.f32.mrf.mxu1  ;;  %v14427_v36 = vpop.f32.mrf.mxu0  ;;  %14896 = vmatprep.mubr.msk.f32.mxu1 %vm16171_vm1, %v20323_v38  ;;  %14908 = vmatprep.mubr.msk.f32.mxu0 %vm16171_vm1, %v20323_v38  ;;  %v1465_v18 = vadd.f32 %v20334_v41, %v1207_v12 }
 0x233   : > { %14918 = vmatprep.subr.mxu1 %v20323_v38  ;;  %14931 = vmatprep.subr.mxu0 %v20323_v38  ;;  %v17734_v6 = vand.u32 4294901760, %v17711_v17 }
 0x234   : > { %v2287_v23 = vpop.f32.mrf.mxu1  ;;  %v2373_v43 = vpop.f32.mrf.mxu0  ;;  %14897 = vmatmul.mubr.f32.gmra.mxu1 %v17361_v46  ;;  %14909 = vmatmul.mubr.f32.gmra.mxu0 %v5395_v22  ;;  %v2189_v46 = vadd.f32 %v2188_v27, %v2098_v55  ;;  %v1682_v1 = vadd.f32 %v17484_v53, %v1465_v18  ;;  %v1887_v53 = vadd.f32 %v17458_v37, %v1676_v40 }
 0x235   : > { %14919 = vmatpush3.xpose.msra.mxu1 %v5385_v11  ;;  %14932 = vmatpush3.xpose.msra.mxu0 %v17549_v16 }
 0x236   : > { %v14418_v3 = vpop.f32.mrf.mxu1  ;;  %v14430_v62 = vpop.f32.mrf.mxu0  ;;  %14911 = vmatprep.mubr.msk.f32.mxu0 %vm16171_vm1, %v20323_v38  ;;  %14920 = vmatprep.mubr.msk.f32.mxu1 %vm16171_vm1, %v20323_v38  ;;  %v2280_v34 = vadd.f32 %v2279_v50, %v2189_v46  ;;  %v1893_v0 = vadd.f32 %v17520_v25, %v1682_v1  ;;  %v5872_v25 = vsel %vm423_vm0, %v1887_v53, 0 }
 0x237   : > { %14933 = vmatprep.subr.mxu0 %v20323_v38  ;;  %14944 = vmatprep.subr.mxu1 %v20323_v38 }
 0x238   : > { %v2379_v63 = vpop.f32.mrf.mxu0  ;;  %v2453_v30 = vpop.f32.mrf.mxu1  ;;  %14912 = vmatmul.mubr.f32.gmra.mxu0 %v5405_v31  ;;  %14921 = vmatmul.mubr.f32.vlgmr.msra.gmra.mxu1 %v17518_v57  ;;  %v2374_v13 = vadd.f32 %v2373_v43, %v2280_v34  ;;  %v2288_v31 = vadd.f32 %v2287_v23, %v2196_v45  ;;  %v5875_v42 = vsel %vm423_vm0, %v1893_v0, 0  ;;  %v17700_v23 = vand.u32 4294901760, %v5872_v25 }
 0x239   : > { %v2454_v33 = vadd.f32 %v2453_v30, %v2368_v28  ;;  %14934 = vmatpush3.xpose.msra.mxu0 %v17542_v7  ;;  %14945 = vmatpush3.xpose.msra.mxu1 %v17507_v2  ;;  %v17713_v44 = vand.u32 4294901760, %v5875_v42  ;;  %v5971_v34 = vsub.f32 %v17711_v17, %v17734_v6 }
 0x23a   : > { %v14433_v39 = vpop.f32.mrf.mxu0  ;;  %v14442_v52 = vpop.f32.mrf.mxu1  ;;  %14923 = vmatprep.mubr.msk.f32.mxu1 %vm16171_vm1, %v20323_v38  ;;  %14935 = vmatprep.mubr.msk.f32.mxu0 %vm16171_vm1, %v20323_v38  ;;  %v17725_v28 = vsub.f32 %v5872_v25, %v17700_v23 }
 0x23b   : > { %v6444_v27 = vsub.f32 %v2454_v33, %v17630_v26  ;;  %14946 = vmatprep.subr.mxu1 %v20323_v38  ;;  %14959 = vmatprep.subr.mxu0 %v20323_v38  ;;  %v17737_v40 = vsub.f32 %v5875_v42, %v17713_v44  ;;  %v5972_v45 = vand.u32 4294901760, %v5971_v34 }
 0x23c   : > { %v2459_v47 = vpop.f32.mrf.mxu1  ;;  %v17658_v4 = vpop.f32.mrf.mxu0  ;;  %14924 = vmatmul.mubr.f32.gmra.mxu1 %v17526_v49  ;;  %14936 = vmatmul.mubr.f32.vlgmr.msra.gmra.mxu0 %v17542_v7  ;;  %v2380_v7 = vadd.f32 %v2379_v63, %v2288_v31  ;;  %v17746_v30 = vand.u32 4294901760, %v17725_v28 }
 0x23d   : > { %v2460_v24 = vadd.f32 %v2459_v47, %v2374_v13  ;;  %14947 = vmatpush3.xpose.msra.mxu1 %v17526_v49  ;;  %14960 = vmatpush3.xpose.msra.mxu0 %v17554_v29  ;;  %vm6468_vm3 = vcmp.ge.f32.partialorder %v6444_v27, 0.0  ;;  %v6492_v37 = vmul.f32 0.01, %v6444_v27  ;;  %v17758_v33 = vand.u32 4294901760, %v17737_v40 }
 0x23e   : > { %v14445_v56 = vpop.f32.mrf.mxu1  ;;  %v14457_v14 = vpop.f32.mrf.mxu0  ;;  %14926 = vmatprep.mubr.msk.f32.mxu1 %vm16171_vm1, %v20323_v38  ;;  %14938 = vmatprep.mubr.msk.f32.mxu0 %vm16171_vm1, %v20323_v38 }
 0x23f   : > { %v6445_v11 = vsub.f32 %v2460_v24, %v17653_v9  ;;  %14948 = vmatprep.subr.mxu1 %v20323_v38  ;;  %14961 = vmatprep.subr.mxu0 %v20323_v38  ;;  %v17678_v59 = vsel %vm6468_vm3, %v6444_v27, %v6492_v37  ;;  %v5961_v13 = vsub.f32 %v17737_v40, %v17758_v33 }
 0x240   : > { %v2465_v22 = vpop.f32.mrf.mxu1  ;;  %v17681_v50 = vpop.f32.mrf.mxu0  ;;  %14927 = vmatmul.mubr.f32.gmra.mxu1 %v17507_v2  ;;  %14939 = vmatmul.mubr.f32.gmra.mxu0 %v17549_v16  ;;  %v6541_v21 = vsel %vm6540_vm2, %v17678_v59, -inf }
 0x241   : > { %v2466_v8 = vadd.f32 %v2465_v22, %v2380_v7  ;;  %14949 = vmatpush3.xpose.msra.mxu1 %v17518_v57  ;;  %14962 = vmatpush3.xpose.msra.mxu0 %v17570_v58  ;;  %vm6469_vm4 = vcmp.ge.f32.partialorder %v6445_v11, 0.0  ;;  %v6493_v61 = vmul.f32 0.01, %v6445_v11  ;;  %v5962_v24 = vand.u32 4294901760, %v5961_v13 }
 0x242   : > { %6542 = vmax.xlane.f32.xlu0 %v6541_v21  ;;  %v14448_v36 = vpop.f32.mrf.mxu1  ;;  %v14460_v15 = vpop.f32.mrf.mxu0  ;;  %14941 = vmatprep.mubr.msk.f32.mxu0 %vm16171_vm1, %v20323_v38 }
 0x243   : > { %v6446_v16 = vsub.f32 %v2466_v8, %v17674_v19  ;;  %14950 = vmatprep.mubr.msk.f32.mxu1 %vm16171_vm1, %v20323_v38  ;;  %14963 = vmatprep.subr.mxu0 %v20323_v38  ;;  %v17698_v12 = vsel %vm6469_vm4, %v6445_v11, %v6493_v61 }
 0x244   : > { %v17702_v43 = vpop.f32.mrf.mxu0  ;;  %v17704_v32 = vpop.f32.mrf.mxu1  ;;  %14942 = vmatmul.mubr.f32.gmra.mxu0 %v17529_v60  ;;  %14951 = vmatmul.mubr.f32.vlgmr.msra.gmra.mxu1 %v17563_v54  ;;  %v6544_v55 = vsel %vm6540_vm2, %v17698_v12, -inf }
 0x245   : > { %14974 = vmatprep.subr.mxu1 %v20323_v38  ;;  %14964 = vmatpush3.xpose.msra.mxu0 %v17563_v54  ;;  %vm6470_vm5 = vcmp.ge.f32.partialorder %v6446_v16, 0.0  ;;  %v6494_v3 = vmul.f32 0.01, %v6446_v16  ;;  %v2659_v31 = vadd.f32 %v17704_v32, %v17658_v4 }
 0x246   : > { %14975 = vmatpush3.xpose.msra.mxu1 %v17507_v2  ;;  %6545 = vmax.xlane.f32.xlu0 %v6544_v55  ;;  %v14463_v60 = vpop.f32.mrf.mxu0  ;;  %v14472_v62 = vpop.f32.mrf.mxu1 }
 0x247   : > { %14953 = vmatprep.mubr.msk.f32.mxu1 %vm16171_vm1, %v20323_v38  ;;  %14965 = vmatprep.mubr.msk.f32.mxu0 %vm16171_vm1, %v20323_v38  ;;  %v17722_v46 = vsel %vm6470_vm5, %v6446_v16, %v6494_v3 }
 0x248   : > { %v17727_v41 = vpop.f32.mrf.mxu1  ;;  %v2748_v54 = vpop.f32.mrf.mxu0  ;;  %14954 = vmatmul.mubr.f32.gmra.mxu1 %v17570_v58  ;;  %14966 = vmatmul.mubr.f32.vlgmr.msra.gmra.mxu0 %v17518_v57  ;;  %v6547_v18 = vsel %vm6540_vm2, %v17722_v46, -inf }
 0x249   : > { %14976 = vmatprep.subr.mxu1 %v20323_v38  ;;  %14989 = vmatprep.subr.mxu0 %v20323_v38  ;;  %v2749_v0 = vadd.f32 %v2748_v54, %v2659_v31 }
 0x24a   : > { %14977 = vmatpush3.xpose.msra.mxu1 %v17526_v49  ;;  %14990 = vmatpush3.xpose.msra.mxu0 %v17687_v48  ;;  %v14475_v58 = vpop.f32.mrf.mxu1  ;;  %v14487_v63 = vpop.f32.mrf.mxu0 }
 0x24b   : > { %6548 = vmax.xlane.f32.xlu1 %v6547_v18  ;;  %14956 = vmatprep.mubr.msk.f32.mxu1 %vm16171_vm1, %v20323_v38 }
 0x24c   : > { %14968 = vmatprep.mubr.msk.f32.mxu0 %vm16171_vm1, %v20323_v38  ;;  %v17750_v35 = vpop.f32.mrf.mxu1  ;;  %v2755_v51 = vpop.f32.mrf.mxu0  ;;  %14957 = vmatmul.mubr.f32.gmra.mxu1 %v17554_v29  ;;  %v5951_v29 = vsub.f32 %v17725_v28, %v17746_v30 }
 0x24d   : > { %14969 = vmatmul.mubr.f32.gmra.mxu0 %v17526_v49  ;;  %14978 = vmatprep.subr.mxu1 %v20323_v38 }
 0x24e   : > { %14991 = vmatprep.subr.mxu0 %v20323_v38  ;;  %14979 = vmatpush3.xpose.msra.mxu1 %v17518_v57  ;;  %v14478_v1 = vpop.f32.mrf.mxu1  ;;  %v14490_v20 = vpop.f32.mrf.mxu0  ;;  %v5952_v47 = vand.u32 4294901760, %v5951_v29 }
 0x24f   : > { %14992 = vmatpush3.xpose.msra.mxu0 %v17713_v44  ;;  %14971 = vmatprep.mubr.msk.f32.mxu0 %vm16171_vm1, %v20323_v38 }
 0x250   : > { %14980 = vmatprep.mubr.msk.f32.mxu1 %vm16171_vm1, %v20323_v38  ;;  %v2762_v39 = vpop.f32.mrf.mxu0  ;;  %v2838_v52 = vpop.f32.mrf.mxu1  ;;  %14993 = vmatprep.subr.mxu0 %v20323_v38 }
 0x251   : > { %14972 = vmatmul.mubr.f32.gmra.mxu0 %v17507_v2  ;;  %14981 = vmatmul.mubr.f32.vlgmr.msra.gmra.mxu1 %v17518_v57  ;;  %v2839_v14 = vadd.f32 %v2838_v52, %v2749_v0  ;;  %v16150_v0 = vld [vmem:[%s16272_s26 + $0x8] sm:$0xff] }
 0x252   : > { %15004 = vmatprep.subr.mxu1 %v20323_v38  ;;  %v14493_v27 = vpop.f32.mrf.mxu0  ;;  %v14502_v53 = vpop.f32.mrf.mxu1  ;;  %14983 = vmatprep.mubr.msk.f32.mxu1 %vm16171_vm1, %v20323_v38 }
 0x253   : > { %14994 = vmatpush3.xpose.msra.mxu0 %v17700_v23  ;;  %15005 = vmatpush3.xpose.msra.mxu1 %v5972_v45 }
 0x254   : > { %14995 = vmatprep.mubr.msk.f32.mxu0 %vm16171_vm1, %v20323_v38  ;;  %v2846_v10 = vpop.f32.mrf.mxu1  ;;  %v2934_v57 = vpop.f32.mrf.mxu0  ;;  %15006 = vmatprep.subr.mxu1 %v20323_v38 }
 0x255   : > { %14984 = vmatmul.mubr.f32.gmra.mxu1 %v17526_v49  ;;  %15019 = vmatprep.subr.mxu0 %v20323_v38  ;;  %v2665_v49 = vadd.f32 %v17727_v41, %v17681_v50  ;;  %v2935_v22 = vadd.f32 %v2934_v57, %v2839_v14  ;;  %v16149_v57 = vld [vmem:[%s20241_s7] ss:$0 sm:$0xff] }
 0x256   : > { %14996 = vmatmul.mubr.f32.vlgmr.msra.gmra.mxu0 %v5952_v47  ;;  %v14505_v37 = vpop.f32.mrf.mxu1  ;;  %v14517_v5 = vpop.f32.mrf.mxu0  ;;  %14986 = vmatprep.mubr.msk.f32.mxu1 %vm16171_vm1, %v20323_v38 }
 0x257   : > { %15007 = vmatpush3.xpose.msra.mxu1 %v5962_v24  ;;  %15020 = vmatpush3.xpose.msra.mxu0 %v17711_v17  ;;  %v2756_v25 = vadd.f32 %v2755_v51, %v2665_v49  ;;  %v16151_v49 = vld [vmem:[%s16272_s26] sm:$0xff] }
 0x258   : > { %14998 = vmatprep.mubr.msk.f32.mxu0 %vm16171_vm1, %v20323_v38  ;;  %v2854_v56 = vpop.f32.mrf.mxu1  ;;  %v2940_v4 = vpop.f32.mrf.mxu0  ;;  %15008 = vmatprep.subr.mxu1 %v20323_v38  ;;  %v6863_v14 = vmul.f32 %v16151_v49, %v16149_v57 }
 0x259   : > { %14987 = vmatmul.mubr.f32.gmra.mxu1 %v17507_v2  ;;  %15021 = vmatprep.subr.mxu0 %v20323_v38  ;;  %v2671_v2 = vadd.f32 %v17750_v35, %v17702_v43  ;;  %v2847_v8 = vadd.f32 %v2846_v10, %v2756_v25  ;;  %v16148_v10 = vld [vmem:[%s16272_s26 + $0x10] sm:$0xff] }
 0x25a   : > { %14999 = vmatmul.mubr.f32.gmra.mxu0 %v5962_v24  ;;  %v14508_v7 = vpop.f32.mrf.mxu1  ;;  %v14520_v11 = vpop.f32.mrf.mxu0  ;;  %15010 = vmatprep.mubr.msk.f32.mxu1 %vm16171_vm1, %v20323_v38  ;;  %v6865_v31 = vmul.f32 %v16149_v57, %v16148_v10 }
 0x25b   : > { %15009 = vmatpush3.xpose.msra.mxu1 %v5952_v47  ;;  %15022 = vmatpush3.xpose.msra.mxu0 %v17737_v40  ;;  %v2763_v15 = vadd.f32 %v2762_v39, %v2671_v2  ;;  %v2941_v16 = vadd.f32 %v2940_v4, %v2847_v8  ;;  %v16152_v7 = vld [vmem:[%s20242_s8] ss:$0 sm:$0xff] }
 0x25c   : > { %15001 = vmatprep.mubr.msk.f32.mxu0 %vm16171_vm1, %v20323_v38  ;;  %v2946_v50 = vpop.f32.mrf.mxu0  ;;  %v3020_v21 = vpop.f32.mrf.mxu1  ;;  %15023 = vmatprep.subr.mxu0 %v20323_v38  ;;  %v17875_v11 = vadd.f32 %v16152_v7, %v6865_v31  ;;  %v17888_v2 = vadd.f32 %v16152_v7, %v6863_v14 }
 0x25d   : > { %v3021_v61 = vadd.f32 %v3020_v21, %v2935_v22  ;;  %15034 = vmatprep.subr.mxu1 %v20323_v38  ;;  %v2855_v3 = vadd.f32 %v2854_v56, %v2763_v15  ;;  %v6864_v56 = vmul.f32 %v16150_v0, %v16149_v57 }
 0x25e   : > { %15002 = vmatmul.mubr.f32.gmra.mxu0 %v5972_v45  ;;  %15011 = vmatmul.mubr.f32.vlgmr.msra.gmra.mxu1 %v17700_v23  ;;  %v14523_v42 = vpop.f32.mrf.mxu0  ;;  %v14532_v36 = vpop.f32.mrf.mxu1  ;;  %v17891_v8 = vand.u32 4294901760, %v17875_v11 }
 0x25f   : > { %v6447_v32 = vsub.f32 %v3021_v61, %v17630_v26  ;;  %15024 = vmatpush3.xpose.msra.mxu0 %v17725_v28  ;;  %15035 = vmatpush3.xpose.msra.mxu1 %v17687_v48  ;;  %v2947_v18 = vadd.f32 %v2946_v50, %v2855_v3  ;;  %v17881_v22 = vadd.f32 %v16152_v7, %v6864_v56 }
 0x260   : > { %15013 = vmatprep.mubr.msk.f32.mxu1 %vm16171_vm1, %v20323_v38  ;;  %15025 = vmatprep.mubr.msk.f32.mxu0 %vm16171_vm1, %v20323_v38  ;;  %v3026_v43 = vpop.f32.mrf.mxu1  ;;  %v17812_v55 = vpop.f32.mrf.mxu0 }
 0x261   : > { %v3027_v60 = vadd.f32 %v3026_v43, %v2941_v16  ;;  %15036 = vmatprep.subr.mxu1 %v20323_v38  ;;  %15049 = vmatprep.subr.mxu0 %v20323_v38  ;;  %vm6471_vm6 = vcmp.ge.f32.partialorder %v6447_v32, 0.0  ;;  %v6495_v62 = vmul.f32 0.01, %v6447_v32  ;;  %v17907_v16 = vand.u32 4294901760, %v17888_v2 }
 0x262   : > { %15014 = vmatmul.mubr.f32.gmra.mxu1 %v17713_v44  ;;  %15026 = vmatmul.mubr.f32.vlgmr.msra.gmra.mxu0 %v17725_v28  ;;  %v14535_v41 = vpop.f32.mrf.mxu1  ;;  %v14547_v54 = vpop.f32.mrf.mxu0 }
 0x263   : > { %v6448_v58 = vsub.f32 %v3027_v60, %v17653_v9  ;;  %15037 = vmatpush3.xpose.msra.mxu1 %v17713_v44  ;;  %15050 = vmatpush3.xpose.msra.mxu0 %v17734_v6  ;;  %v17821_v63 = vsel %vm6471_vm6, %v6447_v32, %v6495_v62 }
 0x264   : > { %15016 = vmatprep.mubr.msk.f32.mxu1 %vm16171_vm1, %v20323_v38  ;;  %15028 = vmatprep.mubr.msk.f32.mxu0 %vm16171_vm1, %v20323_v38  ;;  %v3032_v35 = vpop.f32.mrf.mxu1  ;;  %v17827_v51 = vpop.f32.mrf.mxu0  ;;  %v6550_v34 = vsel %vm6540_vm2, %v17821_v63, -inf }
 0x265   : > { %v3033_v28 = vadd.f32 %v3032_v35, %v2947_v18  ;;  %15038 = vmatprep.subr.mxu1 %v20323_v38  ;;  %15051 = vmatprep.subr.mxu0 %v20323_v38  ;;  %vm6472_vm7 = vcmp.ge.f32.partialorder %v6448_v58, 0.0  ;;  %v6496_v1 = vmul.f32 0.01, %v6448_v58 }
 0x266   : > { %15017 = vmatmul.mubr.f32.gmra.mxu1 %v17687_v48  ;;  %15029 = vmatmul.mubr.f32.gmra.mxu0 %v17737_v40  ;;  %v14538_v20 = vpop.f32.mrf.mxu1  ;;  %v14550_v29 = vpop.f32.mrf.mxu0 }
 0x267   : > { %v6449_v39 = vsub.f32 %v3033_v28, %v17674_v19  ;;  %15039 = vmatpush3.xpose.msra.mxu1 %v17700_v23  ;;  %15052 = vmatpush3.xpose.msra.mxu0 %v17758_v33  ;;  %v17838_v52 = vsel %vm6472_vm7, %v6448_v58, %v6496_v1 }
 0x268   : > { %6551 = vmax.xlane.f32.xlu1 %v6550_v34  ;;  %15031 = vmatprep.mubr.msk.f32.mxu0 %vm16171_vm1, %v20323_v38  ;;  %v17842_v45 = vpop.f32.mrf.mxu0  ;;  %v17844_v13 = vpop.f32.mrf.mxu1  ;;  %v6553_v40 = vsel %vm6540_vm2, %v17838_v52, -inf }
 0x269   : > { %15040 = vmatprep.mubr.msk.f32.mxu1 %vm16171_vm1, %v20323_v38  ;;  %15053 = vmatprep.subr.mxu0 %v20323_v38  ;;  %vm6473_vm8 = vcmp.ge.f32.partialorder %v6449_v39, 0.0  ;;  %v6497_v27 = vmul.f32 0.01, %v6449_v39  ;;  %v3226_v3 = vadd.f32 %v17844_v13, %v17812_v55 }
 0x26a   : > { %15032 = vmatmul.mubr.f32.gmra.mxu0 %v17711_v17  ;;  %15041 = vmatmul.mubr.f32.vlgmr.msra.gmra.mxu1 %v17746_v30  ;;  %v14553_v53 = vpop.f32.mrf.mxu0  ;;  %v14562_v47 = vpop.f32.mrf.mxu1 }
 0x26b   : > { %15064 = vmatprep.subr.mxu1 %v20323_v38  ;;  %15054 = vmatpush3.xpose.msra.mxu0 %v17746_v30  ;;  %v17859_v24 = vsel %vm6473_vm8, %v6449_v39, %v6497_v27 }
 0x26c   : > { %15065 = vmatpush3.xpose.msra.mxu1 %v17687_v48  ;;  %6554 = vmax.xlane.f32.xlu0 %v6553_v40  ;;  %v3231_v17 = vpop.f32.mrf.mxu1  ;;  %v3315_v37 = vpop.f32.mrf.mxu0  ;;  %v6556_v5 = vsel %vm6540_vm2, %v17859_v24, -inf }
 0x26d   : > { %15043 = vmatprep.mubr.msk.f32.mxu1 %vm16171_vm1, %v20323_v38  ;;  %15055 = vmatprep.mubr.msk.f32.mxu0 %vm16171_vm1, %v20323_v38  ;;  %v3232_v18 = vadd.f32 %v3231_v17, %v17827_v51 }
 0x26e   : > { %15044 = vmatmul.mubr.f32.gmra.mxu1 %v17758_v33  ;;  %15056 = vmatmul.mubr.f32.vlgmr.msra.gmra.mxu0 %v17700_v23  ;;  %v14565_v30 = vpop.f32.mrf.mxu1  ;;  %v14577_v4 = vpop.f32.mrf.mxu0 }
 0x26f   : > { %15066 = vmatprep.subr.mxu1 %v20323_v38  ;;  %6557 = vmax.xlane.f32.xlu1 %v6556_v5 }
 0x270   : > { %15067 = vmatpush3.xpose.msra.mxu1 %v17713_v44  ;;  %15046 = vmatprep.mubr.msk.f32.mxu1 %vm16171_vm1, %v20323_v38  ;;  %v3237_v33 = vpop.f32.mrf.mxu1  ;;  %v3322_v25 = vpop.f32.mrf.mxu0 }
 0x271   : > { %15058 = vmatprep.mubr.msk.f32.mxu0 %vm16171_vm1, %v20323_v38  ;;  %15068 = vmatprep.subr.mxu1 %v20323_v38  ;;  %v3323_v28 = vadd.f32 %v3322_v25, %v3232_v18 }
 0x272   : > { %15047 = vmatmul.mubr.f32.gmra.mxu1 %v17734_v6  ;;  %15059 = vmatmul.mubr.f32.gmra.mxu0 %v17713_v44  ;;  %v14568_v50 = vpop.f32.mrf.mxu1  ;;  %v14580_v21 = vpop.f32.mrf.mxu0  ;;  %v17900_v6 = vand.u32 4294901760, %v17881_v22 }
 0x273   : > { %15061 = vmatprep.mubr.msk.f32.mxu0 %vm16171_vm1, %v20323_v38  ;;  %15070 = vmatprep.mubr.msk.f32.mxu1 %vm16171_vm1, %v20323_v38 }
 0x274   : > { %15069 = vmatpush3.xpose.msra.mxu1 %v17700_v23  ;;  %v3329_v61 = vpop.f32.mrf.mxu0  ;;  %v3405_v42 = vpop.f32.mrf.mxu1  ;;  %15079 = vmatprep.subr.mxu0 %v20323_v38 }
 0x275   : > { %15094 = vmatprep.subr.mxu1 %v20323_v38  ;;  %15080 = vmatpush3.msra.mxu0 %v17891_v8 }
 0x276   : > { %15062 = vmatmul.mubr.f32.gmra.mxu0 %v17687_v48  ;;  %v14583_v36 = vpop.f32.mrf.mxu0  ;;  %v14592_v15 = vpop.f32.mrf.mxu1  ;;  %15081 = vmatprep.subr.mxu0 %v20323_v38 }
 0x277   : > { %15071 = vmatmul.mubr.f32.vlgmr.msra.gmra.mxu1 %v17700_v23  ;;  %15082 = vmatpush3.msra.mxu0 %v17900_v6  ;;  %v3316_v23 = vadd.f32 %v3315_v37, %v3226_v3 }
 0x278   : > { %15073 = vmatprep.mubr.msk.f32.mxu1 %vm16171_vm1, %v20323_v38  ;;  %v3413_v32 = vpop.f32.mrf.mxu1  ;;  %v3501_v43 = vpop.f32.mrf.mxu0  ;;  %15083 = vmatprep.subr.mxu0 %v20323_v38 }
 0x279   : > { %15084 = vmatpush3.msra.mxu0 %v17907_v16  ;;  %15085 = vmatprep.mubr.msk.f32.mxu0 %vm16171_vm1, %v20323_v38  ;;  %v3406_v55 = vadd.f32 %v3405_v42, %v3316_v23  ;;  %v3414_v29 = vadd.f32 %v3413_v32, %v3323_v28 }
 0x27a   : > { %v14595_v60 = vpop.f32.mrf.mxu1  ;;  %v14607_v62 = vpop.f32.mrf.mxu0  ;;  %15109 = vmatprep.subr.mxu0 %v20323_v38 }
 0x27b   : > { %15074 = vmatmul.mubr.f32.gmra.mxu1 %v17713_v44  ;;  %v3502_v34 = vadd.f32 %v3501_v43, %v3406_v55  ;;  %v3238_v44 = vadd.f32 %v3237_v33, %v17842_v45 }
 0x27c   : > { %15076 = vmatprep.mubr.msk.f32.mxu1 %vm16171_vm1, %v20323_v38  ;;  %v3421_v41 = vpop.f32.mrf.mxu1  ;;  %v3507_v54 = vpop.f32.mrf.mxu0 }
 0x27d   : > { %v3330_v27 = vadd.f32 %v3329_v61, %v3238_v44  ;;  %v3508_v51 = vadd.f32 %v3507_v54, %v3414_v29 }
 0x27e   : > { %v14598_v58 = vpop.f32.mrf.mxu1  ;;  %v14610_v35 = vpop.f32.mrf.mxu0 }
 0x27f   : > { %15077 = vmatmul.mubr.f32.gmra.mxu1 %v17687_v48  ;;  %v3422_v57 = vadd.f32 %v3421_v41, %v3330_v27 }
 0x280   : > { %v3513_v1 = vpop.f32.mrf.mxu0  ;;  %v3587_v20 = vpop.f32.mrf.mxu1  ;;  %15100 = vmatprep.mubr.msk.f32.mxu1 %vm16171_vm1, %v20323_v38 }
 0x281   : > { %v3588_v39 = vadd.f32 %v3587_v20, %v3502_v34  ;;  %v3514_v5 = vadd.f32 %v3513_v1, %v3422_v57 }
 0x282   : > { %v14613_v13 = vpop.f32.mrf.mxu0  ;;  %v14622_v40 = vpop.f32.mrf.mxu1 }
 0x283   : > { %v6450_v53 = vsub.f32 %v3588_v39, %v17630_v26 }
 0x284   : > { %v3593_v47 = vpop.f32.mrf.mxu1  ;;  %v3686_v10 = vpop.f32.mrf.mxu0 }
 0x285   : > { %v3594_v31 = vadd.f32 %v3593_v47, %v3508_v51  ;;  %vm6474_vm9 = vcmp.ge.f32.partialorder %v6450_v53, 0.0  ;;  %v6498_v48 = vmul.f32 0.01, %v6450_v53 }
 0x286   : > { %v14625_v17 = vpop.f32.mrf.mxu1  ;;  %v14637_v37 = vpop.f32.mrf.mxu0 }
 0x287   : > { %v6451_v0 = vsub.f32 %v3594_v31, %v17653_v9  ;;  %v17930_v45 = vsel %vm6474_vm9, %v6450_v53, %v6498_v48 }
 0x288   : > { %v3599_v56 = vpop.f32.mrf.mxu1  ;;  %v3696_v30 = vpop.f32.mrf.mxu0  ;;  %v6559_v4 = vsel %vm6540_vm2, %v17930_v45, -inf }
 0x289   : > { %v3600_v49 = vadd.f32 %v3599_v56, %v3514_v5  ;;  %6560 = vmax.xlane.f32.xlu0 %v6559_v4  ;;  %vm6475_vm10 = vcmp.ge.f32.partialorder %v6451_v0, 0.0  ;;  %v6499_v14 = vmul.f32 0.01, %v6451_v0 }
 0x28a   : > { %v14628_v7 = vpop.f32.mrf.mxu1  ;;  %v14640_v33 = vpop.f32.mrf.mxu0 }
 0x28b   : > { %v6452_v25 = vsub.f32 %v3600_v49, %v17674_v19  ;;  %v17935_v50 = vsel %vm6475_vm10, %v6451_v0, %v6499_v14 }
 0x28c   : > { %v3706_v21 = vpop.f32.mrf.mxu0  ;;  %v3792_v61 = vpop.f32.mrf.mxu1  ;;  %v6562_v42 = vsel %vm6540_vm2, %v17935_v50, -inf }
 0x28d   : > { %v3793_v36 = vadd.f32 %v3792_v61, %v3686_v10  ;;  %6563 = vmax.xlane.f32.xlu1 %v6562_v42  ;;  %vm6476_vm11 = vcmp.ge.f32.partialorder %v6452_v25, 0.0  ;;  %v6500_v15 = vmul.f32 0.01, %v6452_v25 }
 0x28e   : > { %v14643_v32 = vpop.f32.mrf.mxu0  ;;  %v14652_v43 = vpop.f32.mrf.mxu1 }
 0x28f   : > { %v17939_v3 = vsel %vm6476_vm11, %v6452_v25, %v6500_v15 }
 0x290   : > { %v3798_v60 = vpop.f32.mrf.mxu1  ;;  %v3882_v62 = vpop.f32.mrf.mxu0  ;;  %v6565_v23 = vsel %vm6540_vm2, %v17939_v3, -inf }
 0x291   : > { %v3799_v41 = vadd.f32 %v3798_v60, %v3696_v30  ;;  %v3883_v54 = vadd.f32 %v3882_v62, %v3793_v36  ;;  %6566 = vmax.xlane.f32.xlu0 %v6565_v23 }
 0x292   : > { %v14655_v18 = vpop.f32.mrf.mxu1  ;;  %v14667_v55 = vpop.f32.mrf.mxu0 }
 0x294   : > { %v3804_v58 = vpop.f32.mrf.mxu1  ;;  %v3889_v35 = vpop.f32.mrf.mxu0 }
 0x295   : > { %v3805_v28 = vadd.f32 %v3804_v58, %v3706_v21  ;;  %v3890_v34 = vadd.f32 %v3889_v35, %v3799_v41 }
 0x296   : > { %v14658_v1 = vpop.f32.mrf.mxu1  ;;  %v14670_v20 = vpop.f32.mrf.mxu0 }
 0x298   : > { %v3896_v44 = vpop.f32.mrf.mxu0  ;;  %v3972_v29 = vpop.f32.mrf.mxu1 }
 0x299   : > { %v17943_v39 = vadd.f32 %v3896_v44, %v3805_v28  ;;  %v3973_v13 = vadd.f32 %v3972_v29, %v3883_v54 }
 0x29a   : > { %v14673_v40 = vpop.f32.mrf.mxu0  ;;  %v14682_v27 = vpop.f32.mrf.mxu1 }
 0x29c   : > { %v3980_v51 = vpop.f32.mrf.mxu1  ;;  %v4068_v53 = vpop.f32.mrf.mxu0 }
 0x29d   : > { %v3981_v47 = vadd.f32 %v3980_v51, %v3890_v34  ;;  %v17945_v10 = vadd.f32 %v4068_v53, %v3973_v13 }
 0x29e   : > { %v14685_v57 = vpop.f32.mrf.mxu1  ;;  %v14697_v31 = vpop.f32.mrf.mxu0 }
 0x2a0   : > { %v17947_v48 = vpop.f32.mrf.mxu1  ;;  %v4074_v17 = vpop.f32.mrf.mxu0 }
 0x2a1   : > { %v17949_v37 = vadd.f32 %v4074_v17, %v3981_v47 }
 0x2a2   : > { %v14688_v5 = vpop.f32.mrf.mxu1  ;;  %v14700_v0 = vpop.f32.mrf.mxu0 }
 0x2a4   : > { %v17951_v56 = vpop.f32.mrf.mxu0  ;;  %v17953_v30 = vpop.f32.mrf.mxu1 }
 0x2a6   : > { %v14703_v4 = vpop.f32.mrf.mxu0  ;;  %v14712_v49 = vpop.f32.mrf.mxu1 }
 0x2a8   : > { %v17955_v14 = vpop.f32.mrf.mxu1  ;;  %v4253_v7 = vpop.f32.mrf.mxu0 }
 0x2aa   : > { %v14715_v33 = vpop.f32.mrf.mxu1  ;;  %v14727_v25 = vpop.f32.mrf.mxu0 }
 0x2ac   : > { %v17957_v21 = vpop.f32.mrf.mxu1  ;;  %v4263_v61 = vpop.f32.mrf.mxu0 }
 0x2ae   : > { %v14718_v42 = vpop.f32.mrf.mxu1  ;;  %v14730_v36 = vpop.f32.mrf.mxu0 }
 0x2b0   : > { %v4273_v15 = vpop.f32.mrf.mxu0  ;;  %v4359_v32 = vpop.f32.mrf.mxu1 }
 0x2b1   : > { %v4360_v43 = vadd.f32 %v4359_v32, %v4253_v7 }
 0x2b2   : > { %v14733_v60 = vpop.f32.mrf.mxu0  ;;  %v14742_v62 = vpop.f32.mrf.mxu1 }
 0x2b4   : > { %v4365_v23 = vpop.f32.mrf.mxu1  ;;  %v4449_v41 = vpop.f32.mrf.mxu0 }
 0x2b5   : > { %v4366_v54 = vadd.f32 %v4365_v23, %v4263_v61  ;;  %v4450_v18 = vadd.f32 %v4449_v41, %v4360_v43 }
 0x2b6   : > { %v14745_v55 = vpop.f32.mrf.mxu1  ;;  %v14757_v58 = vpop.f32.mrf.mxu0 }
 0x2b8   : > { %v4371_v35 = vpop.f32.mrf.mxu1  ;;  %v4456_v28 = vpop.f32.mrf.mxu0 }
 0x2b9   : > { %v4372_v34 = vadd.f32 %v4371_v35, %v4273_v15  ;;  %v4457_v1 = vadd.f32 %v4456_v28, %v4366_v54 }
 0x2ba   : > { %v14748_v20 = vpop.f32.mrf.mxu1  ;;  %v14760_v44 = vpop.f32.mrf.mxu0 }
 0x2bc   : > { %v4463_v29 = vpop.f32.mrf.mxu0  ;;  %v4539_v13 = vpop.f32.mrf.mxu1 }
 0x2bd   : > { %v4464_v40 = vadd.f32 %v4463_v29, %v4372_v34  ;;  %v4540_v27 = vadd.f32 %v4539_v13, %v4450_v18 }
 0x2be   : > { %v14763_v51 = vpop.f32.mrf.mxu0  ;;  %v14772_v53 = vpop.f32.mrf.mxu1 }
 0x2bf   : > { %v3989_v51 = vadd.f32 %v17947_v48, %v17943_v39  ;;  %v4161_v39 = vadd.f32 %v17955_v14, %v17949_v37 }
 0x2c0   : > { %v4547_v47 = vpop.f32.mrf.mxu1  ;;  %v4635_v57 = vpop.f32.mrf.mxu0 }
 0x2c1   : > { %v4548_v31 = vadd.f32 %v4547_v47, %v4457_v1  ;;  %v17959_v17 = vadd.f32 %v4635_v57, %v4540_v27 }
 0x2c2   : > { %v14775_v5 = vpop.f32.mrf.mxu1  ;;  %v14787_v0 = vpop.f32.mrf.mxu0 }
 0x2c4   : > { %v4555_v4 = vpop.f32.mrf.mxu1  ;;  %v4641_v49 = vpop.f32.mrf.mxu0 }
 0x2c5   : > { %v17961_v7 = vadd.f32 %v4555_v4, %v4464_v40  ;;  %v17963_v33 = vadd.f32 %v4641_v49, %v4548_v31  ;;  %v4081_v31 = vadd.f32 %v17951_v56, %v3989_v51 }
 0x2c6   : > { %v14778_v25 = vpop.f32.mrf.mxu1  ;;  %v14790_v61 = vpop.f32.mrf.mxu0 }
 0x2c7   : > { %v4167_v25 = vadd.f32 %v17957_v21, %v4081_v31  ;;  %v6454_v21 = vsub.f32 %v4161_v39, %v17653_v9 }
 0x2c8   : > { %v17965_v42 = vpop.f32.mrf.mxu0  ;;  %v17967_v36 = vpop.f32.mrf.mxu1 }
 0x2c9   : > { %vm6478_vm14 = vcmp.ge.f32.partialorder %v6454_v21, 0.0 }
 0x2ca   : > { %v14802_v15 = vpop.f32.mrf.mxu1  ;;  %v14793_v32 = vpop.f32.mrf.mxu0 }
 0x2cb   : > { %v6543_v43 = vpop.xlane.xlu0 %6542 }
 0x2cc   : > { %v6613_v60 = vsub.f32 %v17678_v59, %v6543_v43  ;;  %v17970_v62 = vpop.f32.mrf.mxu1  ;;  %v4820_v23 = vpop.f32.mrf.mxu0 }
 0x2ce   : > { %v6637_v41 = vmul.f32 1.442695, %v6613_v60  ;;  %v14805_v54 = vpop.f32.mrf.mxu1  ;;  %v14817_v18 = vpop.f32.mrf.mxu0  ;;  %v6455_v60 = vsub.f32 %v4167_v25, %v17674_v19 }
 0x2cf   : > { %v6546_v55 = vpop.xlane.xlu0 %6545 }
 0x2d0   : > { %16051 = vpow2.f32 %v6637_v41  ;;  %v6614_v58 = vsub.f32 %v17698_v12, %v6546_v55  ;;  %v17973_v35 = vpop.f32.mrf.mxu1  ;;  %v4830_v28 = vpop.f32.mrf.mxu0  ;;  %v4155_v12 = vadd.f32 %v17953_v30, %v17945_v10  ;;  %vm6479_vm13 = vcmp.ge.f32.partialorder %v6455_v60, 0.0 }
 0x2d2   : > { %v6639_v34 = vmul.f32 1.442695, %v6614_v58  ;;  %v14808_v1 = vpop.f32.mrf.mxu1  ;;  %v14820_v20 = vpop.f32.mrf.mxu0 }
 0x2d3   : > { %v6503_v20 = vmul.f32 0.01, %v6455_v60 }
 0x2d4   : > { %16053 = vpow2.f32 %v6639_v34  ;;  %v6549_v44 = vpop.xlane.xlu1 %6548  ;;  %v4840_v29 = vpop.f32.mrf.mxu0 }
 0x2d5   : > { %v6615_v59 = vsub.f32 %v17722_v46, %v6549_v44  ;;  %v4926_v13 = vpop.f32.mrf.mxu1  ;;  %v6453_v46 = vsub.f32 %v4155_v12, %v17630_v26 }
 0x2d6   : > { %v4927_v40 = vadd.f32 %v4926_v13, %v4820_v23  ;;  %v14823_v27 = vpop.f32.mrf.mxu0 }
 0x2d7   : > { %v6641_v53 = vmul.f32 1.442695, %v6615_v59  ;;  %v14832_v47 = vpop.f32.mrf.mxu1  ;;  %v6501_v41 = vmul.f32 0.01, %v6453_v46  ;;  %vm6477_vm12 = vcmp.ge.f32.partialorder %v6453_v46, 0.0 }
 0x2d8   : > { %v5016_v57 = vpop.f32.mrf.mxu0  ;;  %v18011_v47 = vsel %vm6479_vm13, %v6455_v60, %v6503_v20 }
 0x2d9   : > { %16055 = vpow2.f32 %v6641_v53  ;;  %v4932_v5 = vpop.f32.mrf.mxu1  ;;  %v5017_v0 = vadd.f32 %v5016_v57, %v4927_v40  ;;  %v17999_v1 = vsel %vm6477_vm12, %v6453_v46, %v6501_v41 }
 0x2da   : > { %v4933_v4 = vadd.f32 %v4932_v5, %v4830_v28  ;;  %v14847_v49 = vpop.f32.mrf.mxu0  ;;  %v6568_v27 = vsel %vm6540_vm2, %v17999_v1, -inf }
 0x2db   : > { %v14835_v61 = vpop.f32.mrf.mxu1 }
 0x2dc   : > { %v5023_v48 = vpop.f32.mrf.mxu0 }
 0x2dd   : > { %v17985_v10 = vpop.eup %16051  ;;  %v4938_v30 = vpop.f32.mrf.mxu1  ;;  %v5024_v15 = vadd.f32 %v5023_v48, %v4933_v4 }
 0x2de   : > { %v4939_v32 = vadd.f32 %v4938_v30, %v4840_v29  ;;  %v6685_v56 = vsel %vm6540_vm2, %v17985_v10, 0.0  ;;  %v14850_v43 = vpop.f32.mrf.mxu0  ;;  %v6502_v29 = vmul.f32 0.01, %v6454_v21 }
 0x2df   : > { %v14838_v23 = vpop.f32.mrf.mxu1  ;;  %6686 = vadd.xlane.f32.xlu1 %v6685_v56 }
 0x2e0   : > { %v5030_v54 = vpop.f32.mrf.mxu0  ;;  %v18015_v31 = vsel %vm6478_vm14, %v6454_v21, %v6502_v29  ;;  %v18046_v29 = vsub.f32 %v17888_v2, %v17907_v16 }
 0x2e1   : > { %v17991_v37 = vpop.eup %16053  ;;  %v17993_v14 = vadd.f32 %v5030_v54, %v4939_v32  ;;  %v5106_v18 = vpop.f32.mrf.mxu1  ;;  %v6571_v46 = vsel %vm6540_vm2, %v18015_v31, -inf }
 0x2e2   : > { %v17995_v55 = vadd.f32 %v5106_v18, %v5017_v0  ;;  %v6688_v58 = vsel %vm6540_vm2, %v17991_v37, 0.0  ;;  %v14853_v28 = vpop.f32.mrf.mxu0  ;;  %v6574_v0 = vsel %vm6540_vm2, %v18011_v47, -inf  ;;  %v18034_v18 = vsub.f32 %v17875_v11, %v17891_v8 }
 0x2e3   : > { %v14862_v34 = vpop.f32.mrf.mxu1  ;;  %6689 = vadd.xlane.f32.xlu0 %v6688_v58 }
 0x2e4   : > { %v18001_v44 = vpop.f32.mrf.mxu0  ;;  %v18038_v20 = vand.u32 4294901760, %v18034_v18 }
 0x2e5   : > { %v5114_v59 = vpop.f32.mrf.mxu1 }
 0x2e6   : > { %v18003_v13 = vpop.eup %16055  ;;  %v18005_v40 = vadd.f32 %v5114_v59, %v5024_v15  ;;  %v14877_v51 = vpop.f32.mrf.mxu0 }
 0x2e7   : > { %v14865_v12 = vpop.f32.mrf.mxu1  ;;  %v6691_v53 = vsel %vm6540_vm2, %v18003_v13, 0.0  ;;  %6569 = vmax.xlane.f32.xlu0 %v6568_v27 }
 0x2e8   : > { %6692 = vadd.xlane.f32.xlu1 %v6691_v53  ;;  %v18013_v57 = vpop.f32.mrf.mxu0 }
 0x2e9   : > { %v18017_v5 = vpop.f32.mrf.mxu1 }
 0x2ea   : > { %v14880_v4 = vpop.f32.mrf.mxu0 }
 0x2eb   : > { %v14868_v49 = vpop.f32.mrf.mxu1  ;;  %6575 = vmax.xlane.f32.xlu0 %v6574_v0 }
 0x2ec   : > { %6572 = vmax.xlane.f32.xlu1 %v6571_v46  ;;  %v18023_v25 = vpop.f32.mrf.mxu0 }
 0x2ed   : > { %v18025_v61 = vpop.f32.mrf.mxu1 }
 0x2ee   : > { %v14883_v39 = vpop.f32.mrf.mxu0 }
 0x2ef   : > { %v14892_v48 = vpop.f32.mrf.mxu1 }
 0x2f0   : > { %v5387_v30 = vpop.f32.mrf.mxu0  ;;  %v4722_v48 = vadd.f32 %v17967_v36, %v17959_v17  ;;  %v4728_v17 = vadd.f32 %v17970_v62, %v17963_v33 }
 0x2f1   : > { %v6552_v15 = vpop.xlane.xlu1 %6551  ;;  %v18027_v32 = vpop.f32.mrf.mxu1 }
 0x2f2   : > { %v6616_v56 = vsub.f32 %v17821_v63, %v6552_v15  ;;  %v14907_v43 = vpop.f32.mrf.mxu0  ;;  %v18042_v63 = vsub.f32 %v17881_v22, %v17900_v6  ;;  %v6457_v33 = vsub.f32 %v4728_v17, %v17653_v9 }
 0x2f3   : > { %v14895_v60 = vpop.f32.mrf.mxu1 }
 0x2f4   : > { %v6643_v23 = vmul.f32 1.442695, %v6616_v56  ;;  %v5397_v41 = vpop.f32.mrf.mxu0  ;;  %v18052_v53 = vand.u32 4294901760, %v18042_v63  ;;  %vm6481_vm3 = vcmp.ge.f32.partialorder %v6457_v33, 0.0 }
 0x2f5   : > { %v6555_v21 = vpop.xlane.xlu0 %6554  ;;  %v18030_v54 = vpop.f32.mrf.mxu1 }
 0x2f6   : > { %16057 = vpow2.f32 %v6643_v23  ;;  %v6617_v58 = vsub.f32 %v17838_v52, %v6555_v21  ;;  %v14910_v28 = vpop.f32.mrf.mxu0  ;;  %v7027_v52 = vsub.f32 %v18034_v18, %v18038_v20  ;;  %v7034_v2 = vsub.f32 %v18042_v63, %v18052_v53 }
 0x2f7   : > { %v14898_v34 = vpop.f32.mrf.mxu1  ;;  %v4648_v21 = vadd.f32 %v17965_v42, %v17961_v7  ;;  %v6456_v28 = vsub.f32 %v4722_v48, %v17630_v26 }
 0x2f8   : > { %v6645_v59 = vmul.f32 1.442695, %v6617_v58  ;;  %v6558_v27 = vpop.xlane.xlu1 %6557  ;;  %v5407_v11 = vpop.f32.mrf.mxu0  ;;  %v18054_v46 = vand.u32 4294901760, %v7027_v52 }
 0x2f9   : > { %v6618_v51 = vsub.f32 %v17859_v24, %v6558_v27  ;;  %v5493_v12 = vpop.f32.mrf.mxu1  ;;  %v7040_v24 = vand.u32 4294901760, %v18046_v29  ;;  %v4734_v34 = vadd.f32 %v17973_v35, %v4648_v21  ;;  %vm6480_vm15 = vcmp.ge.f32.partialorder %v6456_v28, 0.0 }
 0x2fa   : > { %16059 = vpow2.f32 %v6645_v59  ;;  %v5494_v0 = vadd.f32 %v5493_v12, %v5387_v30  ;;  %v14913_v22 = vpop.f32.mrf.mxu0  ;;  %15095 = vmatpush3.msra.mxu1 %v18054_v46  ;;  %v18062_v30 = vand.u32 4294901760, %v7034_v2 }
 0x2fb   : > { %v6647_v4 = vmul.f32 1.442695, %v6618_v51  ;;  %v14922_v49 = vpop.f32.mrf.mxu1  ;;  %15096 = vmatprep.subr.mxu1 %v20323_v38  ;;  %v7041_v23 = vsub.f32 %v18046_v29, %v7040_v24 }
 0x2fc   : > { %v5583_v39 = vpop.f32.mrf.mxu0  ;;  %15097 = vmatpush3.msra.mxu1 %v18062_v30 }
 0x2fd   : > { %16061 = vpow2.f32 %v6647_v4  ;;  %v5499_v15 = vpop.f32.mrf.mxu1  ;;  %v5584_v56 = vadd.f32 %v5583_v39, %v5494_v0  ;;  %15098 = vmatprep.subr.mxu1 %v20323_v38  ;;  %v6458_v0 = vsub.f32 %v4734_v34, %v17674_v19  ;;  %v6504_v4 = vmul.f32 0.01, %v6456_v28 }
 0x2fe   : > { %v5500_v43 = vadd.f32 %v5499_v15, %v5397_v41  ;;  %v14937_v60 = vpop.f32.mrf.mxu0  ;;  %v7042_v41 = vand.u32 4294901760, %v7041_v23 }
 0x2ff   : > { %v14925_v58 = vpop.f32.mrf.mxu1  ;;  %v18087_v21 = vsel %vm6480_vm15, %v6456_v28, %v6504_v4  ;;  %vm6482_vm4 = vcmp.ge.f32.partialorder %v6458_v0, 0.0 }
 0x300   : > { %v5590_v36 = vpop.f32.mrf.mxu0  ;;  %15099 = vmatpush3.msra.mxu1 %v7042_v41  ;;  %v6506_v58 = vmul.f32 0.01, %v6458_v0 }
 0x301   : > { %v5505_v59 = vpop.f32.mrf.mxu1  ;;  %v5591_v27 = vadd.f32 %v5590_v36, %v5500_v43  ;;  %15124 = vmatprep.subr.mxu1 %v20323_v38  ;;  %v6505_v43 = vmul.f32 0.01, %v6457_v33 }
 0x302   : > { %v5506_v51 = vadd.f32 %v5505_v59, %v5407_v11  ;;  %v14940_v12 = vpop.f32.mrf.mxu0  ;;  %v6577_v59 = vsel %vm6540_vm2, %v18087_v21, -inf }
 0x303   : > { %v18076_v7 = vpop.eup %16057  ;;  %v14928_v42 = vpop.f32.mrf.mxu1 }
 0x304   : > { %v6694_v62 = vsel %vm6540_vm2, %v18076_v7, 0.0  ;;  %v5597_v52 = vpop.f32.mrf.mxu0  ;;  %v18097_v42 = vsel %vm6482_vm4, %v6458_v0, %v6506_v58 }
 0x305   : > { %6695 = vadd.xlane.f32.xlu1 %v6694_v62  ;;  %v5598_v35 = vadd.f32 %v5597_v52, %v5506_v51  ;;  %v5673_v22 = vpop.f32.mrf.mxu1  ;;  %v18095_v51 = vsel %vm6481_vm3, %v6457_v33, %v6505_v43 }
 0x306   : > { %v5674_v11 = vadd.f32 %v5673_v22, %v5584_v56  ;;  %v14943_v49 = vpop.f32.mrf.mxu0  ;;  %v6580_v22 = vsel %vm6540_vm2, %v18095_v51, -inf }
 0x307   : > { %v18083_v2 = vpop.eup %16059  ;;  %v14952_v39 = vpop.f32.mrf.mxu1 }
 0x308   : > { %v6697_v48 = vsel %vm6540_vm2, %v18083_v2, 0.0  ;;  %v5769_v15 = vpop.f32.mrf.mxu0 }
 0x309   : > { %6698 = vadd.xlane.f32.xlu0 %v6697_v48  ;;  %v5681_v60 = vpop.f32.mrf.mxu1  ;;  %v5770_v23 = vadd.f32 %v5769_v15, %v5674_v11  ;;  %v6583_v11 = vsel %vm6540_vm2, %v18097_v42, -inf }
 0x30a   : > { %v18089_v17 = vpop.eup %16061  ;;  %v5682_v56 = vadd.f32 %v5681_v60, %v5591_v27  ;;  %v14967_v36 = vpop.f32.mrf.mxu0 }
 0x30b   : > { %v14955_v41 = vpop.f32.mrf.mxu1  ;;  %v6700_v34 = vsel %vm6540_vm2, %v18089_v17, 0.0 }
 0x30c   : > { %6701 = vadd.xlane.f32.xlu1 %v6700_v34 }
 0x30d   : > { %6578 = vmax.xlane.f32.xlu0 %v6577_v59  ;;  %v5689_v28 = vpop.f32.mrf.mxu1  ;;  %v5775_v12 = vpop.f32.mrf.mxu0 }
 0x30e   : > { %v5690_v62 = vadd.f32 %v5689_v28, %v5598_v35  ;;  %v5776_v52 = vadd.f32 %v5775_v12, %v5682_v56 }
 0x30f   : > { %v14958_v27 = vpop.f32.mrf.mxu1  ;;  %v14970_v4 = vpop.f32.mrf.mxu0 }
 0x310   : > { %6581 = vmax.xlane.f32.xlu1 %v6580_v22 }
 0x311   : > { %6584 = vmax.xlane.f32.xlu0 %v6583_v11  ;;  %v5781_v49 = vpop.f32.mrf.mxu0  ;;  %v5855_v33 = vpop.f32.mrf.mxu1 }
 0x312   : > { %v5782_v39 = vadd.f32 %v5781_v49, %v5690_v62  ;;  %v18103_v48 = vadd.f32 %v5855_v33, %v5770_v23  ;;  %v6561_v15 = vpop.xlane.xlu0 %6560  ;;  %v5123_v33 = vadd.f32 %v18017_v5, %v17993_v14 }
 0x313   : > { %v14982_v0 = vpop.f32.mrf.mxu1  ;;  %v6619_v35 = vsub.f32 %v17930_v45, %v6561_v15  ;;  %v14973_v43 = vpop.f32.mrf.mxu0 }
 0x314   : > { %v5215_v43 = vadd.f32 %v18023_v25, %v5123_v33 }
 0x315   : > { %v6649_v60 = vmul.f32 1.442695, %v6619_v35  ;;  %v5861_v58 = vpop.f32.mrf.mxu1  ;;  %v5209_v35 = vadd.f32 %v18013_v57, %v18005_v40 }
 0x316   : > { %v18106_v56 = vadd.f32 %v5861_v58, %v5776_v52  ;;  %v5954_v36 = vpop.f32.mrf.mxu0  ;;  %v6564_v41 = vpop.xlane.xlu1 %6563  ;;  %v5203_v52 = vadd.f32 %v18001_v44, %v17995_v55  ;;  %v5301_v58 = vadd.f32 %v18030_v54, %v5215_v43 }
 0x317   : > { %16063 = vpow2.f32 %v6649_v60  ;;  %v14985_v34 = vpop.f32.mrf.mxu1  ;;  %v6620_v59 = vsub.f32 %v17935_v50, %v6564_v41  ;;  %v5295_v44 = vadd.f32 %v18027_v32, %v5209_v35 }
 0x318   : > { %v14997_v28 = vpop.f32.mrf.mxu0  ;;  %v5289_v50 = vadd.f32 %v18025_v61, %v5203_v52  ;;  %v6461_v25 = vsub.f32 %v5301_v58, %v17674_v19 }
 0x319   : > { %v6651_v12 = vmul.f32 1.442695, %v6620_v59  ;;  %v5867_v62 = vpop.f32.mrf.mxu1  ;;  %v6460_v57 = vsub.f32 %v5295_v44, %v17653_v9 }
 0x31a   : > { %v18109_v23 = vadd.f32 %v5867_v62, %v5782_v39  ;;  %v5964_v27 = vpop.f32.mrf.mxu0  ;;  %v6567_v22 = vpop.xlane.xlu0 %6566  ;;  %v6459_v55 = vsub.f32 %v5289_v50, %v17630_v26  ;;  %v6509_v50 = vmul.f32 0.01, %v6461_v25  ;;  %vm6485_vm7 = vcmp.ge.f32.partialorder %v6461_v25, 0.0 }
 0x31b   : > { %16065 = vpow2.f32 %v6651_v12  ;;  %v14988_v45 = vpop.f32.mrf.mxu1  ;;  %v6621_v4 = vsub.f32 %v17939_v3, %v6567_v22  ;;  %v6508_v33 = vmul.f32 0.01, %v6460_v57  ;;  %vm6484_vm6 = vcmp.ge.f32.partialorder %v6460_v57, 0.0 }
 0x31c   : > { %v15000_v11 = vpop.f32.mrf.mxu0  ;;  %v6507_v32 = vmul.f32 0.01, %v6459_v55  ;;  %vm6483_vm5 = vcmp.ge.f32.partialorder %v6459_v55, 0.0 }
 0x31d   : > { %v6653_v49 = vmul.f32 1.442695, %v6621_v4 }
 0x31e   : > { %v5974_v15 = vpop.f32.mrf.mxu0  ;;  %v6060_v0 = vpop.f32.mrf.mxu1 }
 0x31f   : > { %16067 = vpow2.f32 %v6653_v49  ;;  %v6061_v39 = vadd.f32 %v6060_v0, %v5954_v36  ;;  %v18133_v49 = vsel %vm6483_vm5, %v6459_v55, %v6507_v32  ;;  %v18141_v55 = vsel %vm6484_vm6, %v6460_v57, %v6508_v33 }
 0x320   : > { %v15003_v3 = vpop.f32.mrf.mxu0  ;;  %v15012_v60 = vpop.f32.mrf.mxu1 }
 0x321   : > { %v6586_v60 = vsel %vm6540_vm2, %v18133_v49, -inf }
 0x322   : > { %v6066_v14 = vpop.f32.mrf.mxu1  ;;  %v6150_v5 = vpop.f32.mrf.mxu0 }
 0x323   : > { %v6067_v61 = vadd.f32 %v6066_v14, %v5964_v27  ;;  %v6151_v41 = vadd.f32 %v6150_v5, %v6061_v39  ;;  %v18143_v14 = vsel %vm6485_vm7, %v6461_v25, %v6509_v50 }
 0x324   : > { %v18123_v34 = vpop.eup %16063  ;;  %v15015_v36 = vpop.f32.mrf.mxu1 }
 0x325   : > { %v15027_v59 = vpop.f32.mrf.mxu0  ;;  %v6703_v40 = vsel %vm6540_vm2, %v18123_v34, 0.0 }
 0x326   : > { %v6072_v28 = vpop.f32.mrf.mxu1  ;;  %6704 = vadd.xlane.f32.xlu1 %v6703_v40  ;;  %v6589_v59 = vsel %vm6540_vm2, %v18141_v55, -inf  ;;  %v6592_v40 = vsel %vm6540_vm2, %v18143_v14, -inf }
 0x327   : > { %v6157_v12 = vpop.f32.mrf.mxu0  ;;  %v6073_v54 = vadd.f32 %v6072_v28, %v5974_v15 }
 0x328   : > { %v6158_v62 = vadd.f32 %v6157_v12, %v6067_v61  ;;  %v18129_v27 = vpop.eup %16065  ;;  %v15018_v22 = vpop.f32.mrf.mxu1 }
 0x329   : > { %v15030_v45 = vpop.f32.mrf.mxu0  ;;  %v6706_v4 = vsel %vm6540_vm2, %v18129_v27, 0.0 }
 0x32a   : > { %v6240_v11 = vpop.f32.mrf.mxu1  ;;  %6707 = vadd.xlane.f32.xlu0 %v6706_v4 }
 0x32b   : > { %v6164_v52 = vpop.f32.mrf.mxu0  ;;  %v6241_v39 = vadd.f32 %v6240_v11, %v6151_v41 }
 0x32c   : > { %v6165_v0 = vadd.f32 %v6164_v52, %v6073_v54  ;;  %v18135_v15 = vpop.eup %16067  ;;  %v15042_v35 = vpop.f32.mrf.mxu1 }
 0x32d   : > { %v15033_v43 = vpop.f32.mrf.mxu0  ;;  %v6709_v3 = vsel %vm6540_vm2, %v18135_v15, 0.0 }
 0x32e   : > { %v6248_v44 = vpop.f32.mrf.mxu1  ;;  %6710 = vadd.xlane.f32.xlu1 %v6709_v3  ;;  %6587 = vmax.xlane.f32.xlu0 %v6586_v60 }
 0x32f   : > { %v6336_v58 = vpop.f32.mrf.mxu0  ;;  %v6249_v5 = vadd.f32 %v6248_v44, %v6158_v62 }
 0x330   : > { %v6337_v61 = vadd.f32 %v6336_v58, %v6241_v39  ;;  %v15045_v41 = vpop.f32.mrf.mxu1 }
 0x331   : > { %v15057_v36 = vpop.f32.mrf.mxu0 }
 0x332   : > { %v6256_v28 = vpop.f32.mrf.mxu1  ;;  %6590 = vmax.xlane.f32.xlu1 %v6589_v59  ;;  %6593 = vmax.xlane.f32.xlu0 %v6592_v40 }
 0x333   : > { %v6342_v12 = vpop.f32.mrf.mxu0  ;;  %v6257_v32 = vadd.f32 %v6256_v28, %v6165_v0 }
 0x334   : > { %v6343_v54 = vadd.f32 %v6342_v12, %v6249_v5  ;;  %v15048_v57 = vpop.f32.mrf.mxu1 }
 0x335   : > { %v15060_v22 = vpop.f32.mrf.mxu0 }
 0x337   : > { %v6348_v25 = vpop.f32.mrf.mxu0  ;;  %v6422_v62 = vpop.f32.mrf.mxu1 }
 0x338   : > { %v6349_v45 = vadd.f32 %v6348_v25, %v6257_v32  ;;  %v18149_v4 = vadd.f32 %v6422_v62, %v6337_v61  ;;  %v18175_v25 = vld [vmem:[%s20235_s1 + $0x8] sm:$0xff] }
 0x339   : > { %v15063_v52 = vpop.f32.mrf.mxu0  ;;  %v15072_v11 = vpop.f32.mrf.mxu1  ;;  %v18181_v62 = vld [vmem:[%s20236_s2 + $0x8] sm:$0xff] }
 0x33b   : > { %v6428_v33 = vpop.f32.mrf.mxu1 }
 0x33c   : > { %v18151_v50 = vadd.f32 %v6428_v33, %v6343_v54  ;;  %v18162_v54 = vld [vmem:[%s20235_s1] sm:$0xff] }
 0x33d   : > { %v15075_v39 = vpop.f32.mrf.mxu1 }
 0x33f   : > { %v6434_v35 = vpop.f32.mrf.mxu1 }
 0x340   : > { %v18153_v43 = vadd.f32 %v6434_v35, %v6349_v45 }
 0x341   : > { %v15078_v3 = vpop.f32.mrf.mxu1 }
 0x368   : > { %v6687_v60 = vpop.xlane.xlu1 %6686 }
 0x369   : > { %16069 = vrcp.f32 %v6687_v60  ;;  %v6462_v60 = vsub.f32 %v18103_v48, %v17630_v26  ;;  %v18213_v48 = vld [vmem:[%s20236_s2 + $0x10] sm:$0xff] }
 0x36b   : > { %vm6486_vm8 = vcmp.ge.f32.partialorder %v6462_v60, 0.0 }
 0x36c   : > { %v6690_v0 = vpop.xlane.xlu0 %6689 }
 0x36d   : > { %16071 = vrcp.f32 %v6690_v0 }
 0x370   : > { %v6570_v44 = vpop.xlane.xlu0 %6569 }
 0x371   : > { %v6693_v58 = vpop.xlane.xlu1 %6692  ;;  %v6622_v5 = vsub.f32 %v17999_v1, %v6570_v44  ;;  %v18167_v1 = vld [vmem:[%s20236_s2] sm:$0xff] }
 0x372   : > { %16073 = vrcp.f32 %v6693_v58 }
 0x373   : > { %v6655_v61 = vmul.f32 1.442695, %v6622_v5 }
 0x374   : > { %v6576_v41 = vpop.xlane.xlu0 %6575 }
 0x375   : > { %16075 = vpow2.f32 %v6655_v61  ;;  %v6573_v36 = vpop.xlane.xlu1 %6572  ;;  %v6624_v59 = vsub.f32 %v18011_v47, %v6576_v41 }
 0x376   : > { %v16070_v40 = vpop.eup %16069  ;;  %v6623_v28 = vsub.f32 %v18015_v31, %v6573_v36 }
 0x377   : > { %v6781_v12 = vmul.f32 %v16070_v40, %v17985_v10  ;;  %v6659_v32 = vmul.f32 1.442695, %v6624_v59 }
 0x378   : > { %v6657_v57 = vmul.f32 1.442695, %v6623_v28  ;;  %v6510_v28 = vmul.f32 0.01, %v6462_v60 }
 0x379   : > { %v6805_v22 = vadd.f32 %v18167_v1, %v6781_v12  ;;  %16077 = vpow2.f32 %v6659_v32  ;;  %v6464_v32 = vsub.f32 %v18109_v23, %v17674_v19 }
 0x37a   : > { %v16072_v47 = vpop.eup %16071  ;;  %16079 = vpow2.f32 %v6657_v57 }
 0x37b   : > { %v6832_v31 = vmul.f32 %v18162_v54, %v6805_v22  ;;  %v6782_v10 = vmul.f32 %v16072_v47, %v17991_v37  ;;  %v6463_v37 = vsub.f32 %v18106_v56, %v17653_v9  ;;  %v18203_v56 = vld [vmem:[%s20235_s1 + $0x10] sm:$0xff]  ;;  %vm6488_vm10 = vcmp.ge.f32.partialorder %v6464_v32, 0.0 }
 0x37d   : > { %v6891_v45 = vsel %vm6540_vm2, %v6832_v31, 0  ;;  %v6806_v52 = vadd.f32 %v18181_v62, %v6782_v10  ;;  %v6511_v40 = vmul.f32 0.01, %v6463_v37  ;;  %vm6487_vm9 = vcmp.ge.f32.partialorder %v6463_v37, 0.0 }
 0x37e   : > { %v18184_v11 = vand.u32 4294901760, %v6891_v45 }
 0x37f   : > { %v16074_v33 = vpop.eup %16073  ;;  %v6833_v39 = vmul.f32 %v18175_v25, %v6806_v52  ;;  %v20336_v52 = vld [vmem:[#allocation2_spill] sm:$0xff] }
 0x380   : > { %v18190_v35 = vsub.f32 %v6891_v45, %v18184_v11  ;;  %15101 = vmatmul.mubr.f32.vlgmr.msra.gmra.mxu1 %v18184_v11  ;;  %v6783_v3 = vmul.f32 %v16074_v33, %v18003_v13  ;;  %v18244_v33 = vand.u32 4294901760, %v20336_v52 }
 0x381   : > { %15103 = vmatprep.mubr.msk.f32.mxu1 %vm16171_vm1, %v20323_v38  ;;  %v6894_v0 = vsel %vm6540_vm2, %v6833_v39, 0  ;;  %15125 = vmatpush3.msra.mxu1 %v17891_v8 }
 0x382   : > { %v18205_v44 = vpop.eup %16075  ;;  %v18207_v58 = vand.u32 4294901760, %v6894_v0  ;;  %v6969_v13 = vand.u32 4294901760, %v18190_v35  ;;  %v6807_v5 = vadd.f32 %v18213_v48, %v6783_v3  ;;  %15126 = vmatprep.subr.mxu1 %v20323_v38  ;;  %v18250_v3 = vsel %vm6487_vm9, %v6463_v37, %v6511_v40 }
 0x383   : > { %v6712_v61 = vsel %vm6540_vm2, %v18205_v44, 0.0  ;;  %15127 = vmatpush3.msra.mxu1 %v17900_v6  ;;  %v6598_v37 = vsel %vm6540_vm2, %v18250_v3, -inf  ;;  %v18271_v40 = vsub.f32 %v20336_v52, %v18244_v33 }
 0x384   : > { %v18221_v41 = vsub.f32 %v6894_v0, %v18207_v58  ;;  %15104 = vmatmul.mubr.f32.gmra.mxu1 %v18207_v58  ;;  %6713 = vadd.xlane.f32.xlu1 %v6712_v61  ;;  %v6970_v36 = vsub.f32 %v18190_v35, %v6969_v13  ;;  %v6834_v59 = vmul.f32 %v18203_v56, %v6807_v5 }
 0x385   : > { %15106 = vmatprep.mubr.msk.f32.mxu1 %vm16171_vm1, %v20323_v38  ;;  %15128 = vmatprep.subr.mxu1 %v20323_v38  ;;  %v18257_v5 = vsel %vm6486_vm8, %v6462_v60, %v6510_v28 }
 0x386   : > { %v18229_v12 = vpop.eup %16077  ;;  %v6971_v57 = vand.u32 4294901760, %v6970_v36  ;;  %v6897_v22 = vsel %vm6540_vm2, %v6834_v59, 0  ;;  %15129 = vmatpush3.msra.mxu1 %v17907_v16  ;;  %v6979_v47 = vand.u32 4294901760, %v18221_v41  ;;  %v6512_v36 = vmul.f32 0.01, %v6464_v32 }
 0x387   : > { %v18236_v31 = vpop.eup %16079  ;;  %v18238_v10 = vand.u32 4294901760, %v6897_v22  ;;  %v6718_v45 = vsel %vm6540_vm2, %v18229_v12, 0.0  ;;  %15154 = vmatprep.subr.mxu1 %v20323_v38  ;;  %v6595_v60 = vsel %vm6540_vm2, %v18257_v5, -inf }
 0x388   : > { %15086 = vmatmul.mubr.f32.vlgmr.msra.gmra.mxu0 %v6971_v57  ;;  %6719 = vadd.xlane.f32.xlu1 %v6718_v45  ;;  %v6715_v23 = vsel %vm6540_vm2, %v18236_v31, 0.0  ;;  %v6980_v39 = vsub.f32 %v18221_v41, %v6979_v47 }
 0x389   : > { %v18253_v0 = vsub.f32 %v6897_v22, %v18238_v10  ;;  %15107 = vmatmul.mubr.f32.gmra.mxu1 %v18238_v10  ;;  %6716 = vadd.xlane.f32.xlu0 %v6715_v23  ;;  %v18278_v22 = vsel %vm6488_vm10, %v6464_v32, %v6512_v36 }
 0x38a   : > { %15088 = vmatprep.mubr.msk.f32.mxu0 %vm16171_vm1, %v20323_v38  ;;  %15130 = vmatprep.mubr.msk.f32.mxu1 %vm16171_vm1, %v20323_v38  ;;  %v6981_v61 = vand.u32 4294901760, %v6980_v39  ;;  %v6601_v52 = vsel %vm6540_vm2, %v18278_v22, -inf }
 0x38b   : > { %15110 = vmatpush3.msra.mxu0 %v18034_v18  ;;  %v6989_v59 = vand.u32 4294901760, %v18253_v0 }
 0x38c   : > { %15089 = vmatmul.mubr.f32.gmra.mxu0 %v6981_v61  ;;  %6599 = vmax.xlane.f32.xlu1 %v6598_v37 }
 0x38d   : > { %15131 = vmatmul.mubr.f32.vlgmr.msra.gmra.mxu1 %v6969_v13  ;;  %6596 = vmax.xlane.f32.xlu0 %v6595_v60  ;;  %v6990_v28 = vsub.f32 %v18253_v0, %v6989_v59  ;;  %v18285_v13 = vand.u32 4294901760, %v18271_v40 }
 0x38e   : > { %v6696_v57 = vpop.xlane.xlu1 %6695  ;;  %15091 = vmatprep.mubr.msk.f32.mxu0 %vm16171_vm1, %v20323_v38  ;;  %15133 = vmatprep.mubr.msk.f32.mxu1 %vm16171_vm1, %v20323_v38 }
 0x38f   : > { %16081 = vrcp.f32 %v6696_v57  ;;  %v6991_v45 = vand.u32 4294901760, %v6990_v28  ;;  %15111 = vmatprep.subr.mxu0 %v20323_v38  ;;  %15155 = vmatpush3.msra.mxu1 %v17891_v8 }
 0x390   : > { %15112 = vmatpush3.msra.mxu0 %v18042_v63  ;;  %15156 = vmatprep.subr.mxu1 %v20323_v38 }
 0x391   : > { %15092 = vmatmul.mubr.f32.gmra.mxu0 %v6991_v45  ;;  %15134 = vmatmul.mubr.f32.gmra.mxu1 %v6979_v47  ;;  %v7594_v47 = vsub.f32 %v18271_v40, %v18285_v13 }
 0x392   : > { %v6699_v32 = vpop.xlane.xlu0 %6698  ;;  %6602 = vmax.xlane.f32.xlu0 %v6601_v52  ;;  %15113 = vmatprep.subr.mxu0 %v20323_v38  ;;  %v6465_v52 = vsub.f32 %v18149_v4, %v17630_v26 }
 0x393   : > { %16083 = vrcp.f32 %v6699_v32  ;;  %15114 = vmatpush3.msra.mxu0 %v18046_v29  ;;  %15115 = vmatprep.mubr.msk.f32.mxu0 %vm16171_vm1, %v20323_v38 }
 0x394   : > { %15136 = vmatprep.mubr.msk.f32.mxu1 %vm16171_vm1, %v20323_v38  ;;  %15157 = vmatpush3.msra.mxu1 %v17900_v6  ;;  %vm6489_vm11 = vcmp.ge.f32.partialorder %v6465_v52, 0.0 }
 0x395   : > { %15116 = vmatmul.mubr.f32.vlgmr.msra.gmra.mxu0 %v18190_v35  ;;  %15137 = vmatmul.mubr.f32.gmra.mxu1 %v6989_v59  ;;  %v6702_v23 = vpop.xlane.xlu1 %6701  ;;  %v18308_v35 = vand.u32 4294901760, %v7594_v47 }
 0x396   : > { %16085 = vrcp.f32 %v6702_v23  ;;  %v6579_v39 = vpop.xlane.xlu0 %6578  ;;  %15158 = vmatprep.subr.mxu1 %v20323_v38  ;;  %15118 = vmatprep.mubr.msk.f32.mxu0 %vm16171_vm1, %v20323_v38 }
 0x397   : > { %v6625_v61 = vsub.f32 %v18087_v21, %v6579_v39  ;;  %15159 = vmatpush3.msra.mxu1 %v17907_v16  ;;  %15160 = vmatprep.mubr.msk.f32.mxu1 %vm16171_vm1, %v20323_v38 }
 0x398   : > { %15139 = vmatprep.subr.mxu0 %v20323_v38  ;;  %15184 = vmatprep.subr.mxu1 %v20323_v38 }
 0x399   : > { %v6661_v36 = vmul.f32 1.442695, %v6625_v61  ;;  %15119 = vmatmul.mubr.f32.gmra.mxu0 %v18221_v41  ;;  %15161 = vmatmul.mubr.f32.vlgmr.msra.gmra.mxu1 %v18184_v11  ;;  %v6582_v37 = vpop.xlane.xlu1 %6581 }
 0x39a   : > { %v6626_v59 = vsub.f32 %v18095_v51, %v6582_v37  ;;  %v6585_v21 = vpop.xlane.xlu0 %6584  ;;  %15121 = vmatprep.mubr.msk.f32.mxu0 %vm16171_vm1, %v20323_v38  ;;  %15140 = vmatpush3.msra.mxu0 %v18038_v20 }
 0x39b   : > { %16087 = vpow2.f32 %v6661_v36  ;;  %v6627_v16 = vsub.f32 %v18097_v42, %v6585_v21  ;;  %15163 = vmatprep.mubr.msk.f32.mxu1 %vm16171_vm1, %v20323_v38  ;;  %15141 = vmatprep.subr.mxu0 %v20323_v38 }
 0x39c   : > { %v16082_v41 = vpop.eup %16081  ;;  %v6663_v60 = vmul.f32 1.442695, %v6626_v59  ;;  %15142 = vmatpush3.msra.mxu0 %v18052_v53  ;;  %15185 = vmatpush3.msra.mxu1 %v18308_v35 }
 0x39d   : > { %v6784_v51 = vmul.f32 %v16082_v41, %v18076_v7  ;;  %v6665_v28 = vmul.f32 1.442695, %v6627_v16  ;;  %15122 = vmatmul.mubr.f32.gmra.mxu0 %v18253_v0  ;;  %15164 = vmatmul.mubr.f32.gmra.mxu1 %v18207_v58 }
 0x39e   : > { %16089 = vpow2.f32 %v6663_v60  ;;  %15143 = vmatprep.subr.mxu0 %v20323_v38  ;;  %15145 = vmatprep.mubr.msk.f32.mxu0 %vm16171_vm1, %v20323_v38 }
 0x39f   : > { %v6808_v42 = vadd.f32 %v18167_v1, %v6784_v51  ;;  %16091 = vpow2.f32 %v6665_v28  ;;  %15144 = vmatpush3.msra.mxu0 %v7040_v24  ;;  %15166 = vmatprep.mubr.msk.f32.mxu1 %vm16171_vm1, %v20323_v38 }
 0x3a0   : > { %v16084_v7 = vpop.eup %16083  ;;  %15186 = vmatprep.subr.mxu1 %v20323_v38  ;;  %15169 = vmatprep.subr.mxu0 %v20323_v38 }
 0x3a1   : > { %v6835_v0 = vmul.f32 %v18162_v54, %v6808_v42  ;;  %15146 = vmatmul.mubr.f32.vlgmr.msra.gmra.mxu0 %v18184_v11  ;;  %15167 = vmatmul.mubr.f32.gmra.mxu1 %v18238_v10  ;;  %v6785_v57 = vmul.f32 %v16084_v7, %v18083_v2 }
 0x3a2   : > { %15187 = vmatpush3.msra.mxu1 %v18054_v46  ;;  %15148 = vmatprep.mubr.msk.f32.mxu0 %vm16171_vm1, %v20323_v38 }
 0x3a3   : > { %v16086_v29 = vpop.eup %16085  ;;  %15188 = vmatprep.subr.mxu1 %v20323_v38  ;;  %15190 = vmatprep.mubr.msk.f32.mxu1 %vm16171_vm1, %v20323_v38  ;;  %v7458_v24 = vsel %vm6540_vm2, %v6835_v0, 0  ;;  %v6809_v45 = vadd.f32 %v18181_v62, %v6785_v57  ;;  %v20337_v0 = vld [vmem:[#allocation3_spill] sm:$0xff] }
 0x3a4   : > { %15189 = vmatpush3.msra.mxu1 %v18062_v30  ;;  %v18348_v11 = vand.u32 4294901760, %v7458_v24  ;;  %15170 = vmatpush3.msra.mxu0 %v18244_v33  ;;  %v6786_v2 = vmul.f32 %v16086_v29, %v18089_v17  ;;  %v6466_v17 = vsub.f32 %v18151_v50, %v17653_v9  ;;  %v6513_v50 = vmul.f32 0.01, %v6465_v52 }
 0x3a5   : > { %15149 = vmatmul.mubr.f32.gmra.mxu0 %v18207_v58  ;;  %15171 = vmatprep.subr.mxu0 %v20323_v38  ;;  %v6836_v32 = vmul.f32 %v18175_v25, %v6809_v45  ;;  %v18417_v57 = vand.u32 4294901760, %v20337_v0 }
 0x3a6   : > { %v18358_v47 = vsub.f32 %v7458_v24, %v18348_v11  ;;  %15191 = vmatmul.mubr.f32.vlgmr.msra.gmra.mxu1 %v18348_v11  ;;  %15151 = vmatprep.mubr.msk.f32.mxu0 %vm16171_vm1, %v20323_v38  ;;  %v6810_v30 = vadd.f32 %v18213_v48, %v6786_v2  ;;  %v6514_v16 = vmul.f32 0.01, %v6466_v17  ;;  %vm6490_vm12 = vcmp.ge.f32.partialorder %v6466_v17, 0.0 }
 0x3a7   : > { %15193 = vmatprep.mubr.msk.f32.mxu1 %vm16171_vm1, %v20323_v38  ;;  %v7461_v26 = vsel %vm6540_vm2, %v6836_v32, 0  ;;  %15172 = vmatpush3.msra.mxu0 %v17891_v8  ;;  %v18412_v42 = vsel %vm6489_vm11, %v6465_v52, %v6513_v50  ;;  %v18438_v50 = vsub.f32 %v20337_v0, %v18417_v57 }
 0x3a8   : > { %v18370_v4 = vpop.eup %16087  ;;  %v18372_v58 = vand.u32 4294901760, %v7461_v26  ;;  %15173 = vmatprep.subr.mxu0 %v20323_v38  ;;  %15214 = vmatprep.subr.mxu1 %v20323_v38  ;;  %v7536_v23 = vand.u32 4294901760, %v18358_v47  ;;  %v6837_v39 = vmul.f32 %v18203_v56, %v6810_v30  ;;  %v18420_v24 = vsel %vm6490_vm12, %v6466_v17, %v6514_v16 }
 0x3a9   : > { %15152 = vmatmul.mubr.f32.gmra.mxu0 %v18238_v10  ;;  %v6721_v9 = vsel %vm6540_vm2, %v18370_v4, 0.0  ;;  %15215 = vmatpush3.msra.mxu1 %v18244_v33  ;;  %v6467_v10 = vsub.f32 %v18153_v43, %v17674_v19  ;;  %v6604_v32 = vsel %vm6540_vm2, %v18412_v42, -inf  ;;  %v6607_v17 = vsel %vm6540_vm2, %v18420_v24, -inf }
 0x3aa   : > { %v18383_v61 = vsub.f32 %v7461_v26, %v18372_v58  ;;  %15194 = vmatmul.mubr.f32.gmra.mxu1 %v18372_v58  ;;  %6722 = vadd.xlane.f32.xlu1 %v6721_v9  ;;  %v7537_v36 = vsub.f32 %v18358_v47, %v7536_v23  ;;  %v7464_v37 = vsel %vm6540_vm2, %v6837_v39, 0 }
 0x3ab   : > { %v18388_v59 = vpop.eup %16089  ;;  %15174 = vmatpush3.msra.mxu0 %v17900_v6  ;;  %15175 = vmatprep.mubr.msk.f32.mxu0 %vm16171_vm1, %v20323_v38  ;;  %v18395_v21 = vand.u32 4294901760, %v7464_v37  ;;  %v6515_v2 = vmul.f32 0.01, %v6467_v10  ;;  %vm6491_vm13 = vcmp.ge.f32.partialorder %v6467_v10, 0.0 }
 0x3ac   : > { %v18397_v41 = vpop.eup %16091  ;;  %15196 = vmatprep.mubr.msk.f32.mxu1 %vm16171_vm1, %v20323_v38  ;;  %v7538_v60 = vand.u32 4294901760, %v7537_v36  ;;  %15216 = vmatprep.subr.mxu1 %v20323_v38  ;;  %v6724_v51 = vsel %vm6540_vm2, %v18388_v59, 0.0  ;;  %v7546_v19 = vand.u32 4294901760, %v18383_v61 }
 0x3ad   : > { %v18406_v43 = vsub.f32 %v7464_v37, %v18395_v21  ;;  %v6727_v28 = vsel %vm6540_vm2, %v18397_v41, 0.0  ;;  %6725 = vadd.xlane.f32.xlu0 %v6724_v51  ;;  %15217 = vmatpush3.msra.mxu1 %v17891_v8  ;;  %v18434_v9 = vsel %vm6491_vm13, %v6467_v10, %v6515_v2  ;;  %v18450_v10 = vand.u32 4294901760, %v18438_v50 }
 0x3ae   : > { %15176 = vmatmul.mubr.f32.vlgmr.msra.gmra.mxu0 %v7538_v60  ;;  %15197 = vmatmul.mubr.f32.gmra.mxu1 %v18395_v21  ;;  %v7547_v7 = vsub.f32 %v18383_v61, %v7546_v19 }
 0x3af   : > { %6728 = vadd.xlane.f32.xlu1 %v6727_v28  ;;  %15218 = vmatprep.subr.mxu1 %v20323_v38  ;;  %v6705_v29 = vpop.xlane.xlu1 %6704  ;;  %v7556_v45 = vand.u32 4294901760, %v18406_v43  ;;  %v8161_v28 = vsub.f32 %v18438_v50, %v18450_v10 }
 0x3b0   : > { %15178 = vmatprep.mubr.msk.f32.mxu0 %vm16171_vm1, %v20323_v38  ;;  %15219 = vmatpush3.msra.mxu1 %v17900_v6  ;;  %v7548_v52 = vand.u32 4294901760, %v7547_v7  ;;  %16093 = vrcp.f32 %v6705_v29 }
 0x3b1   : > { %15220 = vmatprep.mubr.msk.f32.mxu1 %vm16171_vm1, %v20323_v38  ;;  %6605 = vmax.xlane.f32.xlu0 %v6604_v32  ;;  %v7557_v30 = vsub.f32 %v18406_v43, %v7556_v45 }
 0x3b2   : > { %15179 = vmatmul.mubr.f32.gmra.mxu0 %v7548_v52  ;;  %15221 = vmatmul.mubr.f32.vlgmr.msra.gmra.mxu1 %v7536_v23  ;;  %v6610_v23 = vsel %vm6540_vm2, %v18434_v9, -inf }
 0x3b3   : > { %6608 = vmax.xlane.f32.xlu1 %v6607_v17  ;;  %15199 = vmatprep.subr.mxu0 %v20323_v38  ;;  %v7558_v26 = vand.u32 4294901760, %v7557_v30  ;;  %v6708_v39 = vpop.xlane.xlu0 %6707 }
 0x3b4   : > { %15181 = vmatprep.mubr.msk.f32.mxu0 %vm16171_vm1, %v20323_v38  ;;  %15200 = vmatpush3.msra.mxu0 %v18271_v40  ;;  %16095 = vrcp.f32 %v6708_v39 }
 0x3b5   : > { %15223 = vmatprep.mubr.msk.f32.mxu1 %vm16171_vm1, %v20323_v38  ;;  %15201 = vmatprep.subr.mxu0 %v20323_v38 }
 0x3b6   : > { %15182 = vmatmul.mubr.f32.gmra.mxu0 %v7558_v26  ;;  %15224 = vmatmul.mubr.f32.gmra.mxu1 %v7546_v19 }
 0x3b7   : > { %6611 = vmax.xlane.f32.xlu0 %v6610_v23  ;;  %15202 = vmatpush3.msra.mxu0 %v18034_v18  ;;  %v6711_v36 = vpop.xlane.xlu1 %6710  ;;  %v6588_v37 = vpop.xlane.xlu0 %6587 }
 0x3b8   : > { %15203 = vmatprep.subr.mxu0 %v20323_v38  ;;  %15244 = vmatprep.subr.mxu1 %v20323_v38  ;;  %16097 = vrcp.f32 %v6711_v36  ;;  %v6628_v16 = vsub.f32 %v18133_v49, %v6588_v37 }
 0x3b9   : > { %15204 = vmatpush3.msra.mxu0 %v18042_v63  ;;  %15205 = vmatprep.mubr.msk.f32.mxu0 %vm16171_vm1, %v20323_v38 }
 0x3ba   : > { %15226 = vmatprep.mubr.msk.f32.mxu1 %vm16171_vm1, %v20323_v38  ;;  %15245 = vmatpush3.msra.mxu1 %v18244_v33  ;;  %v6667_v60 = vmul.f32 1.442695, %v6628_v16 }
 0x3bb   : > { %15206 = vmatmul.mubr.f32.vlgmr.msra.gmra.mxu0 %v18358_v47  ;;  %15227 = vmatmul.mubr.f32.gmra.mxu1 %v7556_v45  ;;  %v6591_v51 = vpop.xlane.xlu1 %6590  ;;  %v6594_v19 = vpop.xlane.xlu0 %6593 }
 0x3bc   : > { %15246 = vmatprep.subr.mxu1 %v20323_v38  ;;  %16099 = vpow2.f32 %v6667_v60  ;;  %15208 = vmatprep.mubr.msk.f32.mxu0 %vm16171_vm1, %v20323_v38  ;;  %v6629_v63 = vsub.f32 %v18141_v55, %v6591_v51  ;;  %v6630_v49 = vsub.f32 %v18143_v14, %v6594_v19  ;;  %v18477_v55 = vand.u32 4294901760, %v8161_v28 }
 0x3bd   : > { %v16094_v7 = vpop.eup %16093  ;;  %15247 = vmatpush3.msra.mxu1 %v17891_v8  ;;  %15250 = vmatprep.mubr.msk.f32.mxu1 %vm16171_vm1, %v20323_v38 }
 0x3be   : > { %v6787_v47 = vmul.f32 %v16094_v7, %v18123_v34  ;;  %15248 = vmatprep.subr.mxu1 %v20323_v38  ;;  %v6669_v0 = vmul.f32 1.442695, %v6629_v63  ;;  %v6671_v29 = vmul.f32 1.442695, %v6630_v49  ;;  %15229 = vmatprep.subr.mxu0 %v20323_v38 }
 0x3bf   : > { %15249 = vmatpush3.msra.mxu1 %v17900_v6  ;;  %15209 = vmatmul.mubr.f32.gmra.mxu0 %v18383_v61 }
 0x3c0   : > { %v6811_v14 = vadd.f32 %v18167_v1, %v6787_v47  ;;  %15251 = vmatmul.mubr.f32.vlgmr.msra.gmra.mxu1 %v18348_v11  ;;  %15211 = vmatprep.mubr.msk.f32.mxu0 %vm16171_vm1, %v20323_v38  ;;  %16101 = vpow2.f32 %v6669_v0 }
 0x3c1   : > { %v16096_v34 = vpop.eup %16095  ;;  %15230 = vmatpush3.msra.mxu0 %v18285_v13  ;;  %15253 = vmatprep.mubr.msk.f32.mxu1 %vm16171_vm1, %v20323_v38  ;;  %16103 = vpow2.f32 %v6671_v29  ;;  %v20338_v29 = vld [vmem:[#allocation4_spill] sm:$0xff] }
 0x3c2   : > { %v6838_v6 = vmul.f32 %v18162_v54, %v6811_v14  ;;  %15231 = vmatprep.subr.mxu0 %v20323_v38  ;;  %15274 = vmatprep.subr.mxu1 %v20323_v38  ;;  %v6788_v61 = vmul.f32 %v16096_v34, %v18129_v27  ;;  %v18576_v14 = vand.u32 4294901760, %v20338_v29 }
 0x3c3   : > { %15212 = vmatmul.mubr.f32.gmra.mxu0 %v18406_v43  ;;  %15275 = vmatpush3.msra.mxu1 %v18477_v55 }
 0x3c4   : > { %15254 = vmatmul.mubr.f32.gmra.mxu1 %v18372_v58  ;;  %15232 = vmatpush3.msra.mxu0 %v18038_v20  ;;  %v8025_v45 = vsel %vm6540_vm2, %v6838_v6, 0  ;;  %v6812_v2 = vadd.f32 %v18181_v62, %v6788_v61  ;;  %v18589_v6 = vsub.f32 %v20338_v29, %v18576_v14  ;;  %v20339_v29 = vld [vmem:[#allocation5_spill] sm:$0xff] }
 0x3c5   : > { %v16098_v52 = vpop.eup %16097  ;;  %15233 = vmatprep.subr.mxu0 %v20323_v38  ;;  %15235 = vmatprep.mubr.msk.f32.mxu0 %vm16171_vm1, %v20323_v38  ;;  %v18499_v32 = vand.u32 4294901760, %v8025_v45 }
 0x3c6   : > { %15234 = vmatpush3.msra.mxu0 %v18052_v53  ;;  %15256 = vmatprep.mubr.msk.f32.mxu1 %vm16171_vm1, %v20323_v38  ;;  %v6839_v27 = vmul.f32 %v18175_v25, %v6812_v2  ;;  %v6789_v43 = vmul.f32 %v16098_v52, %v18135_v15  ;;  %v18601_v61 = vand.u32 4294901760, %v18589_v6 }
 0x3c7   : > { %15236 = vmatmul.mubr.f32.vlgmr.msra.gmra.mxu0 %v18348_v11  ;;  %15276 = vmatprep.subr.mxu1 %v20323_v38  ;;  %v18509_v30 = vsub.f32 %v8025_v45, %v18499_v32 }
 0x3c8   : > { %15257 = vmatmul.mubr.f32.gmra.mxu1 %v18395_v21  ;;  %15238 = vmatprep.mubr.msk.f32.mxu0 %vm16171_vm1, %v20323_v38  ;;  %v8028_v53 = vsel %vm6540_vm2, %v6839_v27, 0  ;;  %v6813_v17 = vadd.f32 %v18213_v48, %v6789_v43 }
 0x3c9   : > { %v18516_v26 = vpop.eup %16099  ;;  %15277 = vmatpush3.msra.mxu1 %v18308_v35  ;;  %15280 = vmatprep.mubr.msk.f32.mxu1 %vm16171_vm1, %v20323_v38  ;;  %v18521_v15 = vand.u32 4294901760, %v8028_v53  ;;  %v8103_v11 = vand.u32 4294901760, %v18509_v30 }
 0x3ca   : > { %15278 = vmatprep.subr.mxu1 %v20323_v38  ;;  %15259 = vmatprep.subr.mxu0 %v20323_v38  ;;  %v6840_v39 = vmul.f32 %v18203_v56, %v6813_v17  ;;  %v6730_v36 = vsel %vm6540_vm2, %v18516_v26, 0.0 }
 0x3cb   : > { %15279 = vmatpush3.msra.mxu1 %v18054_v46  ;;  %15239 = vmatmul.mubr.f32.gmra.mxu0 %v18372_v58  ;;  %v18530_v23 = vsub.f32 %v8028_v53, %v18521_v15  ;;  %v8104_v37 = vsub.f32 %v18509_v30, %v8103_v11 }
 0x3cc   : > { %15281 = vmatmul.mubr.f32.vlgmr.msra.gmra.mxu1 %v18499_v32  ;;  %15241 = vmatprep.mubr.msk.f32.mxu0 %vm16171_vm1, %v20323_v38  ;;  %v8031_v16 = vsel %vm6540_vm2, %v6840_v39, 0 }
 0x3cd   : > { %15260 = vmatpush3.msra.mxu0 %v18417_v57  ;;  %15283 = vmatprep.mubr.msk.f32.mxu1 %vm16171_vm1, %v20323_v38  ;;  %v18542_v46 = vand.u32 4294901760, %v8031_v16  ;;  %v8113_v58 = vand.u32 4294901760, %v18530_v23  ;;  %v18545_v60 = vpop.eup %16101  ;;  %v8105_v19 = vand.u32 4294901760, %v8104_v37 }
 0x3ce   : > { %15261 = vmatprep.subr.mxu0 %v20323_v38  ;;  %6731 = vadd.xlane.f32.xlu1 %v6730_v36  ;;  %v18548_v51 = vpop.eup %16103  ;;  %v6733_v7 = vsel %vm6540_vm2, %v18545_v60, 0.0 }
 0x3cf   : > { %15242 = vmatmul.mubr.f32.gmra.mxu0 %v18395_v21  ;;  %15304 = vmatprep.subr.mxu1 %v20323_v38  ;;  %v8122_v28 = vsub.f32 %v8031_v16, %v18542_v46  ;;  %v8114_v63 = vsub.f32 %v18530_v23, %v8113_v58  ;;  %v6736_v21 = vsel %vm6540_vm2, %v18548_v51, 0.0 }
 0x3d0   : > { %15284 = vmatmul.mubr.f32.gmra.mxu1 %v18521_v15  ;;  %15262 = vmatpush3.msra.mxu0 %v18244_v33 }
 0x3d1   : > { %15263 = vmatprep.subr.mxu0 %v20323_v38  ;;  %15265 = vmatprep.mubr.msk.f32.mxu0 %vm16171_vm1, %v20323_v38  ;;  %v8123_v49 = vand.u32 4294901760, %v8122_v28  ;;  %v8115_v47 = vand.u32 4294901760, %v8114_v63 }
 0x3d2   : > { %15264 = vmatpush3.msra.mxu0 %v17891_v8  ;;  %15286 = vmatprep.mubr.msk.f32.mxu1 %vm16171_vm1, %v20323_v38 }
 0x3d3   : > { %15305 = vmatpush3.msra.mxu1 %v18417_v57  ;;  %15266 = vmatmul.mubr.f32.vlgmr.msra.gmra.mxu0 %v8105_v19  ;;  %v8124_v0 = vsub.f32 %v8122_v28, %v8123_v49 }
 0x3d4   : > { %15287 = vmatmul.mubr.f32.gmra.mxu1 %v18542_v46  ;;  %15306 = vmatprep.subr.mxu1 %v20323_v38 }
 0x3d5   : > { %6737 = vadd.xlane.f32.xlu1 %v6736_v21  ;;  %6734 = vadd.xlane.f32.xlu0 %v6733_v7  ;;  %v8125_v34 = vand.u32 4294901760, %v8124_v0 }
 0x3d6   : > { %15307 = vmatpush3.msra.mxu1 %v18244_v33  ;;  %15268 = vmatprep.mubr.msk.f32.mxu0 %vm16171_vm1, %v20323_v38 }
 0x3d7   : > { %15308 = vmatprep.subr.mxu1 %v20323_v38  ;;  %15310 = vmatprep.mubr.msk.f32.mxu1 %vm16171_vm1, %v20323_v38 }
 0x3d8   : > { %15309 = vmatpush3.msra.mxu1 %v17891_v8  ;;  %15269 = vmatmul.mubr.f32.gmra.mxu0 %v8115_v47 }
 0x3d9   : > { %15311 = vmatmul.mubr.f32.vlgmr.msra.gmra.mxu1 %v8103_v11  ;;  %15289 = vmatprep.subr.mxu0 %v20323_v38 }
 0x3da   : > { %15271 = vmatprep.mubr.msk.f32.mxu0 %vm16171_vm1, %v20323_v38  ;;  %15290 = vmatpush3.msra.mxu0 %v18438_v50 }
 0x3db   : > { %15313 = vmatprep.mubr.msk.f32.mxu1 %vm16171_vm1, %v20323_v38  ;;  %15291 = vmatprep.subr.mxu0 %v20323_v38 }
 0x3dc   : > { %15272 = vmatmul.mubr.f32.gmra.mxu0 %v8125_v34  ;;  %15334 = vmatprep.subr.mxu1 %v20323_v38  ;;  %v18708_v34 = vand.u32 4294901760, %v20339_v29 }
 0x3dd   : > { %15314 = vmatmul.mubr.f32.gmra.mxu1 %v8113_v58  ;;  %15292 = vmatpush3.msra.mxu0 %v18271_v40 }
 0x3de   : > { %15293 = vmatprep.subr.mxu0 %v20323_v38  ;;  %15295 = vmatprep.mubr.msk.f32.mxu0 %vm16171_vm1, %v20323_v38 }
 0x3df   : > { %15294 = vmatpush3.msra.mxu0 %v18034_v18  ;;  %15316 = vmatprep.mubr.msk.f32.mxu1 %vm16171_vm1, %v20323_v38  ;;  %v8728_v18 = vsub.f32 %v18589_v6, %v18601_v61 }
 0x3e0   : > { %15335 = vmatpush3.msra.mxu1 %v18417_v57  ;;  %15296 = vmatmul.mubr.f32.vlgmr.msra.gmra.mxu0 %v18509_v30 }
 0x3e1   : > { %15317 = vmatmul.mubr.f32.gmra.mxu1 %v8123_v49  ;;  %15336 = vmatprep.subr.mxu1 %v20323_v38 }
 0x3e2   : > { %15337 = vmatpush3.msra.mxu1 %v18244_v33  ;;  %15298 = vmatprep.mubr.msk.f32.mxu0 %vm16171_vm1, %v20323_v38 }
 0x3e3   : > { %15338 = vmatprep.subr.mxu1 %v20323_v38  ;;  %15340 = vmatprep.mubr.msk.f32.mxu1 %vm16171_vm1, %v20323_v38 }
 0x3e4   : > { %15339 = vmatpush3.msra.mxu1 %v17891_v8  ;;  %15299 = vmatmul.mubr.f32.gmra.mxu0 %v18530_v23  ;;  %v18623_v8 = vand.u32 4294901760, %v8728_v18 }
 0x3e5   : > { %15341 = vmatmul.mubr.f32.vlgmr.msra.gmra.mxu1 %v18499_v32  ;;  %15319 = vmatprep.subr.mxu0 %v20323_v38 }
 0x3e6   : > { %15301 = vmatprep.mubr.msk.f32.mxu0 %vm16171_vm1, %v20323_v38  ;;  %15320 = vmatpush3.msra.mxu0 %v18450_v10 }
 0x3e7   : > { %15343 = vmatprep.mubr.msk.f32.mxu1 %vm16171_vm1, %v20323_v38  ;;  %15321 = vmatprep.subr.mxu0 %v20323_v38 }
 0x3e8   : > { %15302 = vmatmul.mubr.f32.gmra.mxu0 %v8122_v28  ;;  %15364 = vmatprep.subr.mxu1 %v20323_v38 }
 0x3e9   : > { %15344 = vmatmul.mubr.f32.gmra.mxu1 %v18521_v15  ;;  %15322 = vmatpush3.msra.mxu0 %v18285_v13 }
 0x3ea   : > { %15323 = vmatprep.subr.mxu0 %v20323_v38  ;;  %15325 = vmatprep.mubr.msk.f32.mxu0 %vm16171_vm1, %v20323_v38 }
 0x3eb   : > { %15324 = vmatpush3.msra.mxu0 %v18038_v20  ;;  %15346 = vmatprep.mubr.msk.f32.mxu1 %vm16171_vm1, %v20323_v38 }
 0x3ec   : > { %15326 = vmatmul.mubr.f32.vlgmr.msra.gmra.mxu0 %v18499_v32  ;;  %15365 = vmatpush3.msra.mxu1 %v18623_v8 }
 0x3ed   : > { %15347 = vmatmul.mubr.f32.gmra.mxu1 %v18542_v46  ;;  %15328 = vmatprep.mubr.msk.f32.mxu0 %vm16171_vm1, %v20323_v38 }
 0x3ee   : > { %15366 = vmatprep.subr.mxu1 %v20323_v38  ;;  %15370 = vmatprep.mubr.msk.f32.mxu1 %vm16171_vm1, %v20323_v38 }
 0x3ef   : > { %15367 = vmatpush3.msra.mxu1 %v18477_v55  ;;  %15349 = vmatprep.subr.mxu0 %v20323_v38 }
 0x3f0   : > { %15329 = vmatmul.mubr.f32.gmra.mxu0 %v18521_v15  ;;  %15368 = vmatprep.subr.mxu1 %v20323_v38 }
 0x3f1   : > { %15331 = vmatprep.mubr.msk.f32.mxu0 %vm16171_vm1, %v20323_v38  ;;  %15369 = vmatpush3.msra.mxu1 %v18308_v35 }
 0x3f2   : > { %15350 = vmatpush3.msra.mxu0 %v18576_v14  ;;  %15394 = vmatprep.subr.mxu1 %v20323_v38 }
 0x3f3   : > { %15351 = vmatprep.subr.mxu0 %v20323_v38 }
 0x3f4   : > { %15332 = vmatmul.mubr.f32.gmra.mxu0 %v18542_v46 }
 0x3f5   : > { %15352 = vmatpush3.msra.mxu0 %v18417_v57  ;;  %15355 = vmatprep.mubr.msk.f32.mxu0 %vm16171_vm1, %v20323_v38 }
 0x3f6   : > { %15353 = vmatprep.subr.mxu0 %v20323_v38 }
 0x3f7   : > { %15354 = vmatpush3.msra.mxu0 %v18244_v33 }
 0x3f8   : > { %15379 = vmatprep.subr.mxu0 %v20323_v38 }
 0x40d   : > { %v6714_v20 = vpop.xlane.xlu1 %6713 }
 0x40e   : > { %16105 = vrcp.f32 %v6714_v20 }
 0x411   : > { %v6720_v35 = vpop.xlane.xlu1 %6719 }
 0x412   : > { %16107 = vrcp.f32 %v6720_v35  ;;  %v6717_v45 = vpop.xlane.xlu0 %6716 }
 0x413   : > { %16109 = vrcp.f32 %v6717_v45 }
 0x415   : > { %v6600_v2 = vpop.xlane.xlu1 %6599 }
 0x416   : > { %v6597_v52 = vpop.xlane.xlu0 %6596  ;;  %v6632_v32 = vsub.f32 %v18250_v3, %v6600_v2 }
 0x417   : > { %v6631_v27 = vsub.f32 %v18257_v5, %v6597_v52 }
 0x418   : > { %v6675_v43 = vmul.f32 1.442695, %v6632_v32 }
 0x419   : > { %v6673_v30 = vmul.f32 1.442695, %v6631_v27  ;;  %v18725_v27 = vsub.f32 %v20339_v29, %v18708_v34  ;;  %v18827_v29 = vld [vmem:[%s20236_s2 + $0x10] sm:$0xff] }
 0x41a   : > { %16111 = vpow2.f32 %v6675_v43 }
 0x41b   : > { %v16106_v53 = vpop.eup %16105  ;;  %16113 = vpow2.f32 %v6673_v30  ;;  %v6603_v17 = vpop.xlane.xlu0 %6602 }
 0x41c   : > { %v6790_v15 = vmul.f32 %v16106_v53, %v18205_v44  ;;  %v6633_v11 = vsub.f32 %v18278_v22, %v6603_v17  ;;  %v18735_v53 = vand.u32 4294901760, %v18725_v27 }
 0x41e   : > { %v6814_v39 = vadd.f32 %v18167_v1, %v6790_v15  ;;  %v6677_v23 = vmul.f32 1.442695, %v6633_v11  ;;  %v9295_v11 = vsub.f32 %v18725_v27, %v18735_v53 }
 0x41f   : > { %v16108_v36 = vpop.eup %16107 }
 0x420   : > { %v16110_v37 = vpop.eup %16109  ;;  %v6841_v16 = vmul.f32 %v18162_v54, %v6814_v39  ;;  %16115 = vpow2.f32 %v6677_v23  ;;  %v6792_v3 = vmul.f32 %v16108_v36, %v18229_v12  ;;  %v18757_v36 = vand.u32 4294901760, %v9295_v11 }
 0x421   : > { %v6791_v5 = vmul.f32 %v16110_v37, %v18236_v31 }
 0x422   : > { %v8592_v46 = vsel %vm6540_vm2, %v6841_v16, 0  ;;  %v6816_v58 = vadd.f32 %v18213_v48, %v6792_v3 }
 0x423   : > { %v18668_v19 = vand.u32 4294901760, %v8592_v46  ;;  %v6815_v44 = vadd.f32 %v18181_v62, %v6791_v5 }
 0x424   : > { %v6843_v1 = vmul.f32 %v18203_v56, %v6816_v58 }
 0x425   : > { %v18673_v22 = vsub.f32 %v8592_v46, %v18668_v19  ;;  %15371 = vmatmul.mubr.f32.vlgmr.msra.gmra.mxu1 %v18668_v19  ;;  %v6842_v54 = vmul.f32 %v18175_v25, %v6815_v44 }
 0x426   : > { %15373 = vmatprep.mubr.msk.f32.mxu1 %vm16171_vm1, %v20323_v38  ;;  %15395 = vmatpush3.msra.mxu1 %v18576_v14  ;;  %v8598_v48 = vsel %vm6540_vm2, %v6843_v1, 0 }
 0x427   : > { %v18681_v12 = vpop.eup %16111  ;;  %v8595_v62 = vsel %vm6540_vm2, %v6842_v54, 0  ;;  %v8670_v56 = vand.u32 4294901760, %v18673_v22  ;;  %v18685_v31 = vand.u32 4294901760, %v8598_v48  ;;  %15396 = vmatprep.subr.mxu1 %v20323_v38 }
 0x428   : > { %v18688_v28 = vpop.eup %16113  ;;  %v18690_v25 = vand.u32 4294901760, %v8595_v62  ;;  %v6742_v63 = vsel %vm6540_vm2, %v18681_v12, 0.0  ;;  %15397 = vmatpush3.msra.mxu1 %v18417_v57 }
 0x429   : > { %6743 = vadd.xlane.f32.xlu1 %v6742_v63  ;;  %v6739_v49 = vsel %vm6540_vm2, %v18688_v28, 0.0  ;;  %v8671_v21 = vsub.f32 %v18673_v22, %v8670_v56  ;;  %v18699_v7 = vsub.f32 %v8598_v48, %v18685_v31  ;;  %15398 = vmatprep.subr.mxu1 %v20323_v38  ;;  %v18793_v48 = vld [vmem:[%s20235_s1] sm:$0xff] }
 0x42a   : > { %v8679_v47 = vsub.f32 %v8595_v62, %v18690_v25  ;;  %15374 = vmatmul.mubr.f32.gmra.mxu1 %v18690_v25  ;;  %6740 = vadd.xlane.f32.xlu0 %v6739_v49 }
 0x42b   : > { %15376 = vmatprep.mubr.msk.f32.mxu1 %vm16171_vm1, %v20323_v38  ;;  %v8672_v0 = vand.u32 4294901760, %v8671_v21  ;;  %15399 = vmatpush3.msra.mxu1 %v18244_v33  ;;  %v8690_v20 = vand.u32 4294901760, %v18699_v7 }
 0x42c   : > { %v8680_v18 = vand.u32 4294901760, %v8679_v47  ;;  %15424 = vmatprep.subr.mxu1 %v20323_v38 }
 0x42d   : > { %v18712_v35 = vpop.eup %16115  ;;  %15356 = vmatmul.mubr.f32.vlgmr.msra.gmra.mxu0 %v8672_v0  ;;  %v8691_v32 = vsub.f32 %v18699_v7, %v8690_v20  ;;  %v18820_v0 = vld [vmem:[%s20235_s1 + $0x8] sm:$0xff] }
 0x42e   : > { %15377 = vmatmul.mubr.f32.gmra.mxu1 %v18685_v31  ;;  %v6745_v45 = vsel %vm6540_vm2, %v18712_v35, 0.0  ;;  %15358 = vmatprep.mubr.msk.f32.mxu0 %vm16171_vm1, %v20323_v38  ;;  %v8681_v2 = vsub.f32 %v8679_v47, %v8680_v18 }
 0x42f   : > { %6746 = vadd.xlane.f32.xlu0 %v6745_v45  ;;  %15400 = vmatprep.mubr.msk.f32.mxu1 %vm16171_vm1, %v20323_v38  ;;  %v8692_v30 = vand.u32 4294901760, %v8691_v32  ;;  %v18841_v32 = vld [vmem:[%s20235_s1 + $0x10] sm:$0xff] }
 0x430   : > { %v8682_v52 = vand.u32 4294901760, %v8681_v2  ;;  %15380 = vmatpush3.msra.mxu0 %v18589_v6 }
 0x431   : > { %15381 = vmatprep.subr.mxu0 %v20323_v38 }
 0x432   : > { %15359 = vmatmul.mubr.f32.gmra.mxu0 %v8682_v52  ;;  %15401 = vmatmul.mubr.f32.vlgmr.msra.gmra.mxu1 %v8670_v56 }
 0x433   : > { %v6723_v43 = vpop.xlane.xlu1 %6722  ;;  %15361 = vmatprep.mubr.msk.f32.mxu0 %vm16171_vm1, %v20323_v38  ;;  %15403 = vmatprep.mubr.msk.f32.mxu1 %vm16171_vm1, %v20323_v38 }
 0x434   : > { %16117 = vrcp.f32 %v6723_v43  ;;  %15382 = vmatpush3.msra.mxu0 %v18438_v50  ;;  %15425 = vmatpush3.msra.mxu1 %v18576_v14 }
 0x435   : > { %15383 = vmatprep.subr.mxu0 %v20323_v38  ;;  %15426 = vmatprep.subr.mxu1 %v20323_v38 }
 0x436   : > { %15362 = vmatmul.mubr.f32.gmra.mxu0 %v8692_v30  ;;  %15404 = vmatmul.mubr.f32.gmra.mxu1 %v8680_v18  ;;  %v6726_v17 = vpop.xlane.xlu0 %6725 }
 0x437   : > { %16119 = vrcp.f32 %v6726_v17  ;;  %15384 = vmatpush3.msra.mxu0 %v18271_v40  ;;  %15385 = vmatprep.mubr.msk.f32.mxu0 %vm16171_vm1, %v20323_v38 }
 0x438   : > { %v6729_v15 = vpop.xlane.xlu1 %6728  ;;  %15406 = vmatprep.mubr.msk.f32.mxu1 %vm16171_vm1, %v20323_v38  ;;  %15427 = vmatpush3.msra.mxu1 %v18417_v57 }
 0x439   : > { %16121 = vrcp.f32 %v6729_v15  ;;  %15428 = vmatprep.subr.mxu1 %v20323_v38  ;;  %15409 = vmatprep.subr.mxu0 %v20323_v38 }
 0x43a   : > { %15386 = vmatmul.mubr.f32.vlgmr.msra.gmra.mxu0 %v18673_v22  ;;  %15407 = vmatmul.mubr.f32.gmra.mxu1 %v8690_v20  ;;  %v6606_v40 = vpop.xlane.xlu0 %6605 }
 0x43b   : > { %v6634_v39 = vsub.f32 %v18412_v42, %v6606_v40  ;;  %15388 = vmatprep.mubr.msk.f32.mxu0 %vm16171_vm1, %v20323_v38  ;;  %15429 = vmatpush3.msra.mxu1 %v18244_v33 }
 0x43c   : > { %v6609_v23 = vpop.xlane.xlu1 %6608  ;;  %15430 = vmatprep.mubr.msk.f32.mxu1 %vm16171_vm1, %v20323_v38  ;;  %15410 = vmatpush3.msra.mxu0 %v18601_v61 }
 0x43d   : > { %v6679_v37 = vmul.f32 1.442695, %v6634_v39  ;;  %v6635_v16 = vsub.f32 %v18420_v24, %v6609_v23  ;;  %15411 = vmatprep.subr.mxu0 %v20323_v38  ;;  %15454 = vmatprep.subr.mxu1 %v20323_v38 }
 0x43e   : > { %15389 = vmatmul.mubr.f32.gmra.mxu0 %v8679_v47  ;;  %15431 = vmatmul.mubr.f32.vlgmr.msra.gmra.mxu1 %v18668_v19 }
 0x43f   : > { %16123 = vpow2.f32 %v6679_v37  ;;  %v6681_v33 = vmul.f32 1.442695, %v6635_v16  ;;  %15391 = vmatprep.mubr.msk.f32.mxu0 %vm16171_vm1, %v20323_v38  ;;  %15433 = vmatprep.mubr.msk.f32.mxu1 %vm16171_vm1, %v20323_v38 }
 0x440   : > { %v6612_v42 = vpop.xlane.xlu0 %6611  ;;  %v7079_v3 = vpop.f32.mrf.mxu1  ;;  %15412 = vmatpush3.msra.mxu0 %v18450_v10  ;;  %15455 = vmatpush3.msra.mxu1 %v18757_v36 }
 0x441   : > { %v16118_v24 = vpop.eup %16117  ;;  %16125 = vpow2.f32 %v6681_v33  ;;  %v6636_v5 = vsub.f32 %v18434_v9, %v6612_v42  ;;  %15413 = vmatprep.subr.mxu0 %v20323_v38  ;;  %15456 = vmatprep.subr.mxu1 %v20323_v38  ;;  %v18781_v9 = vld [vmem:[%s20236_s2] sm:$0xff] }
 0x442   : > { %v6793_v46 = vmul.f32 %v16118_v24, %v18370_v4  ;;  %15392 = vmatmul.mubr.f32.gmra.mxu0 %v18699_v7  ;;  %15434 = vmatmul.mubr.f32.gmra.mxu1 %v18690_v25  ;;  %v15102_v58 = vpop.f32.mrf.mxu1 }
 0x443   : > { %v6683_v44 = vmul.f32 1.442695, %v6636_v5  ;;  %15414 = vmatpush3.msra.mxu0 %v18285_v13  ;;  %15415 = vmatprep.mubr.msk.f32.mxu0 %vm16171_vm1, %v20323_v38 }
 0x444   : > { %v16120_v1 = vpop.eup %16119  ;;  %v6817_v22 = vadd.f32 %v18781_v9, %v6793_v46  ;;  %v7085_v4 = vpop.f32.mrf.mxu1  ;;  %15436 = vmatprep.mubr.msk.f32.mxu1 %vm16171_vm1, %v20323_v38  ;;  %15457 = vmatpush3.msra.mxu1 %v18623_v8 }
 0x445   : > { %16127 = vpow2.f32 %v6683_v44  ;;  %15458 = vmatprep.subr.mxu1 %v20323_v38  ;;  %15439 = vmatprep.subr.mxu0 %v20323_v38  ;;  %v6794_v13 = vmul.f32 %v16120_v1, %v18388_v59  ;;  %v18804_v59 = vld [vmem:[%s20236_s2 + $0x8] sm:$0xff] }
 0x446   : > { %v16122_v54 = vpop.eup %16121  ;;  %v6844_v62 = vmul.f32 %v18793_v48, %v6817_v22  ;;  %15416 = vmatmul.mubr.f32.vlgmr.msra.gmra.mxu0 %v18668_v19  ;;  %15437 = vmatmul.mubr.f32.gmra.mxu1 %v18685_v31  ;;  %v15105_v56 = vpop.f32.mrf.mxu1 }
 0x447   : > { %15418 = vmatprep.mubr.msk.f32.mxu0 %vm16171_vm1, %v20323_v38  ;;  %15459 = vmatpush3.msra.mxu1 %v18477_v55  ;;  %v6818_v63 = vadd.f32 %v18804_v59, %v6794_v13  ;;  %v6795_v49 = vmul.f32 %v16122_v54, %v18397_v41 }
 0x448   : > { %v6973_v21 = vpop.f32.mrf.mxu0  ;;  %15460 = vmatprep.mubr.msk.f32.mxu1 %vm16171_vm1, %v20323_v38  ;;  %v9159_v19 = vsel %vm6540_vm2, %v6844_v62, 0  ;;  %15440 = vmatpush3.msra.mxu0 %v18708_v34 }
 0x449   : > { %v18812_v7 = vadd.f32 %v7079_v3, %v6973_v21  ;;  %v7091_v55 = vpop.f32.mrf.mxu1  ;;  %v18814_v47 = vand.u32 4294901760, %v9159_v19  ;;  %15441 = vmatprep.subr.mxu0 %v20323_v38  ;;  %v6845_v41 = vmul.f32 %v18820_v0, %v6818_v63  ;;  %15484 = vmatprep.subr.mxu1 %v20323_v38  ;;  %v6819_v18 = vadd.f32 %v18827_v29, %v6795_v49 }
 0x44a   : > { %15419 = vmatmul.mubr.f32.gmra.mxu0 %v18690_v25  ;;  %v15087_v20 = vpop.f32.mrf.mxu0 }
 0x44b   : > { %v18832_v45 = vsub.f32 %v9159_v19, %v18814_v47  ;;  %15461 = vmatmul.mubr.f32.vlgmr.msra.gmra.mxu1 %v18814_v47  ;;  %v15108_v2 = vpop.f32.mrf.mxu1  ;;  %15421 = vmatprep.mubr.msk.f32.mxu0 %vm16171_vm1, %v20323_v38  ;;  %v9162_v52 = vsel %vm6540_vm2, %v6845_v41, 0  ;;  %v6846_v43 = vmul.f32 %v18841_v32, %v6819_v18 }
 0x44c   : > { %v18844_v25 = vpop.eup %16123  ;;  %v6983_v30 = vpop.f32.mrf.mxu0  ;;  %15463 = vmatprep.mubr.msk.f32.mxu1 %vm16171_vm1, %v20323_v38  ;;  %v18848_v17 = vand.u32 4294901760, %v9162_v52  ;;  %15442 = vmatpush3.msra.mxu0 %v18576_v14 }
 0x44d   : > { %v18851_v15 = vadd.f32 %v7085_v4, %v6983_v30  ;;  %v7259_v11 = vpop.f32.mrf.mxu1  ;;  %v6748_v40 = vsel %vm6540_vm2, %v18844_v25, 0.0  ;;  %15443 = vmatprep.subr.mxu0 %v20323_v38  ;;  %15485 = vmatpush3.msra.mxu1 %v18708_v34  ;;  %v9237_v39 = vand.u32 4294901760, %v18832_v45  ;;  %v9165_v23 = vsel %vm6540_vm2, %v6846_v43, 0  ;;  %v20340_v4 = vld [vmem:[#allocation6_spill] sm:$0xff] }
 0x44e   : > { %v18859_v37 = vpop.eup %16125  ;;  %15422 = vmatmul.mubr.f32.gmra.mxu0 %v18685_v31  ;;  %v18863_v16 = vsub.f32 %v9162_v52, %v18848_v17  ;;  %6749 = vadd.xlane.f32.xlu1 %v6748_v40  ;;  %v15090_v33 = vpop.f32.mrf.mxu0  ;;  %v18865_v42 = vand.u32 4294901760, %v9165_v23  ;;  %v18884_v13 = vand.u32 4294901760, %v20340_v4 }
 0x44f   : > { %15464 = vmatmul.mubr.f32.gmra.mxu1 %v18848_v17  ;;  %v6751_v3 = vsel %vm6540_vm2, %v18859_v37, 0.0  ;;  %v15132_v24 = vpop.f32.mrf.mxu1  ;;  %15444 = vmatpush3.msra.mxu0 %v18417_v57  ;;  %v9238_v5 = vsub.f32 %v18832_v45, %v9237_v39 }
 0x450   : > { %6752 = vadd.xlane.f32.xlu0 %v6751_v3  ;;  %15445 = vmatprep.mubr.msk.f32.mxu0 %vm16171_vm1, %v20323_v38  ;;  %v18875_v31 = vsub.f32 %v9165_v23, %v18865_v42  ;;  %v9247_v46 = vand.u32 4294901760, %v18863_v16  ;;  %v18904_v2 = vsub.f32 %v20340_v4, %v18884_v13 }
 0x451   : > { %v6993_v58 = vpop.f32.mrf.mxu0  ;;  %v7267_v44 = vpop.f32.mrf.mxu1  ;;  %15466 = vmatprep.mubr.msk.f32.mxu1 %vm16171_vm1, %v20323_v38  ;;  %v9239_v1 = vand.u32 4294901760, %v9238_v5  ;;  %15486 = vmatprep.subr.mxu1 %v20323_v38 }
 0x452   : > { %v18881_v22 = vpop.eup %16127  ;;  %v7092_v54 = vadd.f32 %v7091_v55, %v6993_v58  ;;  %15487 = vmatpush3.msra.mxu1 %v18576_v14  ;;  %v9248_v62 = vsub.f32 %v18863_v16, %v9247_v46  ;;  %15469 = vmatprep.subr.mxu0 %v20323_v38  ;;  %v9257_v56 = vand.u32 4294901760, %v18875_v31  ;;  %v18916_v3 = vand.u32 4294901760, %v18904_v2 }
 0x453   : > { %15446 = vmatmul.mubr.f32.vlgmr.msra.gmra.mxu0 %v9239_v1  ;;  %15467 = vmatmul.mubr.f32.gmra.mxu1 %v18865_v42  ;;  %v6754_v63 = vsel %vm6540_vm2, %v18881_v22, 0.0  ;;  %v15093_v49 = vpop.f32.mrf.mxu0  ;;  %v15135_v21 = vpop.f32.mrf.mxu1 }
 0x454   : > { %6755 = vadd.xlane.f32.xlu1 %v6754_v63  ;;  %15488 = vmatprep.subr.mxu1 %v20323_v38  ;;  %v9249_v19 = vand.u32 4294901760, %v9248_v62  ;;  %v9258_v18 = vsub.f32 %v18875_v31, %v9257_v56 }
 0x455   : > { %v7169_v55 = vpop.f32.mrf.mxu0  ;;  %v7275_v41 = vpop.f32.mrf.mxu1  ;;  %15448 = vmatprep.mubr.msk.f32.mxu0 %vm16171_vm1, %v20323_v38  ;;  %15489 = vmatpush3.msra.mxu1 %v18417_v57 }
 0x456   : > { %v7170_v20 = vadd.f32 %v7169_v55, %v18812_v7  ;;  %15490 = vmatprep.mubr.msk.f32.mxu1 %vm16171_vm1, %v20323_v38  ;;  %15470 = vmatpush3.msra.mxu0 %v18725_v27  ;;  %v9259_v23 = vand.u32 4294901760, %v9258_v18 }
 0x457   : > { %15449 = vmatmul.mubr.f32.gmra.mxu0 %v9249_v19  ;;  %15491 = vmatmul.mubr.f32.vlgmr.msra.gmra.mxu1 %v9237_v39  ;;  %v6732_v52 = vpop.xlane.xlu1 %6731  ;;  %v15117_v43 = vpop.f32.mrf.mxu0 }
 0x458   : > { %16129 = vrcp.f32 %v6732_v52  ;;  %v15138_v30 = vpop.f32.mrf.mxu1  ;;  %15451 = vmatprep.mubr.msk.f32.mxu0 %vm16171_vm1, %v20323_v38  ;;  %15493 = vmatprep.mubr.msk.f32.mxu1 %vm16171_vm1, %v20323_v38  ;;  %v7260_v7 = vadd.f32 %v7259_v11, %v7170_v20 }
 0x459   : > { %v7176_v40 = vpop.f32.mrf.mxu0  ;;  %15471 = vmatprep.subr.mxu0 %v20323_v38  ;;  %15514 = vmatprep.subr.mxu1 %v20323_v38 }
 0x45a   : > { %v7177_v33 = vadd.f32 %v7176_v40, %v18851_v15  ;;  %v7441_v39 = vpop.f32.mrf.mxu1  ;;  %15472 = vmatpush3.msra.mxu0 %v18589_v6  ;;  %15515 = vmatpush3.msra.mxu1 %v18708_v34 }
 0x45b   : > { %15452 = vmatmul.mubr.f32.gmra.mxu0 %v9259_v23  ;;  %15494 = vmatmul.mubr.f32.gmra.mxu1 %v9247_v46  ;;  %v15120_v24 = vpop.f32.mrf.mxu0  ;;  %v9862_v46 = vsub.f32 %v18904_v2, %v18916_v3 }
 0x45c   : > { %v15162_v11 = vpop.f32.mrf.mxu1  ;;  %15473 = vmatprep.subr.mxu0 %v20323_v38  ;;  %15475 = vmatprep.mubr.msk.f32.mxu0 %vm16171_vm1, %v20323_v38  ;;  %v7268_v5 = vadd.f32 %v7267_v44, %v7177_v33 }
 0x45d   : > { %v7183_v58 = vpop.f32.mrf.mxu0  ;;  %15474 = vmatpush3.msra.mxu0 %v18438_v50  ;;  %15496 = vmatprep.mubr.msk.f32.mxu1 %vm16171_vm1, %v20323_v38 }
 0x45e   : > { %v6738_v15 = vpop.xlane.xlu1 %6737  ;;  %v6735_v1 = vpop.xlane.xlu0 %6734  ;;  %v7184_v4 = vadd.f32 %v7183_v58, %v7092_v54  ;;  %15516 = vmatprep.subr.mxu1 %v20323_v38  ;;  %15499 = vmatprep.subr.mxu0 %v20323_v38 }
 0x45f   : > { %16131 = vrcp.f32 %v6738_v15  ;;  %v7447_v62 = vpop.f32.mrf.mxu1  ;;  %15476 = vmatmul.mubr.f32.vlgmr.msra.gmra.mxu0 %v18832_v45  ;;  %15497 = vmatmul.mubr.f32.gmra.mxu1 %v9257_v56  ;;  %v15123_v44 = vpop.f32.mrf.mxu0  ;;  %v18937_v45 = vand.u32 4294901760, %v9862_v46 }
 0x460   : > { %16133 = vrcp.f32 %v6735_v1  ;;  %15517 = vmatpush3.msra.mxu1 %v18576_v14  ;;  %15478 = vmatprep.mubr.msk.f32.mxu0 %vm16171_vm1, %v20323_v38  ;;  %v7276_v50 = vadd.f32 %v7275_v41, %v7184_v4 }
 0x461   : > { %v15165_v54 = vpop.f32.mrf.mxu1  ;;  %15518 = vmatprep.subr.mxu1 %v20323_v38  ;;  %v7355_v63 = vpop.f32.mrf.mxu0  ;;  %15520 = vmatprep.mubr.msk.f32.mxu1 %vm16171_vm1, %v20323_v38 }
 0x462   : > { %v7356_v49 = vadd.f32 %v7355_v63, %v7260_v7  ;;  %15519 = vmatpush3.msra.mxu1 %v18417_v57  ;;  %15500 = vmatpush3.msra.mxu0 %v18735_v53 }
 0x463   : > { %v7453_v56 = vpop.f32.mrf.mxu1  ;;  %15479 = vmatmul.mubr.f32.gmra.mxu0 %v18863_v16  ;;  %15521 = vmatmul.mubr.f32.vlgmr.msra.gmra.mxu1 %v18814_v47  ;;  %v15147_v21 = vpop.f32.mrf.mxu0 }
 0x464   : > { %v18941_v19 = vadd.f32 %v7441_v39, %v7356_v49  ;;  %15481 = vmatprep.mubr.msk.f32.mxu0 %vm16171_vm1, %v20323_v38  ;;  %15523 = vmatprep.mubr.msk.f32.mxu1 %vm16171_vm1, %v20323_v38 }
 0x465   : > { %v16130_v55 = vpop.eup %16129  ;;  %v15168_v57 = vpop.f32.mrf.mxu1  ;;  %15501 = vmatprep.subr.mxu0 %v20323_v38  ;;  %15544 = vmatprep.subr.mxu1 %v20323_v38 }
 0x466   : > { %v7361_v41 = vpop.f32.mrf.mxu0  ;;  %v6796_v16 = vmul.f32 %v16130_v55, %v18516_v26  ;;  %15502 = vmatpush3.msra.mxu0 %v18601_v61  ;;  %15545 = vmatpush3.msra.mxu1 %v18937_v45 }
 0x467   : > { %v7362_v18 = vadd.f32 %v7361_v41, %v7268_v5  ;;  %v7646_v20 = vpop.f32.mrf.mxu1  ;;  %15482 = vmatmul.mubr.f32.gmra.mxu0 %v18875_v31  ;;  %15524 = vmatmul.mubr.f32.gmra.mxu1 %v18848_v17 }
 0x468   : > { %v15150_v52 = vpop.f32.mrf.mxu0  ;;  %v6820_v43 = vadd.f32 %v18781_v9, %v6796_v16  ;;  %15503 = vmatprep.subr.mxu0 %v20323_v38  ;;  %15505 = vmatprep.mubr.msk.f32.mxu0 %vm16171_vm1, %v20323_v38 }
 0x469   : > { %v18955_v30 = vadd.f32 %v7447_v62, %v7362_v18  ;;  %v15192_v26 = vpop.f32.mrf.mxu1  ;;  %15504 = vmatpush3.msra.mxu0 %v18450_v10  ;;  %15526 = vmatprep.mubr.msk.f32.mxu1 %vm16171_vm1, %v20323_v38 }
 0x46a   : > { %v7367_v7 = vpop.f32.mrf.mxu0  ;;  %v6847_v31 = vmul.f32 %v18793_v48, %v6820_v43  ;;  %15546 = vmatprep.subr.mxu1 %v20323_v38  ;;  %15529 = vmatprep.subr.mxu0 %v20323_v38 }
 0x46b   : > { %v7368_v40 = vadd.f32 %v7367_v7, %v7276_v50  ;;  %v7652_v23 = vpop.f32.mrf.mxu1  ;;  %15506 = vmatmul.mubr.f32.vlgmr.msra.gmra.mxu0 %v18814_v47  ;;  %15527 = vmatmul.mubr.f32.gmra.mxu1 %v18865_v42 }
 0x46c   : > { %v15153_v33 = vpop.f32.mrf.mxu0  ;;  %v16132_v39 = vpop.eup %16131  ;;  %15547 = vmatpush3.msra.mxu1 %v18757_v36  ;;  %15508 = vmatprep.mubr.msk.f32.mxu0 %vm16171_vm1, %v20323_v38  ;;  %v9726_v10 = vsel %vm6540_vm2, %v6847_v31, 0 }
 0x46d   : > { %v18968_v24 = vadd.f32 %v7453_v56, %v7368_v40  ;;  %v16134_v11 = vpop.eup %16133  ;;  %v15195_v5 = vpop.f32.mrf.mxu1  ;;  %15548 = vmatprep.subr.mxu1 %v20323_v38  ;;  %15550 = vmatprep.mubr.msk.f32.mxu1 %vm16171_vm1, %v20323_v38  ;;  %v18977_v47 = vand.u32 4294901760, %v9726_v10  ;;  %v6798_v58 = vmul.f32 %v16132_v39, %v18548_v51 }
 0x46e   : > { %v7540_v15 = vpop.f32.mrf.mxu0  ;;  %15549 = vmatpush3.msra.mxu1 %v18623_v8  ;;  %15530 = vmatpush3.msra.mxu0 %v18884_v13  ;;  %v6797_v1 = vmul.f32 %v16134_v11, %v18545_v60 }
 0x46f   : > { %v7647_v4 = vadd.f32 %v7646_v20, %v7540_v15  ;;  %v7658_v46 = vpop.f32.mrf.mxu1  ;;  %15509 = vmatmul.mubr.f32.gmra.mxu0 %v18848_v17  ;;  %v18985_v62 = vsub.f32 %v9726_v10, %v18977_v47  ;;  %15551 = vmatmul.mubr.f32.vlgmr.msra.gmra.mxu1 %v18977_v47  ;;  %v6822_v60 = vadd.f32 %v18827_v29, %v6798_v58 }
 0x470   : > { %v15177_v44 = vpop.f32.mrf.mxu0  ;;  %15511 = vmatprep.mubr.msk.f32.mxu0 %vm16171_vm1, %v20323_v38  ;;  %15553 = vmatprep.mubr.msk.f32.mxu1 %vm16171_vm1, %v20323_v38  ;;  %v6821_v51 = vadd.f32 %v18804_v59, %v6797_v1 }
 0x471   : > { %v15198_v8 = vpop.f32.mrf.mxu1  ;;  %15531 = vmatprep.subr.mxu0 %v20323_v38  ;;  %15574 = vmatprep.subr.mxu1 %v20323_v38  ;;  %v9804_v17 = vand.u32 4294901760, %v18985_v62  ;;  %v6849_v63 = vmul.f32 %v18841_v32, %v6822_v60 }
 0x472   : > { %v7550_v50 = vpop.f32.mrf.mxu0  ;;  %v6848_v54 = vmul.f32 %v18820_v0, %v6821_v51  ;;  %15532 = vmatpush3.msra.mxu0 %v18708_v34  ;;  %15575 = vmatpush3.msra.mxu1 %v18884_v13 }
 0x473   : > { %v7653_v49 = vadd.f32 %v7652_v23, %v7550_v50  ;;  %v7826_v56 = vpop.f32.mrf.mxu1  ;;  %15512 = vmatmul.mubr.f32.gmra.mxu0 %v18865_v42  ;;  %15533 = vmatprep.subr.mxu0 %v20323_v38  ;;  %v9805_v21 = vsub.f32 %v18985_v62, %v9804_v17  ;;  %v9732_v41 = vsel %vm6540_vm2, %v6849_v63, 0  ;;  %v20341_v23 = vld [vmem:[#allocation7_spill] sm:$0xff] }
 0x474   : > { %v9729_v55 = vsel %vm6540_vm2, %v6848_v54, 0  ;;  %v15180_v57 = vpop.f32.mrf.mxu0  ;;  %15534 = vmatpush3.msra.mxu0 %v18576_v14  ;;  %15535 = vmatprep.mubr.msk.f32.mxu0 %vm16171_vm1, %v20323_v38  ;;  %v19011_v52 = vand.u32 4294901760, %v9732_v41  ;;  %v19027_v33 = vand.u32 4294901760, %v20341_v23 }
 0x475   : > { %v19009_v16 = vand.u32 4294901760, %v9729_v55  ;;  %v15222_v18 = vpop.f32.mrf.mxu1  ;;  %v9806_v20 = vand.u32 4294901760, %v9805_v21  ;;  %15576 = vmatprep.subr.mxu1 %v20323_v38  ;;  %15559 = vmatprep.subr.mxu0 %v20323_v38 }
 0x476   : > { %v7560_v42 = vpop.f32.mrf.mxu0  ;;  %15577 = vmatpush3.msra.mxu1 %v18708_v34  ;;  %v19021_v31 = vsub.f32 %v9732_v41, %v19011_v52  ;;  %v19046_v8 = vsub.f32 %v20341_v23, %v19027_v33 }
 0x477   : > { %v19017_v43 = vsub.f32 %v9729_v55, %v19009_v16  ;;  %15554 = vmatmul.mubr.f32.gmra.mxu1 %v19009_v16  ;;  %v7659_v26 = vadd.f32 %v7658_v46, %v7560_v42  ;;  %v7834_v7 = vpop.f32.mrf.mxu1  ;;  %15536 = vmatmul.mubr.f32.vlgmr.msra.gmra.mxu0 %v9806_v20 }
 0x478   : > { %15556 = vmatprep.mubr.msk.f32.mxu1 %vm16171_vm1, %v20323_v38  ;;  %v15183_v40 = vpop.f32.mrf.mxu0  ;;  %15578 = vmatprep.subr.mxu1 %v20323_v38  ;;  %v9824_v11 = vand.u32 4294901760, %v19021_v31 }
 0x479   : > { %v15225_v39 = vpop.f32.mrf.mxu1  ;;  %15538 = vmatprep.mubr.msk.f32.mxu0 %vm16171_vm1, %v20323_v38  ;;  %15579 = vmatpush3.msra.mxu1 %v18576_v14  ;;  %v9814_v10 = vand.u32 4294901760, %v19017_v43 }
 0x47a   : > { %15560 = vmatpush3.msra.mxu0 %v18904_v2  ;;  %15604 = vmatprep.subr.mxu1 %v20323_v38  ;;  %v9825_v60 = vsub.f32 %v19021_v31, %v9824_v11 }
 0x47b   : > { %15557 = vmatmul.mubr.f32.gmra.mxu1 %v19011_v52  ;;  %v7736_v5 = vpop.f32.mrf.mxu0  ;;  %v7842_v58 = vpop.f32.mrf.mxu1  ;;  %v9815_v15 = vsub.f32 %v19017_v43, %v9814_v10  ;;  %15561 = vmatprep.subr.mxu0 %v20323_v38 }
 0x47c   : > { %v7737_v1 = vadd.f32 %v7736_v5, %v7647_v4  ;;  %15580 = vmatprep.mubr.msk.f32.mxu1 %vm16171_vm1, %v20323_v38  ;;  %15562 = vmatpush3.msra.mxu0 %v18725_v27  ;;  %v9826_v21 = vand.u32 4294901760, %v9825_v60 }
 0x47d   : > { %v9816_v46 = vand.u32 4294901760, %v9815_v15  ;;  %v15207_v44 = vpop.f32.mrf.mxu0  ;;  %v15228_v51 = vpop.f32.mrf.mxu1  ;;  %15563 = vmatprep.subr.mxu0 %v20323_v38 }
 0x47e   : > { %15564 = vmatpush3.msra.mxu0 %v18589_v6  ;;  %v7827_v50 = vadd.f32 %v7826_v56, %v7737_v1  ;;  %v19056_v6 = vand.u32 4294901760, %v19046_v8 }
 0x47f   : > { %15539 = vmatmul.mubr.f32.gmra.mxu0 %v9816_v46  ;;  %15581 = vmatmul.mubr.f32.vlgmr.msra.gmra.mxu1 %v9804_v17  ;;  %v7743_v4 = vpop.f32.mrf.mxu0 }
 0x480   : > { %v7744_v54 = vadd.f32 %v7743_v4, %v7653_v49  ;;  %v8008_v63 = vpop.f32.mrf.mxu1  ;;  %15541 = vmatprep.mubr.msk.f32.mxu0 %vm16171_vm1, %v20323_v38  ;;  %15583 = vmatprep.mubr.msk.f32.mxu1 %vm16171_vm1, %v20323_v38  ;;  %v10429_v20 = vsub.f32 %v19046_v8, %v19056_v6 }
 0x481   : > { %v15210_v55 = vpop.f32.mrf.mxu0  ;;  %15605 = vmatpush3.msra.mxu1 %v18884_v13  ;;  %15589 = vmatprep.subr.mxu0 %v20323_v38 }
 0x482   : > { %v15252_v56 = vpop.f32.mrf.mxu1  ;;  %15606 = vmatprep.subr.mxu1 %v20323_v38  ;;  %v7835_v17 = vadd.f32 %v7834_v7, %v7744_v54 }
 0x483   : > { %15542 = vmatmul.mubr.f32.gmra.mxu0 %v9826_v21  ;;  %15584 = vmatmul.mubr.f32.gmra.mxu1 %v9814_v10  ;;  %v7750_v49 = vpop.f32.mrf.mxu0  ;;  %v19074_v10 = vand.u32 4294901760, %v10429_v20 }
 0x484   : > { %v7751_v57 = vadd.f32 %v7750_v49, %v7659_v26  ;;  %v8014_v41 = vpop.f32.mrf.mxu1  ;;  %15565 = vmatprep.mubr.msk.f32.mxu0 %vm16171_vm1, %v20323_v38  ;;  %15586 = vmatprep.mubr.msk.f32.mxu1 %vm16171_vm1, %v20323_v38 }
 0x485   : > { %v15213_v18 = vpop.f32.mrf.mxu0  ;;  %15607 = vmatpush3.msra.mxu1 %v18708_v34 }
 0x486   : > { %v15255_v42 = vpop.f32.mrf.mxu1  ;;  %15608 = vmatprep.subr.mxu1 %v20323_v38  ;;  %v7843_v7 = vadd.f32 %v7842_v58, %v7751_v57 }
 0x487   : > { %15566 = vmatmul.mubr.f32.vlgmr.msra.gmra.mxu0 %v18985_v62  ;;  %15587 = vmatmul.mubr.f32.gmra.mxu1 %v9824_v11  ;;  %v7922_v26 = vpop.f32.mrf.mxu0 }
 0x488   : > { %v7923_v40 = vadd.f32 %v7922_v26, %v7827_v50  ;;  %v8020_v23 = vpop.f32.mrf.mxu1  ;;  %15568 = vmatprep.mubr.msk.f32.mxu0 %vm16171_vm1, %v20323_v38  ;;  %15609 = vmatpush3.msra.mxu1 %v18576_v14 }
 0x489   : > { %15610 = vmatprep.mubr.msk.f32.mxu1 %vm16171_vm1, %v20323_v38  ;;  %v15237_v39 = vpop.f32.mrf.mxu0  ;;  %15590 = vmatpush3.msra.mxu0 %v18916_v3 }
 0x48a   : > { %v19076_v5 = vadd.f32 %v8008_v63, %v7923_v40  ;;  %v15258_v62 = vpop.f32.mrf.mxu1  ;;  %15591 = vmatprep.subr.mxu0 %v20323_v38  ;;  %15634 = vmatprep.subr.mxu1 %v20323_v38 }
 0x48b   : > { %15569 = vmatmul.mubr.f32.gmra.mxu0 %v19017_v43  ;;  %15611 = vmatmul.mubr.f32.vlgmr.msra.gmra.mxu1 %v18977_v47  ;;  %v7928_v14 = vpop.f32.mrf.mxu0 }
 0x48c   : > { %v7929_v11 = vadd.f32 %v7928_v14, %v7835_v17  ;;  %v8213_v58 = vpop.f32.mrf.mxu1  ;;  %15571 = vmatprep.mubr.msk.f32.mxu0 %vm16171_vm1, %v20323_v38  ;;  %15613 = vmatprep.mubr.msk.f32.mxu1 %vm16171_vm1, %v20323_v38 }
 0x48d   : > { %v15240_v15 = vpop.f32.mrf.mxu0  ;;  %15592 = vmatpush3.msra.mxu0 %v18735_v53  ;;  %15635 = vmatpush3.msra.mxu1 %v19074_v10 }
 0x48e   : > { %v19088_v1 = vadd.f32 %v8014_v41, %v7929_v11  ;;  %v15282_v46 = vpop.f32.mrf.mxu1  ;;  %15593 = vmatprep.subr.mxu0 %v20323_v38  ;;  %15636 = vmatprep.subr.mxu1 %v20323_v38 }
 0x48f   : > { %15572 = vmatmul.mubr.f32.gmra.mxu0 %v19021_v31  ;;  %15614 = vmatmul.mubr.f32.gmra.mxu1 %v19009_v16  ;;  %v7934_v43 = vpop.f32.mrf.mxu0 }
 0x490   : > { %v7935_v44 = vadd.f32 %v7934_v43, %v7843_v7  ;;  %v8219_v51 = vpop.f32.mrf.mxu1  ;;  %15594 = vmatpush3.msra.mxu0 %v18601_v61  ;;  %15595 = vmatprep.mubr.msk.f32.mxu0 %vm16171_vm1, %v20323_v38 }
 0x491   : > { %15616 = vmatprep.mubr.msk.f32.mxu1 %vm16171_vm1, %v20323_v38  ;;  %v15243_v60 = vpop.f32.mrf.mxu0  ;;  %15637 = vmatpush3.msra.mxu1 %v18937_v45 }
 0x492   : > { %v19100_v50 = vadd.f32 %v8020_v23, %v7935_v44  ;;  %v15285_v4 = vpop.f32.mrf.mxu1  ;;  %15638 = vmatprep.subr.mxu1 %v20323_v38  ;;  %15619 = vmatprep.subr.mxu0 %v20323_v38 }
 0x493   : > { %15596 = vmatmul.mubr.f32.vlgmr.msra.gmra.mxu0 %v18977_v47  ;;  %15617 = vmatmul.mubr.f32.gmra.mxu1 %v19011_v52  ;;  %v8107_v61 = vpop.f32.mrf.mxu0 }
 0x494   : > { %v8214_v31 = vadd.f32 %v8213_v58, %v8107_v61  ;;  %v8225_v54 = vpop.f32.mrf.mxu1  ;;  %15598 = vmatprep.mubr.msk.f32.mxu0 %vm16171_vm1, %v20323_v38  ;;  %15639 = vmatpush3.msra.mxu1 %v18757_v36 }
 0x495   : > { %v15267_v63 = vpop.f32.mrf.mxu0  ;;  %15640 = vmatprep.mubr.msk.f32.mxu1 %vm16171_vm1, %v20323_v38  ;;  %15620 = vmatpush3.msra.mxu0 %v19027_v33 }
 0x496   : > { %v15288_v21 = vpop.f32.mrf.mxu1  ;;  %15621 = vmatprep.subr.mxu0 %v20323_v38  ;;  %15664 = vmatprep.subr.mxu1 %v20323_v38 }
 0x497   : > { %15599 = vmatmul.mubr.f32.gmra.mxu0 %v19009_v16 }
 0x498   : > { %v8117_v47 = vpop.f32.mrf.mxu0  ;;  %15601 = vmatprep.mubr.msk.f32.mxu0 %vm16171_vm1, %v20323_v38  ;;  %15622 = vmatpush3.msra.mxu0 %v18884_v13 }
 0x499   : > { %v8220_v36 = vadd.f32 %v8219_v51, %v8117_v47  ;;  %v8393_v55 = vpop.f32.mrf.mxu1  ;;  %15623 = vmatprep.subr.mxu0 %v20323_v38 }
 0x49a   : > { %v15270_v56 = vpop.f32.mrf.mxu0  ;;  %15624 = vmatpush3.msra.mxu0 %v18708_v34 }
 0x49b   : > { %15602 = vmatmul.mubr.f32.gmra.mxu0 %v19011_v52  ;;  %v15312_v17 = vpop.f32.mrf.mxu1  ;;  %15649 = vmatprep.subr.mxu0 %v20323_v38 }
 0x49c   : > { %v8127_v49 = vpop.f32.mrf.mxu0  ;;  %15625 = vmatprep.mubr.msk.f32.mxu0 %vm16171_vm1, %v20323_v38 }
 0x49d   : > { %v8226_v16 = vadd.f32 %v8225_v54, %v8127_v49  ;;  %v8401_v57 = vpop.f32.mrf.mxu1 }
 0x49e   : > { %v15273_v41 = vpop.f32.mrf.mxu0 }
 0x49f   : > { %v15315_v18 = vpop.f32.mrf.mxu1 }
 0x4a0   : > { %v8303_v20 = vpop.f32.mrf.mxu0 }
 0x4a1   : > { %v8304_v42 = vadd.f32 %v8303_v20, %v8214_v31  ;;  %v8409_v7 = vpop.f32.mrf.mxu1 }
 0x4a2   : > { %v15297_v26 = vpop.f32.mrf.mxu0 }
 0x4a3   : > { %v15318_v40 = vpop.f32.mrf.mxu1  ;;  %v8394_v23 = vadd.f32 %v8393_v55, %v8304_v42 }
 0x4a4   : > { %v8310_v39 = vpop.f32.mrf.mxu0 }
 0x4a5   : > { %v8311_v62 = vadd.f32 %v8310_v39, %v8220_v36  ;;  %v8575_v52 = vpop.f32.mrf.mxu1 }
 0x4a6   : > { %v15300_v14 = vpop.f32.mrf.mxu0 }
 0x4a7   : > { %v15342_v11 = vpop.f32.mrf.mxu1  ;;  %v8402_v58 = vadd.f32 %v8401_v57, %v8311_v62 }
 0x4a8   : > { %v8317_v15 = vpop.f32.mrf.mxu0 }
 0x4a9   : > { %v8318_v46 = vadd.f32 %v8317_v15, %v8226_v16  ;;  %v8581_v43 = vpop.f32.mrf.mxu1 }
 0x4aa   : > { %v15303_v44 = vpop.f32.mrf.mxu0 }
 0x4ab   : > { %v15345_v51 = vpop.f32.mrf.mxu1  ;;  %v8410_v60 = vadd.f32 %v8409_v7, %v8318_v46 }
 0x4ac   : > { %v8489_v4 = vpop.f32.mrf.mxu0 }
 0x4ad   : > { %v8490_v61 = vadd.f32 %v8489_v4, %v8394_v23  ;;  %v8587_v54 = vpop.f32.mrf.mxu1 }
 0x4ae   : > { %v15327_v31 = vpop.f32.mrf.mxu0 }
 0x4af   : > { %v19124_v63 = vadd.f32 %v8575_v52, %v8490_v61  ;;  %v15348_v21 = vpop.f32.mrf.mxu1 }
 0x4b0   : > { %v8495_v47 = vpop.f32.mrf.mxu0  ;;  %v20342_v21 = vld [vmem:[#allocation8_spill] sm:$0xff] }
 0x4b1   : > { %v8496_v55 = vadd.f32 %v8495_v47, %v8402_v58  ;;  %v19166_v47 = vand.u32 4294901760, %v20342_v21 }
 0x4b2   : > { %v15330_v36 = vpop.f32.mrf.mxu0  ;;  %v6744_v56 = vpop.xlane.xlu1 %6743 }
 0x4b3   : > { %v19126_v17 = vadd.f32 %v8581_v43, %v8496_v55  ;;  %16135 = vrcp.f32 %v6744_v56  ;;  %v6741_v49 = vpop.xlane.xlu0 %6740 }
 0x4b4   : > { %v8501_v16 = vpop.f32.mrf.mxu0  ;;  %16137 = vrcp.f32 %v6741_v49 }
 0x4b5   : > { %v8502_v57 = vadd.f32 %v8501_v16, %v8410_v60 }
 0x4b6   : > { %v15333_v41 = vpop.f32.mrf.mxu0 }
 0x4b7   : > { %v19128_v18 = vadd.f32 %v8587_v54, %v8502_v57  ;;  %v19178_v57 = vsub.f32 %v20342_v21, %v19166_v47 }
 0x4b8   : > { %v6747_v20 = vpop.xlane.xlu0 %6746 }
 0x4b9   : > { %16139 = vrcp.f32 %v6747_v20 }
 0x4c0   : > { %v16136_v42 = vpop.eup %16135 }
 0x4c1   : > { %v16138_v7 = vpop.eup %16137  ;;  %v6800_v26 = vmul.f32 %v16136_v42, %v18681_v12 }
 0x4c2   : > { %v6799_v40 = vmul.f32 %v16138_v7, %v18688_v28  ;;  %v10995_v7 = vand.u32 4294901760, %v19178_v57 }
 0x4c3   : > { %v6824_v23 = vadd.f32 %v18804_v59, %v6800_v26 }
 0x4c4   : > { %v6823_v39 = vadd.f32 %v18781_v9, %v6799_v40  ;;  %v10996_v40 = vsub.f32 %v19178_v57, %v10995_v7 }
 0x4c5   : > { %v6851_v62 = vmul.f32 %v18820_v0, %v6824_v23 }
 0x4c6   : > { %v16140_v52 = vpop.eup %16139  ;;  %v6850_v14 = vmul.f32 %v18793_v48, %v6823_v39 }
 0x4c7   : > { %v10296_v11 = vsel %vm6540_vm2, %v6851_v62, 0  ;;  %v6801_v58 = vmul.f32 %v16140_v52, %v18712_v35 }
 0x4c8   : > { %v10293_v15 = vsel %vm6540_vm2, %v6850_v14, 0  ;;  %v19139_v46 = vand.u32 4294901760, %v10296_v11 }
 0x4c9   : > { %v19141_v12 = vand.u32 4294901760, %v10293_v15  ;;  %v6825_v28 = vadd.f32 %v18827_v29, %v6801_v58 }
 0x4ca   : > { %v19145_v43 = vsub.f32 %v10296_v11, %v19139_v46 }
 0x4cb   : > { %v10370_v44 = vsub.f32 %v10293_v15, %v19141_v12  ;;  %15641 = vmatmul.mubr.f32.vlgmr.msra.gmra.mxu1 %v19141_v12  ;;  %v6852_v51 = vmul.f32 %v18841_v32, %v6825_v28 }
 0x4cc   : > { %15643 = vmatprep.mubr.msk.f32.mxu1 %vm16171_vm1, %v20323_v38  ;;  %15665 = vmatpush3.msra.mxu1 %v19027_v33  ;;  %v10381_v4 = vand.u32 4294901760, %v19145_v43 }
 0x4cd   : > { %v10371_v35 = vand.u32 4294901760, %v10370_v44  ;;  %v10299_v60 = vsel %vm6540_vm2, %v6852_v51, 0  ;;  %15666 = vmatprep.subr.mxu1 %v20323_v38  ;;  %v11427_v51 = vld [vmem:[%s20239_s5 + $0x8] sm:$0xff] }
 0x4ce   : > { %v19156_v61 = vand.u32 4294901760, %v10299_v60  ;;  %15667 = vmatpush3.msra.mxu1 %v18884_v13  ;;  %v10382_v36 = vsub.f32 %v19145_v43, %v10381_v4 }
 0x4cf   : > { %15644 = vmatmul.mubr.f32.gmra.mxu1 %v19139_v46  ;;  %v10372_v54 = vsub.f32 %v10370_v44, %v10371_v35  ;;  %15668 = vmatprep.subr.mxu1 %v20323_v38 }
 0x4d0   : > { %15646 = vmatprep.mubr.msk.f32.mxu1 %vm16171_vm1, %v20323_v38  ;;  %v10390_v31 = vsub.f32 %v10299_v60, %v19156_v61  ;;  %15669 = vmatpush3.msra.mxu1 %v18708_v34  ;;  %v10383_v49 = vand.u32 4294901760, %v10382_v36 }
 0x4d1   : > { %v10373_v55 = vand.u32 4294901760, %v10372_v54  ;;  %15694 = vmatprep.subr.mxu1 %v20323_v38 }
 0x4d2   : > { %v10391_v56 = vand.u32 4294901760, %v10390_v31 }
 0x4d3   : > { %15626 = vmatmul.mubr.f32.vlgmr.msra.gmra.mxu0 %v10373_v55  ;;  %15647 = vmatmul.mubr.f32.gmra.mxu1 %v19156_v61 }
 0x4d4   : > { %15628 = vmatprep.mubr.msk.f32.mxu0 %vm16171_vm1, %v20323_v38  ;;  %15670 = vmatprep.mubr.msk.f32.mxu1 %vm16171_vm1, %v20323_v38  ;;  %v10392_v16 = vsub.f32 %v10390_v31, %v10391_v56 }
 0x4d5   : > { %15650 = vmatpush3.msra.mxu0 %v19046_v8 }
 0x4d6   : > { %15651 = vmatprep.subr.mxu0 %v20323_v38  ;;  %v10393_v42 = vand.u32 4294901760, %v10392_v16 }
 0x4d7   : > { %v6750_v41 = vpop.xlane.xlu1 %6749  ;;  %15671 = vmatmul.mubr.f32.vlgmr.msra.gmra.mxu1 %v10371_v35  ;;  %15629 = vmatmul.mubr.f32.gmra.mxu0 %v10383_v49 }
 0x4d8   : > { %16141 = vrcp.f32 %v6750_v41  ;;  %15631 = vmatprep.mubr.msk.f32.mxu0 %vm16171_vm1, %v20323_v38  ;;  %15673 = vmatprep.mubr.msk.f32.mxu1 %vm16171_vm1, %v20323_v38 }
 0x4d9   : > { %v6753_v20 = vpop.xlane.xlu0 %6752  ;;  %15652 = vmatpush3.msra.mxu0 %v18904_v2  ;;  %15695 = vmatpush3.msra.mxu1 %v19027_v33 }
 0x4da   : > { %16143 = vrcp.f32 %v6753_v20  ;;  %15653 = vmatprep.subr.mxu0 %v20323_v38  ;;  %15696 = vmatprep.subr.mxu1 %v20323_v38 }
 0x4db   : > { %15632 = vmatmul.mubr.f32.gmra.mxu0 %v10393_v42  ;;  %15674 = vmatmul.mubr.f32.gmra.mxu1 %v10381_v4 }
 0x4dc   : > { %15654 = vmatpush3.msra.mxu0 %v18725_v27  ;;  %15655 = vmatprep.mubr.msk.f32.mxu0 %vm16171_vm1, %v20323_v38  ;;  %v10997_v27 = vand.u32 4294901760, %v10996_v40 }
 0x4dd   : > { %v6756_v26 = vpop.xlane.xlu1 %6755  ;;  %15676 = vmatprep.mubr.msk.f32.mxu1 %vm16171_vm1, %v20323_v38  ;;  %15697 = vmatpush3.msra.mxu1 %v18884_v13 }
 0x4de   : > { %16145 = vrcp.f32 %v6756_v26  ;;  %15698 = vmatprep.subr.mxu1 %v20323_v38  ;;  %15679 = vmatprep.subr.mxu0 %v20323_v38 }
 0x4df   : > { %15656 = vmatmul.mubr.f32.vlgmr.msra.gmra.mxu0 %v10370_v44  ;;  %15677 = vmatmul.mubr.f32.gmra.mxu1 %v10391_v56  ;;  %v11426_v56 = vld [vmem:[%s20239_s5] sm:$0xff] }
 0x4e0   : > { %15658 = vmatprep.mubr.msk.f32.mxu0 %vm16171_vm1, %v20323_v38  ;;  %15699 = vmatpush3.msra.mxu1 %v18708_v34 }
 0x4e1   : > { %15700 = vmatprep.mubr.msk.f32.mxu1 %vm16171_vm1, %v20323_v38  ;;  %15680 = vmatpush3.msra.mxu0 %v19056_v6 }
 0x4e2   : > { %15681 = vmatprep.subr.mxu0 %v20323_v38  ;;  %15724 = vmatprep.subr.mxu1 %v20323_v38 }
 0x4e3   : > { %15659 = vmatmul.mubr.f32.gmra.mxu0 %v19145_v43  ;;  %15701 = vmatmul.mubr.f32.vlgmr.msra.gmra.mxu1 %v19141_v12 }
 0x4e4   : > { %15661 = vmatprep.mubr.msk.f32.mxu0 %vm16171_vm1, %v20323_v38  ;;  %15703 = vmatprep.mubr.msk.f32.mxu1 %vm16171_vm1, %v20323_v38 }
 0x4e5   : > { %v16142_v34 = vpop.eup %16141  ;;  %v19215_v23 = vpop.f32.mrf.mxu1  ;;  %15682 = vmatpush3.msra.mxu0 %v18916_v3  ;;  %15725 = vmatpush3.msra.mxu1 %v10997_v27  ;;  %v19315_v27 = vand.u32 4294901760, %v11426_v56 }
 0x4e6   : > { %v6802_v39 = vmul.f32 %v16142_v34, %v18844_v25  ;;  %15683 = vmatprep.subr.mxu0 %v20323_v38  ;;  %15726 = vmatprep.subr.mxu1 %v20323_v38 }
 0x4e7   : > { %v16144_v62 = vpop.eup %16143  ;;  %15662 = vmatmul.mubr.f32.gmra.mxu0 %v10390_v31  ;;  %15704 = vmatmul.mubr.f32.gmra.mxu1 %v19139_v46  ;;  %v15372_v52 = vpop.f32.mrf.mxu1 }
 0x4e8   : > { %v6826_v14 = vadd.f32 %v18781_v9, %v6802_v39  ;;  %v6803_v11 = vmul.f32 %v16144_v62, %v18859_v37  ;;  %15684 = vmatpush3.msra.mxu0 %v18735_v53  ;;  %15685 = vmatprep.mubr.msk.f32.mxu0 %vm16171_vm1, %v20323_v38 }
 0x4e9   : > { %15706 = vmatprep.mubr.msk.f32.mxu1 %vm16171_vm1, %v20323_v38  ;;  %15727 = vmatpush3.msra.mxu1 %v19074_v10 }
 0x4ea   : > { %v6853_v25 = vmul.f32 %v18793_v48, %v6826_v14  ;;  %v19231_v58 = vpop.f32.mrf.mxu1  ;;  %15728 = vmatprep.subr.mxu1 %v20323_v38  ;;  %15709 = vmatprep.subr.mxu0 %v20323_v38  ;;  %v6827_v9 = vadd.f32 %v18804_v59, %v6803_v11 }
 0x4eb   : > { %v16146_v37 = vpop.eup %16145  ;;  %15686 = vmatmul.mubr.f32.vlgmr.msra.gmra.mxu0 %v19141_v12  ;;  %15707 = vmatmul.mubr.f32.gmra.mxu1 %v19156_v61 }
 0x4ec   : > { %v6804_v53 = vmul.f32 %v16146_v37, %v18881_v22  ;;  %v15375_v15 = vpop.f32.mrf.mxu1  ;;  %15688 = vmatprep.mubr.msk.f32.mxu0 %vm16171_vm1, %v20323_v38  ;;  %15729 = vmatpush3.msra.mxu1 %v18937_v45  ;;  %v10860_v48 = vsel %vm6540_vm2, %v6853_v25, 0  ;;  %v6854_v10 = vmul.f32 %v18820_v0, %v6827_v9  ;;  %v19334_v37 = vsub.f32 %v11426_v56, %v19315_v27 }
 0x4ed   : > { %v19244_v28 = vpop.f32.mrf.mxu0  ;;  %15730 = vmatprep.mubr.msk.f32.mxu1 %vm16171_vm1, %v20323_v38  ;;  %v19248_v59 = vand.u32 4294901760, %v10860_v48  ;;  %15710 = vmatpush3.msra.mxu0 %v19166_v47 }
 0x4ee   : > { %v19251_v22 = vpop.f32.mrf.mxu1  ;;  %15711 = vmatprep.subr.mxu0 %v20323_v38  ;;  %v10863_v12 = vsel %vm6540_vm2, %v6854_v10, 0  ;;  %15754 = vmatprep.subr.mxu1 %v20323_v38  ;;  %v6828_v45 = vadd.f32 %v18827_v29, %v6804_v53 }
 0x4ef   : > { %15689 = vmatmul.mubr.f32.gmra.mxu0 %v19139_v46  ;;  %v19259_v0 = vsub.f32 %v10860_v48, %v19248_v59  ;;  %15731 = vmatmul.mubr.f32.vlgmr.msra.gmra.mxu1 %v19248_v59  ;;  %v15357_v43 = vpop.f32.mrf.mxu0  ;;  %v19262_v44 = vand.u32 4294901760, %v10863_v12 }
 0x4f0   : > { %v15378_v35 = vpop.f32.mrf.mxu1  ;;  %15691 = vmatprep.mubr.msk.f32.mxu0 %vm16171_vm1, %v20323_v38  ;;  %15733 = vmatprep.mubr.msk.f32.mxu1 %vm16171_vm1, %v20323_v38  ;;  %v6855_v29 = vmul.f32 %v18841_v32, %v6828_v45  ;;  %v19285_v32 = vand.u32 4294901760, %v11427_v51  ;;  %v19349_v43 = vand.u32 4294901760, %v19334_v37 }
 0x4f1   : > { %v19273_v46 = vsub.f32 %v10863_v12, %v19262_v44  ;;  %15712 = vmatpush3.msra.mxu0 %v19027_v33  ;;  %15755 = vmatpush3.msra.mxu1 %v19166_v47  ;;  %v10938_v60 = vand.u32 4294901760, %v19259_v0 }
 0x4f2   : > { %v19278_v4 = vpop.f32.mrf.mxu0  ;;  %v19280_v54 = vpop.f32.mrf.mxu1  ;;  %15713 = vmatprep.subr.mxu0 %v20323_v38  ;;  %v10866_v31 = vsel %vm6540_vm2, %v6855_v29, 0  ;;  %15756 = vmatprep.subr.mxu1 %v20323_v38  ;;  %v19313_v40 = vsub.f32 %v11427_v51, %v19285_v32 }
 0x4f3   : > { %15692 = vmatmul.mubr.f32.gmra.mxu0 %v19156_v61  ;;  %15734 = vmatmul.mubr.f32.gmra.mxu1 %v19262_v44  ;;  %v10939_v21 = vsub.f32 %v19259_v0, %v10938_v60  ;;  %v19290_v55 = vand.u32 4294901760, %v10866_v31  ;;  %v10948_v36 = vand.u32 4294901760, %v19273_v46 }
 0x4f4   : > { %v15360_v49 = vpop.f32.mrf.mxu0  ;;  %v15402_v16 = vpop.f32.mrf.mxu1  ;;  %15714 = vmatpush3.msra.mxu0 %v18884_v13  ;;  %15715 = vmatprep.mubr.msk.f32.mxu0 %vm16171_vm1, %v20323_v38  ;;  %v19331_v9 = vand.u32 4294901760, %v19313_v40 }
 0x4f5   : > { %15736 = vmatprep.mubr.msk.f32.mxu1 %vm16171_vm1, %v20323_v38  ;;  %v10940_v61 = vand.u32 4294901760, %v10939_v21  ;;  %v19302_v41 = vsub.f32 %v10866_v31, %v19290_v55  ;;  %15757 = vmatpush3.msra.mxu1 %v19027_v33  ;;  %v10949_v20 = vsub.f32 %v19273_v46, %v10948_v36 }
 0x4f6   : > { %v19306_v42 = vpop.f32.mrf.mxu0  ;;  %v19308_v26 = vpop.f32.mrf.mxu1  ;;  %15758 = vmatprep.subr.mxu1 %v20323_v38  ;;  %15739 = vmatprep.subr.mxu0 %v20323_v38  ;;  %v11846_v45 = vsub.f32 %v19313_v40, %v19331_v9 }
 0x4f7   : > { %15716 = vmatmul.mubr.f32.vlgmr.msra.gmra.mxu0 %v10940_v61  ;;  %15737 = vmatmul.mubr.f32.gmra.mxu1 %v19290_v55  ;;  %v10958_v34 = vand.u32 4294901760, %v19302_v41  ;;  %v10950_v52 = vand.u32 4294901760, %v10949_v20  ;;  %v8793_v61 = vadd.f32 %v19251_v22, %v19306_v42 }
 0x4f8   : > { %v15363_v39 = vpop.f32.mrf.mxu0  ;;  %v15405_v62 = vpop.f32.mrf.mxu1  ;;  %15718 = vmatprep.mubr.msk.f32.mxu0 %vm16171_vm1, %v20323_v38  ;;  %15759 = vmatpush3.msra.mxu1 %v18884_v13 }
 0x4f9   : > { %15760 = vmatprep.mubr.msk.f32.mxu1 %vm16171_vm1, %v20323_v38  ;;  %15740 = vmatpush3.msra.mxu0 %v19178_v57  ;;  %v10959_v14 = vsub.f32 %v19302_v41, %v10958_v34 }
 0x4fa   : > { %v8870_v11 = vpop.f32.mrf.mxu0  ;;  %v19326_v25 = vpop.f32.mrf.mxu1  ;;  %15741 = vmatprep.subr.mxu0 %v20323_v38  ;;  %15784 = vmatprep.subr.mxu1 %v20323_v38 }
 0x4fb   : > { %15719 = vmatmul.mubr.f32.gmra.mxu0 %v10950_v52  ;;  %15761 = vmatmul.mubr.f32.vlgmr.msra.gmra.mxu1 %v10938_v60  ;;  %v10960_v48 = vand.u32 4294901760, %v10959_v14  ;;  %v11847_v60 = vand.u32 4294901760, %v11846_v45 }
 0x4fc   : > { %v15387_v53 = vpop.f32.mrf.mxu0  ;;  %v15408_v15 = vpop.f32.mrf.mxu1  ;;  %15721 = vmatprep.mubr.msk.f32.mxu0 %vm16171_vm1, %v20323_v38  ;;  %15763 = vmatprep.mubr.msk.f32.mxu1 %vm16171_vm1, %v20323_v38 }
 0x4fd   : > { %15742 = vmatpush3.msra.mxu0 %v19046_v8  ;;  %15785 = vmatpush3.msra.mxu1 %v19166_v47  ;;  %v11436_v8 = vsel %vm423_vm0, %v18941_v19, 0 }
 0x4fe   : > { %v8877_v10 = vpop.f32.mrf.mxu0  ;;  %v19342_v12 = vpop.f32.mrf.mxu1  ;;  %15743 = vmatprep.subr.mxu0 %v20323_v38  ;;  %15786 = vmatprep.subr.mxu1 %v20323_v38  ;;  %v19371_v19 = vand.u32 4294901760, %v11436_v8 }
 0x4ff   : > { %15722 = vmatmul.mubr.f32.gmra.mxu0 %v10960_v48  ;;  %15764 = vmatmul.mubr.f32.gmra.mxu1 %v10948_v36  ;;  %v11442_v36 = vsel %vm423_vm0, %v18968_v24, 0  ;;  %v8787_v24 = vadd.f32 %v19231_v58, %v19278_v4  ;;  %v11445_v58 = vsel %vm423_vm0, %v19076_v5, 0  ;;  %v11448_v4 = vsel %vm423_vm0, %v19088_v1, 0 }
 0x500   : > { %v15390_v51 = vpop.f32.mrf.mxu0  ;;  %v15432_v35 = vpop.f32.mrf.mxu1  ;;  %15744 = vmatpush3.msra.mxu0 %v18904_v2  ;;  %15745 = vmatprep.mubr.msk.f32.mxu0 %vm16171_vm1, %v20323_v38  ;;  %v11853_v2 = vsub.f32 %v19334_v37, %v19349_v43  ;;  %v19390_v57 = vand.u32 4294901760, %v11442_v36  ;;  %v19397_v16 = vsub.f32 %v11436_v8, %v19371_v19  ;;  %v19417_v5 = vand.u32 4294901760, %v11445_v58 }
 0x501   : > { %15766 = vmatprep.mubr.msk.f32.mxu1 %vm16171_vm1, %v20323_v38  ;;  %15787 = vmatpush3.msra.mxu1 %v19027_v33  ;;  %v11439_v33 = vsel %vm423_vm0, %v18955_v30, 0  ;;  %v8781_v30 = vadd.f32 %v19215_v23, %v19244_v28  ;;  %v19423_v62 = vand.u32 4294901760, %v11448_v4 }
 0x502   : > { %v8884_v47 = vpop.f32.mrf.mxu0  ;;  %v19359_v29 = vpop.f32.mrf.mxu1  ;;  %15788 = vmatprep.subr.mxu1 %v20323_v38  ;;  %15769 = vmatprep.subr.mxu0 %v20323_v38  ;;  %v19384_v49 = vand.u32 4294901760, %v11439_v33  ;;  %v20269_v14 = vand.u32 4294901760, %v19397_v16 }
 0x503   : > { %15746 = vmatmul.mubr.f32.vlgmr.msra.gmra.mxu0 %v19259_v0  ;;  %15767 = vmatmul.mubr.f32.gmra.mxu1 %v10958_v34  ;;  %v8885_v1 = vadd.f32 %v8884_v47, %v8793_v61  ;;  %v19449_v51 = vsub.f32 %v11448_v4, %v19423_v62  ;;  %v11457_v47 = vsel %vm423_vm0, %v19126_v17, 0 }
 0x504   : > { %v15393_v31 = vpop.f32.mrf.mxu0  ;;  %v15435_v21 = vpop.f32.mrf.mxu1  ;;  %15748 = vmatprep.mubr.msk.f32.mxu0 %vm16171_vm1, %v20323_v38  ;;  %15789 = vmatpush3.msra.mxu1 %v18884_v13  ;;  %v11854_v13 = vand.u32 4294901760, %v11853_v2  ;;  %v19408_v34 = vsub.f32 %v11439_v33, %v19384_v49  ;;  %v11460_v33 = vsel %vm423_vm0, %v19128_v18, 0 }
 0x505   : > { %15790 = vmatprep.mubr.msk.f32.mxu1 %vm16171_vm1, %v20323_v38  ;;  %15770 = vmatpush3.msra.mxu0 %v10995_v7  ;;  %v8871_v7 = vadd.f32 %v8870_v11, %v8781_v30 }
 0x506   : > { %v9056_v0 = vpop.f32.mrf.mxu0  ;;  %v19381_v56 = vpop.f32.mrf.mxu1  ;;  %15771 = vmatprep.subr.mxu0 %v20323_v38  ;;  %15839 = vmatprep.subr.mxu1 %v11847_v60  ;;  %v20268_v48 = vand.u32 4294901760, %v19408_v34 }
 0x507   : > { %15749 = vmatmul.mubr.f32.gmra.mxu0 %v19273_v46  ;;  %15791 = vmatmul.mubr.f32.vlgmr.msra.gmra.mxu1 %v19248_v59  ;;  %v8878_v46 = vadd.f32 %v8877_v10, %v8787_v24  ;;  %v8961_v22 = vadd.f32 %v19280_v54, %v8871_v7  ;;  %v11451_v54 = vsel %vm423_vm0, %v19100_v50, 0  ;;  %v19441_v50 = vsub.f32 %v11445_v58, %v19417_v5 }
 0x508   : > { %v15417_v23 = vpop.f32.mrf.mxu0  ;;  %v15438_v28 = vpop.f32.mrf.mxu1  ;;  %15751 = vmatprep.mubr.msk.f32.mxu0 %vm16171_vm1, %v20323_v38  ;;  %15793 = vmatprep.mubr.msk.f32.mxu1 %vm16171_vm1, %v20323_v38  ;;  %v8977_v10 = vadd.f32 %v19326_v25, %v8885_v1  ;;  %v11577_v25 = vsub.f32 %v19397_v16, %v20269_v14  ;;  %v11587_v17 = vsub.f32 %v19408_v34, %v20268_v48  ;;  %v20264_v24 = vand.u32 4294901760, %v19449_v51 }
 0x509   : > { %15772 = vmatpush3.msra.mxu0 %v19056_v6  ;;  %15840 = vmatpush3.msra.mxu1 %v11847_v60  ;;  %v19415_v6 = vsub.f32 %v11442_v36, %v19390_v57  ;;  %v9057_v11 = vadd.f32 %v9056_v0, %v8961_v22  ;;  %v19493_v7 = vand.u32 4294901760, %v11460_v33 }
 0x50a   : > { %v9062_v20 = vpop.f32.mrf.mxu0  ;;  %15773 = vmatprep.subr.mxu0 %v20323_v38  ;;  %15841 = vmatprep.subr.mxu1 %v11854_v13  ;;  %v11588_v61 = vand.u32 4294901760, %v11587_v17 }
 0x50b   : > { %v19410_v39 = vpop.f32.mrf.mxu1  ;;  %15752 = vmatmul.mubr.f32.gmra.mxu0 %v19302_v41  ;;  %15794 = vmatmul.mubr.f32.gmra.mxu1 %v19262_v44  ;;  %v8969_v41 = vadd.f32 %v19308_v26, %v8878_v46  ;;  %v9143_v60 = vadd.f32 %v19342_v12, %v9057_v11  ;;  %v20266_v12 = vand.u32 4294901760, %v19441_v50  ;;  %20344 = vst [vmem:[#allocation13_spill] sm:$0xff] %v19493_v7 }
 0x50c   : > { %v15420_v42 = vpop.f32.mrf.mxu0  ;;  %15774 = vmatpush3.msra.mxu0 %v18916_v3  ;;  %15775 = vmatprep.mubr.msk.f32.mxu0 %vm16171_vm1, %v20323_v38  ;;  %v11454_v3 = vsel %vm423_vm0, %v19124_v63, 0  ;;  %v20267_v63 = vand.u32 4294901760, %v19415_v6 }
 0x50d   : > { %v15462_v52 = vpop.f32.mrf.mxu1  ;;  %15796 = vmatprep.mubr.msk.f32.mxu1 %vm16171_vm1, %v20323_v38  ;;  %15842 = vmatpush3.msra.mxu1 %v11854_v13  ;;  %v9063_v26 = vadd.f32 %v9062_v20, %v8969_v41  ;;  %v19457_v8 = vand.u32 4294901760, %v11454_v3  ;;  %v11578_v13 = vand.u32 4294901760, %v11577_v25  ;;  %v11463_v23 = vsel %vm423_vm0, %v9143_v60, 0 }
 0x50e   : > { %v9068_v53 = vpop.f32.mrf.mxu0  ;;  %15799 = vmatprep.subr.mxu0 %v19285_v32  ;;  %15919 = vmatprep.subr.mxu1 %v19285_v32  ;;  %v11597_v18 = vsub.f32 %v19415_v6, %v20267_v63  ;;  %v19513_v22 = vand.u32 4294901760, %v11463_v23 }
 0x50f   : > { %v19435_v15 = vpop.f32.mrf.mxu1  ;;  %15776 = vmatmul.mubr.f32.vlgmr.msra.gmra.mxu0 %v19248_v59  ;;  %15797 = vmatmul.mubr.f32.gmra.mxu1 %v19290_v55  ;;  %v19451_v59 = vand.u32 4294901760, %v11451_v54  ;;  %v9069_v2 = vadd.f32 %v9068_v53, %v8977_v10  ;;  %v9149_v31 = vadd.f32 %v19359_v29, %v9063_v26 }
 0x510   : > { %v15423_v45 = vpop.f32.mrf.mxu0  ;;  %15843 = vmatprep.mubr.f32.mxu1 %v19371_v19  ;;  %15778 = vmatprep.mubr.msk.f32.mxu0 %vm16171_vm1, %v20323_v38  ;;  %v11598_v20 = vand.u32 4294901760, %v11597_v18  ;;  %20345 = vst [vmem:[#allocation11_spill] sm:$0xff] %v19513_v22 }
 0x511   : > { %v15465_v35 = vpop.f32.mrf.mxu1  ;;  %15800 = vmatpush3.msra.mxu0 %v19285_v32  ;;  %v19483_v29 = vsub.f32 %v11451_v54, %v19451_v59  ;;  %v9155_v28 = vadd.f32 %v19381_v56, %v9069_v2  ;;  %v11466_v58 = vsel %vm423_vm0, %v9149_v31, 0  ;;  %v11607_v56 = vsub.f32 %v19441_v50, %v20266_v12 }
 0x512   : > { %15801 = vmatprep.subr.mxu0 %v19315_v27  ;;  %v19521_v54 = vsub.f32 %v11460_v33, %v19493_v7  ;;  %v19523_v11 = vand.u32 4294901760, %v11466_v58  ;;  %v19535_v35 = vsub.f32 %v11463_v23, %v19513_v22 }
 0x513   : > { %v19466_v21 = vpop.f32.mrf.mxu0  ;;  %v19468_v36 = vpop.f32.mrf.mxu1  ;;  %15779 = vmatmul.mubr.f32.gmra.mxu0 %v19262_v44  ;;  %15844 = vmatmul.mubr.f32.vlgmr.msra.gmra.mxu1 %v19384_v49  ;;  %v19485_v44 = vand.u32 4294901760, %v11457_v47  ;;  %v20263_v52 = vand.u32 4294901760, %v19483_v29  ;;  %v11469_v53 = vsel %vm423_vm0, %v9155_v28, 0  ;;  %v11608_v45 = vand.u32 4294901760, %v11607_v56 }
 0x514   : > { %15846 = vmatprep.mubr.f32.mxu1 %v19390_v57  ;;  %15781 = vmatprep.mubr.msk.f32.mxu0 %vm16171_vm1, %v20323_v38  ;;  %v19491_v38 = vsub.f32 %v11454_v3, %v19457_v8  ;;  %20346 = vst [vmem:[#allocation10_spill] sm:$0xff] %v19523_v11  ;;  %v19537_v25 = vand.u32 4294901760, %v11469_v53  ;;  %v19545_v31 = vsub.f32 %v11466_v58, %v19523_v11  ;;  %vm13033_vm1 = vcmask 253952  }
 0x515   : > { %20343 = vst [vmem:[#allocation15_spill] sm:$0xff] %v19485_v44  ;;  %v15447_v30 = vpop.f32.mrf.mxu0  ;;  %v15468_v0 = vpop.f32.mrf.mxu1  ;;  %15802 = vmatpush3.msra.mxu0 %v19315_v27  ;;  %15920 = vmatpush3.msra.mxu1 %v19285_v32  ;;  %v19511_v1 = vsub.f32 %v11457_v47, %v19485_v44  ;;  %v11627_v2 = vsub.f32 %v19483_v29, %v20263_v52 }
 0x516   : > { %15879 = vmatprep.subr.mxu0 %v19313_v40  ;;  %15921 = vmatprep.subr.mxu1 %v19315_v27  ;;  %v20262_v3 = vand.u32 4294901760, %v19491_v38  ;;  %20347 = vst [vmem:[#allocation9_spill] sm:$0xff] %v19537_v25  ;;  %v20257_v30 = vand.u32 4294901760, %v19521_v54 }
 0x517   : > { %v19500_v46 = vpop.f32.mrf.mxu0  ;;  %v19502_v4 = vpop.f32.mrf.mxu1  ;;  %15782 = vmatmul.mubr.f32.gmra.mxu0 %v19290_v55  ;;  %15847 = vmatmul.mubr.f32.gmra.mxu1 %v19417_v5  ;;  %v11617_v55 = vsub.f32 %v19449_v51, %v20264_v24  ;;  %v20261_v33 = vand.u32 4294901760, %v19511_v1  ;;  %v11628_v58 = vand.u32 4294901760, %v11627_v2 }
 0x518   : > { %15803 = vmatprep.mubr.f32.mxu0 %v11578_v13  ;;  %15849 = vmatprep.mubr.f32.mxu1 %v19423_v62  ;;  %v11637_v18 = vsub.f32 %v19491_v38, %v20262_v3 }
 0x519   : > { %v15450_v42 = vpop.f32.mrf.mxu0  ;;  %v15492_v41 = vpop.f32.mrf.mxu1  ;;  %15922 = vmatpush3.msra.mxu1 %v19315_v27  ;;  %v11618_v17 = vand.u32 4294901760, %v11617_v55 }
 0x51a   : > { %15999 = vmatprep.subr.mxu1 %v19285_v32  ;;  %v11638_v56 = vand.u32 4294901760, %v11637_v18  ;;  %v11657_v42 = vsub.f32 %v19521_v54, %v20257_v30  ;;  %v20255_v41 = vand.u32 4294901760, %v19545_v31 }
 0x51b   : > { %v19528_v26 = vpop.f32.mrf.mxu0  ;;  %v19530_v10 = vpop.f32.mrf.mxu1  ;;  %15804 = vmatmul.mubr.f32.vlgmr.msra.gmra.mxu0 %v11588_v61  ;;  %15850 = vmatmul.mubr.f32.gmra.mxu1 %v19451_v59  ;;  %v11647_v61 = vsub.f32 %v19511_v1, %v20261_v33 }
 0x51c   : > { %15806 = vmatprep.mubr.f32.mxu0 %v11598_v20  ;;  %15852 = vmatprep.mubr.f32.mxu1 %v19457_v8  ;;  %v20256_v20 = vand.u32 4294901760, %v19535_v35 }
 0x51d   : > { %v15453_v47 = vpop.f32.mrf.mxu0  ;;  %v15495_v60 = vpop.f32.mrf.mxu1  ;;  %15880 = vmatpush3.msra.mxu0 %v19313_v40  ;;  %v19557_v40 = vsub.f32 %v11469_v53, %v19537_v25 }
 0x51e   : > { %15881 = vmatprep.subr.mxu0 %v19334_v37  ;;  %v11648_v60 = vand.u32 4294901760, %v11647_v61  ;;  %v11667_v2 = vsub.f32 %v19535_v35, %v20256_v20 }
 0x51f   : > { %v9437_v0 = vpop.f32.mrf.mxu0  ;;  %v19552_v13 = vpop.f32.mrf.mxu1  ;;  %15807 = vmatmul.mubr.f32.gmra.mxu0 %v11608_v45  ;;  %15853 = vmatmul.mubr.f32.gmra.mxu1 %v19485_v44  ;;  %v9348_v45 = vadd.f32 %v19410_v39, %v19466_v21  ;;  %v9354_v21 = vadd.f32 %v19435_v15, %v19500_v46 }
 0x520   : > { %15809 = vmatprep.mubr.f32.mxu0 %v11618_v17  ;;  %15855 = vmatprep.mubr.f32.mxu1 %v19493_v7  ;;  %v20258_v17 = vand.u32 4294901760, %v19557_v40 }
 0x521   : > { %v15477_v23 = vpop.f32.mrf.mxu0  ;;  %v15498_v28 = vpop.f32.mrf.mxu1  ;;  %15882 = vmatpush3.msra.mxu0 %v19334_v37  ;;  %v9438_v18 = vadd.f32 %v9437_v0, %v9348_v45 }
 0x522   : > { %15959 = vmatprep.subr.mxu0 %v19331_v9  ;;  %v11658_v23 = vand.u32 4294901760, %v11657_v42  ;;  %v11677_v28 = vsub.f32 %v19545_v31, %v20255_v41  ;;  %v11687_v0 = vsub.f32 %v19557_v40, %v20258_v17 }
 0x523   : > { %v9444_v55 = vpop.f32.mrf.mxu0  ;;  %v9709_v53 = vpop.f32.mrf.mxu1  ;;  %15810 = vmatmul.mubr.f32.gmra.mxu0 %v11628_v58  ;;  %15856 = vmatmul.mubr.f32.gmra.mxu1 %v19513_v22  ;;  %v9528_v45 = vadd.f32 %v19502_v4, %v9438_v18 }
 0x524   : > { %15812 = vmatprep.mubr.f32.mxu0 %v11638_v56  ;;  %15858 = vmatprep.mubr.f32.mxu1 %v19523_v11  ;;  %v9445_v42 = vadd.f32 %v9444_v55, %v9354_v21 }
 0x525   : > { %v15480_v37 = vpop.f32.mrf.mxu0  ;;  %v15522_v47 = vpop.f32.mrf.mxu1 }
 0x526   : > { %v11668_v37 = vand.u32 4294901760, %v11667_v2  ;;  %v11678_v47 = vand.u32 4294901760, %v11677_v28 }
 0x527   : > { %v9451_v58 = vpop.f32.mrf.mxu0  ;;  %v9715_v39 = vpop.f32.mrf.mxu1  ;;  %15813 = vmatmul.mubr.f32.gmra.mxu0 %v11648_v60  ;;  %15859 = vmatmul.mubr.f32.gmra.mxu1 %v19537_v25  ;;  %v9360_v60 = vadd.f32 %v19468_v36, %v19528_v26 }
 0x528   : > { %15815 = vmatprep.mubr.f32.mxu0 %v11658_v23  ;;  %v11688_v23 = vand.u32 4294901760, %v11687_v0 }
 0x529   : > { %v15483_v61 = vpop.f32.mrf.mxu0  ;;  %v15525_v56 = vpop.f32.mrf.mxu1  ;;  %v9452_v2 = vadd.f32 %v9451_v58, %v9360_v60 }
 0x52a   : > { %v9536_v56 = vadd.f32 %v19530_v10, %v9445_v42 }
 0x52b   : > { %v9623_v41 = vpop.f32.mrf.mxu0  ;;  %v9721_v20 = vpop.f32.mrf.mxu1  ;;  %15816 = vmatmul.mubr.f32.gmra.mxu0 %v11668_v37  ;;  %v9544_v26 = vadd.f32 %v19552_v13, %v9452_v2 }
 0x52c   : > { %v9624_v30 = vadd.f32 %v9623_v41, %v9528_v45  ;;  %15818 = vmatprep.mubr.f32.mxu0 %v11678_v47 }
 0x52d   : > { %v15507_v15 = vpop.f32.mrf.mxu0  ;;  %v15528_v46 = vpop.f32.mrf.mxu1 }
 0x52e   : > { %v9710_v61 = vadd.f32 %v9709_v53, %v9624_v30 }
 0x52f   : > { %v9629_v17 = vpop.f32.mrf.mxu0  ;;  %v9914_v55 = vpop.f32.mrf.mxu1  ;;  %15819 = vmatmul.mubr.f32.gmra.mxu0 %v11688_v23 }
 0x530   : > { %v11472_v4 = vsel %vm423_vm0, %v9710_v61, 0  ;;  %v9630_v18 = vadd.f32 %v9629_v17, %v9536_v56 }
 0x531   : > { %v19591_v28 = vand.u32 4294901760, %v11472_v4  ;;  %v15510_v21 = vpop.f32.mrf.mxu0  ;;  %v15552_v37 = vpop.f32.mrf.mxu1 }
 0x532   : > { %v9716_v36 = vadd.f32 %v9715_v39, %v9630_v18 }
 0x533   : > { %20348 = vst [vmem:[#allocation17_spill] sm:$0xff] %v19591_v28  ;;  %v19595_v41 = vsub.f32 %v11472_v4, %v19591_v28  ;;  %v9635_v58 = vpop.f32.mrf.mxu0  ;;  %15861 = vmatprep.mubr.f32.mxu1 %v19591_v28 }
 0x534   : > { %v11475_v10 = vsel %vm423_vm0, %v9716_v36, 0  ;;  %v9636_v30 = vadd.f32 %v9635_v58, %v9544_v26 }
 0x535   : > { %v19599_v53 = vand.u32 4294901760, %v11475_v10  ;;  %v15513_v0 = vpop.f32.mrf.mxu0  ;;  %v20260_v17 = vand.u32 4294901760, %v19595_v41 }
 0x536   : > { %v9722_v42 = vadd.f32 %v9721_v20, %v9636_v30 }
 0x537   : > { %20349 = vst [vmem:[#allocation16_spill] sm:$0xff] %v19599_v53  ;;  %v19603_v45 = vsub.f32 %v11475_v10, %v19599_v53  ;;  %v9920_v39 = vpop.f32.mrf.mxu1  ;;  %v9808_v13 = vpop.f32.mrf.mxu0  ;;  %15862 = vmatmul.mubr.f32.gmra.mxu1 %v19599_v53  ;;  %v11697_v47 = vsub.f32 %v19595_v41, %v20260_v17 }
 0x538   : > { %v11478_v60 = vsel %vm423_vm0, %v9722_v42, 0  ;;  %v9915_v33 = vadd.f32 %v9914_v55, %v9808_v13 }
 0x539   : > { %v19610_v15 = vand.u32 4294901760, %v11478_v60  ;;  %v15555_v46 = vpop.f32.mrf.mxu1  ;;  %v15537_v23 = vpop.f32.mrf.mxu0  ;;  %v11698_v2 = vand.u32 4294901760, %v11697_v47  ;;  %v20259_v20 = vand.u32 4294901760, %v19603_v45 }
 0x53b   : > { %20350 = vst [vmem:[#allocation18_spill] sm:$0xff] %v19610_v15  ;;  %v19614_v61 = vsub.f32 %v11478_v60, %v19610_v15  ;;  %v9926_v56 = vpop.f32.mrf.mxu1  ;;  %15821 = vmatprep.mubr.f32.mxu0 %v11698_v2  ;;  %15864 = vmatprep.mubr.f32.mxu1 %v19610_v15  ;;  %v11707_v4 = vsub.f32 %v19603_v45, %v20259_v20 }
 0x53d   : > { %v15558_v18 = vpop.f32.mrf.mxu1  ;;  %v11708_v21 = vand.u32 4294901760, %v11707_v4  ;;  %v20265_v37 = vand.u32 4294901760, %v19614_v61 }
 0x53f   : > { %v9818_v36 = vpop.f32.mrf.mxu0  ;;  %v10094_v26 = vpop.f32.mrf.mxu1  ;;  %15822 = vmatmul.mubr.f32.gmra.mxu0 %v11708_v21  ;;  %v11717_v58 = vsub.f32 %v19614_v61, %v20265_v37 }
 0x541   : > { %v15540_v10 = vpop.f32.mrf.mxu0  ;;  %v15582_v30 = vpop.f32.mrf.mxu1  ;;  %v11718_v0 = vand.u32 4294901760, %v11717_v58 }
 0x542   : > { %v9921_v10 = vadd.f32 %v9920_v39, %v9818_v36 }
 0x543   : > { %v9828_v42 = vpop.f32.mrf.mxu0  ;;  %v10102_v47 = vpop.f32.mrf.mxu1  ;;  %15824 = vmatprep.mubr.f32.mxu0 %v11718_v0 }
 0x545   : > { %v15543_v60 = vpop.f32.mrf.mxu0  ;;  %v15585_v46 = vpop.f32.mrf.mxu1 }
 0x546   : > { %v9927_v46 = vadd.f32 %v9926_v56, %v9828_v42 }
 0x547   : > { %v10004_v23 = vpop.f32.mrf.mxu0  ;;  %v10110_v2 = vpop.f32.mrf.mxu1 }
 0x548   : > { %v10005_v52 = vadd.f32 %v10004_v23, %v9915_v33 }
 0x549   : > { %v15567_v4 = vpop.f32.mrf.mxu0  ;;  %v15588_v18 = vpop.f32.mrf.mxu1 }
 0x54a   : > { %v10095_v63 = vadd.f32 %v10094_v26, %v10005_v52 }
 0x54b   : > { %v10011_v20 = vpop.f32.mrf.mxu0  ;;  %v10276_v17 = vpop.f32.mrf.mxu1 }
 0x54c   : > { %v10012_v12 = vadd.f32 %v10011_v20, %v9921_v10 }
 0x54d   : > { %v15570_v21 = vpop.f32.mrf.mxu0  ;;  %v15612_v3 = vpop.f32.mrf.mxu1 }
 0x54e   : > { %v10103_v53 = vadd.f32 %v10102_v47, %v10012_v12 }
 0x54f   : > { %v10018_v24 = vpop.f32.mrf.mxu0  ;;  %v10282_v37 = vpop.f32.mrf.mxu1 }
 0x550   : > { %v10019_v18 = vadd.f32 %v10018_v24, %v9927_v46 }
 0x551   : > { %v15573_v30 = vpop.f32.mrf.mxu0  ;;  %v15615_v58 = vpop.f32.mrf.mxu1 }
 0x552   : > { %v10111_v23 = vadd.f32 %v10110_v2, %v10019_v18 }
 0x553   : > { %v10190_v0 = vpop.f32.mrf.mxu0  ;;  %v10288_v60 = vpop.f32.mrf.mxu1 }
 0x554   : > { %v10191_v48 = vadd.f32 %v10190_v0, %v10095_v63 }
 0x555   : > { %v15597_v14 = vpop.f32.mrf.mxu0  ;;  %v15618_v4 = vpop.f32.mrf.mxu1 }
 0x556   : > { %v10277_v15 = vadd.f32 %v10276_v17, %v10191_v48 }
 0x557   : > { %v10196_v55 = vpop.f32.mrf.mxu0 }
 0x558   : > { %v11481_v3 = vsel %vm423_vm0, %v10277_v15, 0  ;;  %v10197_v33 = vadd.f32 %v10196_v55, %v10103_v53 }
 0x559   : > { %v19625_v13 = vand.u32 4294901760, %v11481_v3  ;;  %v15600_v39 = vpop.f32.mrf.mxu0 }
 0x55a   : > { %v10283_v36 = vadd.f32 %v10282_v37, %v10197_v33 }
 0x55b   : > { %20351 = vst [vmem:[#allocation14_spill] sm:$0xff] %v19625_v13  ;;  %v19628_v52 = vsub.f32 %v11481_v3, %v19625_v13  ;;  %v10202_v20 = vpop.f32.mrf.mxu0  ;;  %15865 = vmatmul.mubr.f32.gmra.mxu1 %v19625_v13 }
 0x55c   : > { %v11484_v14 = vsel %vm423_vm0, %v10283_v36, 0  ;;  %v10203_v63 = vadd.f32 %v10202_v20, %v10111_v23 }
 0x55d   : > { %v19632_v48 = vand.u32 4294901760, %v11484_v14  ;;  %v15603_v12 = vpop.f32.mrf.mxu0  ;;  %v20276_v24 = vand.u32 4294901760, %v19628_v52 }
 0x55e   : > { %v10289_v53 = vadd.f32 %v10288_v60, %v10203_v63 }
 0x55f   : > { %20352 = vst [vmem:[#allocation12_spill] sm:$0xff] %v19632_v48  ;;  %v19636_v17 = vsub.f32 %v11484_v14, %v19632_v48  ;;  %15867 = vmatprep.mubr.f32.mxu1 %v19632_v48  ;;  %v11727_v15 = vsub.f32 %v19628_v52, %v20276_v24 }
 0x560   : > { %v11487_v56 = vsel %vm423_vm0, %v10289_v53, 0 }
 0x561   : > { %v19643_v37 = vand.u32 4294901760, %v11487_v56  ;;  %v11728_v26 = vand.u32 4294901760, %v11727_v15  ;;  %v20275_v42 = vand.u32 4294901760, %v19636_v17 }
 0x563   : > { %20353 = vst [vmem:[#allocation19_spill] sm:$0xff] %v19643_v37  ;;  %v19647_v47 = vsub.f32 %v11487_v56, %v19643_v37  ;;  %15825 = vmatmul.mubr.f32.gmra.mxu0 %v11728_v26  ;;  %15868 = vmatmul.mubr.f32.gmra.mxu1 %v19643_v37  ;;  %v11737_v2 = vsub.f32 %v19636_v17, %v20275_v42 }
 0x565   : > { %v11738_v21 = vand.u32 4294901760, %v11737_v2  ;;  %v20274_v10 = vand.u32 4294901760, %v19647_v47 }
 0x567   : > { %15827 = vmatprep.mubr.f32.mxu0 %v11738_v21  ;;  %v11747_v30 = vsub.f32 %v19647_v47, %v20274_v10 }
 0x569   : > { %v11748_v58 = vand.u32 4294901760, %v11747_v30 }
 0x56b   : > { %15828 = vmatmul.mubr.f32.gmra.mxu0 %v11748_v58 }
 0x58b   : > { %v10481_v0 = vpop.f32.mrf.mxu1 }
 0x58d   : > { %v15642_v60 = vpop.f32.mrf.mxu1 }
 0x58f   : > { %v10487_v46 = vpop.f32.mrf.mxu1 }
 0x591   : > { %v15645_v4 = vpop.f32.mrf.mxu1 }
 0x593   : > { %v10375_v18 = vpop.f32.mrf.mxu0  ;;  %v10493_v55 = vpop.f32.mrf.mxu1 }
 0x594   : > { %v10482_v58 = vadd.f32 %v10481_v0, %v10375_v18 }
 0x595   : > { %v15627_v3 = vpop.f32.mrf.mxu0  ;;  %v15648_v33 = vpop.f32.mrf.mxu1 }
 0x597   : > { %v10385_v39 = vpop.f32.mrf.mxu0  ;;  %v10661_v36 = vpop.f32.mrf.mxu1 }
 0x598   : > { %v10488_v42 = vadd.f32 %v10487_v46, %v10385_v39 }
 0x599   : > { %v15630_v23 = vpop.f32.mrf.mxu0  ;;  %v15672_v20 = vpop.f32.mrf.mxu1 }
 0x59b   : > { %v10395_v14 = vpop.f32.mrf.mxu0  ;;  %v10669_v63 = vpop.f32.mrf.mxu1 }
 0x59d   : > { %v15633_v12 = vpop.f32.mrf.mxu0  ;;  %v15675_v53 = vpop.f32.mrf.mxu1 }
 0x59e   : > { %v10494_v53 = vadd.f32 %v10493_v55, %v10395_v14 }
 0x59f   : > { %v10571_v15 = vpop.f32.mrf.mxu0  ;;  %v10677_v56 = vpop.f32.mrf.mxu1 }
 0x5a0   : > { %v10572_v10 = vadd.f32 %v10571_v15, %v10482_v58 }
 0x5a1   : > { %v15657_v26 = vpop.f32.mrf.mxu0  ;;  %v15678_v2 = vpop.f32.mrf.mxu1 }
 0x5a2   : > { %v10662_v37 = vadd.f32 %v10661_v36, %v10572_v10 }
 0x5a3   : > { %v10578_v21 = vpop.f32.mrf.mxu0  ;;  %v10843_v30 = vpop.f32.mrf.mxu1 }
 0x5a4   : > { %v10579_v20 = vadd.f32 %v10578_v21, %v10488_v42 }
 0x5a5   : > { %v15660_v60 = vpop.f32.mrf.mxu0  ;;  %v15702_v4 = vpop.f32.mrf.mxu1 }
 0x5a6   : > { %v10670_v11 = vadd.f32 %v10669_v63, %v10579_v20 }
 0x5a7   : > { %v10585_v3 = vpop.f32.mrf.mxu0  ;;  %v10849_v33 = vpop.f32.mrf.mxu1 }
 0x5a8   : > { %v10586_v2 = vadd.f32 %v10585_v3, %v10494_v53 }
 0x5a9   : > { %v15663_v24 = vpop.f32.mrf.mxu0  ;;  %v15705_v23 = vpop.f32.mrf.mxu1 }
 0x5aa   : > { %v10678_v10 = vadd.f32 %v10677_v56, %v10586_v2 }
 0x5ab   : > { %v10757_v48 = vpop.f32.mrf.mxu0  ;;  %v10855_v12 = vpop.f32.mrf.mxu1 }
 0x5ac   : > { %v10758_v13 = vadd.f32 %v10757_v48, %v10662_v37 }
 0x5ad   : > { %v15687_v28 = vpop.f32.mrf.mxu0  ;;  %v15708_v26 = vpop.f32.mrf.mxu1 }
 0x5ae   : > { %v10844_v25 = vadd.f32 %v10843_v30, %v10758_v13 }
 0x5af   : > { %v10763_v0 = vpop.f32.mrf.mxu0  ;;  %v11048_v18 = vpop.f32.mrf.mxu1 }
 0x5b0   : > { %v11490_v15 = vsel %vm423_vm0, %v10844_v25, 0  ;;  %v10764_v58 = vadd.f32 %v10763_v0, %v10670_v11 }
 0x5b1   : > { %v19658_v60 = vand.u32 4294901760, %v11490_v15  ;;  %v15690_v24 = vpop.f32.mrf.mxu0  ;;  %v15732_v46 = vpop.f32.mrf.mxu1 }
 0x5b2   : > { %v10850_v42 = vadd.f32 %v10849_v33, %v10764_v58 }
 0x5b3   : > { %20354 = vst [vmem:[#allocation20_spill] sm:$0xff] %v19658_v60  ;;  %v19661_v39 = vsub.f32 %v11490_v15, %v19658_v60  ;;  %v10769_v48 = vpop.f32.mrf.mxu0  ;;  %v11054_v28 = vpop.f32.mrf.mxu1  ;;  %15870 = vmatprep.mubr.f32.mxu1 %v19658_v60 }
 0x5b4   : > { %v11493_v13 = vsel %vm423_vm0, %v10850_v42, 0  ;;  %v10770_v37 = vadd.f32 %v10769_v48, %v10678_v10 }
 0x5b5   : > { %v19665_v55 = vand.u32 4294901760, %v11493_v13  ;;  %v15693_v25 = vpop.f32.mrf.mxu0  ;;  %v15735_v11 = vpop.f32.mrf.mxu1  ;;  %v20290_v36 = vand.u32 4294901760, %v19661_v39 }
 0x5b6   : > { %v10856_v14 = vadd.f32 %v10855_v12, %v10770_v37 }
 0x5b7   : > { %20355 = vst [vmem:[#allocation2_spill] sm:$0xff] %v19665_v55  ;;  %v19669_v63 = vsub.f32 %v11493_v13, %v19665_v55  ;;  %v10942_v56 = vpop.f32.mrf.mxu0  ;;  %v11060_v21 = vpop.f32.mrf.mxu1  ;;  %15871 = vmatmul.mubr.f32.gmra.mxu1 %v19665_v55  ;;  %v11757_v30 = vsub.f32 %v19661_v39, %v20290_v36 }
 0x5b8   : > { %v11496_v4 = vsel %vm423_vm0, %v10856_v14, 0 }
 0x5b9   : > { %v19676_v3 = vand.u32 4294901760, %v11496_v4  ;;  %v15717_v33 = vpop.f32.mrf.mxu0  ;;  %v15738_v23 = vpop.f32.mrf.mxu1  ;;  %v11758_v20 = vand.u32 4294901760, %v11757_v30  ;;  %v20289_v12 = vand.u32 4294901760, %v19669_v63 }
 0x5bb   : > { %20356 = vst [vmem:[#allocation3_spill] sm:$0xff] %v19676_v3  ;;  %v19680_v53 = vsub.f32 %v11496_v4, %v19676_v3  ;;  %v10952_v26 = vpop.f32.mrf.mxu0  ;;  %v11228_v2 = vpop.f32.mrf.mxu1  ;;  %15830 = vmatprep.mubr.f32.mxu0 %v11758_v20  ;;  %15873 = vmatprep.mubr.f32.mxu1 %v19676_v3  ;;  %v11767_v0 = vsub.f32 %v19669_v63, %v20289_v12 }
 0x5bc   : > { %v11049_v20 = vadd.f32 %v11048_v18, %v10942_v56  ;;  %v11055_v36 = vadd.f32 %v11054_v28, %v10952_v26 }
 0x5bd   : > { %v15720_v15 = vpop.f32.mrf.mxu0  ;;  %v15762_v58 = vpop.f32.mrf.mxu1  ;;  %v11768_v24 = vand.u32 4294901760, %v11767_v0  ;;  %v20295_v46 = vand.u32 4294901760, %v19680_v53 }
 0x5bf   : > { %v10962_v42 = vpop.f32.mrf.mxu0  ;;  %v11236_v10 = vpop.f32.mrf.mxu1  ;;  %15831 = vmatmul.mubr.f32.gmra.mxu0 %v11768_v24  ;;  %v11777_v48 = vsub.f32 %v19680_v53, %v20295_v46 }
 0x5c0   : > { %v11061_v60 = vadd.f32 %v11060_v21, %v10962_v42 }
 0x5c1   : > { %v15723_v13 = vpop.f32.mrf.mxu0  ;;  %v15765_v37 = vpop.f32.mrf.mxu1  ;;  %v11778_v25 = vand.u32 4294901760, %v11777_v48 }
 0x5c3   : > { %v11138_v11 = vpop.f32.mrf.mxu0  ;;  %v11244_v14 = vpop.f32.mrf.mxu1  ;;  %15833 = vmatprep.mubr.f32.mxu0 %v11778_v25 }
 0x5c4   : > { %v11139_v58 = vadd.f32 %v11138_v11, %v11049_v20 }
 0x5c5   : > { %v15747_v30 = vpop.f32.mrf.mxu0  ;;  %v15768_v4 = vpop.f32.mrf.mxu1 }
 0x5c6   : > { %v11229_v13 = vadd.f32 %v11228_v2, %v11139_v58 }
 0x5c7   : > { %v11145_v33 = vpop.f32.mrf.mxu0  ;;  %v11410_v23 = vpop.f32.mrf.mxu1 }
 0x5c8   : > { %v11146_v46 = vadd.f32 %v11145_v33, %v11055_v36 }
 0x5c9   : > { %v15750_v0 = vpop.f32.mrf.mxu0  ;;  %v15792_v15 = vpop.f32.mrf.mxu1 }
 0x5ca   : > { %v11237_v44 = vadd.f32 %v11236_v10, %v11146_v46  ;;  %v19703_v46 = vld [vmem:[%s20240_s6] ss:$0 sm:$0xff] }
 0x5cb   : > { %v11152_v12 = vpop.f32.mrf.mxu0  ;;  %v11416_v24 = vpop.f32.mrf.mxu1 }
 0x5cc   : > { %v11153_v4 = vadd.f32 %v11152_v12, %v11061_v60 }
 0x5cd   : > { %v15753_v3 = vpop.f32.mrf.mxu0  ;;  %v15795_v55 = vpop.f32.mrf.mxu1 }
 0x5ce   : > { %v11245_v3 = vadd.f32 %v11244_v14, %v11153_v4 }
 0x5cf   : > { %v11324_v37 = vpop.f32.mrf.mxu0  ;;  %v11422_v48 = vpop.f32.mrf.mxu1 }
 0x5d0   : > { %v11325_v22 = vadd.f32 %v11324_v37, %v11229_v13 }
 0x5d1   : > { %v15777_v25 = vpop.f32.mrf.mxu0  ;;  %v15798_v30 = vpop.f32.mrf.mxu1 }
 0x5d2   : > { %v11411_v7 = vadd.f32 %v11410_v23, %v11325_v22 }
 0x5d3   : > { %v11330_v18 = vpop.f32.mrf.mxu0  ;;  %v15845_v56 = vpop.f32.mrf.mxu1 }
 0x5d4   : > { %v11499_v11 = vsel %vm423_vm0, %v11411_v7, 0  ;;  %v11331_v20 = vadd.f32 %v11330_v18, %v11237_v44 }
 0x5d5   : > { %v19691_v0 = vand.u32 4294901760, %v11499_v11  ;;  %v15780_v28 = vpop.f32.mrf.mxu0  ;;  %v11891_v55 = vpop.f32.mrf.mxu1 }
 0x5d6   : > { %v11417_v36 = vadd.f32 %v11416_v24, %v11331_v20 }
 0x5d7   : > { %v19694_v26 = vsub.f32 %v11499_v11, %v19691_v0  ;;  %v11336_v21 = vpop.f32.mrf.mxu0  ;;  %v15848_v2 = vpop.f32.mrf.mxu1  ;;  %15874 = vmatmul.mubr.f32.gmra.mxu1 %v19691_v0 }
 0x5d8   : > { %v11502_v22 = vsel %vm423_vm0, %v11417_v36, 0  ;;  %v11337_v60 = vadd.f32 %v11336_v21, %v11245_v3  ;;  %v20357_v21 = vand.u32 4294901760, %v19397_v16 }
 0x5d9   : > { %v19698_v12 = vand.u32 4294901760, %v11502_v22  ;;  %v15783_v7 = vpop.f32.mrf.mxu0  ;;  %v11903_v44 = vpop.f32.mrf.mxu1  ;;  %v11786_v42 = vand.u32 4294901760, %v19694_v26 }
 0x5da   : > { %v11423_v10 = vadd.f32 %v11422_v48, %v11337_v60 }
 0x5db   : > { %v19707_v14 = vsub.f32 %v11502_v22, %v19698_v12  ;;  %v15805_v33 = vpop.f32.mrf.mxu0  ;;  %v15851_v23 = vpop.f32.mrf.mxu1  ;;  %15876 = vmatprep.mubr.f32.mxu1 %v19698_v12  ;;  %v11787_v15 = vsub.f32 %v19694_v26, %v11786_v42 }
 0x5dc   : > { %v11505_v58 = vsel %vm423_vm0, %v11423_v10, 0  ;;  %v11591_v24 = vadd.f32 %v15805_v33, %v19703_v46  ;;  %vm12955_vm0 = vcmask 261120  }
 0x5dd   : > { %v19715_v13 = vand.u32 4294901760, %v11505_v58  ;;  %v11580_v37 = vpop.f32.mrf.mxu0  ;;  %v11915_v25 = vpop.f32.mrf.mxu1  ;;  %v11788_v48 = vand.u32 4294901760, %v11787_v15  ;;  %v11796_v30 = vand.u32 4294901760, %v19707_v14 }
 0x5de   : > { %v11581_v4 = vadd.f32 %v19703_v46, %v11580_v37  ;;  %v19719_v18 = vadd.f32 %v15845_v56, %v11591_v24  ;;  %v20358_v24 = vand.u32 4294901760, %v19408_v34 }
 0x5df   : > { %v19722_v11 = vsub.f32 %v11505_v58, %v19715_v13  ;;  %v15808_v20 = vpop.f32.mrf.mxu0  ;;  %15834 = vmatmul.mubr.f32.gmra.mxu0 %v11788_v48  ;;  %v15854_v28 = vpop.f32.mrf.mxu1  ;;  %15877 = vmatmul.mubr.f32.gmra.mxu1 %v19715_v13  ;;  %v11797_v36 = vsub.f32 %v19707_v14, %v11796_v30  ;;  %v20359_v48 = vand.u32 4294901760, %v19415_v6 }
 0x5e0   : > { %v11611_v3 = vadd.f32 %v15808_v20, %v19703_v46  ;;  %15923 = vmatprep.mubr.f32.mxu1 %v20357_v21  ;;  %v19731_v22 = vadd.f32 %v11891_v55, %v11581_v4 }
 0x5e1   : > { %v11600_v56 = vpop.f32.mrf.mxu0  ;;  %v11798_v60 = vand.u32 4294901760, %v11797_v36  ;;  %v11806_v7 = vand.u32 4294901760, %v19722_v11  ;;  %v11927_v15 = vpop.f32.mrf.mxu1 }
 0x5e2   : > { %v11601_v10 = vadd.f32 %v19703_v46, %v11600_v56  ;;  %v19735_v33 = vadd.f32 %v15848_v2, %v11611_v3 }
 0x5e3   : > { %v15811_v58 = vpop.f32.mrf.mxu0  ;;  %15836 = vmatprep.mubr.f32.mxu0 %v11798_v60  ;;  %15924 = vmatmul.mubr.f32.vlgmr.msra.gmra.mxu1 %v20358_v24  ;;  %v11807_v37 = vsub.f32 %v19722_v11, %v11806_v7  ;;  %v15857_v21 = vpop.f32.mrf.mxu1  ;;  %v20360_v60 = vand.u32 4294901760, %v19441_v50 }
 0x5e4   : > { %v11631_v55 = vadd.f32 %v15811_v58, %v19703_v46  ;;  %15926 = vmatprep.mubr.f32.mxu1 %v20359_v48  ;;  %16000 = vmatpush3.msra.mxu1 %v19285_v32  ;;  %v19746_v4 = vadd.f32 %v11903_v44, %v11601_v10  ;;  %v20361_v44 = vand.u32 4294901760, %v19449_v51 }
 0x5e5   : > { %v11620_v2 = vpop.f32.mrf.mxu0  ;;  %v11808_v20 = vand.u32 4294901760, %v11807_v37  ;;  %16001 = vmatprep.subr.mxu1 %v19315_v27  ;;  %v11939_v24 = vpop.f32.mrf.mxu1 }
 0x5e6   : > { %v11621_v36 = vadd.f32 %v19703_v46, %v11620_v2  ;;  %16002 = vmatpush3.msra.mxu1 %v19315_v27  ;;  %v19751_v3 = vadd.f32 %v15851_v23, %v11631_v55  ;;  %v20362_v55 = vand.u32 4294901760, %v19483_v29 }
 0x5e7   : > { %v15814_v56 = vpop.f32.mrf.mxu0  ;;  %15837 = vmatmul.mubr.f32.gmra.mxu0 %v11808_v20  ;;  %15927 = vmatmul.mubr.f32.gmra.mxu1 %v20360_v60  ;;  %v15860_v20 = vpop.f32.mrf.mxu1 }
 0x5e8   : > { %v11651_v32 = vadd.f32 %v15814_v56, %v19703_v46  ;;  %15883 = vmatprep.mubr.f32.mxu0 %v19397_v16  ;;  %15929 = vmatprep.mubr.f32.mxu1 %v20361_v44  ;;  %v19759_v10 = vadd.f32 %v11915_v25, %v11621_v36  ;;  %v20363_v16 = vand.u32 4294901760, %v19491_v38  ;;  %v20366_v44 = vand.u32 4294901760, %v19535_v35 }
 0x5e9   : > { %v11640_v58 = vpop.f32.mrf.mxu0 }
 0x5ea   : > { %v11641_v27 = vadd.f32 %v19703_v46, %v11640_v58  ;;  %v19762_v23 = vadd.f32 %v15854_v28, %v11651_v32 }
 0x5eb   : > { %v15817_v37 = vpop.f32.mrf.mxu0  ;;  %15884 = vmatmul.mubr.f32.vlgmr.msra.gmra.mxu0 %v19408_v34  ;;  %15930 = vmatmul.mubr.f32.gmra.mxu1 %v20362_v55 }
 0x5ec   : > { %v11671_v48 = vadd.f32 %v15817_v37, %v19703_v46  ;;  %15886 = vmatprep.mubr.f32.mxu0 %v19415_v6  ;;  %15932 = vmatprep.mubr.f32.mxu1 %v20363_v16  ;;  %v19771_v25 = vadd.f32 %v11927_v15, %v11641_v27  ;;  %v20364_v6 = vand.u32 4294901760, %v19511_v1  ;;  %v20365_v15 = vand.u32 4294901760, %v19521_v54 }
 0x5ed   : > { %v11660_v2 = vpop.f32.mrf.mxu0  ;;  %15960 = vmatpush3.msra.mxu0 %v19331_v9  ;;  %v20369_v27 = vand.u32 4294901760, %v19595_v41  ;;  %v20372_v37 = vand.u32 4294901760, %v19628_v52 }
 0x5ee   : > { %v11661_v28 = vadd.f32 %v19703_v46, %v11660_v2  ;;  %15961 = vmatprep.subr.mxu0 %v19349_v43  ;;  %v19776_v34 = vadd.f32 %v15857_v21, %v11671_v48  ;;  %v20375_v2 = vand.u32 4294901760, %v19661_v39 }
 0x5ef   : > { %v15820_v36 = vpop.f32.mrf.mxu0  ;;  %15887 = vmatmul.mubr.f32.gmra.mxu0 %v19441_v50  ;;  %15933 = vmatmul.mubr.f32.gmra.mxu1 %v20364_v6  ;;  %v11951_v50 = vpop.f32.mrf.mxu1  ;;  %v20388_v6 = vld [vmem:[#allocation19_spill] sm:$0xff] }
 0x5f0   : > { %v11691_v56 = vadd.f32 %v15820_v36, %v19703_v46  ;;  %15889 = vmatprep.mubr.f32.mxu0 %v19449_v51  ;;  %15935 = vmatprep.mubr.f32.mxu1 %v20365_v15  ;;  %v19785_v9 = vadd.f32 %v11939_v24, %v11661_v28  ;;  %v20367_v51 = vand.u32 4294901760, %v19545_v31  ;;  %v20376_v28 = vand.u32 4294901760, %v19669_v63  ;;  %v20387_v36 = vld [vmem:[#allocation12_spill] sm:$0xff]  ;;  %v20390_v15 = vld [vmem:[#allocation2_spill] sm:$0xff] }
 0x5f1   : > { %v11680_v60 = vpop.f32.mrf.mxu0  ;;  %15962 = vmatpush3.msra.mxu0 %v19349_v43  ;;  %v20368_v43 = vand.u32 4294901760, %v19557_v40 }
 0x5f2   : > { %v11681_v21 = vadd.f32 %v19703_v46, %v11680_v60  ;;  %v19789_v32 = vadd.f32 %v15860_v20, %v11691_v56  ;;  %v20377_v20 = vand.u32 4294901760, %v19680_v53  ;;  %v20389_v56 = vld [vmem:[#allocation20_spill] sm:$0xff]  ;;  %v20391_v60 = vld [vmem:[#allocation3_spill] sm:$0xff] }
 0x5f3   : > { %15890 = vmatmul.mubr.f32.gmra.mxu0 %v19483_v29  ;;  %15936 = vmatmul.mubr.f32.gmra.mxu1 %v20366_v44  ;;  %v20370_v29 = vand.u32 4294901760, %v19603_v45 }
 0x5f4   : > { %15892 = vmatprep.mubr.f32.mxu0 %v19491_v38  ;;  %15938 = vmatprep.mubr.f32.mxu1 %v20367_v51  ;;  %v19797_v58 = vadd.f32 %v11951_v50, %v11681_v21  ;;  %v20371_v38 = vand.u32 4294901760, %v19614_v61 }
 0x5f7   : > { %15893 = vmatmul.mubr.f32.gmra.mxu0 %v19511_v1  ;;  %15939 = vmatmul.mubr.f32.gmra.mxu1 %v20368_v43  ;;  %v15863_v24 = vpop.f32.mrf.mxu1 }
 0x5f8   : > { %15895 = vmatprep.mubr.f32.mxu0 %v19521_v54  ;;  %15941 = vmatprep.mubr.f32.mxu1 %v20369_v27 }
 0x5f9   : > { %v11963_v16 = vpop.f32.mrf.mxu1 }
 0x5fb   : > { %15896 = vmatmul.mubr.f32.gmra.mxu0 %v19535_v35  ;;  %15942 = vmatmul.mubr.f32.gmra.mxu1 %v20370_v29  ;;  %v20373_v35 = vand.u32 4294901760, %v19636_v17 }
 0x5fc   : > { %15898 = vmatprep.mubr.f32.mxu0 %v19545_v31  ;;  %15944 = vmatprep.mubr.f32.mxu1 %v20371_v38 }
 0x5ff   : > { %v15823_v1 = vpop.f32.mrf.mxu0  ;;  %15899 = vmatmul.mubr.f32.gmra.mxu0 %v19557_v40  ;;  %15945 = vmatmul.mubr.f32.gmra.mxu1 %v20372_v37  ;;  %v20374_v40 = vand.u32 4294901760, %v19647_v47 }
 0x600   : > { %v11711_v54 = vadd.f32 %v15823_v1, %v19703_v46  ;;  %15901 = vmatprep.mubr.f32.mxu0 %v19595_v41  ;;  %15947 = vmatprep.mubr.f32.mxu1 %v20373_v35 }
 0x601   : > { %v11700_v55 = vpop.f32.mrf.mxu0 }
 0x602   : > { %v11701_v31 = vadd.f32 %v19703_v46, %v11700_v55  ;;  %v19819_v48 = vadd.f32 %v15863_v24, %v11711_v54 }
 0x603   : > { %15902 = vmatmul.mubr.f32.gmra.mxu0 %v19603_v45  ;;  %15948 = vmatmul.mubr.f32.gmra.mxu1 %v20374_v40  ;;  %v20378_v45 = vld [vmem:[#allocation15_spill] sm:$0xff] }
 0x604   : > { %15904 = vmatprep.mubr.f32.mxu0 %v19614_v61  ;;  %15950 = vmatprep.mubr.f32.mxu1 %v20375_v2  ;;  %v19827_v41 = vadd.f32 %v11963_v16, %v11701_v31  ;;  %v20379_v61 = vld [vmem:[#allocation13_spill] sm:$0xff] }
 0x607   : > { %15905 = vmatmul.mubr.f32.gmra.mxu0 %v19628_v52  ;;  %15951 = vmatmul.mubr.f32.gmra.mxu1 %v20376_v28 }
 0x608   : > { %15907 = vmatprep.mubr.f32.mxu0 %v19636_v17  ;;  %15953 = vmatprep.mubr.f32.mxu1 %v20377_v20  ;;  %v20380_v17 = vld [vmem:[#allocation11_spill] sm:$0xff] }
 0x60b   : > { %15908 = vmatmul.mubr.f32.gmra.mxu0 %v19647_v47  ;;  %15954 = vmatmul.mubr.f32.gmra.mxu1 %v11786_v42 }
 0x60c   : > { %15910 = vmatprep.mubr.f32.mxu0 %v19661_v39  ;;  %15956 = vmatprep.mubr.f32.mxu1 %v11796_v30 }
 0x60f   : > { %15911 = vmatmul.mubr.f32.gmra.mxu0 %v19669_v63  ;;  %15957 = vmatmul.mubr.f32.gmra.mxu1 %v11806_v7  ;;  %v20382_v63 = vld [vmem:[#allocation9_spill] sm:$0xff]  ;;  %v20386_v7 = vld [vmem:[#allocation14_spill] sm:$0xff] }
 0x610   : > { %15913 = vmatprep.mubr.f32.mxu0 %v19680_v53  ;;  %16003 = vmatprep.mubr.f32.mxu1 %v19371_v19 }
 0x613   : > { %15914 = vmatmul.mubr.f32.gmra.mxu0 %v19694_v26  ;;  %16004 = vmatmul.mubr.f32.vlgmr.msra.gmra.mxu1 %v19384_v49 }
 0x614   : > { %15916 = vmatprep.mubr.f32.mxu0 %v19707_v14  ;;  %16006 = vmatprep.mubr.f32.mxu1 %v19390_v57  ;;  %v20385_v14 = vld [vmem:[#allocation18_spill] sm:$0xff] }
 0x617   : > { %15917 = vmatmul.mubr.f32.gmra.mxu0 %v19722_v11  ;;  %16007 = vmatmul.mubr.f32.gmra.mxu1 %v19417_v5 }
 0x618   : > { %15963 = vmatprep.mubr.f32.mxu0 %v19371_v19  ;;  %16009 = vmatprep.mubr.f32.mxu1 %v19423_v62 }
 0x61b   : > { %15964 = vmatmul.mubr.f32.vlgmr.msra.gmra.mxu0 %v19384_v49  ;;  %16010 = vmatmul.mubr.f32.gmra.mxu1 %v19451_v59  ;;  %v15866_v52 = vpop.f32.mrf.mxu1 }
 0x61c   : > { %15966 = vmatprep.mubr.f32.mxu0 %v19390_v57  ;;  %16012 = vmatprep.mubr.f32.mxu1 %v19457_v8  ;;  %v20381_v57 = vld [vmem:[#allocation10_spill] sm:$0xff] }
 0x61f   : > { %15967 = vmatmul.mubr.f32.gmra.mxu0 %v19417_v5  ;;  %16013 = vmatmul.mubr.f32.gmra.mxu1 %v20378_v45 }
 0x620   : > { %15969 = vmatprep.mubr.f32.mxu0 %v19423_v62  ;;  %16015 = vmatprep.mubr.f32.mxu1 %v20379_v61  ;;  %v11975_v62 = vpop.f32.mrf.mxu1 }
 0x623   : > { %v15826_v19 = vpop.f32.mrf.mxu0  ;;  %15970 = vmatmul.mubr.f32.gmra.mxu0 %v19451_v59  ;;  %16016 = vmatmul.mubr.f32.gmra.mxu1 %v20380_v17  ;;  %v20383_v59 = vld [vmem:[#allocation17_spill] sm:$0xff]  ;;  %v15869_v30 = vpop.f32.mrf.mxu1 }
 0x624   : > { %v11731_v49 = vadd.f32 %v15826_v19, %v19703_v46  ;;  %15972 = vmatprep.mubr.f32.mxu0 %v19457_v8  ;;  %16018 = vmatprep.mubr.f32.mxu1 %v20381_v57  ;;  %v20384_v8 = vld [vmem:[#allocation16_spill] sm:$0xff] }
 0x625   : > { %v11720_v47 = vpop.f32.mrf.mxu0  ;;  %v19905_v21 = vpop.f32.mrf.mxu1 }
 0x626   : > { %v11721_v5 = vadd.f32 %v19703_v46, %v11720_v47  ;;  %v19868_v39 = vadd.f32 %v15866_v52, %v11731_v49 }
 0x627   : > { %15973 = vmatmul.mubr.f32.gmra.mxu0 %v20378_v45  ;;  %16019 = vmatmul.mubr.f32.gmra.mxu1 %v20382_v63 }
 0x628   : > { %15975 = vmatprep.mubr.f32.mxu0 %v20379_v61  ;;  %16021 = vmatprep.mubr.f32.mxu1 %v20383_v59  ;;  %v19874_v53 = vadd.f32 %v11975_v62, %v11721_v5 }
 0x62b   : > { %v15829_v26 = vpop.f32.mrf.mxu0  ;;  %15976 = vmatmul.mubr.f32.gmra.mxu0 %v20380_v17  ;;  %16022 = vmatmul.mubr.f32.gmra.mxu1 %v20384_v8 }
 0x62c   : > { %v11751_v42 = vadd.f32 %v15829_v26, %v19703_v46  ;;  %15978 = vmatprep.mubr.f32.mxu0 %v20381_v57  ;;  %16024 = vmatprep.mubr.f32.mxu1 %v20385_v14 }
 0x62d   : > { %v19907_v50 = vpop.f32.mrf.mxu0 }
 0x62e   : > { %v19881_v11 = vadd.f32 %v15869_v30, %v11751_v42 }
 0x62f   : > { %15979 = vmatmul.mubr.f32.gmra.mxu0 %v20382_v63  ;;  %16025 = vmatmul.mubr.f32.gmra.mxu1 %v20386_v7 }
 0x630   : > { %15981 = vmatprep.mubr.f32.mxu0 %v20383_v59  ;;  %16027 = vmatprep.mubr.f32.mxu1 %v20387_v36 }
 0x633   : > { %15982 = vmatmul.mubr.f32.gmra.mxu0 %v20384_v8  ;;  %16028 = vmatmul.mubr.f32.gmra.mxu1 %v20388_v6 }
 0x634   : > { %15984 = vmatprep.mubr.f32.mxu0 %v20385_v14  ;;  %16030 = vmatprep.mubr.f32.mxu1 %v20389_v56 }
 0x637   : > { %15985 = vmatmul.mubr.f32.gmra.mxu0 %v20386_v7  ;;  %16031 = vmatmul.mubr.f32.gmra.mxu1 %v20390_v15 }
 0x638   : > { %15987 = vmatprep.mubr.f32.mxu0 %v20387_v36  ;;  %16033 = vmatprep.mubr.f32.mxu1 %v20391_v60 }
 0x63b   : > { %15988 = vmatmul.mubr.f32.gmra.mxu0 %v20388_v6  ;;  %16034 = vmatmul.mubr.f32.gmra.mxu1 %v19691_v0 }
 0x63c   : > { %15990 = vmatprep.mubr.f32.mxu0 %v20389_v56  ;;  %16036 = vmatprep.mubr.f32.mxu1 %v19698_v12 }
 0x63f   : > { %15991 = vmatmul.mubr.f32.gmra.mxu0 %v20390_v15  ;;  %16037 = vmatmul.mubr.f32.gmra.mxu1 %v19715_v13 }
 0x640   : > { %15993 = vmatprep.mubr.f32.mxu0 %v20391_v60 }
 0x643   : > { %15994 = vmatmul.mubr.f32.gmra.mxu0 %v19691_v0 }
 0x644   : > { %15996 = vmatprep.mubr.f32.mxu0 %v19698_v12 }
 0x647   : > { %15997 = vmatmul.mubr.f32.gmra.mxu0 %v19715_v13 }
 0x677   : > { %v15872_v44 = vpop.f32.mrf.mxu1 }
 0x679   : > { %v11999_v24 = vpop.f32.mrf.mxu1 }
 0x67f   : > { %v15832_v51 = vpop.f32.mrf.mxu0 }
 0x680   : > { %v11771_v43 = vadd.f32 %v15832_v51, %v19703_v46 }
 0x681   : > { %v11760_v27 = vpop.f32.mrf.mxu0 }
 0x682   : > { %v11761_v29 = vadd.f32 %v19703_v46, %v11760_v27  ;;  %v19911_v38 = vadd.f32 %v15872_v44, %v11771_v43 }
 0x684   : > { %20392 = vst [vmem:[#allocation4_spill] sm:$0xff] %v19911_v38  ;;  %v19913_v1 = vadd.f32 %v11999_v24, %v11761_v29 }
 0x686   : > { %20393 = vst [vmem:[#allocation5_spill] sm:$0xff] %v19913_v1 }
 0x697   : > { %v15875_v0 = vpop.f32.mrf.mxu1 }
 0x699   : > { %v12011_v12 = vpop.f32.mrf.mxu1 }
 0x69f   : > { %v15835_v37 = vpop.f32.mrf.mxu0  ;;  %v15878_v13 = vpop.f32.mrf.mxu1 }
 0x6a0   : > { %v11791_v54 = vadd.f32 %v15835_v37, %v19703_v46 }
 0x6a1   : > { %v11780_v35 = vpop.f32.mrf.mxu0  ;;  %v12023_v55 = vpop.f32.mrf.mxu1 }
 0x6a2   : > { %v11781_v31 = vadd.f32 %v19703_v46, %v11780_v35  ;;  %v19917_v16 = vadd.f32 %v15875_v0, %v11791_v54 }
 0x6a3   : > { %v19919_v40 = vpop.f32.mrf.mxu1 }
 0x6a4   : > { %20394 = vst [vmem:[#allocation6_spill] sm:$0xff] %v19917_v16  ;;  %v19921_v2 = vadd.f32 %v12011_v12, %v11781_v31 }
 0x6a5   : > { %v19923_v28 = vpop.f32.mrf.mxu1 }
 0x6a6   : > { %20395 = vst [vmem:[#allocation7_spill] sm:$0xff] %v19921_v2 }
 0x6a7   : > { %v15838_v20 = vpop.f32.mrf.mxu0  ;;  %v19925_v45 = vpop.f32.mrf.mxu1 }
 0x6a8   : > { %v11811_v61 = vadd.f32 %v15838_v20, %v19703_v46 }
 0x6a9   : > { %v11800_v52 = vpop.f32.mrf.mxu0  ;;  %v19928_v19 = vpop.f32.mrf.mxu1 }
 0x6aa   : > { %v11801_v17 = vadd.f32 %v19703_v46, %v11800_v52  ;;  %v19931_v49 = vadd.f32 %v15878_v13, %v11811_v61 }
 0x6ab   : > { %v15885_v57 = vpop.f32.mrf.mxu0  ;;  %v19933_v47 = vpop.f32.mrf.mxu1 }
 0x6ac   : > { %20396 = vst [vmem:[#allocation8_spill] sm:$0xff] %v19931_v49  ;;  %v19935_v5 = vadd.f32 %v12023_v55, %v11801_v17 }
 0x6ad   : > { %v12105_v62 = vpop.f32.mrf.mxu0  ;;  %v19937_v63 = vpop.f32.mrf.mxu1 }
 0x6ae   : > { %20397 = vst [vmem:[#allocation15_spill] sm:$0xff] %v19935_v5 }
 0x6af   : > { %v15888_v59 = vpop.f32.mrf.mxu0  ;;  %v19939_v26 = vpop.f32.mrf.mxu1 }
 0x6b1   : > { %v12119_v8 = vpop.f32.mrf.mxu0  ;;  %v19941_v42 = vpop.f32.mrf.mxu1 }
 0x6b3   : > { %v15891_v14 = vpop.f32.mrf.mxu0  ;;  %v19943_v30 = vpop.f32.mrf.mxu1 }
 0x6b5   : > { %v12133_v7 = vpop.f32.mrf.mxu0  ;;  %v19945_v36 = vpop.f32.mrf.mxu1 }
 0x6b7   : > { %v15894_v6 = vpop.f32.mrf.mxu0  ;;  %v19947_v56 = vpop.f32.mrf.mxu1 }
 0x6b9   : > { %v12147_v15 = vpop.f32.mrf.mxu0  ;;  %v19949_v60 = vpop.f32.mrf.mxu1 }
 0x6bb   : > { %v15897_v44 = vpop.f32.mrf.mxu0  ;;  %v19951_v51 = vpop.f32.mrf.mxu1 }
 0x6bd   : > { %v12161_v43 = vpop.f32.mrf.mxu0  ;;  %v19953_v27 = vpop.f32.mrf.mxu1 }
 0x6bf   : > { %v19955_v29 = vpop.f32.mrf.mxu0  ;;  %v19957_v24 = vpop.f32.mrf.mxu1 }
 0x6c1   : > { %v19959_v0 = vpop.f32.mrf.mxu0  ;;  %v19961_v12 = vpop.f32.mrf.mxu1 }
 0x6c2   : > { %20398 = vst [vmem:[#allocation13_spill] sm:$0xff] %v19961_v12 }
 0x6c3   : > { %v19963_v37 = vpop.f32.mrf.mxu0  ;;  %v19965_v13 = vpop.f32.mrf.mxu1 }
 0x6c4   : > { %20399 = vst [vmem:[#allocation11_spill] sm:$0xff] %v19965_v13 }
 0x6c5   : > { %v19967_v54 = vpop.f32.mrf.mxu0  ;;  %v19969_v35 = vpop.f32.mrf.mxu1 }
 0x6c6   : > { %20400 = vst [vmem:[#allocation10_spill] sm:$0xff] %v19969_v35 }
 0x6c7   : > { %v19971_v55 = vpop.f32.mrf.mxu0  ;;  %v19973_v31 = vpop.f32.mrf.mxu1 }
 0x6c8   : > { %20401 = vst [vmem:[#allocation9_spill] sm:$0xff] %v19973_v31 }
 0x6c9   : > { %v19975_v20 = vpop.f32.mrf.mxu0  ;;  %v19977_v61 = vpop.f32.mrf.mxu1 }
 0x6ca   : > { %20402 = vst [vmem:[#allocation17_spill] sm:$0xff] %v19977_v61 }
 0x6cb   : > { %v19979_v52 = vpop.f32.mrf.mxu0  ;;  %v19981_v17 = vpop.f32.mrf.mxu1 }
 0x6cc   : > { %20403 = vst [vmem:[#allocation16_spill] sm:$0xff] %v19979_v52  ;;  %20404 = vst [vmem:[#allocation18_spill] sm:$0xff] %v19981_v17  ;;  %v12113_v17 = vadd.f32 %v15885_v57, %v19719_v18  ;;  %v12141_v18 = vadd.f32 %v15891_v14, %v19751_v3  ;;  %v12134_v57 = vadd.f32 %v12133_v7, %v19759_v10 }
 0x6cd   : > { %v19983_v5 = vpop.f32.mrf.mxu0  ;;  %v19985_v49 = vpop.f32.mrf.mxu1 }
 0x6ce   : > { %20405 = vst [vmem:[#allocation14_spill] sm:$0xff] %v19983_v5  ;;  %20406 = vst [vmem:[#allocation12_spill] sm:$0xff] %v19985_v49  ;;  %v12106_v49 = vadd.f32 %v12105_v62, %v19731_v22  ;;  %v12148_v22 = vadd.f32 %v12147_v15, %v19771_v25 }
 0x6cf   : > { %v19987_v2 = vpop.f32.mrf.mxu0  ;;  %v19989_v16 = vpop.f32.mrf.mxu1 }
 0x6d0   : > { %20407 = vst [vmem:[#allocation19_spill] sm:$0xff] %v19987_v2  ;;  %20408 = vst [vmem:[#allocation20_spill] sm:$0xff] %v19989_v16  ;;  %v11741_v16 = vadd.f32 %v19703_v46, %v19907_v50  ;;  %v12120_v2 = vadd.f32 %v12119_v8, %v19746_v4  ;;  %v12169_v46 = vadd.f32 %v15897_v44, %v19776_v34 }
 0x6d1   : > { %v19991_v35 = vpop.f32.mrf.mxu0  ;;  %v19993_v31 = vpop.f32.mrf.mxu1 }
 0x6d2   : > { %20409 = vst [vmem:[#allocation2_spill] sm:$0xff] %v19991_v35  ;;  %20410 = vst [vmem:[#allocation3_spill] sm:$0xff] %v19993_v31  ;;  %v20024_v4 = vadd.f32 %v19905_v21, %v11741_v16  ;;  %v20034_v16 = vadd.f32 %v19941_v42, %v12148_v22 }
 0x6d3   : > { %v19995_v1 = vpop.f32.mrf.mxu0  ;;  %v16005_v61 = vpop.f32.mrf.mxu1 }
 0x6d4   : > { %20411 = vst [vmem:[#allocation21_spill] sm:$0xff] %v19995_v1  ;;  %v12127_v1 = vadd.f32 %v15888_v59, %v19735_v33  ;;  %v12162_v33 = vadd.f32 %v12161_v43, %v19785_v9  ;;  %v12374_v9 = vadd.f32 %v19937_v63, %v12134_v57 }
 0x6d5   : > { %v19997_v38 = vpop.f32.mrf.mxu0  ;;  %v12813_v13 = vpop.f32.mrf.mxu1 }
 0x6d6   : > { %20412 = vst [vmem:[#allocation22_spill] sm:$0xff] %v19997_v38  ;;  %v12350_v38 = vadd.f32 %v19919_v40, %v12113_v17  ;;  %v12366_v34 = vadd.f32 %v19925_v45, %v12127_v1  ;;  %v12183_v45 = vadd.f32 %v19955_v29, %v19789_v32  ;;  %v20050_v42 = vadd.f32 %v19945_v36, %v12162_v33 }
 0x6d7   : > { %v20000_v12 = vpop.f32.mrf.mxu0  ;;  %v16008_v5 = vpop.f32.mrf.mxu1  ;;  %v12204_v36 = vadd.f32 %v19975_v20, %v19874_v53 }
 0x6d8   : > { %20413 = vst [vmem:[#allocation23_spill] sm:$0xff] %v20000_v12  ;;  %v12155_v12 = vadd.f32 %v15894_v6, %v19762_v23 }
 0x6d9   : > { %v20006_v35 = vpop.f32.mrf.mxu0  ;;  %v12825_v31 = vpop.f32.mrf.mxu1 }
 0x6da   : > { %20414 = vst [vmem:[#allocation24_spill] sm:$0xff] %v20006_v35  ;;  %v12342_v35 = vadd.f32 %v19923_v28, %v12106_v49  ;;  %v12382_v49 = vadd.f32 %v19933_v47, %v12141_v18  ;;  %v12398_v21 = vadd.f32 %v19939_v26, %v12155_v12  ;;  %v12197_v47 = vadd.f32 %v19963_v37, %v19819_v48 }
 0x6db   : > { %v15965_v62 = vpop.f32.mrf.mxu0  ;;  %v16011_v52 = vpop.f32.mrf.mxu1  ;;  %v12211_v48 = vadd.f32 %v19971_v55, %v19868_v39  ;;  %v20069_v39 = vadd.f32 %v19947_v56, %v12183_v45 }
 0x6dc   : > { %v12609_v50 = vadd.f32 %v15965_v62, %v12350_v38  ;;  %v12358_v38 = vadd.f32 %v19928_v19, %v12120_v2  ;;  %v20039_v2 = vadd.f32 %v19943_v30, %v12169_v46  ;;  %v12176_v19 = vadd.f32 %v19959_v0, %v19797_v58  ;;  %v20416_v62 = vld [vmem:[#allocation13_spill] sm:$0xff] }
 0x6dd   : > { %v12602_v3 = vpop.f32.mrf.mxu0  ;;  %v12837_v10 = vpop.f32.mrf.mxu1  ;;  %v12190_v58 = vadd.f32 %v19967_v54, %v19827_v41  ;;  %v20075_v20 = vadd.f32 %v19951_v51, %v12197_v47  ;;  %v20093_v46 = vadd.f32 %v20416_v62, %v12204_v36 }
 0x6de   : > { %v12820_v23 = vadd.f32 %v16005_v61, %v12609_v50  ;;  %v12603_v25 = vadd.f32 %v12602_v3, %v12342_v35  ;;  %v20072_v54 = vadd.f32 %v19949_v60, %v12176_v19  ;;  %v20086_v60 = vadd.f32 %v19957_v24, %v12211_v48  ;;  %v20417_v50 = vld [vmem:[#allocation14_spill] sm:$0xff]  ;;  %v20418_v19 = vld [vmem:[#allocation11_spill] sm:$0xff] }
 0x6df   : > { %v15968_v40 = vpop.f32.mrf.mxu0  ;;  %v20028_v28 = vpop.f32.mrf.mxu1  ;;  %v20083_v56 = vadd.f32 %v19953_v27, %v12190_v58  ;;  %v12218_v33 = vadd.f32 %v20417_v50, %v20024_v4 }
 0x6e0   : > { %12957 = vst.msk [vmem:[%s20020_s28 + $0x8] sm:$0xff] %vm12955_vm0, %v12820_v23  ;;  %v13036_v59 = vmul.f32 %v12820_v23, %v12820_v23  ;;  %v12814_v8 = vadd.f32 %v12813_v13, %v12603_v25  ;;  %v12621_v1 = vadd.f32 %v15968_v40, %v12366_v34  ;;  %v12981_v14 = vsel %vm12955_vm0, %v12820_v23, 0.0 }
 0x6e1   : > { %v12614_v63 = vpop.f32.mrf.mxu0  ;;  %v20047_v26 = vpop.f32.mrf.mxu1 }
 0x6e2   : > { %12956 = vst.msk [vmem:[%s20020_s28] sm:$0xff] %vm12955_vm0, %v12814_v8  ;;  %v12980_v30 = vsel %vm12955_vm0, %v12814_v8, 0.0  ;;  %v13035_v32 = vmul.f32 %v12814_v8, %v12814_v8  ;;  %v12832_v7 = vadd.f32 %v16008_v5, %v12621_v1  ;;  %v12615_v15 = vadd.f32 %v12614_v63, %v12358_v38 }
 0x6e3   : > { %v12982_v6 = vadd.f32 %v12981_v14, %v12980_v30  ;;  %v15971_v44 = vpop.f32.mrf.mxu0  ;;  %v16017_v43 = vpop.f32.mrf.mxu1  ;;  %v13060_v29 = vsel %vm12955_vm0, %v13036_v59, 0.0 }
 0x6e4   : > { %v13059_v0 = vsel %vm12955_vm0, %v13035_v32, 0.0  ;;  %12959 = vst.msk [vmem:[%s20020_s28 + $0x18] sm:$0xff] %vm12955_vm0, %v12832_v7  ;;  %v12633_v5 = vadd.f32 %v15971_v44, %v12382_v49  ;;  %v12826_v41 = vadd.f32 %v12825_v31, %v12615_v15  ;;  %v13038_v53 = vmul.f32 %v12832_v7, %v12832_v7  ;;  %v20420_v15 = vld [vmem:[#allocation19_spill] sm:$0xff] }
 0x6e5   : > { %v13061_v12 = vadd.f32 %v13060_v29, %v13059_v0  ;;  %v12626_v37 = vpop.f32.mrf.mxu0  ;;  %v20066_v13 = vpop.f32.mrf.mxu1  ;;  %v12985_v3 = vsel %vm12955_vm0, %v12832_v7, 0.0 }
 0x6e6   : > { %v12844_v35 = vadd.f32 %v16011_v52, %v12633_v5  ;;  %v12627_v55 = vadd.f32 %v12626_v37, %v12374_v9  ;;  %12958 = vst.msk [vmem:[%s20020_s28 + $0x10] sm:$0xff] %vm12955_vm0, %v12826_v41  ;;  %v12983_v31 = vsel %vm12955_vm0, %v12826_v41, 0.0  ;;  %v13037_v61 = vmul.f32 %v12826_v41, %v12826_v41  ;;  %v20415_v52 = vld [vmem:[#allocation16_spill] sm:$0xff]  ;;  %v20422_v41 = vld [vmem:[#allocation2_spill] sm:$0xff] }
 0x6e7   : > { %v15974_v17 = vpop.f32.mrf.mxu0  ;;  %v20080_v18 = vpop.f32.mrf.mxu1  ;;  %v12225_v57 = vadd.f32 %v20415_v52, %v19881_v11  ;;  %v12984_v51 = vadd.f32 %v12983_v31, %v12982_v6  ;;  %v13064_v34 = vsel %vm12955_vm0, %v13038_v53, 0.0  ;;  %v20419_v6 = vld [vmem:[#allocation4_spill] sm:$0xff] }
 0x6e8   : > { %12961 = vst.msk [vmem:[%s20020_s28 + $0x28] sm:$0xff] %vm12955_vm0, %v12844_v35  ;;  %v12838_v22 = vadd.f32 %v12837_v10, %v12627_v55  ;;  %v13062_v27 = vsel %vm12955_vm0, %v13037_v61, 0.0  ;;  %v12645_v23 = vadd.f32 %v15974_v17, %v12398_v21  ;;  %v13040_v40 = vmul.f32 %v12844_v35, %v12844_v35 }
 0x6e9   : > { %v12638_v24 = vpop.f32.mrf.mxu0  ;;  %v12873_v25 = vpop.f32.mrf.mxu1  ;;  %v13063_v11 = vadd.f32 %v13062_v27, %v13061_v12  ;;  %v12986_v10 = vadd.f32 %v12985_v3, %v12984_v51  ;;  %v20109_v47 = vadd.f32 %v20418_v19, %v12225_v57  ;;  %v12989_v63 = vsel %vm12955_vm0, %v12844_v35, 0.0  ;;  %v20421_v12 = vld [vmem:[#allocation5_spill] sm:$0xff] }
 0x6ea   : > { %12960 = vst.msk [vmem:[%s20020_s28 + $0x20] sm:$0xff] %vm12955_vm0, %v12838_v22  ;;  %v12987_v38 = vsel %vm12955_vm0, %v12838_v22, 0.0  ;;  %v13039_v49 = vmul.f32 %v12838_v22, %v12838_v22  ;;  %v12856_v4 = vadd.f32 %v20028_v28, %v12645_v23  ;;  %v12639_v9 = vadd.f32 %v12638_v24, %v20034_v16 }
 0x6eb   : > { %v15977_v59 = vpop.f32.mrf.mxu0  ;;  %v20105_v8 = vpop.f32.mrf.mxu1  ;;  %v12988_v21 = vadd.f32 %v12987_v38, %v12986_v10  ;;  %v13065_v1 = vadd.f32 %v13064_v34, %v13063_v11  ;;  %v12239_v44 = vadd.f32 %v20420_v15, %v20419_v6  ;;  %v13068_v36 = vsel %vm12955_vm0, %v13040_v40, 0.0  ;;  %v20424_v38 = vld [vmem:[#allocation6_spill] sm:$0xff]  ;;  %v20425_v40 = vld [vmem:[#allocation21_spill] sm:$0xff] }
 0x6ec   : > { %v12657_v45 = vadd.f32 %v15977_v59, %v20039_v2  ;;  %v13066_v14 = vsel %vm12955_vm0, %v13039_v49, 0.0  ;;  %12963 = vst.msk [vmem:[%s20020_s28 + $0x38] sm:$0xff] %vm12955_vm0, %v12856_v4  ;;  %v13042_v28 = vmul.f32 %v12856_v4, %v12856_v4  ;;  %v12850_v16 = vadd.f32 %v20047_v26, %v12639_v9 }
 0x6ed   : > { %v12650_v30 = vpop.f32.mrf.mxu0  ;;  %v20116_v32 = vpop.f32.mrf.mxu1  ;;  %v13067_v7 = vadd.f32 %v13066_v14, %v13065_v1  ;;  %v12990_v58 = vadd.f32 %v12989_v63, %v12988_v21  ;;  %v12232_v37 = vadd.f32 %v20422_v41, %v20421_v12  ;;  %v12993_v55 = vsel %vm12955_vm0, %v12856_v4, 0.0  ;;  %v20426_v21 = vld [vmem:[#allocation9_spill] sm:$0xff]  ;;  %v20428_v41 = vld [vmem:[#allocation7_spill] sm:$0xff] }
 0x6ee   : > { %v12868_v48 = vadd.f32 %v16017_v43, %v12657_v45  ;;  %v12651_v2 = vadd.f32 %v12650_v30, %v20050_v42  ;;  %12962 = vst.msk [vmem:[%s20020_s28 + $0x30] sm:$0xff] %vm12955_vm0, %v12850_v16  ;;  %v12991_v29 = vsel %vm12955_vm0, %v12850_v16, 0.0  ;;  %v13041_v0 = vmul.f32 %v12850_v16, %v12850_v16  ;;  %v20423_v42 = vld [vmem:[#allocation10_spill] sm:$0xff] }
 0x6ef   : > { %v15980_v26 = vpop.f32.mrf.mxu0  ;;  %v16026_v5 = vpop.f32.mrf.mxu1  ;;  %v12992_v53 = vadd.f32 %v12991_v29, %v12990_v58  ;;  %v13069_v43 = vadd.f32 %v13068_v36, %v13067_v7  ;;  %v20130_v35 = vadd.f32 %v20423_v42, %v12218_v33  ;;  %v13072_v51 = vsel %vm12955_vm0, %v13042_v28, 0.0 }
 0x6f0   : > { %12965 = vst.msk [vmem:[%s20020_s28 + $0x48] sm:$0xff] %vm12955_vm0, %v12868_v48  ;;  %v13070_v31 = vsel %vm12955_vm0, %v13041_v0, 0.0  ;;  %v12862_v61 = vadd.f32 %v20066_v13, %v12651_v2  ;;  %v12669_v17 = vadd.f32 %v15980_v26, %v20069_v39  ;;  %v13044_v3 = vmul.f32 %v12868_v48, %v12868_v48 }
 0x6f1   : > { %v12662_v52 = vpop.f32.mrf.mxu0  ;;  %v12897_v57 = vpop.f32.mrf.mxu1  ;;  %v13071_v22 = vadd.f32 %v13070_v31, %v13069_v43  ;;  %v12994_v62 = vadd.f32 %v12993_v55, %v12992_v53  ;;  %v12253_v49 = vadd.f32 %v20425_v40, %v20424_v38  ;;  %v20429_v53 = vld [vmem:[#allocation22_spill] sm:$0xff] }
 0x6f2   : > { %v12663_v50 = vadd.f32 %v12662_v52, %v20072_v54  ;;  %12964 = vst.msk [vmem:[%s20020_s28 + $0x40] sm:$0xff] %vm12955_vm0, %v12862_v61  ;;  %v12995_v33 = vsel %vm12955_vm0, %v12862_v61, 0.0  ;;  %v13043_v27 = vmul.f32 %v12862_v61, %v12862_v61  ;;  %v12880_v13 = vadd.f32 %v20080_v18, %v12669_v17  ;;  %v20430_v61 = vld [vmem:[#allocation8_spill] sm:$0xff]  ;;  %v20431_v17 = vld [vmem:[#allocation23_spill] sm:$0xff] }
 0x6f3   : > { %v15983_v23 = vpop.f32.mrf.mxu0  ;;  %v16029_v39 = vpop.f32.mrf.mxu1  ;;  %v12996_v24 = vadd.f32 %v12995_v33, %v12994_v62  ;;  %v13073_v34 = vadd.f32 %v13072_v51, %v13071_v22  ;;  %v12997_v54 = vsel %vm12955_vm0, %v12868_v48, 0.0  ;;  %v12494_v18 = vadd.f32 %v20426_v21, %v12239_v44  ;;  %v20434_v21 = vld [vmem:[#allocation24_spill] sm:$0xff] }
 0x6f4   : > { %v12874_v11 = vadd.f32 %v12873_v25, %v12663_v50  ;;  %v12681_v10 = vadd.f32 %v15983_v23, %v20075_v20  ;;  %v13074_v4 = vsel %vm12955_vm0, %v13043_v27, 0.0  ;;  %12967 = vst.msk [vmem:[%s20020_s28 + $0x58] sm:$0xff] %vm12955_vm0, %v12880_v13  ;;  %v13076_v19 = vsel %vm12955_vm0, %v13044_v3, 0.0 }
 0x6f5   : > { %v12674_v9 = vpop.f32.mrf.mxu0  ;;  %v12909_v59 = vpop.f32.mrf.mxu1  ;;  %v13075_v1 = vadd.f32 %v13074_v4, %v13073_v34  ;;  %v12998_v25 = vadd.f32 %v12997_v54, %v12996_v24  ;;  %v13046_v63 = vmul.f32 %v12880_v13, %v12880_v13  ;;  %v13001_v6 = vsel %vm12955_vm0, %v12880_v13, 0.0 }
 0x6f6   : > { %12966 = vst.msk [vmem:[%s20020_s28 + $0x50] sm:$0xff] %vm12955_vm0, %v12874_v11  ;;  %v12999_v20 = vsel %vm12955_vm0, %v12874_v11, 0.0  ;;  %v13045_v45 = vmul.f32 %v12874_v11, %v12874_v11  ;;  %v12892_v14 = vadd.f32 %v20105_v8, %v12681_v10  ;;  %v12675_v28 = vadd.f32 %v12674_v9, %v20083_v56  ;;  %v20427_v8 = vld [vmem:[#allocation17_spill] sm:$0xff]  ;;  %v20433_v9 = vld [vmem:[#allocation15_spill] sm:$0xff] }
 0x6f7   : > { %v15986_v16 = vpop.f32.mrf.mxu0  ;;  %v16032_v30 = vpop.f32.mrf.mxu1  ;;  %v13000_v7 = vadd.f32 %v12999_v20, %v12998_v25  ;;  %v13077_v58 = vadd.f32 %v13076_v19, %v13075_v1  ;;  %v12486_v56 = vadd.f32 %v20427_v8, %v12232_v37  ;;  %v12246_v43 = vadd.f32 %v20429_v53, %v20428_v41 }
 0x6f8   : > { %v13078_v48 = vsel %vm12955_vm0, %v13045_v45, 0.0  ;;  %v12693_v2 = vadd.f32 %v15986_v16, %v20086_v60  ;;  %12969 = vst.msk [vmem:[%s20020_s28 + $0x68] sm:$0xff] %vm12955_vm0, %v12892_v14  ;;  %v13048_v15 = vmul.f32 %v12892_v14, %v12892_v14  ;;  %v12886_v44 = vadd.f32 %v20116_v32, %v12675_v28  ;;  %v20435_v45 = vld [vmem:[#allocation12_spill] sm:$0xff] }
 0x6f9   : > { %v12686_v36 = vpop.f32.mrf.mxu0  ;;  %v13079_v29 = vadd.f32 %v13078_v48, %v13077_v58  ;;  %v13002_v0 = vadd.f32 %v13001_v6, %v13000_v7  ;;  %v13080_v60 = vsel %vm12955_vm0, %v13046_v63, 0.0  ;;  %v12921_v32 = vpop.f32.mrf.mxu1  ;;  %v12267_v37 = vadd.f32 %v20431_v17, %v20430_v61 }
 0x6fa   : > { %v12904_v26 = vadd.f32 %v16026_v5, %v12693_v2  ;;  %v12687_v12 = vadd.f32 %v12686_v36, %v20093_v46  ;;  %12968 = vst.msk [vmem:[%s20020_s28 + $0x60] sm:$0xff] %vm12955_vm0, %v12886_v44  ;;  %v13003_v42 = vsel %vm12955_vm0, %v12886_v44, 0.0  ;;  %v13047_v55 = vmul.f32 %v12886_v44, %v12886_v44  ;;  %v20432_v46 = vld [vmem:[#allocation18_spill] sm:$0xff] }
 0x6fb   : > { %v15989_v31 = vpop.f32.mrf.mxu0  ;;  %v13004_v52 = vadd.f32 %v13003_v42, %v13002_v0  ;;  %v13081_v5 = vadd.f32 %v13080_v60, %v13079_v29  ;;  %v12510_v51 = vadd.f32 %v20432_v46, %v12253_v49  ;;  %v13005_v22 = vsel %vm12955_vm0, %v12892_v14, 0.0  ;;  %v16035_v40 = vpop.f32.mrf.mxu1  ;;  %v20436_v42 = vld [vmem:[#allocation20_spill] sm:$0xff] }
 0x6fc   : > { %12971 = vst.msk [vmem:[%s20020_s28 + $0x78] sm:$0xff] %vm12955_vm0, %v12904_v26  ;;  %v13082_v62 = vsel %vm12955_vm0, %v13047_v55, 0.0  ;;  %v12898_v50 = vadd.f32 %v12897_v57, %v12687_v12  ;;  %v12705_v3 = vadd.f32 %v15989_v31, %v20109_v47  ;;  %v13084_v27 = vsel %vm12955_vm0, %v13048_v15, 0.0 }
 0x6fd   : > { %v12698_v33 = vpop.f32.mrf.mxu0  ;;  %v13083_v13 = vadd.f32 %v13082_v62, %v13081_v5  ;;  %v13006_v23 = vadd.f32 %v13005_v22, %v13004_v52  ;;  %v13050_v34 = vmul.f32 %v12904_v26, %v12904_v26  ;;  %v12260_v1 = vadd.f32 %v20434_v21, %v20433_v9  ;;  %v12933_v16 = vpop.f32.mrf.mxu1 }
 0x6fe   : > { %v12699_v24 = vadd.f32 %v12698_v33, %v20130_v35  ;;  %12970 = vst.msk [vmem:[%s20020_s28 + $0x70] sm:$0xff] %vm12955_vm0, %v12898_v50  ;;  %v13007_v11 = vsel %vm12955_vm0, %v12898_v50, 0.0  ;;  %v13049_v10 = vmul.f32 %v12898_v50, %v12898_v50  ;;  %v12916_v38 = vadd.f32 %v16029_v39, %v12705_v3 }
 0x6ff   : > { %v15992_v57 = vpop.f32.mrf.mxu0  ;;  %v13008_v49 = vadd.f32 %v13007_v11, %v13006_v23  ;;  %v13085_v47 = vadd.f32 %v13084_v27, %v13083_v13  ;;  %v13009_v25 = vsel %vm12955_vm0, %v12904_v26, 0.0  ;;  %v12502_v19 = vadd.f32 %v20435_v45, %v12246_v43  ;;  %v16038_v53 = vpop.f32.mrf.mxu1 }
 0x700   : > { %v12910_v54 = vadd.f32 %v12909_v59, %v12699_v24  ;;  %v12717_v4 = vadd.f32 %v15992_v57, %v12494_v18  ;;  %v13086_v35 = vsel %vm12955_vm0, %v13049_v10, 0.0  ;;  %12973 = vst.msk [vmem:[%s20020_s28 + $0x88] sm:$0xff] %vm12955_vm0, %v12916_v38  ;;  %v13088_v14 = vsel %vm12955_vm0, %v13050_v34, 0.0 }
 0x701   : > { %v12710_v20 = vpop.f32.mrf.mxu0  ;;  %v13087_v63 = vadd.f32 %v13086_v35, %v13085_v47  ;;  %v13010_v39 = vadd.f32 %v13009_v25, %v13008_v49  ;;  %v13052_v28 = vmul.f32 %v12916_v38, %v12916_v38  ;;  %v13013_v36 = vsel %vm12955_vm0, %v12916_v38, 0.0  ;;  %v12945_v27 = vpop.f32.mrf.mxu1 }
 0x702   : > { %12972 = vst.msk [vmem:[%s20020_s28 + $0x80] sm:$0xff] %vm12955_vm0, %v12910_v54  ;;  %v13011_v59 = vsel %vm12955_vm0, %v12910_v54, 0.0  ;;  %v13051_v18 = vmul.f32 %v12910_v54, %v12910_v54  ;;  %v12928_v7 = vadd.f32 %v16032_v30, %v12717_v4  ;;  %v12711_v58 = vadd.f32 %v12710_v20, %v12486_v56 }
 0x703   : > { %v15995_v48 = vpop.f32.mrf.mxu0  ;;  %v13012_v2 = vadd.f32 %v13011_v59, %v13010_v39  ;;  %v13089_v6 = vadd.f32 %v13088_v14, %v13087_v63  ;;  %v13092_v56 = vsel %vm12955_vm0, %v13052_v28, 0.0  ;;  %v12526_v55 = vadd.f32 %v20436_v42, %v12267_v37 }
 0x704   : > { %v13090_v15 = vsel %vm12955_vm0, %v13051_v18, 0.0  ;;  %v12729_v44 = vadd.f32 %v15995_v48, %v12510_v51  ;;  %12975 = vst.msk [vmem:[%s20020_s28 + $0x98] sm:$0xff] %vm12955_vm0, %v12928_v7  ;;  %v13054_v8 = vmul.f32 %v12928_v7, %v12928_v7  ;;  %v12922_v29 = vadd.f32 %v12921_v32, %v12711_v58  ;;  %v20437_v32 = vld [vmem:[#allocation3_spill] sm:$0xff] }
 0x705   : > { %v12722_v0 = vpop.f32.mrf.mxu0  ;;  %v13091_v26 = vadd.f32 %v13090_v15, %v13089_v6  ;;  %v13014_v12 = vadd.f32 %v13013_v36, %v13012_v2  ;;  %v12518_v52 = vadd.f32 %v20437_v32, %v12260_v1  ;;  %v13017_v5 = vsel %vm12955_vm0, %v12928_v7, 0.0 }
 0x706   : > { %v12940_v41 = vadd.f32 %v16035_v40, %v12729_v44  ;;  %v12723_v30 = vadd.f32 %v12722_v0, %v12502_v19  ;;  %12974 = vst.msk [vmem:[%s20020_s28 + $0x90] sm:$0xff] %vm12955_vm0, %v12922_v29  ;;  %v13015_v43 = vsel %vm12955_vm0, %v12922_v29, 0.0  ;;  %v13053_v60 = vmul.f32 %v12922_v29, %v12922_v29 }
 0x707   : > { %v15998_v31 = vpop.f32.mrf.mxu0  ;;  %v13016_v61 = vadd.f32 %v13015_v43, %v13014_v12  ;;  %v13093_v17 = vadd.f32 %v13092_v56, %v13091_v26  ;;  %v13096_v50 = vsel %vm12955_vm0, %v13054_v8, 0.0 }
 0x708   : > { %12977 = vst.msk [vmem:[%s20020_s28 + $0xa8] sm:$0xff] %vm12955_vm0, %v12940_v41  ;;  %v13094_v46 = vsel %vm12955_vm0, %v13053_v60, 0.0  ;;  %v12934_v51 = vadd.f32 %v12933_v16, %v12723_v30  ;;  %v12741_v22 = vadd.f32 %v15998_v31, %v12526_v55  ;;  %v13056_v13 = vmul.f32 %v12940_v41, %v12940_v41 }
 0x709   : > { %v12734_v62 = vpop.f32.mrf.mxu0  ;;  %v13095_v3 = vadd.f32 %v13094_v46, %v13093_v17  ;;  %v13018_v37 = vadd.f32 %v13017_v5, %v13016_v61  ;;  %v13021_v40 = vsel %vm12955_vm0, %v12940_v41, 0.0 }
 0x70a   : > { %v12735_v33 = vadd.f32 %v12734_v62, %v12518_v52  ;;  %12976 = vst.msk [vmem:[%s20020_s28 + $0xa0] sm:$0xff] %vm12955_vm0, %v12934_v51  ;;  %v13019_v23 = vsel %vm12955_vm0, %v12934_v51, 0.0  ;;  %v13055_v24 = vmul.f32 %v12934_v51, %v12934_v51  ;;  %v12952_v34 = vadd.f32 %v16038_v53, %v12741_v22 }
 0x70b   : > { %v13020_v11 = vadd.f32 %v13019_v23, %v13018_v37  ;;  %v13097_v10 = vadd.f32 %v13096_v50, %v13095_v3  ;;  %v13100_v9 = vsel %vm12955_vm0, %v13056_v13, 0.0 }
 0x70c   : > { %v12946_v38 = vadd.f32 %v12945_v27, %v12735_v33  ;;  %v13098_v57 = vsel %vm12955_vm0, %v13055_v24, 0.0  ;;  %12979 = vst.msk [vmem:[%s20020_s28 + $0xb8] sm:$0xff] %vm12955_vm0, %v12952_v34  ;;  %v13058_v21 = vmul.f32 %v12952_v34, %v12952_v34  ;;  %v13025_v20 = vsel %vm12955_vm0, %v12952_v34, 0.0 }
 0x70d   : > { %v13099_v49 = vadd.f32 %v13098_v57, %v13097_v10  ;;  %v13022_v47 = vadd.f32 %v13021_v40, %v13020_v11 }
 0x70e   : > { %12978 = vst.msk [vmem:[%s20020_s28 + $0xb0] sm:$0xff] %vm12955_vm0, %v12946_v38  ;;  %v13023_v54 = vsel %vm12955_vm0, %v12946_v38, 0.0  ;;  %v13057_v4 = vmul.f32 %v12946_v38, %v12946_v38  ;;  %v13104_v63 = vsel %vm12955_vm0, %v13058_v21, 0.0 }
 0x70f   : > { %v13024_v1 = vadd.f32 %v13023_v54, %v13022_v47  ;;  %v13101_v25 = vadd.f32 %v13100_v9, %v13099_v49 }
 0x710   : > { %v13102_v35 = vsel %vm12955_vm0, %v13057_v4, 0.0 }
 0x711   : > { %v13026_v45 = vadd.f32 %v13025_v20, %v13024_v1  ;;  %v13103_v19 = vadd.f32 %v13102_v35, %v13101_v25 }
 0x713   : > { %v13027_v39 = vrot.slane %v13026_v45, 4  ;;  %v13105_v59 = vadd.f32 %v13104_v63, %v13103_v19 }
 0x715   : > { %v13028_v18 = vadd.f32 %v13027_v39, %v13026_v45  ;;  %v13106_v14 = vrot.slane %v13105_v59, 4 }
 0x717   : > { %v13029_v28 = vrot.slane %v13028_v18, 2  ;;  %v13107_v16 = vadd.f32 %v13106_v14, %v13105_v59 }
 0x719   : > { %v13030_v7 = vadd.f32 %v13029_v28, %v13028_v18  ;;  %v13108_v58 = vrot.slane %v13107_v16, 2 }
 0x71b   : > { %v13031_v48 = vrot.slane %v13030_v7, 1  ;;  %v13109_v2 = vadd.f32 %v13108_v58, %v13107_v16 }
 0x71d   : > { %v13032_v6 = vadd.f32 %v13031_v48, %v13030_v7  ;;  %v13110_v15 = vrot.slane %v13109_v2, 1 }
 0x71f   : > { %13034 = vst.msk [vmem:[%s400_s30] sm:$0x1] %vm13033_vm1, %v13032_v6  ;;  %v13111_v44 = vadd.f32 %v13110_v15, %v13109_v2 }
 0x721   : > { %13112 = vst.msk [vmem:[%s403_s14] sm:$0x1] %vm13033_vm1, %v13111_v44 }
 0x722 PF: > { %s22_s17 = sadd.s32 1, %s16168_s17  }
 0x723   : > { %p19_p4 = scmp.ge.s32.totalorder %s22_s17, 4  }
 0x725   :  { %21 = sbr.rel (!%p19_p4) target bundleno = 1 (0x1), region = 110 }

</bundles_post_ra>
